<compile_context>
chip_gen: v5e
topology: v5e:2x2
jax: 0.10.0
libtpu: 0.0.40
codegen_flags: <defaults>
</compile_context>

<pallas_src>
import functools

import jax
import jax.numpy as jnp
from jax.experimental import pallas as pl
from jax.experimental.pallas import tpu as pltpu


def _round_up(v, m):
    return ((v + m - 1) // m) * m


def _pick_graphs_per_step(B, Np, Ep, max_nodes=256, max_edges=1024):
    """Largest divisor G of B with G*Np <= max_nodes, G*Ep <= max_edges and
    at least 2 grid steps left (so the 'parallel' axis can split across the
    two TensorCores on v7x)."""
    best = 1
    for g in range(1, B + 1):
        if B % g:
            continue
        if g * Np > max_nodes or g * Ep > max_edges:
            break
        if B >= 2 and B // g < 2:
            continue
        best = g
    return best


def e3block_kernel(
    # per-step data (leading block dim of 1 == G graphs packed per grid step)
    rowi_ref, coli_ref, h_ref, x_ref, d_ref, flags_ref, emask_ref,
    # EGCL params, stacked over layers (leading dim = n_layers)
    W1r_ref, W1c_ref, W1e_ref, b1_ref, W2_ref, b2_ref, wa_ref, ba_ref,
    W3h_ref, W3a_ref, b3_ref, W4_ref, b4_ref,
    # coord-layer params
    Wc1r_ref, Wc1c_ref, Wc1e_ref, bc1_ref, Wc2_ref, bc2_ref, wc3_ref,
    # outputs
    h_out_ref, x_out_ref,
    *, n_layers, coords_range, mxu_dtype):

    f32 = jnp.float32
    GE = d_ref.shape[1]          # edges per step (G graphs * padded E)
    GN = h_ref.shape[1]          # nodes per step (G graphs * padded N)

    def mm(a, b):
        # MXU matmul: bf16 (or f32) operands, f32 accumulation.
        return jnp.dot(a.astype(mxu_dtype), b.astype(mxu_dtype),
                       preferred_element_type=f32)

    def sigmoid(v):
        # overflow-safe logistic: exp of a non-positive argument (EUP) plus an
        # EUP approx reciprocal instead of a full-precision VPU divide.
        e = jnp.exp(-jnp.abs(v))
        r = pl.reciprocal(1.0 + e, approx=True)
        return jnp.where(v >= 0, r, e * r)

    def silu(v):
        return v * sigmoid(v)

    rowi = rowi_ref[0]           # (GE, 1) int32, already offset by graph*Np
    coli = coli_ref[0]           # (GE, 1) int32
    h = h_ref[0]                 # (GN, HP) f32, zero-padded past real H
    x = x_ref[0]                 # (GN, XP) f32, zero-padded past 3
    d = d_ref[0]                 # (GE, 1)
    flags = flags_ref[0]         # (GN, 1)
    emask = emask_ref[0]         # (GE, 1)

    # Block-diagonal one-hot gather/scatter matrices built on the VPU from the
    # int32 indices (entries 0/1/-1 are exact in bf16).
    node_iota = jax.lax.broadcasted_iota(jnp.int32, (GE, GN), 1)
    row_hot = jnp.where(rowi == node_iota, 1.0, 0.0)        # (GE, GN) f32
    col_hot = jnp.where(coli == node_iota, 1.0, 0.0)        # (GE, GN) f32
    row_oh = row_hot.astype(mxu_dtype)       # reused: gather AND scatter
    col_oh = col_hot.astype(mxu_dtype)
    diff_oh = (row_hot - col_hot).astype(mxu_dtype)

    def scatter_add(data_e):
        # unsorted_segment_sum over edges: contract the edge axis of the
        # (GE, GN) row one-hot against (GE, F) data -> (GN, F).
        # Transposed-LHS matmul; the MXU consumes it natively.
        return jax.lax.dot_general(
            row_oh, data_e.astype(mxu_dtype),
            dimension_numbers=(((0,), (0,)), ((), ())),
            preferred_element_type=f32)

    # ---- compute_distance ----
    diff = mm(diff_oh, x)                                   # x[row] - x[col]
    radial = jnp.sum(diff * diff, axis=1, keepdims=True)    # (GE, 1)
    distance = diff * pl.reciprocal(jnp.sqrt(radial + 1e-8) + 1.0, approx=True)
    # edge_attr == [radial, d]; consumed as rank-1 VPU terms against W1e rows.

    # ---- EGCL layers (linear-before-gather form of the first message linear) ----
    for l in range(n_layers):
        hr = mm(h, W1r_ref[l])                              # (GN, HP)
        hc = mm(h, W1c_ref[l])                              # (GN, HP)
        w1e = W1e_ref[l]                                    # (2, HP) f32
        pre = (mm(row_oh, hr) + mm(col_oh, hc)
               + radial * w1e[0:1, :] + d * w1e[1:2, :] + b1_ref[l])
        m = silu(pre)
        m = silu(mm(m, W2_ref[l]) + b2_ref[l])
        # attention gate: VPU multiply + lane reduction (no 1-lane MXU output)
        att = sigmoid(jnp.sum(m * wa_ref[l], axis=1, keepdims=True) + ba_ref[l])
        m = m * (att * emask)
        agg = scatter_add(m)                                # (GN, HP) segment sum
        nh = silu(mm(h, W3h_ref[l]) + mm(agg, W3a_ref[l]) + b3_ref[l])
        h = (h + mm(nh, W4_ref[l]) + b4_ref[l]) * flags

    # ---- E3CoordLayer ----
    hr = mm(h, Wc1r_ref[...])
    hc = mm(h, Wc1c_ref[...])
    wc1e = Wc1e_ref[...]                                    # (2, HP) f32
    mc = silu(mm(row_oh, hr) + mm(col_oh, hc)
              + radial * wc1e[0:1, :] + d * wc1e[1:2, :] + bc1_ref[...])
    mc = silu(mm(mc, Wc2_ref[...]) + bc2_ref[...])
    gate = jnp.tanh(jnp.sum(mc * wc3_ref[...], axis=1, keepdims=True))  # (GE, 1)
    trans = distance * (gate * coords_range) * emask        # (GE, XP)
    x_new = (x + scatter_add(trans)) * flags                # (GN, XP)

    h_out_ref[0] = h
    x_out_ref[0] = x_new


def _prep_params(params, H, HP, mxu_dtype):
    """Split W1/W3 (linear-before-gather form), zero-pad to lane-dense HP
    shapes and stack the per-layer weights over a leading n_layers dim."""
    f32 = jnp.float32
    n_layers = len(params["egcl"])

    def pad2(w, r, c):
        w = jnp.asarray(w, f32)
        return jnp.pad(w, ((0, r - w.shape[0]), (0, c - w.shape[1])))

    def rowv(v, width):
        v = jnp.asarray(v, f32).reshape(1, -1)
        return jnp.pad(v, ((0, 0), (0, width - v.shape[1])))

    keys = ["W1r", "W1c", "W1e", "b1", "W2", "b2", "wa", "ba",
            "W3h", "W3a", "b3", "W4", "b4"]
    acc = {k: [] for k in keys}
    for l in range(n_layers):
        p = params["egcl"][l]
        W1 = jnp.asarray(p["W1"], f32)                      # (2H+2, H)
        acc["W1r"].append(pad2(W1[:H], HP, HP))
        acc["W1c"].append(pad2(W1[H:2 * H], HP, HP))
        acc["W1e"].append(pad2(W1[2 * H:], 2, HP))          # rows: [radial, d]
        acc["b1"].append(rowv(p["b1"], HP))
        acc["W2"].append(pad2(p["W2"], HP, HP))
        acc["b2"].append(rowv(p["b2"], HP))
        acc["wa"].append(rowv(jnp.asarray(p["Wa"], f32)[:, 0], HP))
        acc["ba"].append(jnp.asarray(p["ba"], f32).reshape(1, 1))
        W3 = jnp.asarray(p["W3"], f32)                      # (2H, H)
        acc["W3h"].append(pad2(W3[:H], HP, HP))
        acc["W3a"].append(pad2(W3[H:], HP, HP))
        acc["b3"].append(rowv(p["b3"], HP))
        acc["W4"].append(pad2(p["W4"], HP, HP))
        acc["b4"].append(rowv(p["b4"], HP))

    out = {k: jnp.stack(v, axis=0) for k, v in acc.items()}
    for k in ("W1r", "W1c", "W2", "W3h", "W3a", "W4"):
        out[k] = out[k].astype(mxu_dtype)

    c = params["coord"]
    Wc1 = jnp.asarray(c["W1"], f32)
    out["Wc1r"] = pad2(Wc1[:H], HP, HP).astype(mxu_dtype)
    out["Wc1c"] = pad2(Wc1[H:2 * H], HP, HP).astype(mxu_dtype)
    out["Wc1e"] = pad2(Wc1[2 * H:], 2, HP)
    out["bc1"] = rowv(c["b1"], HP)
    out["Wc2"] = pad2(c["W2"], HP, HP).astype(mxu_dtype)
    out["bc2"] = rowv(c["b2"], HP)
    out["wc3"] = rowv(jnp.asarray(c["W3"], f32)[:, 0], HP)
    return out


def e3block_forward(h, x, row, col, d, flags, edge_mask, params, coords_range,
                    graphs_per_step=None, mxu_dtype=jnp.bfloat16):
    f32 = jnp.float32
    B, N, H = h.shape
    E = row.shape[1]
    XD = x.shape[-1]
    n_layers = len(params["egcl"])

    HP = _round_up(H, 128)       # lane-dense hidden dim
    XP = _round_up(XD, 8)        # small coord pad (masked 8-lane store is fine)
    Np = _round_up(N, 8)         # sublane-aligned nodes per graph
    Ep = _round_up(E, 8)         # sublane-aligned edges per graph

    G = graphs_per_step if graphs_per_step is not None \
        else _pick_graphs_per_step(B, Np, Ep)
    assert B % G == 0, "graphs_per_step must divide the batch"
    Bg = B // G
    GN, GE = G * Np, G * Ep

    def pad_axis(a, axis, new):
        pads = [(0, 0)] * a.ndim
        pads[axis] = (0, new - a.shape[axis])
        return jnp.pad(a, pads)

    # Pad nodes/edges to aligned counts (padded edges have edge_mask==0, padded
    # nodes have flags==0), then pack G consecutive graphs into each grid step.
    h_p = pad_axis(pad_axis(h.astype(f32), 2, HP), 1, Np).reshape(Bg, GN, HP)
    x_p = pad_axis(pad_axis(x.astype(f32), 2, XP), 1, Np).reshape(Bg, GN, XP)
    fl = pad_axis(flags.astype(f32), 1, Np).reshape(Bg, GN, 1)
    d_ = pad_axis(d.astype(f32), 1, Ep).reshape(Bg, GE, 1)
    em = pad_axis(edge_mask.astype(f32), 1, Ep).reshape(Bg, GE, 1)
    # node-id offsets make the in-kernel one-hots block-diagonal per graph
    off = (jnp.arange(B, dtype=jnp.int32) % G)[:, None] * Np
    rowi = (pad_axis(row.astype(jnp.int32), 1, Ep) + off).reshape(Bg, GE, 1)
    coli = (pad_axis(col.astype(jnp.int32), 1, Ep) + off).reshape(Bg, GE, 1)

    pp = _prep_params(params, H, HP, mxu_dtype)

    def dspec(shape):                     # per-step data block
        nd = len(shape)
        return pl.BlockSpec((1,) + tuple(shape[1:]),
                            lambda b, _nd=nd: (b,) + (0,) * (_nd - 1))

    def wspec(shape):                     # weights: full block, constant index
        nd = len(shape)
        return pl.BlockSpec(tuple(shape), lambda b, _nd=nd: (0,) * _nd)

    weight_order = ["W1r", "W1c", "W1e", "b1", "W2", "b2", "wa", "ba",
                    "W3h", "W3a", "b3", "W4", "b4",
                    "Wc1r", "Wc1c", "Wc1e", "bc1", "Wc2", "bc2", "wc3"]
    weight_args = [pp[k] for k in weight_order]
    data_args = [rowi, coli, h_p, x_p, d_, fl, em]
    args = data_args + weight_args
    in_specs = ([dspec(a.shape) for a in data_args]
                + [wspec(a.shape) for a in weight_args])

    kernel = functools.partial(e3block_kernel, n_layers=n_layers,
                               coords_range=float(coords_range),
                               mxu_dtype=mxu_dtype)

    h_out, x_out = pl.pallas_call(
        kernel,
        grid=(Bg,),
        out_shape=(jax.ShapeDtypeStruct((Bg, GN, HP), f32),
                   jax.ShapeDtypeStruct((Bg, GN, XP), f32)),
        in_specs=in_specs,
        out_specs=(dspec((Bg, GN, HP)), dspec((Bg, GN, XP))),
        compiler_params=pltpu.CompilerParams(
            dimension_semantics=("parallel",)),
    )(*args)

    h_out = h_out.reshape(B, Np, HP)[:, :N, :H]
    x_out = x_out.reshape(B, Np, XP)[:, :N, :XD]
    return h_out, x_out


# ---------------- pure-JAX reference (for correctness check) ----------------
def ref_forward(params, h, x, row, col, d, flags, edge_mask, coords_range):
    N = h.shape[0]

    def seg_sum(data, ids, n):
        return jnp.zeros((n, data.shape[1]), data.dtype).at[ids].add(data)

    diff = x[row] - x[col]
    radial = jnp.sum(diff ** 2, axis=1, keepdims=True)
    distance = diff / (jnp.sqrt(radial + 1e-8) + 1.0)
    edge_attr = jnp.concatenate([radial, d], axis=1)

    for p in params["egcl"]:
        msg = jnp.concatenate([h[row], h[col], edge_attr], axis=1)
        m = jax.nn.silu(msg @ p["W1"] + p["b1"])
        m = jax.nn.silu(m @ p["W2"] + p["b2"])
        att = jax.nn.sigmoid(m @ p["Wa"] + p["ba"])
        m = m * att * edge_mask
        agg = seg_sum(m, row, N)
        ni = jnp.concatenate([h, agg], axis=1)
        nh = jax.nn.silu(ni @ p["W3"] + p["b3"])
        h = (h + nh @ p["W4"] + p["b4"]) * flags

    c = params["coord"]
    msg = jnp.concatenate([h[row], h[col], edge_attr], axis=1)
    m = jax.nn.silu(msg @ c["W1"] + c["b1"])
    m = jax.nn.silu(m @ c["W2"] + c["b2"])
    s = jnp.tanh(m @ c["W3"])
    trans = distance * s * coords_range * edge_mask
    x = (x + seg_sum(trans, row, N)) * flags
    return h, x


def init_params(key, H, n_layers=2):
    edge_dim = 2
    keys = iter(jax.random.split(key, 64))

    def p(shape, scale=0.1):
        return scale * jax.random.normal(next(keys), shape, dtype=jnp.float32)

    egcl = []
    for _ in range(n_layers):
        egcl.append(dict(
            W1=p((2 * H + edge_dim, H)), b1=p((H,), 0.05),
            W2=p((H, H)),                b2=p((H,), 0.05),
            Wa=p((H, 1)),                ba=p((1,), 0.05),
            W3=p((2 * H, H)),            b3=p((H,), 0.05),
            W4=p((H, H)),                b4=p((H,), 0.05),
        ))
    coord = dict(
        W1=p((2 * H + edge_dim, H)), b1=p((H,), 0.05),
        W2=p((H, H)),                b2=p((H,), 0.05),
        W3=p((H, 1), 0.001),         # xavier(gain=0.001)-style tiny init, no bias
    )
    return dict(egcl=egcl, coord=coord)


if __name__ == "__main__":
    key = jax.random.PRNGKey(0)
    B, N, H, E = 16, 8, 32, 24          # graphs, nodes/graph, nhid, edges/graph
    coords_range = 3.0

    k1, k2, k3, k4, k5, k6, k7, k8 = jax.random.split(key, 8)
    h = jax.random.normal(k1, (B, N, H), dtype=jnp.float32)
    x = jax.random.normal(k2, (B, N, 3), dtype=jnp.float32)
    row = jax.random.randint(k3, (B, E), 0, N)
    col = jax.random.randint(k4, (B, E), 0, N)
    d = jax.random.uniform(k5, (B, E, 1), dtype=jnp.float32)
    flags = (jax.random.uniform(k6, (B, N, 1)) > 0.2).astype(jnp.float32)
    edge_mask = (jax.random.uniform(k7, (B, E, 1)) > 0.2).astype(jnp.float32)
    params = init_params(k8, H)

    # fast path: bf16 MXU operands, f32 accumulation / VPU math
    h_bf, x_bf = e3block_forward(h, x, row, col, d, flags, edge_mask,
                                 params, coords_range)
    # f32 MXU path: structural-correctness check (only approx-recip differs
    # from the reference numerics)
    h_32, x_32 = e3block_forward(h, x, row, col, d, flags, edge_mask,
                                 params, coords_range, mxu_dtype=jnp.float32)
    jax.block_until_ready((h_bf, x_bf, h_32, x_32))

    h_ref, x_ref = [], []
    for b in range(B):
        hr, xr = ref_forward(params, h[b], x[b], row[b], col[b], d[b],
                             flags[b], edge_mask[b], coords_range)
        h_ref.append(hr)
        x_ref.append(xr)
    h_ref = jnp.stack(h_ref)
    x_ref = jnp.stack(x_ref)

    err = lambda a, b_: float(jnp.max(jnp.abs(a - b_)))
    # f32 MXU + EUP approx reciprocals: tight structural check.
    assert jnp.allclose(h_32, h_ref, atol=1e-2, rtol=1e-2), ("h f32", err(h_32, h_ref))
    assert jnp.allclose(x_32, x_ref, atol=1e-2, rtol=1e-2), ("x f32", err(x_32, x_ref))
    # bf16 MXU operands: tolerance covers bf16 rounding of matmul inputs
    # (including the segment-sum data operand) plus approx reciprocals.
    assert jnp.allclose(h_bf, h_ref, atol=5e-2, rtol=5e-2), ("h bf16", err(h_bf, h_ref))
    assert jnp.allclose(x_bf, x_ref, atol=5e-2, rtol=5e-2), ("x bf16", err(x_bf, x_ref))
    print("KERNEL_OK")
</pallas_src>

<mosaic_0001>
module attributes {stable_mosaic.version = 11 : i64} {
  func.func @e3block_kernel(%arg0: i32, %arg1: memref<1x192x1xi32, #tpu.memory_space<vmem>>, %arg2: memref<1x192x1xi32, #tpu.memory_space<vmem>>, %arg3: memref<1x64x128xf32, #tpu.memory_space<vmem>>, %arg4: memref<1x64x8xf32, #tpu.memory_space<vmem>>, %arg5: memref<1x192x1xf32, #tpu.memory_space<vmem>>, %arg6: memref<1x64x1xf32, #tpu.memory_space<vmem>>, %arg7: memref<1x192x1xf32, #tpu.memory_space<vmem>>, %arg8: memref<2x128x128xbf16, #tpu.memory_space<vmem>>, %arg9: memref<2x128x128xbf16, #tpu.memory_space<vmem>>, %arg10: memref<2x2x128xf32, #tpu.memory_space<vmem>>, %arg11: memref<2x1x128xf32, #tpu.memory_space<vmem>>, %arg12: memref<2x128x128xbf16, #tpu.memory_space<vmem>>, %arg13: memref<2x1x128xf32, #tpu.memory_space<vmem>>, %arg14: memref<2x1x128xf32, #tpu.memory_space<vmem>>, %arg15: memref<2x1x1xf32, #tpu.memory_space<vmem>>, %arg16: memref<2x128x128xbf16, #tpu.memory_space<vmem>>, %arg17: memref<2x128x128xbf16, #tpu.memory_space<vmem>>, %arg18: memref<2x1x128xf32, #tpu.memory_space<vmem>>, %arg19: memref<2x128x128xbf16, #tpu.memory_space<vmem>>, %arg20: memref<2x1x128xf32, #tpu.memory_space<vmem>>, %arg21: memref<128x128xbf16, #tpu.memory_space<vmem>>, %arg22: memref<128x128xbf16, #tpu.memory_space<vmem>>, %arg23: memref<2x128xf32, #tpu.memory_space<vmem>>, %arg24: memref<1x128xf32, #tpu.memory_space<vmem>>, %arg25: memref<128x128xbf16, #tpu.memory_space<vmem>>, %arg26: memref<1x128xf32, #tpu.memory_space<vmem>>, %arg27: memref<1x128xf32, #tpu.memory_space<vmem>>, %arg28: memref<1x64x128xf32, #tpu.memory_space<vmem>>, %arg29: memref<1x64x8xf32, #tpu.memory_space<vmem>>) attributes {dimension_semantics = [#tpu.dimension_semantics<parallel>], iteration_bounds = array<i64: 2>, scalar_prefetch = 0 : i64, scratch_operands = 0 : i64, tpu.core_type = #tpu.core_type<tc>, window_params = [{transform_indices = @transform_0, window_bounds = array<i64: 1, 192, 1>}, {transform_indices = @transform_1, window_bounds = array<i64: 1, 192, 1>}, {transform_indices = @transform_2, window_bounds = array<i64: 1, 64, 128>}, {transform_indices = @transform_3, window_bounds = array<i64: 1, 64, 8>}, {transform_indices = @transform_4, window_bounds = array<i64: 1, 192, 1>}, {transform_indices = @transform_5, window_bounds = array<i64: 1, 64, 1>}, {transform_indices = @transform_6, window_bounds = array<i64: 1, 192, 1>}, {pipeline_mode = #tpu.pipeline_mode<synchronous>, transform_indices = @transform_7, window_bounds = array<i64: 2, 128, 128>}, {pipeline_mode = #tpu.pipeline_mode<synchronous>, transform_indices = @transform_8, window_bounds = array<i64: 2, 128, 128>}, {pipeline_mode = #tpu.pipeline_mode<synchronous>, transform_indices = @transform_9, window_bounds = array<i64: 2, 2, 128>}, {pipeline_mode = #tpu.pipeline_mode<synchronous>, transform_indices = @transform_10, window_bounds = array<i64: 2, 1, 128>}, {pipeline_mode = #tpu.pipeline_mode<synchronous>, transform_indices = @transform_11, window_bounds = array<i64: 2, 128, 128>}, {pipeline_mode = #tpu.pipeline_mode<synchronous>, transform_indices = @transform_12, window_bounds = array<i64: 2, 1, 128>}, {pipeline_mode = #tpu.pipeline_mode<synchronous>, transform_indices = @transform_13, window_bounds = array<i64: 2, 1, 128>}, {pipeline_mode = #tpu.pipeline_mode<synchronous>, transform_indices = @transform_14, window_bounds = array<i64: 2, 1, 1>}, {pipeline_mode = #tpu.pipeline_mode<synchronous>, transform_indices = @transform_15, window_bounds = array<i64: 2, 128, 128>}, {pipeline_mode = #tpu.pipeline_mode<synchronous>, transform_indices = @transform_16, window_bounds = array<i64: 2, 128, 128>}, {pipeline_mode = #tpu.pipeline_mode<synchronous>, transform_indices = @transform_17, window_bounds = array<i64: 2, 1, 128>}, {pipeline_mode = #tpu.pipeline_mode<synchronous>, transform_indices = @transform_18, window_bounds = array<i64: 2, 128, 128>}, {pipeline_mode = #tpu.pipeline_mode<synchronous>, transform_indices = @transform_19, window_bounds = array<i64: 2, 1, 128>}, {pipeline_mode = #tpu.pipeline_mode<synchronous>, transform_indices = @transform_20, window_bounds = array<i64: 128, 128>}, {pipeline_mode = #tpu.pipeline_mode<synchronous>, transform_indices = @transform_21, window_bounds = array<i64: 128, 128>}, {pipeline_mode = #tpu.pipeline_mode<synchronous>, transform_indices = @transform_22, window_bounds = array<i64: 2, 128>}, {pipeline_mode = #tpu.pipeline_mode<synchronous>, transform_indices = @transform_23, window_bounds = array<i64: 1, 128>}, {pipeline_mode = #tpu.pipeline_mode<synchronous>, transform_indices = @transform_24, window_bounds = array<i64: 128, 128>}, {pipeline_mode = #tpu.pipeline_mode<synchronous>, transform_indices = @transform_25, window_bounds = array<i64: 1, 128>}, {pipeline_mode = #tpu.pipeline_mode<synchronous>, transform_indices = @transform_26, window_bounds = array<i64: 1, 128>}, {transform_indices = @transform_27, window_bounds = array<i64: 1, 64, 128>}, {transform_indices = @transform_28, window_bounds = array<i64: 1, 64, 8>}]} {
    %c0 = arith.constant 0 : index
    %c0_0 = arith.constant 0 : index
    %c0_1 = arith.constant 0 : index
    %0 = vector.load %arg1[%c0, %c0_0, %c0_1] : memref<1x192x1xi32, #tpu.memory_space<vmem>>, vector<1x192x1xi32>
    %1 = vector.shape_cast %0 : vector<1x192x1xi32> to vector<192x1xi32>
    %c0_2 = arith.constant 0 : index
    %c0_3 = arith.constant 0 : index
    %c0_4 = arith.constant 0 : index
    %2 = vector.load %arg2[%c0_2, %c0_3, %c0_4] : memref<1x192x1xi32, #tpu.memory_space<vmem>>, vector<1x192x1xi32>
    %3 = vector.shape_cast %2 : vector<1x192x1xi32> to vector<192x1xi32>
    %c0_5 = arith.constant 0 : index
    %c0_6 = arith.constant 0 : index
    %c0_7 = arith.constant 0 : index
    %4 = vector.load %arg3[%c0_5, %c0_6, %c0_7] : memref<1x64x128xf32, #tpu.memory_space<vmem>>, vector<1x64x128xf32>
    %5 = vector.shape_cast %4 : vector<1x64x128xf32> to vector<64x128xf32>
    %c0_8 = arith.constant 0 : index
    %c0_9 = arith.constant 0 : index
    %c0_10 = arith.constant 0 : index
    %6 = vector.load %arg4[%c0_8, %c0_9, %c0_10] : memref<1x64x8xf32, #tpu.memory_space<vmem>>, vector<1x64x8xf32>
    %7 = vector.shape_cast %6 : vector<1x64x8xf32> to vector<64x8xf32>
    %c0_11 = arith.constant 0 : index
    %c0_12 = arith.constant 0 : index
    %c0_13 = arith.constant 0 : index
    %8 = vector.load %arg5[%c0_11, %c0_12, %c0_13] : memref<1x192x1xf32, #tpu.memory_space<vmem>>, vector<1x192x1xf32>
    %9 = vector.shape_cast %8 : vector<1x192x1xf32> to vector<192x1xf32>
    %c0_14 = arith.constant 0 : index
    %c0_15 = arith.constant 0 : index
    %c0_16 = arith.constant 0 : index
    %10 = vector.load %arg6[%c0_14, %c0_15, %c0_16] : memref<1x64x1xf32, #tpu.memory_space<vmem>>, vector<1x64x1xf32>
    %11 = vector.shape_cast %10 : vector<1x64x1xf32> to vector<64x1xf32>
    %c0_17 = arith.constant 0 : index
    %c0_18 = arith.constant 0 : index
    %c0_19 = arith.constant 0 : index
    %12 = vector.load %arg7[%c0_17, %c0_18, %c0_19] : memref<1x192x1xf32, #tpu.memory_space<vmem>>, vector<1x192x1xf32>
    %13 = vector.shape_cast %12 : vector<1x192x1xf32> to vector<192x1xf32>
    %14 = tpu.iota {dimensions = array<i32: 1>} : vector<192x64xi32>
    %15 = vector.broadcast %1 : vector<192x1xi32> to vector<192x64xi32>
    %16 = arith.cmpi eq, %15, %14 : vector<192x64xi32>
    %cst = arith.constant 1.000000e+00 : f32
    %cst_20 = arith.constant 0.000000e+00 : f32
    %17 = vector.broadcast %cst : f32 to vector<192x64xf32>
    %18 = vector.broadcast %cst_20 : f32 to vector<192x64xf32>
    %19 = arith.select %16, %17, %18 : vector<192x64xi1>, vector<192x64xf32>
    %20 = vector.broadcast %3 : vector<192x1xi32> to vector<192x64xi32>
    %21 = arith.cmpi eq, %20, %14 : vector<192x64xi32>
    %cst_21 = arith.constant 1.000000e+00 : f32
    %cst_22 = arith.constant 0.000000e+00 : f32
    %22 = vector.broadcast %cst_21 : f32 to vector<192x64xf32>
    %23 = vector.broadcast %cst_22 : f32 to vector<192x64xf32>
    %24 = arith.select %21, %22, %23 : vector<192x64xi1>, vector<192x64xf32>
    %25 = arith.truncf %19 : vector<192x64xf32> to vector<192x64xbf16>
    %26 = arith.truncf %24 : vector<192x64xf32> to vector<192x64xbf16>
    %27 = arith.subf %19, %24 : vector<192x64xf32>
    %28 = arith.truncf %27 : vector<192x64xf32> to vector<192x64xbf16>
    %29 = arith.truncf %7 : vector<64x8xf32> to vector<64x8xbf16>
    %cst_23 = arith.constant dense<0.000000e+00> : vector<192x8xf32>
    %30 = tpu.matmul %28, %29, %cst_23 {dimension_numbers = #tpu.dot_dimension_numbers<[1], [0], [0], [1], [0, 0, 1, 1], [], []>} : vector<192x64xbf16>, vector<64x8xbf16>, vector<192x8xf32> -> vector<192x8xf32>
    %31 = arith.mulf %30, %30 : vector<192x8xf32>
    %cst_24 = arith.constant dense<0.000000e+00> : vector<192xf32>
    %32 = vector.multi_reduction <add>, %31, %cst_24 [1] : vector<192x8xf32> to vector<192xf32>
    %33 = vector.shape_cast %32 : vector<192xf32> to vector<192x1xf32>
    %cst_25 = arith.constant 9.99999993E-9 : f32
    %34 = vector.broadcast %cst_25 : f32 to vector<192x1xf32>
    %35 = arith.addf %33, %34 : vector<192x1xf32>
    %36 = math.sqrt %35 : vector<192x1xf32>
    %cst_26 = arith.constant 1.000000e+00 : f32
    %37 = vector.broadcast %cst_26 : f32 to vector<192x1xf32>
    %38 = arith.addf %36, %37 : vector<192x1xf32>
    %39 = tpu.reciprocal %38 {approx = true} : vector<192x1xf32> -> vector<192x1xf32>
    %40 = vector.broadcast %39 : vector<192x1xf32> to vector<192x8xf32>
    %41 = arith.mulf %30, %40 : vector<192x8xf32>
    %c0_27 = arith.constant 0 : index
    %c0_28 = arith.constant 0 : index
    %c0_29 = arith.constant 0 : index
    %42 = vector.load %arg8[%c0_27, %c0_28, %c0_29] : memref<2x128x128xbf16, #tpu.memory_space<vmem>>, vector<1x128x128xbf16>
    %43 = vector.shape_cast %42 : vector<1x128x128xbf16> to vector<128x128xbf16>
    %44 = arith.truncf %5 : vector<64x128xf32> to vector<64x128xbf16>
    %cst_30 = arith.constant dense<0.000000e+00> : vector<64x128xf32>
    %45 = tpu.matmul %44, %43, %cst_30 {dimension_numbers = #tpu.dot_dimension_numbers<[1], [0], [0], [1], [0, 0, 1, 1], [], []>} : vector<64x128xbf16>, vector<128x128xbf16>, vector<64x128xf32> -> vector<64x128xf32>
    %c0_31 = arith.constant 0 : index
    %c0_32 = arith.constant 0 : index
    %c0_33 = arith.constant 0 : index
    %46 = vector.load %arg9[%c0_31, %c0_32, %c0_33] : memref<2x128x128xbf16, #tpu.memory_space<vmem>>, vector<1x128x128xbf16>
    %47 = vector.shape_cast %46 : vector<1x128x128xbf16> to vector<128x128xbf16>
    %48 = arith.truncf %5 : vector<64x128xf32> to vector<64x128xbf16>
    %cst_34 = arith.constant dense<0.000000e+00> : vector<64x128xf32>
    %49 = tpu.matmul %48, %47, %cst_34 {dimension_numbers = #tpu.dot_dimension_numbers<[1], [0], [0], [1], [0, 0, 1, 1], [], []>} : vector<64x128xbf16>, vector<128x128xbf16>, vector<64x128xf32> -> vector<64x128xf32>
    %c0_35 = arith.constant 0 : index
    %c0_36 = arith.constant 0 : index
    %c0_37 = arith.constant 0 : index
    %50 = vector.load %arg10[%c0_35, %c0_36, %c0_37] : memref<2x2x128xf32, #tpu.memory_space<vmem>>, vector<1x2x128xf32>
    %51 = vector.shape_cast %50 : vector<1x2x128xf32> to vector<2x128xf32>
    %52 = arith.truncf %45 : vector<64x128xf32> to vector<64x128xbf16>
    %cst_38 = arith.constant dense<0.000000e+00> : vector<192x128xf32>
    %53 = tpu.matmul %25, %52, %cst_38 {dimension_numbers = #tpu.dot_dimension_numbers<[1], [0], [0], [1], [0, 0, 1, 1], [], []>} : vector<192x64xbf16>, vector<64x128xbf16>, vector<192x128xf32> -> vector<192x128xf32>
    %54 = arith.truncf %49 : vector<64x128xf32> to vector<64x128xbf16>
    %cst_39 = arith.constant dense<0.000000e+00> : vector<192x128xf32>
    %55 = tpu.matmul %26, %54, %cst_39 {dimension_numbers = #tpu.dot_dimension_numbers<[1], [0], [0], [1], [0, 0, 1, 1], [], []>} : vector<192x64xbf16>, vector<64x128xbf16>, vector<192x128xf32> -> vector<192x128xf32>
    %56 = arith.addf %53, %55 : vector<192x128xf32>
    %57 = vector.extract_strided_slice %51 {offsets = [0, 0], sizes = [1, 128], strides = [1, 1]} : vector<2x128xf32> to vector<1x128xf32>
    %58 = vector.broadcast %33 : vector<192x1xf32> to vector<192x128xf32>
    %59 = vector.broadcast %57 : vector<1x128xf32> to vector<192x128xf32>
    %60 = arith.mulf %58, %59 : vector<192x128xf32>
    %61 = arith.addf %56, %60 : vector<192x128xf32>
    %62 = vector.extract_strided_slice %51 {offsets = [1, 0], sizes = [1, 128], strides = [1, 1]} : vector<2x128xf32> to vector<1x128xf32>
    %63 = vector.broadcast %9 : vector<192x1xf32> to vector<192x128xf32>
    %64 = vector.broadcast %62 : vector<1x128xf32> to vector<192x128xf32>
    %65 = arith.mulf %63, %64 : vector<192x128xf32>
    %66 = arith.addf %61, %65 : vector<192x128xf32>
    %c0_40 = arith.constant 0 : index
    %c0_41 = arith.constant 0 : index
    %c0_42 = arith.constant 0 : index
    %67 = vector.load %arg11[%c0_40, %c0_41, %c0_42] : memref<2x1x128xf32, #tpu.memory_space<vmem>>, vector<1x1x128xf32>
    %68 = vector.shape_cast %67 : vector<1x1x128xf32> to vector<1x128xf32>
    %69 = vector.broadcast %68 : vector<1x128xf32> to vector<192x128xf32>
    %70 = arith.addf %66, %69 : vector<192x128xf32>
    %71 = math.absf %70 : vector<192x128xf32>
    %cst_43 = arith.constant 0.000000e+00 : f32
    %72 = vector.broadcast %cst_43 : f32 to vector<192x128xf32>
    %73 = arith.subf %72, %71 : vector<192x128xf32>
    %74 = math.exp %73 : vector<192x128xf32>
    %cst_44 = arith.constant 1.000000e+00 : f32
    %75 = vector.broadcast %cst_44 : f32 to vector<192x128xf32>
    %76 = arith.addf %75, %74 : vector<192x128xf32>
    %77 = tpu.reciprocal %76 {approx = true} : vector<192x128xf32> -> vector<192x128xf32>
    %cst_45 = arith.constant 0.000000e+00 : f32
    %78 = vector.broadcast %cst_45 : f32 to vector<192x128xf32>
    %79 = arith.cmpf oge, %70, %78 : vector<192x128xf32>
    %80 = arith.mulf %74, %77 : vector<192x128xf32>
    %81 = arith.select %79, %77, %80 : vector<192x128xi1>, vector<192x128xf32>
    %82 = arith.mulf %70, %81 : vector<192x128xf32>
    %c0_46 = arith.constant 0 : index
    %c0_47 = arith.constant 0 : index
    %c0_48 = arith.constant 0 : index
    %83 = vector.load %arg12[%c0_46, %c0_47, %c0_48] : memref<2x128x128xbf16, #tpu.memory_space<vmem>>, vector<1x128x128xbf16>
    %84 = vector.shape_cast %83 : vector<1x128x128xbf16> to vector<128x128xbf16>
    %85 = arith.truncf %82 : vector<192x128xf32> to vector<192x128xbf16>
    %cst_49 = arith.constant dense<0.000000e+00> : vector<192x128xf32>
    %86 = tpu.matmul %85, %84, %cst_49 {dimension_numbers = #tpu.dot_dimension_numbers<[1], [0], [0], [1], [0, 0, 1, 1], [], []>} : vector<192x128xbf16>, vector<128x128xbf16>, vector<192x128xf32> -> vector<192x128xf32>
    %c0_50 = arith.constant 0 : index
    %c0_51 = arith.constant 0 : index
    %c0_52 = arith.constant 0 : index
    %87 = vector.load %arg13[%c0_50, %c0_51, %c0_52] : memref<2x1x128xf32, #tpu.memory_space<vmem>>, vector<1x1x128xf32>
    %88 = vector.shape_cast %87 : vector<1x1x128xf32> to vector<1x128xf32>
    %89 = vector.broadcast %88 : vector<1x128xf32> to vector<192x128xf32>
    %90 = arith.addf %86, %89 : vector<192x128xf32>
    %91 = math.absf %90 : vector<192x128xf32>
    %cst_53 = arith.constant 0.000000e+00 : f32
    %92 = vector.broadcast %cst_53 : f32 to vector<192x128xf32>
    %93 = arith.subf %92, %91 : vector<192x128xf32>
    %94 = math.exp %93 : vector<192x128xf32>
    %cst_54 = arith.constant 1.000000e+00 : f32
    %95 = vector.broadcast %cst_54 : f32 to vector<192x128xf32>
    %96 = arith.addf %95, %94 : vector<192x128xf32>
    %97 = tpu.reciprocal %96 {approx = true} : vector<192x128xf32> -> vector<192x128xf32>
    %cst_55 = arith.constant 0.000000e+00 : f32
    %98 = vector.broadcast %cst_55 : f32 to vector<192x128xf32>
    %99 = arith.cmpf oge, %90, %98 : vector<192x128xf32>
    %100 = arith.mulf %94, %97 : vector<192x128xf32>
    %101 = arith.select %99, %97, %100 : vector<192x128xi1>, vector<192x128xf32>
    %102 = arith.mulf %90, %101 : vector<192x128xf32>
    %c0_56 = arith.constant 0 : index
    %c0_57 = arith.constant 0 : index
    %c0_58 = arith.constant 0 : index
    %103 = vector.load %arg14[%c0_56, %c0_57, %c0_58] : memref<2x1x128xf32, #tpu.memory_space<vmem>>, vector<1x1x128xf32>
    %104 = vector.shape_cast %103 : vector<1x1x128xf32> to vector<1x128xf32>
    %105 = vector.broadcast %104 : vector<1x128xf32> to vector<192x128xf32>
    %106 = arith.mulf %102, %105 : vector<192x128xf32>
    %cst_59 = arith.constant dense<0.000000e+00> : vector<192xf32>
    %107 = vector.multi_reduction <add>, %106, %cst_59 [1] : vector<192x128xf32> to vector<192xf32>
    %108 = vector.shape_cast %107 : vector<192xf32> to vector<192x1xf32>
    %c0_60 = arith.constant 0 : index
    %c0_61 = arith.constant 0 : index
    %c0_62 = arith.constant 0 : index
    %109 = vector.load %arg15[%c0_60, %c0_61, %c0_62] : memref<2x1x1xf32, #tpu.memory_space<vmem>>, vector<1x1x1xf32>
    %110 = vector.shape_cast %109 : vector<1x1x1xf32> to vector<1x1xf32>
    %111 = vector.broadcast %110 : vector<1x1xf32> to vector<192x1xf32>
    %112 = arith.addf %108, %111 : vector<192x1xf32>
    %113 = math.absf %112 : vector<192x1xf32>
    %cst_63 = arith.constant 0.000000e+00 : f32
    %114 = vector.broadcast %cst_63 : f32 to vector<192x1xf32>
    %115 = arith.subf %114, %113 : vector<192x1xf32>
    %116 = math.exp %115 : vector<192x1xf32>
    %cst_64 = arith.constant 1.000000e+00 : f32
    %117 = vector.broadcast %cst_64 : f32 to vector<192x1xf32>
    %118 = arith.addf %117, %116 : vector<192x1xf32>
    %119 = tpu.reciprocal %118 {approx = true} : vector<192x1xf32> -> vector<192x1xf32>
    %cst_65 = arith.constant 0.000000e+00 : f32
    %120 = vector.broadcast %cst_65 : f32 to vector<192x1xf32>
    %121 = arith.cmpf oge, %112, %120 : vector<192x1xf32>
    %122 = arith.mulf %116, %119 : vector<192x1xf32>
    %123 = arith.select %121, %119, %122 : vector<192x1xi1>, vector<192x1xf32>
    %124 = arith.mulf %123, %13 : vector<192x1xf32>
    %125 = vector.broadcast %124 : vector<192x1xf32> to vector<192x128xf32>
    %126 = arith.mulf %102, %125 : vector<192x128xf32>
    %127 = arith.truncf %126 : vector<192x128xf32> to vector<192x128xbf16>
    %cst_66 = arith.constant dense<0.000000e+00> : vector<64x128xf32>
    %128 = tpu.matmul %25, %127, %cst_66 {dimension_numbers = #tpu.dot_dimension_numbers<[0], [0], [1], [1], [0, 1, 1, 1], [], []>} : vector<192x64xbf16>, vector<192x128xbf16>, vector<64x128xf32> -> vector<64x128xf32>
    %c0_67 = arith.constant 0 : index
    %c0_68 = arith.constant 0 : index
    %c0_69 = arith.constant 0 : index
    %129 = vector.load %arg16[%c0_67, %c0_68, %c0_69] : memref<2x128x128xbf16, #tpu.memory_space<vmem>>, vector<1x128x128xbf16>
    %130 = vector.shape_cast %129 : vector<1x128x128xbf16> to vector<128x128xbf16>
    %131 = arith.truncf %5 : vector<64x128xf32> to vector<64x128xbf16>
    %cst_70 = arith.constant dense<0.000000e+00> : vector<64x128xf32>
    %132 = tpu.matmul %131, %130, %cst_70 {dimension_numbers = #tpu.dot_dimension_numbers<[1], [0], [0], [1], [0, 0, 1, 1], [], []>} : vector<64x128xbf16>, vector<128x128xbf16>, vector<64x128xf32> -> vector<64x128xf32>
    %c0_71 = arith.constant 0 : index
    %c0_72 = arith.constant 0 : index
    %c0_73 = arith.constant 0 : index
    %133 = vector.load %arg17[%c0_71, %c0_72, %c0_73] : memref<2x128x128xbf16, #tpu.memory_space<vmem>>, vector<1x128x128xbf16>
    %134 = vector.shape_cast %133 : vector<1x128x128xbf16> to vector<128x128xbf16>
    %135 = arith.truncf %128 : vector<64x128xf32> to vector<64x128xbf16>
    %cst_74 = arith.constant dense<0.000000e+00> : vector<64x128xf32>
    %136 = tpu.matmul %135, %134, %cst_74 {dimension_numbers = #tpu.dot_dimension_numbers<[1], [0], [0], [1], [0, 0, 1, 1], [], []>} : vector<64x128xbf16>, vector<128x128xbf16>, vector<64x128xf32> -> vector<64x128xf32>
    %137 = arith.addf %132, %136 : vector<64x128xf32>
    %c0_75 = arith.constant 0 : index
    %c0_76 = arith.constant 0 : index
    %c0_77 = arith.constant 0 : index
    %138 = vector.load %arg18[%c0_75, %c0_76, %c0_77] : memref<2x1x128xf32, #tpu.memory_space<vmem>>, vector<1x1x128xf32>
    %139 = vector.shape_cast %138 : vector<1x1x128xf32> to vector<1x128xf32>
    %140 = vector.broadcast %139 : vector<1x128xf32> to vector<64x128xf32>
    %141 = arith.addf %137, %140 : vector<64x128xf32>
    %142 = math.absf %141 : vector<64x128xf32>
    %cst_78 = arith.constant 0.000000e+00 : f32
    %143 = vector.broadcast %cst_78 : f32 to vector<64x128xf32>
    %144 = arith.subf %143, %142 : vector<64x128xf32>
    %145 = math.exp %144 : vector<64x128xf32>
    %cst_79 = arith.constant 1.000000e+00 : f32
    %146 = vector.broadcast %cst_79 : f32 to vector<64x128xf32>
    %147 = arith.addf %146, %145 : vector<64x128xf32>
    %148 = tpu.reciprocal %147 {approx = true} : vector<64x128xf32> -> vector<64x128xf32>
    %cst_80 = arith.constant 0.000000e+00 : f32
    %149 = vector.broadcast %cst_80 : f32 to vector<64x128xf32>
    %150 = arith.cmpf oge, %141, %149 : vector<64x128xf32>
    %151 = arith.mulf %145, %148 : vector<64x128xf32>
    %152 = arith.select %150, %148, %151 : vector<64x128xi1>, vector<64x128xf32>
    %153 = arith.mulf %141, %152 : vector<64x128xf32>
    %c0_81 = arith.constant 0 : index
    %c0_82 = arith.constant 0 : index
    %c0_83 = arith.constant 0 : index
    %154 = vector.load %arg19[%c0_81, %c0_82, %c0_83] : memref<2x128x128xbf16, #tpu.memory_space<vmem>>, vector<1x128x128xbf16>
    %155 = vector.shape_cast %154 : vector<1x128x128xbf16> to vector<128x128xbf16>
    %156 = arith.truncf %153 : vector<64x128xf32> to vector<64x128xbf16>
    %cst_84 = arith.constant dense<0.000000e+00> : vector<64x128xf32>
    %157 = tpu.matmul %156, %155, %cst_84 {dimension_numbers = #tpu.dot_dimension_numbers<[1], [0], [0], [1], [0, 0, 1, 1], [], []>} : vector<64x128xbf16>, vector<128x128xbf16>, vector<64x128xf32> -> vector<64x128xf32>
    %158 = arith.addf %5, %157 : vector<64x128xf32>
    %c0_85 = arith.constant 0 : index
    %c0_86 = arith.constant 0 : index
    %c0_87 = arith.constant 0 : index
    %159 = vector.load %arg20[%c0_85, %c0_86, %c0_87] : memref<2x1x128xf32, #tpu.memory_space<vmem>>, vector<1x1x128xf32>
    %160 = vector.shape_cast %159 : vector<1x1x128xf32> to vector<1x128xf32>
    %161 = vector.broadcast %160 : vector<1x128xf32> to vector<64x128xf32>
    %162 = arith.addf %158, %161 : vector<64x128xf32>
    %163 = vector.broadcast %11 : vector<64x1xf32> to vector<64x128xf32>
    %164 = arith.mulf %162, %163 : vector<64x128xf32>
    %c1 = arith.constant 1 : index
    %c0_88 = arith.constant 0 : index
    %c0_89 = arith.constant 0 : index
    %165 = vector.load %arg8[%c1, %c0_88, %c0_89] : memref<2x128x128xbf16, #tpu.memory_space<vmem>>, vector<1x128x128xbf16>
    %166 = vector.shape_cast %165 : vector<1x128x128xbf16> to vector<128x128xbf16>
    %167 = arith.truncf %164 : vector<64x128xf32> to vector<64x128xbf16>
    %cst_90 = arith.constant dense<0.000000e+00> : vector<64x128xf32>
    %168 = tpu.matmul %167, %166, %cst_90 {dimension_numbers = #tpu.dot_dimension_numbers<[1], [0], [0], [1], [0, 0, 1, 1], [], []>} : vector<64x128xbf16>, vector<128x128xbf16>, vector<64x128xf32> -> vector<64x128xf32>
    %c1_91 = arith.constant 1 : index
    %c0_92 = arith.constant 0 : index
    %c0_93 = arith.constant 0 : index
    %169 = vector.load %arg9[%c1_91, %c0_92, %c0_93] : memref<2x128x128xbf16, #tpu.memory_space<vmem>>, vector<1x128x128xbf16>
    %170 = vector.shape_cast %169 : vector<1x128x128xbf16> to vector<128x128xbf16>
    %171 = arith.truncf %164 : vector<64x128xf32> to vector<64x128xbf16>
    %cst_94 = arith.constant dense<0.000000e+00> : vector<64x128xf32>
    %172 = tpu.matmul %171, %170, %cst_94 {dimension_numbers = #tpu.dot_dimension_numbers<[1], [0], [0], [1], [0, 0, 1, 1], [], []>} : vector<64x128xbf16>, vector<128x128xbf16>, vector<64x128xf32> -> vector<64x128xf32>
    %c1_95 = arith.constant 1 : index
    %c0_96 = arith.constant 0 : index
    %c0_97 = arith.constant 0 : index
    %173 = vector.load %arg10[%c1_95, %c0_96, %c0_97] : memref<2x2x128xf32, #tpu.memory_space<vmem>>, vector<1x2x128xf32>
    %174 = vector.shape_cast %173 : vector<1x2x128xf32> to vector<2x128xf32>
    %175 = arith.truncf %168 : vector<64x128xf32> to vector<64x128xbf16>
    %cst_98 = arith.constant dense<0.000000e+00> : vector<192x128xf32>
    %176 = tpu.matmul %25, %175, %cst_98 {dimension_numbers = #tpu.dot_dimension_numbers<[1], [0], [0], [1], [0, 0, 1, 1], [], []>} : vector<192x64xbf16>, vector<64x128xbf16>, vector<192x128xf32> -> vector<192x128xf32>
    %177 = arith.truncf %172 : vector<64x128xf32> to vector<64x128xbf16>
    %cst_99 = arith.constant dense<0.000000e+00> : vector<192x128xf32>
    %178 = tpu.matmul %26, %177, %cst_99 {dimension_numbers = #tpu.dot_dimension_numbers<[1], [0], [0], [1], [0, 0, 1, 1], [], []>} : vector<192x64xbf16>, vector<64x128xbf16>, vector<192x128xf32> -> vector<192x128xf32>
    %179 = arith.addf %176, %178 : vector<192x128xf32>
    %180 = vector.extract_strided_slice %174 {offsets = [0, 0], sizes = [1, 128], strides = [1, 1]} : vector<2x128xf32> to vector<1x128xf32>
    %181 = vector.broadcast %33 : vector<192x1xf32> to vector<192x128xf32>
    %182 = vector.broadcast %180 : vector<1x128xf32> to vector<192x128xf32>
    %183 = arith.mulf %181, %182 : vector<192x128xf32>
    %184 = arith.addf %179, %183 : vector<192x128xf32>
    %185 = vector.extract_strided_slice %174 {offsets = [1, 0], sizes = [1, 128], strides = [1, 1]} : vector<2x128xf32> to vector<1x128xf32>
    %186 = vector.broadcast %9 : vector<192x1xf32> to vector<192x128xf32>
    %187 = vector.broadcast %185 : vector<1x128xf32> to vector<192x128xf32>
    %188 = arith.mulf %186, %187 : vector<192x128xf32>
    %189 = arith.addf %184, %188 : vector<192x128xf32>
    %c1_100 = arith.constant 1 : index
    %c0_101 = arith.constant 0 : index
    %c0_102 = arith.constant 0 : index
    %190 = vector.load %arg11[%c1_100, %c0_101, %c0_102] : memref<2x1x128xf32, #tpu.memory_space<vmem>>, vector<1x1x128xf32>
    %191 = vector.shape_cast %190 : vector<1x1x128xf32> to vector<1x128xf32>
    %192 = vector.broadcast %191 : vector<1x128xf32> to vector<192x128xf32>
    %193 = arith.addf %189, %192 : vector<192x128xf32>
    %194 = math.absf %193 : vector<192x128xf32>
    %cst_103 = arith.constant 0.000000e+00 : f32
    %195 = vector.broadcast %cst_103 : f32 to vector<192x128xf32>
    %196 = arith.subf %195, %194 : vector<192x128xf32>
    %197 = math.exp %196 : vector<192x128xf32>
    %cst_104 = arith.constant 1.000000e+00 : f32
    %198 = vector.broadcast %cst_104 : f32 to vector<192x128xf32>
    %199 = arith.addf %198, %197 : vector<192x128xf32>
    %200 = tpu.reciprocal %199 {approx = true} : vector<192x128xf32> -> vector<192x128xf32>
    %cst_105 = arith.constant 0.000000e+00 : f32
    %201 = vector.broadcast %cst_105 : f32 to vector<192x128xf32>
    %202 = arith.cmpf oge, %193, %201 : vector<192x128xf32>
    %203 = arith.mulf %197, %200 : vector<192x128xf32>
    %204 = arith.select %202, %200, %203 : vector<192x128xi1>, vector<192x128xf32>
    %205 = arith.mulf %193, %204 : vector<192x128xf32>
    %c1_106 = arith.constant 1 : index
    %c0_107 = arith.constant 0 : index
    %c0_108 = arith.constant 0 : index
    %206 = vector.load %arg12[%c1_106, %c0_107, %c0_108] : memref<2x128x128xbf16, #tpu.memory_space<vmem>>, vector<1x128x128xbf16>
    %207 = vector.shape_cast %206 : vector<1x128x128xbf16> to vector<128x128xbf16>
    %208 = arith.truncf %205 : vector<192x128xf32> to vector<192x128xbf16>
    %cst_109 = arith.constant dense<0.000000e+00> : vector<192x128xf32>
    %209 = tpu.matmul %208, %207, %cst_109 {dimension_numbers = #tpu.dot_dimension_numbers<[1], [0], [0], [1], [0, 0, 1, 1], [], []>} : vector<192x128xbf16>, vector<128x128xbf16>, vector<192x128xf32> -> vector<192x128xf32>
    %c1_110 = arith.constant 1 : index
    %c0_111 = arith.constant 0 : index
    %c0_112 = arith.constant 0 : index
    %210 = vector.load %arg13[%c1_110, %c0_111, %c0_112] : memref<2x1x128xf32, #tpu.memory_space<vmem>>, vector<1x1x128xf32>
    %211 = vector.shape_cast %210 : vector<1x1x128xf32> to vector<1x128xf32>
    %212 = vector.broadcast %211 : vector<1x128xf32> to vector<192x128xf32>
    %213 = arith.addf %209, %212 : vector<192x128xf32>
    %214 = math.absf %213 : vector<192x128xf32>
    %cst_113 = arith.constant 0.000000e+00 : f32
    %215 = vector.broadcast %cst_113 : f32 to vector<192x128xf32>
    %216 = arith.subf %215, %214 : vector<192x128xf32>
    %217 = math.exp %216 : vector<192x128xf32>
    %cst_114 = arith.constant 1.000000e+00 : f32
    %218 = vector.broadcast %cst_114 : f32 to vector<192x128xf32>
    %219 = arith.addf %218, %217 : vector<192x128xf32>
    %220 = tpu.reciprocal %219 {approx = true} : vector<192x128xf32> -> vector<192x128xf32>
    %cst_115 = arith.constant 0.000000e+00 : f32
    %221 = vector.broadcast %cst_115 : f32 to vector<192x128xf32>
    %222 = arith.cmpf oge, %213, %221 : vector<192x128xf32>
    %223 = arith.mulf %217, %220 : vector<192x128xf32>
    %224 = arith.select %222, %220, %223 : vector<192x128xi1>, vector<192x128xf32>
    %225 = arith.mulf %213, %224 : vector<192x128xf32>
    %c1_116 = arith.constant 1 : index
    %c0_117 = arith.constant 0 : index
    %c0_118 = arith.constant 0 : index
    %226 = vector.load %arg14[%c1_116, %c0_117, %c0_118] : memref<2x1x128xf32, #tpu.memory_space<vmem>>, vector<1x1x128xf32>
    %227 = vector.shape_cast %226 : vector<1x1x128xf32> to vector<1x128xf32>
    %228 = vector.broadcast %227 : vector<1x128xf32> to vector<192x128xf32>
    %229 = arith.mulf %225, %228 : vector<192x128xf32>
    %cst_119 = arith.constant dense<0.000000e+00> : vector<192xf32>
    %230 = vector.multi_reduction <add>, %229, %cst_119 [1] : vector<192x128xf32> to vector<192xf32>
    %231 = vector.shape_cast %230 : vector<192xf32> to vector<192x1xf32>
    %c1_120 = arith.constant 1 : index
    %c0_121 = arith.constant 0 : index
    %c0_122 = arith.constant 0 : index
    %232 = vector.load %arg15[%c1_120, %c0_121, %c0_122] : memref<2x1x1xf32, #tpu.memory_space<vmem>>, vector<1x1x1xf32>
    %233 = vector.shape_cast %232 : vector<1x1x1xf32> to vector<1x1xf32>
    %234 = vector.broadcast %233 : vector<1x1xf32> to vector<192x1xf32>
    %235 = arith.addf %231, %234 : vector<192x1xf32>
    %236 = math.absf %235 : vector<192x1xf32>
    %cst_123 = arith.constant 0.000000e+00 : f32
    %237 = vector.broadcast %cst_123 : f32 to vector<192x1xf32>
    %238 = arith.subf %237, %236 : vector<192x1xf32>
    %239 = math.exp %238 : vector<192x1xf32>
    %cst_124 = arith.constant 1.000000e+00 : f32
    %240 = vector.broadcast %cst_124 : f32 to vector<192x1xf32>
    %241 = arith.addf %240, %239 : vector<192x1xf32>
    %242 = tpu.reciprocal %241 {approx = true} : vector<192x1xf32> -> vector<192x1xf32>
    %cst_125 = arith.constant 0.000000e+00 : f32
    %243 = vector.broadcast %cst_125 : f32 to vector<192x1xf32>
    %244 = arith.cmpf oge, %235, %243 : vector<192x1xf32>
    %245 = arith.mulf %239, %242 : vector<192x1xf32>
    %246 = arith.select %244, %242, %245 : vector<192x1xi1>, vector<192x1xf32>
    %247 = arith.mulf %246, %13 : vector<192x1xf32>
    %248 = vector.broadcast %247 : vector<192x1xf32> to vector<192x128xf32>
    %249 = arith.mulf %225, %248 : vector<192x128xf32>
    %250 = arith.truncf %249 : vector<192x128xf32> to vector<192x128xbf16>
    %cst_126 = arith.constant dense<0.000000e+00> : vector<64x128xf32>
    %251 = tpu.matmul %25, %250, %cst_126 {dimension_numbers = #tpu.dot_dimension_numbers<[0], [0], [1], [1], [0, 1, 1, 1], [], []>} : vector<192x64xbf16>, vector<192x128xbf16>, vector<64x128xf32> -> vector<64x128xf32>
    %c1_127 = arith.constant 1 : index
    %c0_128 = arith.constant 0 : index
    %c0_129 = arith.constant 0 : index
    %252 = vector.load %arg16[%c1_127, %c0_128, %c0_129] : memref<2x128x128xbf16, #tpu.memory_space<vmem>>, vector<1x128x128xbf16>
    %253 = vector.shape_cast %252 : vector<1x128x128xbf16> to vector<128x128xbf16>
    %254 = arith.truncf %164 : vector<64x128xf32> to vector<64x128xbf16>
    %cst_130 = arith.constant dense<0.000000e+00> : vector<64x128xf32>
    %255 = tpu.matmul %254, %253, %cst_130 {dimension_numbers = #tpu.dot_dimension_numbers<[1], [0], [0], [1], [0, 0, 1, 1], [], []>} : vector<64x128xbf16>, vector<128x128xbf16>, vector<64x128xf32> -> vector<64x128xf32>
    %c1_131 = arith.constant 1 : index
    %c0_132 = arith.constant 0 : index
    %c0_133 = arith.constant 0 : index
    %256 = vector.load %arg17[%c1_131, %c0_132, %c0_133] : memref<2x128x128xbf16, #tpu.memory_space<vmem>>, vector<1x128x128xbf16>
    %257 = vector.shape_cast %256 : vector<1x128x128xbf16> to vector<128x128xbf16>
    %258 = arith.truncf %251 : vector<64x128xf32> to vector<64x128xbf16>
    %cst_134 = arith.constant dense<0.000000e+00> : vector<64x128xf32>
    %259 = tpu.matmul %258, %257, %cst_134 {dimension_numbers = #tpu.dot_dimension_numbers<[1], [0], [0], [1], [0, 0, 1, 1], [], []>} : vector<64x128xbf16>, vector<128x128xbf16>, vector<64x128xf32> -> vector<64x128xf32>
    %260 = arith.addf %255, %259 : vector<64x128xf32>
    %c1_135 = arith.constant 1 : index
    %c0_136 = arith.constant 0 : index
    %c0_137 = arith.constant 0 : index
    %261 = vector.load %arg18[%c1_135, %c0_136, %c0_137] : memref<2x1x128xf32, #tpu.memory_space<vmem>>, vector<1x1x128xf32>
    %262 = vector.shape_cast %261 : vector<1x1x128xf32> to vector<1x128xf32>
    %263 = vector.broadcast %262 : vector<1x128xf32> to vector<64x128xf32>
    %264 = arith.addf %260, %263 : vector<64x128xf32>
    %265 = math.absf %264 : vector<64x128xf32>
    %cst_138 = arith.constant 0.000000e+00 : f32
    %266 = vector.broadcast %cst_138 : f32 to vector<64x128xf32>
    %267 = arith.subf %266, %265 : vector<64x128xf32>
    %268 = math.exp %267 : vector<64x128xf32>
    %cst_139 = arith.constant 1.000000e+00 : f32
    %269 = vector.broadcast %cst_139 : f32 to vector<64x128xf32>
    %270 = arith.addf %269, %268 : vector<64x128xf32>
    %271 = tpu.reciprocal %270 {approx = true} : vector<64x128xf32> -> vector<64x128xf32>
    %cst_140 = arith.constant 0.000000e+00 : f32
    %272 = vector.broadcast %cst_140 : f32 to vector<64x128xf32>
    %273 = arith.cmpf oge, %264, %272 : vector<64x128xf32>
    %274 = arith.mulf %268, %271 : vector<64x128xf32>
    %275 = arith.select %273, %271, %274 : vector<64x128xi1>, vector<64x128xf32>
    %276 = arith.mulf %264, %275 : vector<64x128xf32>
    %c1_141 = arith.constant 1 : index
    %c0_142 = arith.constant 0 : index
    %c0_143 = arith.constant 0 : index
    %277 = vector.load %arg19[%c1_141, %c0_142, %c0_143] : memref<2x128x128xbf16, #tpu.memory_space<vmem>>, vector<1x128x128xbf16>
    %278 = vector.shape_cast %277 : vector<1x128x128xbf16> to vector<128x128xbf16>
    %279 = arith.truncf %276 : vector<64x128xf32> to vector<64x128xbf16>
    %cst_144 = arith.constant dense<0.000000e+00> : vector<64x128xf32>
    %280 = tpu.matmul %279, %278, %cst_144 {dimension_numbers = #tpu.dot_dimension_numbers<[1], [0], [0], [1], [0, 0, 1, 1], [], []>} : vector<64x128xbf16>, vector<128x128xbf16>, vector<64x128xf32> -> vector<64x128xf32>
    %281 = arith.addf %164, %280 : vector<64x128xf32>
    %c1_145 = arith.constant 1 : index
    %c0_146 = arith.constant 0 : index
    %c0_147 = arith.constant 0 : index
    %282 = vector.load %arg20[%c1_145, %c0_146, %c0_147] : memref<2x1x128xf32, #tpu.memory_space<vmem>>, vector<1x1x128xf32>
    %283 = vector.shape_cast %282 : vector<1x1x128xf32> to vector<1x128xf32>
    %284 = vector.broadcast %283 : vector<1x128xf32> to vector<64x128xf32>
    %285 = arith.addf %281, %284 : vector<64x128xf32>
    %286 = vector.broadcast %11 : vector<64x1xf32> to vector<64x128xf32>
    %287 = arith.mulf %285, %286 : vector<64x128xf32>
    %c0_148 = arith.constant 0 : index
    %c0_149 = arith.constant 0 : index
    %288 = vector.load %arg21[%c0_148, %c0_149] : memref<128x128xbf16, #tpu.memory_space<vmem>>, vector<128x128xbf16>
    %289 = arith.truncf %287 : vector<64x128xf32> to vector<64x128xbf16>
    %cst_150 = arith.constant dense<0.000000e+00> : vector<64x128xf32>
    %290 = tpu.matmul %289, %288, %cst_150 {dimension_numbers = #tpu.dot_dimension_numbers<[1], [0], [0], [1], [0, 0, 1, 1], [], []>} : vector<64x128xbf16>, vector<128x128xbf16>, vector<64x128xf32> -> vector<64x128xf32>
    %c0_151 = arith.constant 0 : index
    %c0_152 = arith.constant 0 : index
    %291 = vector.load %arg22[%c0_151, %c0_152] : memref<128x128xbf16, #tpu.memory_space<vmem>>, vector<128x128xbf16>
    %292 = arith.truncf %287 : vector<64x128xf32> to vector<64x128xbf16>
    %cst_153 = arith.constant dense<0.000000e+00> : vector<64x128xf32>
    %293 = tpu.matmul %292, %291, %cst_153 {dimension_numbers = #tpu.dot_dimension_numbers<[1], [0], [0], [1], [0, 0, 1, 1], [], []>} : vector<64x128xbf16>, vector<128x128xbf16>, vector<64x128xf32> -> vector<64x128xf32>
    %c0_154 = arith.constant 0 : index
    %c0_155 = arith.constant 0 : index
    %294 = vector.load %arg23[%c0_154, %c0_155] : memref<2x128xf32, #tpu.memory_space<vmem>>, vector<2x128xf32>
    %295 = arith.truncf %290 : vector<64x128xf32> to vector<64x128xbf16>
    %cst_156 = arith.constant dense<0.000000e+00> : vector<192x128xf32>
    %296 = tpu.matmul %25, %295, %cst_156 {dimension_numbers = #tpu.dot_dimension_numbers<[1], [0], [0], [1], [0, 0, 1, 1], [], []>} : vector<192x64xbf16>, vector<64x128xbf16>, vector<192x128xf32> -> vector<192x128xf32>
    %297 = arith.truncf %293 : vector<64x128xf32> to vector<64x128xbf16>
    %cst_157 = arith.constant dense<0.000000e+00> : vector<192x128xf32>
    %298 = tpu.matmul %26, %297, %cst_157 {dimension_numbers = #tpu.dot_dimension_numbers<[1], [0], [0], [1], [0, 0, 1, 1], [], []>} : vector<192x64xbf16>, vector<64x128xbf16>, vector<192x128xf32> -> vector<192x128xf32>
    %299 = arith.addf %296, %298 : vector<192x128xf32>
    %300 = vector.extract_strided_slice %294 {offsets = [0, 0], sizes = [1, 128], strides = [1, 1]} : vector<2x128xf32> to vector<1x128xf32>
    %301 = vector.broadcast %33 : vector<192x1xf32> to vector<192x128xf32>
    %302 = vector.broadcast %300 : vector<1x128xf32> to vector<192x128xf32>
    %303 = arith.mulf %301, %302 : vector<192x128xf32>
    %304 = arith.addf %299, %303 : vector<192x128xf32>
    %305 = vector.extract_strided_slice %294 {offsets = [1, 0], sizes = [1, 128], strides = [1, 1]} : vector<2x128xf32> to vector<1x128xf32>
    %306 = vector.broadcast %9 : vector<192x1xf32> to vector<192x128xf32>
    %307 = vector.broadcast %305 : vector<1x128xf32> to vector<192x128xf32>
    %308 = arith.mulf %306, %307 : vector<192x128xf32>
    %309 = arith.addf %304, %308 : vector<192x128xf32>
    %c0_158 = arith.constant 0 : index
    %c0_159 = arith.constant 0 : index
    %310 = vector.load %arg24[%c0_158, %c0_159] : memref<1x128xf32, #tpu.memory_space<vmem>>, vector<1x128xf32>
    %311 = vector.broadcast %310 : vector<1x128xf32> to vector<192x128xf32>
    %312 = arith.addf %309, %311 : vector<192x128xf32>
    %313 = math.absf %312 : vector<192x128xf32>
    %cst_160 = arith.constant 0.000000e+00 : f32
    %314 = vector.broadcast %cst_160 : f32 to vector<192x128xf32>
    %315 = arith.subf %314, %313 : vector<192x128xf32>
    %316 = math.exp %315 : vector<192x128xf32>
    %cst_161 = arith.constant 1.000000e+00 : f32
    %317 = vector.broadcast %cst_161 : f32 to vector<192x128xf32>
    %318 = arith.addf %317, %316 : vector<192x128xf32>
    %319 = tpu.reciprocal %318 {approx = true} : vector<192x128xf32> -> vector<192x128xf32>
    %cst_162 = arith.constant 0.000000e+00 : f32
    %320 = vector.broadcast %cst_162 : f32 to vector<192x128xf32>
    %321 = arith.cmpf oge, %312, %320 : vector<192x128xf32>
    %322 = arith.mulf %316, %319 : vector<192x128xf32>
    %323 = arith.select %321, %319, %322 : vector<192x128xi1>, vector<192x128xf32>
    %324 = arith.mulf %312, %323 : vector<192x128xf32>
    %c0_163 = arith.constant 0 : index
    %c0_164 = arith.constant 0 : index
    %325 = vector.load %arg25[%c0_163, %c0_164] : memref<128x128xbf16, #tpu.memory_space<vmem>>, vector<128x128xbf16>
    %326 = arith.truncf %324 : vector<192x128xf32> to vector<192x128xbf16>
    %cst_165 = arith.constant dense<0.000000e+00> : vector<192x128xf32>
    %327 = tpu.matmul %326, %325, %cst_165 {dimension_numbers = #tpu.dot_dimension_numbers<[1], [0], [0], [1], [0, 0, 1, 1], [], []>} : vector<192x128xbf16>, vector<128x128xbf16>, vector<192x128xf32> -> vector<192x128xf32>
    %c0_166 = arith.constant 0 : index
    %c0_167 = arith.constant 0 : index
    %328 = vector.load %arg26[%c0_166, %c0_167] : memref<1x128xf32, #tpu.memory_space<vmem>>, vector<1x128xf32>
    %329 = vector.broadcast %328 : vector<1x128xf32> to vector<192x128xf32>
    %330 = arith.addf %327, %329 : vector<192x128xf32>
    %331 = math.absf %330 : vector<192x128xf32>
    %cst_168 = arith.constant 0.000000e+00 : f32
    %332 = vector.broadcast %cst_168 : f32 to vector<192x128xf32>
    %333 = arith.subf %332, %331 : vector<192x128xf32>
    %334 = math.exp %333 : vector<192x128xf32>
    %cst_169 = arith.constant 1.000000e+00 : f32
    %335 = vector.broadcast %cst_169 : f32 to vector<192x128xf32>
    %336 = arith.addf %335, %334 : vector<192x128xf32>
    %337 = tpu.reciprocal %336 {approx = true} : vector<192x128xf32> -> vector<192x128xf32>
    %cst_170 = arith.constant 0.000000e+00 : f32
    %338 = vector.broadcast %cst_170 : f32 to vector<192x128xf32>
    %339 = arith.cmpf oge, %330, %338 : vector<192x128xf32>
    %340 = arith.mulf %334, %337 : vector<192x128xf32>
    %341 = arith.select %339, %337, %340 : vector<192x128xi1>, vector<192x128xf32>
    %342 = arith.mulf %330, %341 : vector<192x128xf32>
    %c0_171 = arith.constant 0 : index
    %c0_172 = arith.constant 0 : index
    %343 = vector.load %arg27[%c0_171, %c0_172] : memref<1x128xf32, #tpu.memory_space<vmem>>, vector<1x128xf32>
    %344 = vector.broadcast %343 : vector<1x128xf32> to vector<192x128xf32>
    %345 = arith.mulf %342, %344 : vector<192x128xf32>
    %cst_173 = arith.constant dense<0.000000e+00> : vector<192xf32>
    %346 = vector.multi_reduction <add>, %345, %cst_173 [1] : vector<192x128xf32> to vector<192xf32>
    %347 = vector.shape_cast %346 : vector<192xf32> to vector<192x1xf32>
    %348 = math.tanh %347 : vector<192x1xf32>
    %cst_174 = arith.constant 3.000000e+00 : f32
    %349 = vector.broadcast %cst_174 : f32 to vector<192x1xf32>
    %350 = arith.mulf %348, %349 : vector<192x1xf32>
    %351 = vector.broadcast %350 : vector<192x1xf32> to vector<192x8xf32>
    %352 = arith.mulf %41, %351 : vector<192x8xf32>
    %353 = vector.broadcast %13 : vector<192x1xf32> to vector<192x8xf32>
    %354 = arith.mulf %352, %353 : vector<192x8xf32>
    %355 = arith.truncf %354 : vector<192x8xf32> to vector<192x8xbf16>
    %cst_175 = arith.constant dense<0.000000e+00> : vector<64x8xf32>
    %356 = tpu.matmul %25, %355, %cst_175 {dimension_numbers = #tpu.dot_dimension_numbers<[0], [0], [1], [1], [0, 1, 1, 1], [], []>} : vector<192x64xbf16>, vector<192x8xbf16>, vector<64x8xf32> -> vector<64x8xf32>
    %357 = arith.addf %7, %356 : vector<64x8xf32>
    %358 = vector.broadcast %11 : vector<64x1xf32> to vector<64x8xf32>
    %359 = arith.mulf %357, %358 : vector<64x8xf32>
    %c0_176 = arith.constant 0 : index
    %c0_177 = arith.constant 0 : index
    %c0_178 = arith.constant 0 : index
    %360 = vector.load %arg28[%c0_176, %c0_177, %c0_178] : memref<1x64x128xf32, #tpu.memory_space<vmem>>, vector<1x64x128xf32>
    %361 = vector.shape_cast %360 : vector<1x64x128xf32> to vector<64x128xf32>
    %362 = vector.shape_cast %287 : vector<64x128xf32> to vector<1x64x128xf32>
    tpu.vector_store %arg28[%c0_176, %c0_177, %c0_178], %362 {strides = array<i32>} : memref<1x64x128xf32, #tpu.memory_space<vmem>>, vector<1x64x128xf32>,
    %c0_179 = arith.constant 0 : index
    %c0_180 = arith.constant 0 : index
    %c0_181 = arith.constant 0 : index
    %363 = vector.load %arg29[%c0_179, %c0_180, %c0_181] : memref<1x64x8xf32, #tpu.memory_space<vmem>>, vector<1x64x8xf32>
    %364 = vector.shape_cast %363 : vector<1x64x8xf32> to vector<64x8xf32>
    %365 = vector.shape_cast %359 : vector<64x8xf32> to vector<1x64x8xf32>
    tpu.vector_store %arg29[%c0_179, %c0_180, %c0_181], %365 {strides = array<i32>} : memref<1x64x8xf32, #tpu.memory_space<vmem>>, vector<1x64x8xf32>,
    return
  }
  func.func @transform_0(%arg0: i32) -> (i32, i32, i32) {
    %c0_i32 = arith.constant 0 : i32
    %c0_i32_0 = arith.constant 0 : i32
    %c0_i32_1 = arith.constant 0 : i32
    return %arg0, %c0_i32, %c0_i32_0 : i32, i32, i32
  }
  func.func @transform_1(%arg0: i32) -> (i32, i32, i32) {
    %c0_i32 = arith.constant 0 : i32
    %c0_i32_0 = arith.constant 0 : i32
    %c0_i32_1 = arith.constant 0 : i32
    return %arg0, %c0_i32, %c0_i32_0 : i32, i32, i32
  }
  func.func @transform_2(%arg0: i32) -> (i32, i32, i32) {
    %c0_i32 = arith.constant 0 : i32
    %c0_i32_0 = arith.constant 0 : i32
    %c0_i32_1 = arith.constant 0 : i32
    return %arg0, %c0_i32, %c0_i32_0 : i32, i32, i32
  }
  func.func @transform_3(%arg0: i32) -> (i32, i32, i32) {
    %c0_i32 = arith.constant 0 : i32
    %c0_i32_0 = arith.constant 0 : i32
    %c0_i32_1 = arith.constant 0 : i32
    return %arg0, %c0_i32, %c0_i32_0 : i32, i32, i32
  }
  func.func @transform_4(%arg0: i32) -> (i32, i32, i32) {
    %c0_i32 = arith.constant 0 : i32
    %c0_i32_0 = arith.constant 0 : i32
    %c0_i32_1 = arith.constant 0 : i32
    return %arg0, %c0_i32, %c0_i32_0 : i32, i32, i32
  }
  func.func @transform_5(%arg0: i32) -> (i32, i32, i32) {
    %c0_i32 = arith.constant 0 : i32
    %c0_i32_0 = arith.constant 0 : i32
    %c0_i32_1 = arith.constant 0 : i32
    return %arg0, %c0_i32, %c0_i32_0 : i32, i32, i32
  }
  func.func @transform_6(%arg0: i32) -> (i32, i32, i32) {
    %c0_i32 = arith.constant 0 : i32
    %c0_i32_0 = arith.constant 0 : i32
    %c0_i32_1 = arith.constant 0 : i32
    return %arg0, %c0_i32, %c0_i32_0 : i32, i32, i32
  }
  func.func @transform_7(%arg0: i32) -> (i32, i32, i32) {
    %c0_i32 = arith.constant 0 : i32
    %c0_i32_0 = arith.constant 0 : i32
    %c0_i32_1 = arith.constant 0 : i32
    %c0_i32_2 = arith.constant 0 : i32
    return %c0_i32, %c0_i32_0, %c0_i32_1 : i32, i32, i32
  }
  func.func @transform_8(%arg0: i32) -> (i32, i32, i32) {
    %c0_i32 = arith.constant 0 : i32
    %c0_i32_0 = arith.constant 0 : i32
    %c0_i32_1 = arith.constant 0 : i32
    %c0_i32_2 = arith.constant 0 : i32
    return %c0_i32, %c0_i32_0, %c0_i32_1 : i32, i32, i32
  }
  func.func @transform_9(%arg0: i32) -> (i32, i32, i32) {
    %c0_i32 = arith.constant 0 : i32
    %c0_i32_0 = arith.constant 0 : i32
    %c0_i32_1 = arith.constant 0 : i32
    %c0_i32_2 = arith.constant 0 : i32
    return %c0_i32, %c0_i32_0, %c0_i32_1 : i32, i32, i32
  }
  func.func @transform_10(%arg0: i32) -> (i32, i32, i32) {
    %c0_i32 = arith.constant 0 : i32
    %c0_i32_0 = arith.constant 0 : i32
    %c0_i32_1 = arith.constant 0 : i32
    %c0_i32_2 = arith.constant 0 : i32
    return %c0_i32, %c0_i32_0, %c0_i32_1 : i32, i32, i32
  }
  func.func @transform_11(%arg0: i32) -> (i32, i32, i32) {
    %c0_i32 = arith.constant 0 : i32
    %c0_i32_0 = arith.constant 0 : i32
    %c0_i32_1 = arith.constant 0 : i32
    %c0_i32_2 = arith.constant 0 : i32
    return %c0_i32, %c0_i32_0, %c0_i32_1 : i32, i32, i32
  }
  func.func @transform_12(%arg0: i32) -> (i32, i32, i32) {
    %c0_i32 = arith.constant 0 : i32
    %c0_i32_0 = arith.constant 0 : i32
    %c0_i32_1 = arith.constant 0 : i32
    %c0_i32_2 = arith.constant 0 : i32
    return %c0_i32, %c0_i32_0, %c0_i32_1 : i32, i32, i32
  }
  func.func @transform_13(%arg0: i32) -> (i32, i32, i32) {
    %c0_i32 = arith.constant 0 : i32
    %c0_i32_0 = arith.constant 0 : i32
    %c0_i32_1 = arith.constant 0 : i32
    %c0_i32_2 = arith.constant 0 : i32
    return %c0_i32, %c0_i32_0, %c0_i32_1 : i32, i32, i32
  }
  func.func @transform_14(%arg0: i32) -> (i32, i32, i32) {
    %c0_i32 = arith.constant 0 : i32
    %c0_i32_0 = arith.constant 0 : i32
    %c0_i32_1 = arith.constant 0 : i32
    %c0_i32_2 = arith.constant 0 : i32
    return %c0_i32, %c0_i32_0, %c0_i32_1 : i32, i32, i32
  }
  func.func @transform_15(%arg0: i32) -> (i32, i32, i32) {
    %c0_i32 = arith.constant 0 : i32
    %c0_i32_0 = arith.constant 0 : i32
    %c0_i32_1 = arith.constant 0 : i32
    %c0_i32_2 = arith.constant 0 : i32
    return %c0_i32, %c0_i32_0, %c0_i32_1 : i32, i32, i32
  }
  func.func @transform_16(%arg0: i32) -> (i32, i32, i32) {
    %c0_i32 = arith.constant 0 : i32
    %c0_i32_0 = arith.constant 0 : i32
    %c0_i32_1 = arith.constant 0 : i32
    %c0_i32_2 = arith.constant 0 : i32
    return %c0_i32, %c0_i32_0, %c0_i32_1 : i32, i32, i32
  }
  func.func @transform_17(%arg0: i32) -> (i32, i32, i32) {
    %c0_i32 = arith.constant 0 : i32
    %c0_i32_0 = arith.constant 0 : i32
    %c0_i32_1 = arith.constant 0 : i32
    %c0_i32_2 = arith.constant 0 : i32
    return %c0_i32, %c0_i32_0, %c0_i32_1 : i32, i32, i32
  }
  func.func @transform_18(%arg0: i32) -> (i32, i32, i32) {
    %c0_i32 = arith.constant 0 : i32
    %c0_i32_0 = arith.constant 0 : i32
    %c0_i32_1 = arith.constant 0 : i32
    %c0_i32_2 = arith.constant 0 : i32
    return %c0_i32, %c0_i32_0, %c0_i32_1 : i32, i32, i32
  }
  func.func @transform_19(%arg0: i32) -> (i32, i32, i32) {
    %c0_i32 = arith.constant 0 : i32
    %c0_i32_0 = arith.constant 0 : i32
    %c0_i32_1 = arith.constant 0 : i32
    %c0_i32_2 = arith.constant 0 : i32
    return %c0_i32, %c0_i32_0, %c0_i32_1 : i32, i32, i32
  }
  func.func @transform_20(%arg0: i32) -> (i32, i32) {
    %c0_i32 = arith.constant 0 : i32
    %c0_i32_0 = arith.constant 0 : i32
    %c0_i32_1 = arith.constant 0 : i32
    return %c0_i32, %c0_i32_0 : i32, i32
  }
  func.func @transform_21(%arg0: i32) -> (i32, i32) {
    %c0_i32 = arith.constant 0 : i32
    %c0_i32_0 = arith.constant 0 : i32
    %c0_i32_1 = arith.constant 0 : i32
    return %c0_i32, %c0_i32_0 : i32, i32
  }
  func.func @transform_22(%arg0: i32) -> (i32, i32) {
    %c0_i32 = arith.constant 0 : i32
    %c0_i32_0 = arith.constant 0 : i32
    %c0_i32_1 = arith.constant 0 : i32
    return %c0_i32, %c0_i32_0 : i32, i32
  }
  func.func @transform_23(%arg0: i32) -> (i32, i32) {
    %c0_i32 = arith.constant 0 : i32
    %c0_i32_0 = arith.constant 0 : i32
    %c0_i32_1 = arith.constant 0 : i32
    return %c0_i32, %c0_i32_0 : i32, i32
  }
  func.func @transform_24(%arg0: i32) -> (i32, i32) {
    %c0_i32 = arith.constant 0 : i32
    %c0_i32_0 = arith.constant 0 : i32
    %c0_i32_1 = arith.constant 0 : i32
    return %c0_i32, %c0_i32_0 : i32, i32
  }
  func.func @transform_25(%arg0: i32) -> (i32, i32) {
    %c0_i32 = arith.constant 0 : i32
    %c0_i32_0 = arith.constant 0 : i32
    %c0_i32_1 = arith.constant 0 : i32
    return %c0_i32, %c0_i32_0 : i32, i32
  }
  func.func @transform_26(%arg0: i32) -> (i32, i32) {
    %c0_i32 = arith.constant 0 : i32
    %c0_i32_0 = arith.constant 0 : i32
    %c0_i32_1 = arith.constant 0 : i32
    return %c0_i32, %c0_i32_0 : i32, i32
  }
  func.func @transform_27(%arg0: i32) -> (i32, i32, i32) {
    %c0_i32 = arith.constant 0 : i32
    %c0_i32_0 = arith.constant 0 : i32
    %c0_i32_1 = arith.constant 0 : i32
    return %arg0, %c0_i32, %c0_i32_0 : i32, i32, i32
  }
  func.func @transform_28(%arg0: i32) -> (i32, i32, i32) {
    %c0_i32 = arith.constant 0 : i32
    %c0_i32_0 = arith.constant 0 : i32
    %c0_i32_1 = arith.constant 0 : i32
    return %arg0, %c0_i32, %c0_i32_0 : i32, i32, i32
  }
}

</mosaic_0001>

<bundles_post_ra>
// kernel: tpu_custom_call.1
= control target key start
LH: loop header
LB: loop body
LE: loop exit
PB: predicated region body
PF: predicated region fallthrough
CT: control target
= control target key end

     0   :  { %s14084_s0 = inlined_call_operand.vmem [shape: s32[2,192,1], index: 0, kind: input, shape index: {}]   ;;  %s14085_s1 = inlined_call_operand.vmem [shape: s32[2,192,1], index: 1, kind: input, shape index: {}]   ;;  %s14086_s2 = inlined_call_operand.vmem [shape: f32[2,64,128], index: 2, kind: input, shape index: {}]   ;;  %s14087_s3 = inlined_call_operand.vmem [shape: f32[2,64,8], index: 3, kind: input, shape index: {}]   ;;  %s14088_s4 = inlined_call_operand.vmem [shape: f32[2,192,1], index: 4, kind: input, shape index: {}]   ;;  %s14089_s5 = inlined_call_operand.vmem [shape: f32[2,64,1], index: 5, kind: input, shape index: {}]   ;;  %s14090_s6 = inlined_call_operand.vmem [shape: f32[2,192,1], index: 6, kind: input, shape index: {}]   ;;  %s14091_s7 = inlined_call_operand.vmem [shape: bf16[2,128,128], index: 7, kind: input, shape index: {}]   ;;  %s14092_s8 = inlined_call_operand.vmem [shape: bf16[2,128,128], index: 8, kind: input, shape index: {}]   ;;  %s14093_s9 = inlined_call_operand.vmem [shape: f32[2,2,128], index: 9, kind: input, shape index: {}]   ;;  %s14094_s10 = inlined_call_operand.vmem [shape: f32[2,1,128], index: 10, kind: input, shape index: {}]   ;;  %s14095_s11 = inlined_call_operand.vmem [shape: bf16[2,128,128], index: 11, kind: input, shape index: {}]   ;;  %s14096_s12 = inlined_call_operand.vmem [shape: f32[2,1,128], index: 12, kind: input, shape index: {}]   ;;  %s14097_s13 = inlined_call_operand.vmem [shape: f32[2,1,128], index: 13, kind: input, shape index: {}]   ;;  %s14098_s14 = inlined_call_operand.vmem [shape: f32[2,1,1], index: 14, kind: input, shape index: {}]   ;;  %s14099_s15 = inlined_call_operand.vmem [shape: bf16[2,128,128], index: 15, kind: input, shape index: {}]   ;;  %s14100_s16 = inlined_call_operand.vmem [shape: bf16[2,128,128], index: 16, kind: input, shape index: {}]   ;;  %s14101_s17 = inlined_call_operand.vmem [shape: f32[2,1,128], index: 17, kind: input, shape index: {}]   ;;  %s14102_s18 = inlined_call_operand.vmem [shape: bf16[2,128,128], index: 18, kind: input, shape index: {}]   ;;  %s14103_s19 = inlined_call_operand.vmem [shape: f32[2,1,128], index: 19, kind: input, shape index: {}]   ;;  %s14104_s20 = inlined_call_operand.vmem [shape: bf16[128,128], index: 20, kind: input, shape index: {}]   ;;  %s14105_s21 = inlined_call_operand.vmem [shape: bf16[128,128], index: 21, kind: input, shape index: {}]   ;;  %s14106_s22 = inlined_call_operand.vmem [shape: f32[2,128], index: 22, kind: input, shape index: {}]   ;;  %s14107_s23 = inlined_call_operand.vmem [shape: f32[1,128], index: 23, kind: input, shape index: {}]   ;;  %s14108_s24 = inlined_call_operand.vmem [shape: bf16[128,128], index: 24, kind: input, shape index: {}]   ;;  %s14109_s25 = inlined_call_operand.vmem [shape: f32[1,128], index: 25, kind: input, shape index: {}]   ;;  %s14110_s26 = inlined_call_operand.vmem [shape: f32[1,128], index: 26, kind: input, shape index: {}]   ;;  %s14111_s27 = inlined_call_operand.hbm [shape: f32[2,64,128], index: 27, kind: output, shape index: {0}]   ;;  %s14112_s28 = inlined_call_operand.vmem [shape: f32[2,64,8], index: 28, kind: output, shape index: {1}]  }
   0x1   :  { %14346 = sst [smem:[#allocation134_spill]] %s14084_s0 }
   0x2   :  { %14347 = sst [smem:[#allocation135_spill]] %s14085_s1 }
   0x3   :  { %14348 = sst [smem:[#allocation136_spill]] %s14086_s2 }
   0x4   :  { %14349 = sst [smem:[#allocation137_spill]] %s14087_s3 }
   0x5   :  { %14350 = sst [smem:[#allocation138_spill]] %s14088_s4 }
   0x6   :  { %14351 = sst [smem:[#allocation139_spill]] %s14089_s5 }
   0x7   :  { %14352 = sst [smem:[#allocation140_spill]] %s14090_s6 }
   0x8   :  { %14353 = sst [smem:[#allocation141_spill]] %s14091_s7 }
   0x9   :  { %14354 = sst [smem:[#allocation142_spill]] %s14092_s8 }
   0xa   :  { %14355 = sst [smem:[#allocation143_spill]] %s14093_s9 }
   0xb   :  { %14356 = sst [smem:[#allocation144_spill]] %s14094_s10 }
   0xc   :  { %14357 = sst [smem:[#allocation145_spill]] %s14095_s11 }
   0xd   :  { %14358 = sst [smem:[#allocation146_spill]] %s14096_s12 }
   0xe   :  { %14359 = sst [smem:[#allocation147_spill]] %s14109_s25 }
   0xf   :  { %14360 = sst [smem:[#allocation148_spill]] %s14110_s26 }
  0x10   :  { %14361 = sst [smem:[#allocation149_spill]] %s14111_s27 }
  0x11   :  { %14362 = sst [smem:[#allocation150_spill]] %s14112_s28 }
  0x12   :  { %34 = vsyncpa [#allocation3], 0 }
  0x13   :  { %36 = vsyncpa [#allocation3 + $0x1], 0  ;;  %s10253_s8 = smov 0   ;;  %s10255_s5 = smov 0  }
  0x14   :  { %s10257_s9 = smov 0   ;;  %s10259_s30 = smov 0  }
  0x15 LB: > { %14363 = sst [smem:[#allocation5_spill]] %s10088_s8  ;;  %s10274_s3 = sadd.s32 4294967295, %s10100_s30   ;;  %s10100_s30 = sphi %s10259_s30, %s14760_s30   ;;  %s10096_s9 = sphi %s10257_s9, %s14762_s9   ;;  %s10092_s5 = sphi %s10255_s5, %s14764_s5   ;;  %s10088_s8 = sphi %s10253_s8, %s14763_s8  }
  0x16   : > { %14364 = sst [smem:[#allocation6_spill]] %s10096_s9  ;;  %s8063_s6 = sadd.s32 4294967294, %s10100_s30  }
  0x17   : > { %14365 = sst [smem:[#allocation7_spill]] %s10100_s30  ;;  %s10278_s10 = sadd.s32 1, %s10100_s30  }
  0x18   : > { %14366 = sst [smem:[#allocation8_spill]] %s10274_s3  ;;  %s651_s0 = sadd.s32 1, %s10096_s9 }
  0x19   : > { %14367 = sst [smem:[#allocation9_spill]] %s10278_s10  ;;  %s648_s11 = ssub.s32 %s10100_s30, %s10278_s10 }
  0x1a   : > { %p661_p0 = scmp.ne.s32.totalorder %s10096_s9, %s10092_s5  ;;  %p649_p1 = scmp.eq.s32.totalorder %s648_s11, 0 }
  0x1b   : > { %p662_p2 = scmp.eq.s32.totalorder %s10274_s3, 1  ;;  %p667_p3 = scmp.ne.s32.totalorder %s10092_s5, %s10088_s8 }
  0x1c   : > { %p668_p4 = scmp.eq.s32.totalorder %s8063_s6, 1  ;;  %p8066_p7 = scmp.ge.s32.totalorder %s10100_s30, 1 }
  0x1d   : > { %s10289_s29 = scalar_select %p649_p1, %s10096_s9, %s651_s0  }
  0x1e   : > { %p10291_p5 = por %p662_p2, %p661_p0  ;;  %p10295_p6 = por %p668_p4, %p667_p3 }
  0x1f   : > { %14368 = sst [smem:[#allocation10_spill]] %s10289_s29  ;;  %p828_p8 = scmp.lt.s32.totalorder %s10100_s30, 3 }
  0x20   : > { %s14369_s2 = scalar_select %p10291_p5, 1, 0 }
  0x21   : > { %s14371_s7 = scalar_select %p10295_p6, 1, 0 }
  0x22   : > { %14370 = sst [smem:[#allocation11_spill]] %s14369_s2  ;;  %p829_p9 = pnand %p8066_p7, %p828_p8 }
  0x23   : > { %14372 = sst [smem:[#allocation12_spill]] %s14371_s7 }
  0x24   : > { %832 = sbr.rel (%p829_p9) target bundleno = 4382 (0x111e), region = 128 }
  0x29   : > { %s14373_s4 = sld [smem:[#allocation141_spill]]  ;;  %p937_p10 = scmp.lt.s32.totalorder %s10274_s3, 1  ;;  %v10102_v2 = vmov 0   ;;  %vm1404_vm8 = vcmask 523264  }
  0x2a   : > { %s14374_s11 = sld [smem:[#allocation142_spill]]  ;;  %8994 = vset.pattern.permute.xlu2 %v10102_v2  ;;  %8993 = vset.pattern.permute.xlu1 %v10102_v2 }
  0x2b   : > { %s10315_s12 = scalar_select %p937_p10, %s10274_s3, 1  ;;  %8992 = vset.pattern.permute.xlu0 %v10102_v2 }
  0x2c   : > { %s14375_s8 = sld [smem:[#allocation135_spill]] }
  0x2d   : > { %s10318_s1 = smul.u32 192, %s10315_s12  ;;  %s14376_s28 = sld [smem:[#allocation134_spill]] }
  0x2e   : > { %s10363_s27 = sshll.u32 %s10315_s12, 6  ;;  %s14378_s12 = sld [smem:[#allocation136_spill]] }
  0x2f   : > { %v8775_v0 = vld [vmem:[%s14373_s4 + $0x38] sm:$0xff]  ;;  %v8774_v3 = vld [vmem:[%s14373_s4 + $0x30] sm:$0xff]  ;;  %v8773_v5 = vld [vmem:[%s14373_s4 + $0x28] sm:$0xff]  ;;  %14377 = sst [smem:[#allocation13_spill]] %s10363_s27 }
  0x30   : > { %v8783_v1 = vld [vmem:[%s14374_s11 + $0x38] sm:$0xff]  ;;  %2059 = vmatpush.bf16.msra.mxu1 %v8775_v0  ;;  %v8782_v4 = vld [vmem:[%s14374_s11 + $0x30] sm:$0xff]  ;;  %v8781_v6 = vld [vmem:[%s14374_s11 + $0x28] sm:$0xff]  ;;  %s14383_s9 = sld [smem:[#allocation137_spill]] }
  0x31   : > { %2152 = vmatpush.bf16.msra.mxu2 %v8783_v1  ;;  %v8772_v10 = vld [vmem:[%s14373_s4 + $0x20] sm:$0xff]  ;;  %v8771_v15 = vld [vmem:[%s14373_s4 + $0x18] sm:$0xff]  ;;  %v8770_v17 = vld [vmem:[%s14373_s4 + $0x10] sm:$0xff]  ;;  %s14432_s3 = sld [smem:[#allocation145_spill]] }
  0x32   : > { %s10324_s30 = scalar_lea.vmem %s14375_s8, %s10318_s1  ;;  %v8780_v11 = vld [vmem:[%s14374_s11 + $0x20] sm:$0xff]  ;;  %v8779_v16 = vld [vmem:[%s14374_s11 + $0x18] sm:$0xff]  ;;  %v8778_v18 = vld [vmem:[%s14374_s11 + $0x10] sm:$0xff]  ;;  %s14388_s8 = sld [smem:[#allocation138_spill]] }
  0x33   : > { %s10330_s10 = scalar_lea.vmem %s14376_s28, %s10318_s1  ;;  %v1002_v7 = vld [vmem:[%s10324_s30] sm:$0xff]  ;;  %v1003_v12 = vld [vmem:[%s10324_s30 + $0x8] sm:$0xff]  ;;  %v1005_v19 = vld [vmem:[%s10324_s30 + $0x18] sm:$0xff]  ;;  %s14438_s2 = sld [smem:[#allocation143_spill]] }
  0x34   : > { %2060 = vmatpush.bf16.msra.mxu1 %v8774_v3  ;;  %v980_v8 = vld [vmem:[%s10330_s10 + $0x10] sm:$0xff]  ;;  %v978_v9 = vld [vmem:[%s10330_s10] sm:$0xff]  ;;  %1221 = vperm.xlu1 %8993, %v1002_v7   ;;  %v981_v13 = vld [vmem:[%s10330_s10 + $0x18] sm:$0xff]  ;;  %s10378_s7 = scalar_lea.vmem %s14378_s12, %s10363_s27 }
  0x35   : > { %2153 = vmatpush.bf16.msra.mxu2 %v8782_v4  ;;  %1107 = vperm.xlu2 %8994, %v980_v8   ;;  %v979_v14 = vld [vmem:[%s10330_s10 + $0x8] sm:$0xff]  ;;  %v982_v20 = vld [vmem:[%s10330_s10 + $0x20] sm:$0xff]  ;;  %v1004_v21 = vld [vmem:[%s10324_s30 + $0x10] sm:$0xff]  ;;  %v1098_v8 = vlaneseq }
  0x36   : > { %1101 = vperm.xlu0 %8992, %v978_v9   ;;  %v8769_v22 = vld [vmem:[%s14373_s4 + $0x8] sm:$0xff]  ;;  %v8768_v24 = vld [vmem:[%s14373_s4] sm:$0xff]  ;;  %v985_v32 = vld [vmem:[%s10330_s10 + $0x38] sm:$0xff]  ;;  %s10437_s29 = scalar_lea.vmem %s14383_s9, %s10363_s27 }
  0x37   : > { %v8777_v23 = vld [vmem:[%s14374_s11 + $0x8] sm:$0xff]  ;;  %v8776_v25 = vld [vmem:[%s14374_s11] sm:$0xff]  ;;  %v1008_v33 = vld [vmem:[%s10324_s30 + $0x30] sm:$0xff]  ;;  %14384 = sst [smem:[#allocation18_spill]] %s10437_s29 }
  0x38   : > { %2061 = vmatpush.bf16.msra.mxu1 %v8773_v5  ;;  %v1026_v26 = vld [vmem:[%s10378_s7] sm:$0xff]  ;;  %v1027_v27 = vld [vmem:[%s10378_s7 + $0x8] sm:$0xff]  ;;  %v984_v34 = vld [vmem:[%s10330_s10 + $0x30] sm:$0xff]  ;;  %s10491_s6 = scalar_lea.vmem %s14388_s8, %s10318_s1  ;;  %s14495_s8 = sld [smem:[#allocation140_spill]] }
  0x39   : > { %2154 = vmatpush.bf16.msra.mxu2 %v8781_v6  ;;  %v1006_v28 = vld [vmem:[%s10324_s30 + $0x20] sm:$0xff]  ;;  %v1007_v29 = vld [vmem:[%s10324_s30 + $0x28] sm:$0xff]  ;;  %v10390_v30 = vpack.c.bf16 %v1027_v27, %v1026_v26  ;;  %v1028_v35 = vld [vmem:[%s10378_s7 + $0x10] sm:$0xff] }
  0x3a   : > { %v983_v31 = vld [vmem:[%s10330_s10 + $0x28] sm:$0xff]  ;;  %v1029_v36 = vld [vmem:[%s10378_s7 + $0x18] sm:$0xff]  ;;  %v986_v37 = vld [vmem:[%s10330_s10 + $0x40] sm:$0xff] }
  0x3b   : > { %14379 = vst [vmem:[#allocation14_spill] sm:$0xff] %v10390_v30  ;;  %v987_v38 = vld [vmem:[%s10330_s10 + $0x48] sm:$0xff]  ;;  %v10402_v39 = vpack.c.bf16 %v1029_v36, %v1028_v35  ;;  %v1009_v40 = vld [vmem:[%s10324_s30 + $0x38] sm:$0xff]  ;;  %v988_v42 = vld [vmem:[%s10330_s10 + $0x50] sm:$0xff] }
  0x3c   : > { %2062 = vmatpush.bf16.msra.mxu1 %v8772_v10  ;;  %1224 = vperm.xlu1 %8993, %v1003_v12   ;;  %v1011_v41 = vld [vmem:[%s10324_s30 + $0x48] sm:$0xff]  ;;  %v1010_v43 = vld [vmem:[%s10324_s30 + $0x40] sm:$0xff]  ;;  %v1012_v46 = vld [vmem:[%s10324_s30 + $0x50] sm:$0xff] }
  0x3d   : > { %2155 = vmatpush.bf16.msra.mxu2 %v8780_v11  ;;  %1110 = vperm.xlu2 %8994, %v981_v13   ;;  %14380 = vst [vmem:[#allocation15_spill] sm:$0xff] %v10402_v39  ;;  %v1030_v44 = vld [vmem:[%s10378_s7 + $0x20] sm:$0xff]  ;;  %v1031_v45 = vld [vmem:[%s10378_s7 + $0x28] sm:$0xff]  ;;  %v1013_v47 = vld [vmem:[%s10324_s30 + $0x58] sm:$0xff] }
  0x3e   : > { %1104 = vperm.xlu0 %8992, %v979_v14   ;;  %v10414_v48 = vpack.c.bf16 %v1031_v45, %v1030_v44  ;;  %v989_v49 = vld [vmem:[%s10330_s10 + $0x58] sm:$0xff]  ;;  %v991_v50 = vld [vmem:[%s10330_s10 + $0x68] sm:$0xff]  ;;  %v1014_v51 = vld [vmem:[%s10324_s30 + $0x60] sm:$0xff]  ;;  %v10451_v14 = vand.u32 127, %v1098_v8 }
  0x3f   : > { %v990_v52 = vld [vmem:[%s10330_s10 + $0x60] sm:$0xff]  ;;  %v1032_v53 = vld [vmem:[%s10378_s7 + $0x30] sm:$0xff]  ;;  %v1033_v54 = vld [vmem:[%s10378_s7 + $0x38] sm:$0xff] }
  0x40   : > { %2063 = vmatpush.bf16.msra.mxu1 %v8771_v15  ;;  %14381 = vst [vmem:[#allocation16_spill] sm:$0xff] %v10414_v48  ;;  %v992_v55 = vld [vmem:[%s10330_s10 + $0x70] sm:$0xff]  ;;  %v993_v56 = vld [vmem:[%s10330_s10 + $0x78] sm:$0xff]  ;;  %v10426_v57 = vpack.c.bf16 %v1033_v54, %v1032_v53  ;;  %v1015_v58 = vld [vmem:[%s10324_s30 + $0x68] sm:$0xff] }
  0x41   : > { %2156 = vmatpush.bf16.msra.mxu2 %v8779_v16  ;;  %v1017_v59 = vld [vmem:[%s10324_s30 + $0x78] sm:$0xff]  ;;  %v994_v60 = vld [vmem:[%s10330_s10 + $0x80] sm:$0xff]  ;;  %v1016_v61 = vld [vmem:[%s10324_s30 + $0x70] sm:$0xff] }
  0x42   : > { %14382 = vst [vmem:[#allocation17_spill] sm:$0xff] %v10426_v57  ;;  %v1040_v62 = vld [vmem:[%s10437_s29 + $0x30] sm:$0xff]  ;;  %v1041_v63 = vld [vmem:[%s10437_s29 + $0x38] sm:$0xff]  ;;  %v1038_v1 = vld [vmem:[%s10437_s29 + $0x20] sm:$0xff] }
  0x43   : > { %v1403_v0 = vpack.c.bf16 %v1041_v63, %v1040_v62  ;;  %v1039_v2 = vld [vmem:[%s10437_s29 + $0x28] sm:$0xff]  ;;  %v1018_v3 = vld [vmem:[%s10324_s30 + $0x80] sm:$0xff]  ;;  %v1036_v7 = vld [vmem:[%s10437_s29 + $0x10] sm:$0xff] }
  0x44   : > { %2064 = vmatpush.bf16.msra.mxu1 %v8770_v17  ;;  %1230 = vperm.xlu1 %8993, %v1005_v19   ;;  %v1019_v4 = vld [vmem:[%s10324_s30 + $0x88] sm:$0xff]  ;;  %v1402_v5 = vpack.c.bf16 %v1039_v2, %v1038_v1  ;;  %v1037_v9 = vld [vmem:[%s10437_s29 + $0x18] sm:$0xff]  ;;  %v1034_v12 = vld [vmem:[%s10437_s29] sm:$0xff]  ;;  %v10103_v19 = vmov 0.0  }
  0x45   : > { %2157 = vmatpush.bf16.msra.mxu2 %v8778_v18  ;;  %1113 = vperm.xlu2 %8994, %v982_v20   ;;  %v995_v6 = vld [vmem:[%s10330_s10 + $0x88] sm:$0xff]  ;;  %v1401_v11 = vpack.c.bf16 %v1037_v9, %v1036_v7  ;;  %v997_v15 = vld [vmem:[%s10330_s10 + $0x98] sm:$0xff]  ;;  %v1020_v16 = vld [vmem:[%s10324_s30 + $0x90] sm:$0xff] }
  0x46   : > { %1227 = vperm.xlu0 %8992, %v1004_v21   ;;  %1445 = vmatpush.bf16.msra.mxu0 %v1403_v0  ;;  %v1035_v13 = vld [vmem:[%s10437_s29 + $0x8] sm:$0xff]  ;;  %v996_v18 = vld [vmem:[%s10330_s10 + $0x90] sm:$0xff]  ;;  %v1021_v27 = vld [vmem:[%s10324_s30 + $0x98] sm:$0xff]  ;;  %s14690_s29 = sld [smem:[#allocation148_spill]] }
  0x47   : > { %v1400_v17 = vpack.c.bf16 %v1035_v13, %v1034_v12  ;;  %v1024_v36 = vld [vmem:[%s10324_s30 + $0xb0] sm:$0xff]  ;;  %v1046_v63 = vld [vmem:[%s10491_s6 + $0x20] sm:$0xff]  ;;  %v1043_v0 = vld [vmem:[%s10491_s6 + $0x8] sm:$0xff] }
  0x48   : > { %2065 = vmatpush.bf16.msra.mxu1 %v8769_v22  ;;  %v1047_v2 = vld [vmem:[%s10491_s6 + $0x28] sm:$0xff]  ;;  %v1050_v13 = vld [vmem:[%s10491_s6 + $0x40] sm:$0xff] }
  0x49   : > { %2158 = vmatpush.bf16.msra.mxu2 %v8777_v23 }
  0x4a   : > { %1446 = vmatpush.bf16.msra.mxu0 %v1402_v5 }
  0x4c   : > { %2066 = vmatpush.bf16.msra.mxu1 %v8768_v24  ;;  %1233 = vperm.xlu1 %8993, %v1006_v28   ;;  %v998_v24 = vld [vmem:[%s10330_s10 + $0xa0] sm:$0xff] }
  0x4d   : > { %2159 = vmatpush.bf16.msra.mxu2 %v8776_v25  ;;  %1236 = vperm.xlu2 %8994, %v1007_v29   ;;  %v999_v25 = vld [vmem:[%s10330_s10 + $0xa8] sm:$0xff] }
  0x4e   : > { %1116 = vperm.xlu0 %8992, %v983_v31   ;;  %1447 = vmatpush.bf16.msra.mxu0 %v1401_v11  ;;  %v1023_v29 = vld [vmem:[%s10324_s30 + $0xa8] sm:$0xff]  ;;  %v1000_v31 = vld [vmem:[%s10330_s10 + $0xb0] sm:$0xff] }
  0x4f   : > { %2067 = vmatmul.bf16.vlgmr.msra.gmra.mxu1 %v10390_v30 }
  0x50   : > { %2160 = vmatmul.bf16.vlgmr.msra.gmra.mxu2 %v10390_v30 }
  0x52   : > { %1448 = vmatpush.bf16.msra.mxu0 %v1400_v17  ;;  %v1048_v17 = vld [vmem:[%s10491_s6 + $0x30] sm:$0xff] }
  0x54   : > { %1122 = vperm.xlu1 %8993, %v985_v32   ;;  %v1022_v32 = vld [vmem:[%s10324_s30 + $0xa0] sm:$0xff] }
  0x55   : > { %1239 = vperm.xlu2 %8994, %v1008_v33  }
  0x56   : > { %1119 = vperm.xlu0 %8992, %v984_v34  }
  0x5c   : > { %1125 = vperm.xlu1 %8993, %v986_v37   ;;  %v1025_v37 = vld [vmem:[%s10324_s30 + $0xb8] sm:$0xff]  ;;  %s14479_s30 = sld [smem:[#allocation146_spill]] }
  0x5d   : > { %1128 = vperm.xlu2 %8994, %v987_v38   ;;  %v1001_v38 = vld [vmem:[%s10330_s10 + $0xb8] sm:$0xff]  ;;  %s14443_s10 = sld [smem:[#allocation144_spill]] }
  0x5e   : > { %1242 = vperm.xlu0 %8992, %v1009_v40  }
  0x5f   : > { %2072 = vmatmul.bf16.gmra.mxu1 %v10402_v39 }
  0x60   : > { %2165 = vmatmul.bf16.gmra.mxu2 %v10402_v39 }
  0x62   : > { %s14480_s0 = smov %s14479_s30 }
  0x64   : > { %1248 = vperm.xlu1 %8993, %v1011_v41  }
  0x65   : > { %1131 = vperm.xlu2 %8994, %v988_v42  }
  0x66   : > { %1245 = vperm.xlu0 %8992, %v1010_v43  }
  0x6c   : > { %1251 = vperm.xlu1 %8993, %v1012_v46  }
  0x6d   : > { %1254 = vperm.xlu2 %8994, %v1013_v47  }
  0x6e   : > { %1134 = vperm.xlu0 %8992, %v989_v49   ;;  %v1044_v49 = vld [vmem:[%s10491_s6 + $0x10] sm:$0xff] }
  0x6f   : > { %2077 = vmatmul.bf16.gmra.mxu1 %v10414_v48 }
  0x70   : > { %2170 = vmatmul.bf16.gmra.mxu2 %v10414_v48 }
  0x74   : > { %1140 = vperm.xlu1 %8993, %v991_v50   ;;  %v1042_v50 = vld [vmem:[%s10491_s6] sm:$0xff] }
  0x75   : > { %1257 = vperm.xlu2 %8994, %v1014_v51  }
  0x76   : > { %1137 = vperm.xlu0 %8992, %v990_v52  }
  0x7c   : > { %1143 = vperm.xlu1 %8993, %v992_v55   ;;  %v1045_v55 = vld [vmem:[%s10491_s6 + $0x18] sm:$0xff] }
  0x7d   : > { %1146 = vperm.xlu2 %8994, %v993_v56  }
  0x7e   : > { %1260 = vperm.xlu0 %8992, %v1015_v58  }
  0x7f   : > { %2082 = vmatmul.bf16.gmra.mxu1 %v10426_v57 }
  0x80   : > { %2175 = vmatmul.bf16.gmra.mxu2 %v10426_v57 }
  0x84   : > { %1266 = vperm.xlu1 %8993, %v1017_v59  }
  0x85   : > { %1149 = vperm.xlu2 %8994, %v994_v60  }
  0x86   : > { %1263 = vperm.xlu0 %8992, %v1016_v61  }
  0x8c   : > { %1269 = vperm.xlu1 %8993, %v1018_v3  }
  0x8d   : > { %1272 = vperm.xlu2 %8994, %v1019_v4  }
  0x8e   : > { %1152 = vperm.xlu0 %8992, %v995_v6  }
  0x8f   : > { %v1108_v10 = vpop.permute.xlu2 %1107 }
  0x90   : > { %vm1174_vm0 = vcmp.eq.s32.totalorder %v1108_v10, %v10451_v14 }
  0x91   : > { %v10458_v20 = vsel %vm1174_vm0, 1.0, %v10103_v19 }
  0x94   : > { %1158 = vperm.xlu1 %8993, %v997_v15   ;;  %v1049_v15 = vld [vmem:[%s10491_s6 + $0x38] sm:$0xff] }
  0x95   : > { %1275 = vperm.xlu2 %8994, %v1020_v16  }
  0x96   : > { %1155 = vperm.xlu0 %8992, %v996_v18  }
  0x97   : > { %v1111_v21 = vpop.permute.xlu2 %1110 }
  0x98   : > { %vm1175_vm1 = vcmp.eq.s32.totalorder %v1111_v21, %v10451_v14 }
  0x99   : > { %v10462_v22 = vsel %vm1175_vm1, 1.0, %v10103_v19  ;;  %vm10470_vm2 = vmpackc.low %vm1175_vm1, %vm1174_vm0 }
  0x9a   : > { %v10466_v23 = vpack.c.bf16 %v10462_v22, %v10458_v20 }
  0x9c   : > { %14385 = vst [vmem:[#allocation19_spill] sm:$0xff] %v10466_v23  ;;  %1161 = vperm.xlu1 %8993, %v998_v24  }
  0x9d   : > { %1164 = vperm.xlu2 %8994, %v999_v25   ;;  %v1053_v25 = vld [vmem:[%s10491_s6 + $0x58] sm:$0xff] }
  0x9e   : > { %1278 = vperm.xlu0 %8992, %v1021_v27  }
  0x9f   : > { %v10475_v28 = vpop.permute.xlu2 %1113 }
  0xa0   : > { %vm14130_vm12 = vcmp.eq.s32.totalorder %v10475_v28, %v10451_v14 }
  0xa1   : > { %v1200_v10 = vsel %vm14130_vm12, 1.0, %v10103_v19 }
  0xa4   : > { %1284 = vperm.xlu1 %8993, %v1023_v29  }
  0xa5   : > { %1167 = vperm.xlu2 %8994, %v1000_v31  }
  0xa6   : > { %1281 = vperm.xlu0 %8992, %v1022_v32   ;;  %v1222_v33 = vpop.permute.xlu1 %1221  ;;  %v1051_v32 = vld [vmem:[%s10491_s6 + $0x48] sm:$0xff] }
  0xa7   : > { %v1237_v34 = vpop.permute.xlu2 %1236  ;;  %vm1292_vm3 = vcmp.eq.s32.totalorder %v1222_v33, %v10451_v14 }
  0xa8   : > { %v1102_v35 = vpop.permute.xlu0 %1101  ;;  %v1316_v42 = vsel %vm1292_vm3, 1.0, %v10103_v19  ;;  %vm1297_vm11 = vcmp.eq.s32.totalorder %v1237_v34, %v10451_v14 }
  0xa9   : > { %vm1172_vm4 = vcmp.eq.s32.totalorder %v1102_v35, %v10451_v14  ;;  %v1321_v4 = vsel %vm1297_vm11, 1.0, %v10103_v19 }
  0xaa   : > { %v1196_v43 = vsel %vm1172_vm4, 1.0, %v10103_v19 }
  0xab   : > { %v1364_v52 = vsub.f32 %v1196_v43, %v1316_v42 }
  0xac   : > { %1287 = vperm.xlu1 %8993, %v1024_v36  }
  0xad   : > { %1290 = vperm.xlu2 %8994, %v1025_v37  }
  0xae   : > { %1170 = vperm.xlu0 %8992, %v1001_v38   ;;  %v1225_v40 = vpop.permute.xlu1 %1224 }
  0xaf   : > { %v10485_v41 = vpop.permute.xlu2 %1239  ;;  %vm1293_vm5 = vcmp.eq.s32.totalorder %v1225_v40, %v10451_v14 }
  0xb0   : > { %v1105_v44 = vpop.permute.xlu0 %1104  ;;  %v1317_v45 = vsel %vm1293_vm5, 1.0, %v10103_v19  ;;  %vm1298_vm3 = vcmp.eq.s32.totalorder %v10485_v41, %v10451_v14 }
  0xb1   : > { %vm1173_vm6 = vcmp.eq.s32.totalorder %v1105_v44, %v10451_v14  ;;  %v10500_v46 = vpack.c.bf16 %v1317_v45, %v1316_v42  ;;  %v1322_v40 = vsel %vm1298_vm3, 1.0, %v10103_v19 }
  0xb2   : > { %v1197_v47 = vsel %vm1173_vm6, 1.0, %v10103_v19  ;;  %vm10507_vm7 = vmpackc.low %vm1173_vm6, %vm1172_vm4 }
  0xb3   : > { %14389 = vst [vmem:[#allocation20_spill] sm:$0xff] %v10500_v46  ;;  %v10511_v53 = vpack.c.bf16 %v1197_v47, %v1196_v43  ;;  %v1365_v54 = vsub.f32 %v1197_v47, %v1317_v45 }
  0xb4   : > { %2461 = vperm.xlu1 %8993, %v1044_v49  }
  0xb5   : > { %14392 = vst [vmem:[#allocation21_spill] sm:$0xff] %v10511_v53  ;;  %2451 = vperm.xlu2 %8994, %v1042_v50   ;;  %v1388_v56 = vpack.c.bf16 %v1365_v54, %v1364_v52 }
  0xb6   : > { %2466 = vperm.xlu0 %8992, %v1045_v55   ;;  %v1231_v58 = vpop.permute.xlu1 %1230 }
  0xb7   : > { %8080 = vmatmul.msk.bf16.vlgmr.msra.gmra.mxu0 %vm1404_vm8, %v1388_v56  ;;  %v10515_v59 = vpop.permute.xlu2 %1128  ;;  %vm1295_vm9 = vcmp.eq.s32.totalorder %v1231_v58, %v10451_v14 }
  0xb8   : > { %v1228_v60 = vpop.permute.xlu0 %1227  ;;  %v1319_v61 = vsel %vm1295_vm9, 1.0, %v10103_v19  ;;  %vm1181_vm1 = vcmp.eq.s32.totalorder %v10515_v59, %v10451_v14 }
  0xb9   : > { %vm1294_vm10 = vcmp.eq.s32.totalorder %v1228_v60, %v10451_v14  ;;  %v1367_v6 = vsub.f32 %v10462_v22, %v1319_v61  ;;  %v10588_v34 = vsel %vm1181_vm1, 1.0, %v10103_v19 }
  0xba   : > { %v1318_v62 = vsel %vm1294_vm10, 1.0, %v10103_v19 }
  0xbb   : > { %v10523_v1 = vpack.c.bf16 %v1319_v61, %v1318_v62  ;;  %v1366_v7 = vsub.f32 %v10458_v20, %v1318_v62 }
  0xbc   : > { %2471 = vperm.xlu1 %8993, %v1046_v63  }
  0xbd   : > { %14393 = vst [vmem:[#allocation22_spill] sm:$0xff] %v10523_v1  ;;  %2456 = vperm.xlu2 %8994, %v1043_v0   ;;  %v1389_v18 = vpack.c.bf16 %v1367_v6, %v1366_v7 }
  0xbe   : > { %2476 = vperm.xlu0 %8992, %v1047_v2   ;;  %v1234_v3 = vpop.permute.xlu1 %1233 }
  0xbf   : > { %vm1296_vm13 = vcmp.eq.s32.totalorder %v1234_v3, %v10451_v14  ;;  %v10536_v9 = vpop.permute.xlu2 %1131 }
  0xc0   : > { %v10531_v5 = vpop.permute.xlu0 %1116  ;;  %v1320_v8 = vsel %vm1296_vm13, 1.0, %v10103_v19  ;;  %vm1182_vm11 = vcmp.eq.s32.totalorder %v10536_v9, %v10451_v14 }
  0xc1   : > { %vm14129_vm14 = vcmp.eq.s32.totalorder %v10531_v5, %v10451_v14  ;;  %v10544_v11 = vpack.c.bf16 %v1321_v4, %v1320_v8  ;;  %v1368_v36 = vsub.f32 %v1200_v10, %v1320_v8 }
  0xc2   : > { %v1201_v12 = vsel %vm14129_vm14, 1.0, %v10103_v19 }
  0xc3   : > { %14394 = vst [vmem:[#allocation23_spill] sm:$0xff] %v10544_v11  ;;  %v10552_v16 = vpack.c.bf16 %v1201_v12, %v1200_v10  ;;  %v1369_v37 = vsub.f32 %v1201_v12, %v1321_v4  ;;  %v10637_v4 = vsel %vm1182_vm11, 1.0, %v10103_v19 }
  0xc4   : > { %2491 = vperm.xlu1 %8993, %v1050_v13  }
  0xc5   : > { %14395 = vst [vmem:[#allocation24_spill] sm:$0xff] %v10552_v16  ;;  %2486 = vperm.xlu2 %8994, %v1049_v15   ;;  %v1390_v49 = vpack.c.bf16 %v1369_v37, %v1368_v36 }
  0xc6   : > { %2481 = vperm.xlu0 %8992, %v1048_v17   ;;  %v10556_v20 = vpop.permute.xlu1 %1122 }
  0xc7   : > { %8081 = vmatmul.msk.bf16.gmra.mxu0 %vm1404_vm8, %v1389_v18  ;;  %vm1179_vm15 = vcmp.eq.s32.totalorder %v10556_v20, %v10451_v14  ;;  %v1255_v27 = vpop.permute.xlu2 %1254 }
  0xc8   : > { %v10560_v21 = vpop.permute.xlu0 %1119  ;;  %v1203_v22 = vsel %vm1179_vm15, 1.0, %v10103_v19  ;;  %vm1303_vm10 = vcmp.eq.s32.totalorder %v1255_v27, %v10451_v14 }
  0xc9   : > { %vm1178_vm0 = vcmp.eq.s32.totalorder %v10560_v21, %v10451_v14  ;;  %v10627_v0 = vsel %vm1303_vm10, 1.0, %v10103_v19 }
  0xca   : > { %v1202_v24 = vsel %vm1178_vm0, 1.0, %v10103_v19 }
  0xcb   : > { %v10573_v29 = vpack.c.bf16 %v1203_v22, %v1202_v24  ;;  %v1370_v10 = vsub.f32 %v1202_v24, %v1322_v40 }
  0xcc   : > { %v10575_v31 = vpop.f32.mrf.mxu1 }
  0xcd   : > { %14396 = vst [vmem:[#allocation25_spill] sm:$0xff] %v10573_v29  ;;  %2506 = vperm.xlu2 %8994, %v1053_v25  }
  0xce   : > { %2496 = vperm.xlu0 %8992, %v1051_v32   ;;  %v10582_v33 = vpop.permute.xlu1 %1125 }
  0xcf   : > { %vm1180_vm4 = vcmp.eq.s32.totalorder %v10582_v33, %v10451_v14  ;;  %v1258_v47 = vpop.permute.xlu2 %1257 }
  0xd0   : > { %v1243_v35 = vpop.permute.xlu0 %1242  ;;  %v10596_v38 = vsel %vm1180_vm4, 1.0, %v10103_v19  ;;  %vm1304_vm10 = vcmp.eq.s32.totalorder %v1258_v47, %v10451_v14 }
  0xd1   : > { %vm1299_vm5 = vcmp.eq.s32.totalorder %v1243_v35, %v10451_v14  ;;  %v10602_v41 = vpack.c.bf16 %v10588_v34, %v10596_v38 }
  0xd2   : > { %v1323_v42 = vsel %vm1299_vm5, 1.0, %v10103_v19 }
  0xd3   : > { %14397 = vst [vmem:[#allocation26_spill] sm:$0xff] %v10602_v41  ;;  %v10605_v43 = vpop.f32.mrf.mxu2  ;;  %v10607_v44 = vpack.c.bf16 %v1323_v42, %v1322_v40  ;;  %v1371_v2 = vsub.f32 %v1203_v22, %v1323_v42 }
  0xd4   : > { %v10609_v45 = vpop.f32.mrf.mxu1 }
  0xd5   : > { %14398 = vst [vmem:[#allocation27_spill] sm:$0xff] %v10607_v44  ;;  %v1391_v15 = vpack.c.bf16 %v1371_v2, %v1370_v10  ;;  %v2182_v26 = vpack.c.bf16 %v10609_v45, %v10575_v31 }
  0xd6   : > { %v1249_v50 = vpop.permute.xlu1 %1248 }
  0xd7   : > { %8082 = vmatmul.msk.bf16.gmra.mxu0 %vm1404_vm8, %v1390_v49  ;;  %vm1301_vm6 = vcmp.eq.s32.totalorder %v1249_v50, %v10451_v14  ;;  %v1147_v61 = vpop.permute.xlu2 %1146 }
  0xd8   : > { %v1246_v52 = vpop.permute.xlu0 %1245  ;;  %v1325_v54 = vsel %vm1301_vm6, 1.0, %v10103_v19 }
  0xd9   : > { %vm1300_vm9 = vcmp.eq.s32.totalorder %v1246_v52, %v10451_v14  ;;  %v1373_v42 = vsub.f32 %v10588_v34, %v1325_v54  ;;  %v10690_v52 = vsel %vm1304_vm10, 1.0, %v10103_v19  ;;  %v10104_v34 = vmov 1.0|1.0  }
  0xda   : > { %v1324_v55 = vsel %vm1300_vm9, 1.0, %v10103_v19  ;;  %vm1187_vm9 = vcmp.eq.s32.totalorder %v1147_v61, %v10451_v14 }
  0xdb   : > { %v10616_v56 = vpop.f32.mrf.mxu2  ;;  %v10618_v58 = vpack.c.bf16 %v1325_v54, %v1324_v55  ;;  %v10681_v40 = vsel %vm1187_vm9, 1.0, %v10103_v19  ;;  %v1372_v49 = vsub.f32 %v10596_v38, %v1324_v55 }
  0xdc   : > { %v10620_v60 = vpop.f32.mrf.mxu1 }
  0xdd   : > { %14399 = vst [vmem:[#allocation28_spill] sm:$0xff] %v10618_v58  ;;  %v1392_v2 = vpack.c.bf16 %v1373_v42, %v1372_v49 }
  0xde   : > { %v1252_v62 = vpop.permute.xlu1 %1251 }
  0xdf   : > { %vm1302_vm13 = vcmp.eq.s32.totalorder %v1252_v62, %v10451_v14  ;;  %v1150_v22 = vpop.permute.xlu2 %1149 }
  0xe0   : > { %v1135_v63 = vpop.permute.xlu0 %1134  ;;  %v10630_v3 = vsel %vm1302_vm13, 1.0, %v10103_v19 }
  0xe1   : > { %vm1183_vm3 = vcmp.eq.s32.totalorder %v1135_v63, %v10451_v14  ;;  %v10641_v6 = vpack.c.bf16 %v10627_v0, %v10630_v3  ;;  %v1374_v63 = vsub.f32 %v10637_v4, %v10630_v3 }
  0xe2   : > { %v10646_v7 = vsel %vm1183_vm3, 1.0, %v10103_v19  ;;  %vm8935_vm10 = vmpackc.low %vm1183_vm3, %vm1182_vm11  ;;  %vm1188_vm3 = vcmp.eq.s32.totalorder %v1150_v22, %v10451_v14 }
  0xe3   : > { %14400 = vst [vmem:[#allocation29_spill] sm:$0xff] %v10641_v6  ;;  %v10648_v8 = vpop.f32.mrf.mxu2  ;;  %v10652_v12 = vpack.c.bf16 %v10646_v7, %v10637_v4  ;;  %v1375_v33 = vsub.f32 %v10646_v7, %v10627_v0  ;;  %v10758_v3 = vsel %vm1188_vm3, 1.0, %v10103_v19 }
  0xe4   : > { %v10654_v13 = vpop.f32.mrf.mxu1 }
  0xe5   : > { %14401 = vst [vmem:[#allocation30_spill] sm:$0xff] %v10652_v12 }
  0xe6   : > { %v1141_v17 = vpop.permute.xlu1 %1140 }
  0xe7   : > { %8083 = vmatmul.msk.bf16.gmra.mxu0 %vm1404_vm8, %v1391_v15  ;;  %vm1185_vm5 = vcmp.eq.s32.totalorder %v1141_v17, %v10451_v14  ;;  %v1273_v38 = vpop.permute.xlu2 %1272 }
  0xe8   : > { %v1138_v18 = vpop.permute.xlu0 %1137  ;;  %v10661_v25 = vsel %vm1185_vm5, 1.0, %v10103_v19  ;;  %vm1309_vm11 = vcmp.eq.s32.totalorder %v1273_v38, %v10451_v14  ;;  %v1393_v38 = vpack.c.bf16 %v1375_v33, %v1374_v63 }
  0xe9   : > { %vm1184_vm6 = vcmp.eq.s32.totalorder %v1138_v18, %v10451_v14 }
  0xea   : > { %v10667_v24 = vsel %vm1184_vm6, 1.0, %v10103_v19 }
  0xeb   : > { %v10669_v27 = vpop.f32.mrf.mxu2  ;;  %v10673_v32 = vpack.c.bf16 %v10661_v25, %v10667_v24 }
  0xec   : > { %v10675_v35 = vpop.f32.mrf.mxu1  ;;  %v2187_v31 = vpack.c.bf16 %v10669_v27, %v10648_v8  ;;  %v2186_v8 = vpack.c.bf16 %v10616_v56, %v10605_v43 }
  0xed   : > { %14402 = vst [vmem:[#allocation31_spill] sm:$0xff] %v10673_v32 }
  0xee   : > { %v1144_v36 = vpop.permute.xlu1 %1143 }
  0xef   : > { %vm1186_vm13 = vcmp.eq.s32.totalorder %v1144_v36, %v10451_v14  ;;  %v1276_v49 = vpop.permute.xlu2 %1275 }
  0xf0   : > { %v1261_v37 = vpop.permute.xlu0 %1260  ;;  %v10687_v50 = vsel %vm1186_vm13, 1.0, %v10103_v19  ;;  %vm8931_vm12 = vmpackc.low %vm1187_vm9, %vm1186_vm13 }
  0xf1   : > { %vm1305_vm14 = vcmp.eq.s32.totalorder %v1261_v37, %v10451_v14  ;;  %v10699_v62 = vpack.c.bf16 %v10681_v40, %v10687_v50  ;;  %8932 = vmatpush.lsf.msk.bf16.msk.msrb.mxu0 %vm8931_vm12, %v10104_v34 }
  0xf2   : > { %v10693_v47 = vsel %vm1305_vm14, 1.0, %v10103_v19  ;;  %vm8933_vm14 = vmpackc.low %vm1185_vm5, %vm1184_vm6 }
  0xf3   : > { %v10695_v61 = vpop.f32.mrf.mxu2  ;;  %14403 = vst [vmem:[#allocation32_spill] sm:$0xff] %v10699_v62  ;;  %v10704_v54 = vpack.c.bf16 %v10693_v47, %v10690_v52  ;;  %vm8937_vm5 = vmpackc.low %vm1181_vm1, %vm1180_vm4 }
  0xf4   : > { %v2080_v55 = vpop.f32.mrf.mxu1  ;;  %vm8939_vm4 = vmpackc.low %vm1179_vm15, %vm1178_vm0  ;;  %vm14408_vm15 = vcmp.eq.s32.totalorder %v10475_v28, %v10451_v14  ;;  %vm14409_vm0 = vcmp.eq.s32.totalorder %v10531_v5, %v10451_v14 }
  0xf5   : > { %14404 = vst [vmem:[#allocation33_spill] sm:$0xff] %v10704_v54  ;;  %8934 = vmatpush.lsf.msk.bf16.msk.msrb.mxu0 %vm8933_vm14, %v10104_v34  ;;  %vm8941_vm13 = vmpackc.low %vm14409_vm0, %vm14408_vm15  ;;  %vm1534_vm15 = vcmask 64512  }
  0xf6   : > { %v1267_v10 = vpop.permute.xlu1 %1266 }
  0xf7   : > { %8084 = vmatmul.msk.bf16.gmra.mxu0 %vm1404_vm8, %v1392_v2  ;;  %vm1307_vm9 = vcmp.eq.s32.totalorder %v1267_v10, %v10451_v14  ;;  %v10745_v10 = vsel %vm1309_vm11, 1.0, %v10103_v19 }
  0xf8   : > { %v1264_v15 = vpop.permute.xlu0 %1263  ;;  %v10714_v36 = vsel %vm1307_vm9, 1.0, %v10103_v19 }
  0xf9   : > { %vm1306_vm12 = vcmp.eq.s32.totalorder %v1264_v15, %v10451_v14  ;;  %8936 = vmatpush.lsf.msk.bf16.msk.msrb.mxu0 %vm8935_vm10, %v10104_v34  ;;  %v2184_v15 = vpack.c.bf16 %v2080_v55, %v10675_v35  ;;  %v2183_v35 = vpack.c.bf16 %v10654_v13, %v10620_v60  ;;  %v1377_v13 = vsub.f32 %v10661_v25, %v10693_v47 }
  0xfa   : > { %v10723_v17 = vsel %vm1306_vm12, 1.0, %v10103_v19  ;;  %v1379_v56 = vsub.f32 %v10681_v40, %v10714_v36 }
  0xfb   : > { %v2173_v18 = vpop.f32.mrf.mxu2  ;;  %v10728_v37 = vpack.c.bf16 %v10714_v36, %v10723_v17 }
  0xfc   : > { %v2083_v42 = vpop.f32.mrf.mxu1 }
  0xfd   : > { %14405 = vst [vmem:[#allocation34_spill] sm:$0xff] %v10728_v37  ;;  %8938 = vmatpush.lsf.msk.bf16.msk.msrb.mxu0 %vm8937_vm5, %v10104_v34 }
  0xfe   : > { %v1270_v9 = vpop.permute.xlu1 %1269 }
  0xff   : > { %vm1308_vm6 = vcmp.eq.s32.totalorder %v1270_v9, %v10451_v14  ;;  %v1165_v9 = vpop.permute.xlu2 %1164 }
 0x100   : > { %v1153_v2 = vpop.permute.xlu0 %1152  ;;  %v10748_v59 = vsel %vm1308_vm6, 1.0, %v10103_v19  ;;  %vm1193_vm12 = vcmp.eq.s32.totalorder %v1165_v9, %v10451_v14 }
 0x101   : > { %vm1189_vm1 = vcmp.eq.s32.totalorder %v1153_v2, %v10451_v14  ;;  %v10762_v0 = vpack.c.bf16 %v10745_v10, %v10748_v59  ;;  %8940 = vmatpush.lsf.msk.bf16.msk.msrb.mxu0 %vm8939_vm4, %v10104_v34 }
 0x102   : > { %v10765_v4 = vsel %vm1189_vm1, 1.0, %v10103_v19 }
 0x103   : > { %14406 = vst [vmem:[#allocation35_spill] sm:$0xff] %v10762_v0  ;;  %v2176_v7 = vpop.f32.mrf.mxu2  ;;  %v10770_v21 = vpack.c.bf16 %v10765_v4, %v10758_v3 }
 0x104   : > { %v2085_v22 = vpop.f32.mrf.mxu1 }
 0x105   : > { %14407 = vst [vmem:[#allocation36_spill] sm:$0xff] %v10770_v21  ;;  %v2185_v20 = vpack.c.bf16 %v2085_v22, %v2083_v42  ;;  %8942 = vmatpush.lsf.msk.bf16.msk.msrb.mxu0 %vm8941_vm13, %v10104_v34  ;;  %v2188_v22 = vpack.c.bf16 %v2173_v18, %v10695_v61  ;;  %v10810_v61 = vsel %vm1193_vm12, 1.0, %v10103_v19 }
 0x106   : > { %v1159_v2 = vpop.permute.xlu1 %1158 }
 0x107   : > { %2335 = vmatpush.bf16.msrb.mxu1 %v2185_v20  ;;  %8085 = vmatmul.msk.bf16.gmra.mxu0 %vm1404_vm8, %v1393_v38  ;;  %vm1191_vm14 = vcmp.eq.s32.totalorder %v1159_v2, %v10451_v14  ;;  %v1168_v18 = vpop.permute.xlu2 %1167 }
 0x108   : > { %v1156_v42 = vpop.permute.xlu0 %1155  ;;  %v10783_v63 = vsel %vm1191_vm14, 1.0, %v10103_v19  ;;  %vm1194_vm6 = vcmp.eq.s32.totalorder %v1168_v18, %v10451_v14 }
 0x109   : > { %vm1190_vm9 = vcmp.eq.s32.totalorder %v1156_v42, %v10451_v14  ;;  %8944 = vmatpush.lsf.msk.bf16.msk.msrb.mxu0 %vm10470_vm2, %v10104_v34  ;;  %vm1310_vm2 = vcmp.eq.s32.totalorder %v1276_v49, %v10451_v14  ;;  %v1378_v42 = vsub.f32 %v10687_v50, %v10723_v17  ;;  %v1381_v50 = vsub.f32 %v10765_v4, %v10745_v10 }
 0x10a   : > { %v10787_v28 = vsel %vm1190_vm9, 1.0, %v10103_v19  ;;  %v1334_v45 = vsel %vm1310_vm2, 1.0, %v10103_v19 }
 0x10b   : > { %v2178_v5 = vpop.f32.mrf.mxu2  ;;  %2336 = vmatpush.bf16.msrb.mxu1 %v2184_v15  ;;  %v10796_v55 = vpack.c.bf16 %v10783_v63, %v10787_v28  ;;  %v1395_v40 = vpack.c.bf16 %v1379_v56, %v1378_v42 }
 0x10c   : > { %v2189_v33 = vpack.c.bf16 %v2178_v5, %v2176_v7 }
 0x10d   : > { %14410 = vst [vmem:[#allocation37_spill] sm:$0xff] %v10796_v55  ;;  %8946 = vmatpush.lsf.msk.bf16.msk.msrb.mxu0 %vm10507_vm7, %v10104_v34  ;;  %v1376_v34 = vsub.f32 %v10667_v24, %v10690_v52 }
 0x10e   : > { %2230 = vmatpush.bf16.msra.mxu3 %v2189_v33  ;;  %v1162_v60 = vpop.permute.xlu1 %1161  ;;  %v1218_v33 = vsel %vm1194_vm6, 1.0, %v10103_v19 }
 0x10f   : > { %2337 = vmatpush.bf16.msrb.mxu1 %v2183_v35  ;;  %vm1192_vm10 = vcmp.eq.s32.totalorder %v1162_v60, %v10451_v14  ;;  %v1394_v20 = vpack.c.bf16 %v1377_v13, %v1376_v34  ;;  %v1291_v52 = vpop.permute.xlu2 %1290 }
 0x110   : > { %v1279_v7 = vpop.permute.xlu0 %1278  ;;  %v10813_v51 = vsel %vm1192_vm10, 1.0, %v10103_v19  ;;  %vm1315_vm3 = vcmp.eq.s32.totalorder %v1291_v52, %v10451_v14  ;;  %v1054_v52 = vld [vmem:[%s10491_s6 + $0x60] sm:$0xff] }
 0x111   : > { %vm1311_vm7 = vcmp.eq.s32.totalorder %v1279_v7, %v10451_v14  ;;  %v10821_v25 = vpack.c.bf16 %v10810_v61, %v10813_v51  ;;  %v1339_v5 = vsel %vm1315_vm3, 1.0, %v10103_v19  ;;  %v1382_v7 = vsub.f32 %v10787_v28, %v1334_v45 }
 0x112   : > { %2231 = vmatpush.bf16.msra.mxu3 %v2188_v22  ;;  %v1335_v47 = vsel %vm1311_vm7, 1.0, %v10103_v19 }
 0x113   : > { %14411 = vst [vmem:[#allocation38_spill] sm:$0xff] %v10821_v25  ;;  %2338 = vmatpush.bf16.msrb.mxu1 %v2182_v26  ;;  %v10826_v49 = vpack.c.bf16 %v1335_v47, %v1334_v45  ;;  %v1383_v4 = vsub.f32 %v10783_v63, %v1335_v47 }
 0x115   : > { %14412 = vst [vmem:[#allocation39_spill] sm:$0xff] %v10826_v49 }
 0x116   : > { %8906 = vllmr.8.mxu0  ;;  %2232 = vmatpush.bf16.msra.mxu3 %v2187_v31  ;;  %v1285_v27 = vpop.permute.xlu1 %1284  ;;  %v1397_v31 = vpack.c.bf16 %v1383_v4, %v1382_v7 }
 0x117   : > { %8168 = vmatmul.msk.bf16.vlgmr.msrb.gmra.mxu1 %vm1404_vm8, %v10511_v53  ;;  %8086 = vmatmul.msk.bf16.gmra.mxu0 %vm1404_vm8, %v1394_v20  ;;  %vm1313_vm5 = vcmp.eq.s32.totalorder %v1285_v27, %v10451_v14 }
 0x118   : > { %v1282_v38 = vpop.permute.xlu0 %1281  ;;  %v1337_v15 = vsel %vm1313_vm5, 1.0, %v10103_v19 }
 0x119   : > { %vm1312_vm11 = vcmp.eq.s32.totalorder %v1282_v38, %v10451_v14  ;;  %v1385_v28 = vsub.f32 %v10810_v61, %v1337_v15 }
 0x11a   : > { %2233 = vmatpush.bf16.msra.mxu3 %v2186_v8  ;;  %v1336_v24 = vsel %vm1312_vm11, 1.0, %v10103_v19  ;;  %v1052_v8 = vld [vmem:[%s10491_s6 + $0x50] sm:$0xff] }
 0x11b   : > { %v10837_v9 = vpack.c.bf16 %v1337_v15, %v1336_v24  ;;  %v1384_v45 = vsub.f32 %v10813_v51, %v1336_v24 }
 0x11d   : > { %14413 = vst [vmem:[#allocation40_spill] sm:$0xff] %v10837_v9  ;;  %8156 = vmatmul.msk.bf16.vlgmr.msra.gmra.mxu3 %vm1404_vm8, %v10500_v46  ;;  %v1398_v27 = vpack.c.bf16 %v1385_v28, %v1384_v45 }
 0x11e   : > { %v1288_v43 = vpop.permute.xlu1 %1287 }
 0x11f   : > { %vm1314_vm1 = vcmp.eq.s32.totalorder %v1288_v43, %v10451_v14 }
 0x120   : > { %v1171_v2 = vpop.permute.xlu0 %1170  ;;  %v1338_v35 = vsel %vm1314_vm1, 1.0, %v10103_v19 }
 0x121   : > { %vm1195_vm4 = vcmp.eq.s32.totalorder %v1171_v2, %v10451_v14  ;;  %v10852_v22 = vpack.c.bf16 %v1339_v5, %v1338_v35  ;;  %v1380_v14 = vsub.f32 %v10758_v3, %v10748_v59  ;;  %v1386_v15 = vsub.f32 %v1218_v33, %v1338_v35 }
 0x122   : > { %v1219_v26 = vsel %vm1195_vm4, 1.0, %v10103_v19 }
 0x123   : > { %14414 = vst [vmem:[#allocation41_spill] sm:$0xff] %v10852_v22  ;;  %v10855_v60 = vpack.c.bf16 %v1219_v26, %v1218_v33  ;;  %v1396_v19 = vpack.c.bf16 %v1381_v50, %v1380_v14  ;;  %v1387_v24 = vsub.f32 %v1219_v26, %v1339_v5 }
 0x125   : > { %14415 = vst [vmem:[#allocation42_spill] sm:$0xff] %v10855_v60  ;;  %v1399_v42 = vpack.c.bf16 %v1387_v24, %v1386_v15 }
 0x127   : > { %8169 = vmatmul.msk.bf16.gmra.mxu1 %vm1404_vm8, %v10466_v23  ;;  %8087 = vmatmul.msk.bf16.gmra.mxu0 %vm1404_vm8, %v1395_v40 }
 0x12d   : > { %8157 = vmatmul.msk.bf16.gmra.mxu3 %vm1404_vm8, %v10523_v1 }
 0x134   : > { %v10866_v36 = vpop.f32.mrf.mxu0 }
 0x135   : > { %14416 = vst [vmem:[#allocation43_spill] sm:$0xff] %v10866_v36  ;;  %v1510_v17 = vmul.f32 %v10866_v36, %v10866_v36 }
 0x137   : > { %8170 = vmatmul.msk.bf16.gmra.mxu1 %vm1404_vm8, %v10552_v16  ;;  %8088 = vmatmul.msk.bf16.gmra.mxu0 %vm1404_vm8, %v1396_v19  ;;  %v1535_v13 = vsel %vm1534_vm15, %v1510_v17, 0.0 }
 0x138   : > { %1536 = vadd.xlane.f32.xlu0 %v1535_v13 }
 0x13c   : > { %v10874_v59 = vpop.f32.mrf.mxu0 }
 0x13d   : > { %14417 = vst [vmem:[#allocation44_spill] sm:$0xff] %v10874_v59  ;;  %8158 = vmatmul.msk.bf16.gmra.mxu3 %vm1404_vm8, %v10544_v11  ;;  %v1511_v10 = vmul.f32 %v10874_v59, %v10874_v59 }
 0x13f   : > { %v1538_v3 = vsel %vm1534_vm15, %v1511_v10, 0.0 }
 0x140   : > { %1539 = vadd.xlane.f32.xlu1 %v1538_v3 }
 0x144   : > { %v10883_v18 = vpop.f32.mrf.mxu0 }
 0x145   : > { %14418 = vst [vmem:[#allocation45_spill] sm:$0xff] %v10883_v18  ;;  %v1512_v34 = vmul.f32 %v10883_v18, %v10883_v18 }
 0x147   : > { %8171 = vmatmul.msk.bf16.gmra.mxu1 %vm1404_vm8, %v10573_v29  ;;  %8089 = vmatmul.msk.bf16.gmra.mxu0 %vm1404_vm8, %v1397_v31  ;;  %v1541_v20 = vsel %vm1534_vm15, %v1512_v34, 0.0  ;;  %v10948_v31 = vpop.permute.xlu0 %2466 }
 0x148   : > { %1542 = vadd.xlane.f32.xlu2 %v1541_v20  ;;  %14427 = vst [vmem:[#allocation54_spill] sm:$0xff] %v10948_v31 }
 0x14c   : > { %2501 = vperm.xlu0 %8992, %v1052_v8   ;;  %v10892_v63 = vpop.f32.mrf.mxu0 }
 0x14d   : > { %14419 = vst [vmem:[#allocation46_spill] sm:$0xff] %v10892_v63  ;;  %8159 = vmatmul.msk.bf16.gmra.mxu3 %vm1404_vm8, %v10607_v44  ;;  %v1513_v5 = vmul.f32 %v10892_v63, %v10892_v63 }
 0x14f   : > { %v1544_v33 = vsel %vm1534_vm15, %v1513_v5, 0.0  ;;  %v10961_v45 = vpop.permute.xlu0 %2476 }
 0x150   : > { %14429 = vst [vmem:[#allocation56_spill] sm:$0xff] %v10961_v45 }
 0x154   : > { %v10898_v47 = vpop.f32.mrf.mxu0 }
 0x155   : > { %14420 = vst [vmem:[#allocation47_spill] sm:$0xff] %v10898_v47  ;;  %v1514_v38 = vmul.f32 %v10898_v47, %v10898_v47 }
 0x157   : > { %8172 = vmatmul.msk.bf16.gmra.mxu1 %vm1404_vm8, %v10602_v41  ;;  %8090 = vmatmul.msk.bf16.gmra.mxu0 %vm1404_vm8, %v1398_v27  ;;  %v1547_v43 = vsel %vm1534_vm15, %v1514_v38, 0.0  ;;  %v10976_v15 = vpop.permute.xlu0 %2481 }
 0x158   : > { %1548 = vadd.xlane.f32.xlu2 %v1547_v43  ;;  %v10970_v43 = vpop.permute.xlu1 %2461  ;;  %14433 = vst [vmem:[#allocation59_spill] sm:$0xff] %v10976_v15 }
 0x159   : > { %2511 = vperm.xlu1 %8993, %v1054_v52   ;;  %14431 = vst [vmem:[#allocation58_spill] sm:$0xff] %v10970_v43 }
 0x15c   : > { %v10907_v56 = vpop.f32.mrf.mxu0 }
 0x15d   : > { %14421 = vst [vmem:[#allocation48_spill] sm:$0xff] %v10907_v56  ;;  %8160 = vmatmul.msk.bf16.gmra.mxu3 %vm1404_vm8, %v10618_v58  ;;  %v1515_v61 = vmul.f32 %v10907_v56, %v10907_v56 }
 0x15f   : > { %v1550_v51 = vsel %vm1534_vm15, %v1515_v61, 0.0 }
 0x160   : > { %1551 = vadd.xlane.f32.xlu2 %v1550_v51  ;;  %v8791_v51 = vld [vmem:[%s14432_s3 + $0x38] sm:$0xff] }
 0x161   : > { %2966 = vmatpush.bf16.msrb.mxu2 %v8791_v51  ;;  %v8787_v51 = vld [vmem:[%s14432_s3 + $0x18] sm:$0xff] }
 0x164   : > { %v10914_v2 = vpop.f32.mrf.mxu0 }
 0x165   : > { %14422 = vst [vmem:[#allocation49_spill] sm:$0xff] %v10914_v2  ;;  %v1516_v40 = vmul.f32 %v10914_v2, %v10914_v2 }
 0x167   : > { %8173 = vmatmul.msk.bf16.gmra.mxu1 %vm1404_vm8, %v10652_v12  ;;  %8091 = vmatmul.msk.bf16.gmra.mxu0 %vm1404_vm8, %v1399_v42  ;;  %v1553_v14 = vsel %vm1534_vm15, %v1516_v40, 0.0 }
 0x168   : > { %1554 = vadd.xlane.f32.xlu2 %v1553_v14  ;;  %v8790_v14 = vld [vmem:[%s14432_s3 + $0x30] sm:$0xff] }
 0x169   : > { %2967 = vmatpush.bf16.msrb.mxu2 %v8790_v14 }
 0x16c   : > { %v10922_v50 = vpop.f32.mrf.mxu0 }
 0x16d   : > { %14423 = vst [vmem:[#allocation50_spill] sm:$0xff] %v10922_v50  ;;  %8161 = vmatmul.msk.bf16.gmra.mxu3 %vm1404_vm8, %v10641_v6  ;;  %v1517_v10 = vmul.f32 %v10922_v50, %v10922_v50 }
 0x16f   : > { %v1556_v4 = vsel %vm1534_vm15, %v1517_v10, 0.0 }
 0x174   : > { %v10928_v35 = vpop.f32.mrf.mxu0 }
 0x175   : > { %14424 = vst [vmem:[#allocation51_spill] sm:$0xff] %v10928_v35  ;;  %v1518_v26 = vmul.f32 %v10928_v35, %v10928_v35 }
 0x176   : > { %1545 = vadd.xlane.f32.xlu0 %v1544_v33 }
 0x177   : > { %8174 = vmatmul.msk.bf16.gmra.mxu1 %vm1404_vm8, %v10673_v32  ;;  %v1559_v17 = vsel %vm1534_vm15, %v1518_v26, 0.0  ;;  %v8789_v26 = vld [vmem:[%s14432_s3 + $0x28] sm:$0xff] }
 0x178   : > { %2968 = vmatpush.bf16.msrb.mxu2 %v8789_v26 }
 0x17c   : > { %v10935_v19 = vpop.f32.mrf.mxu0 }
 0x17d   : > { %14425 = vst [vmem:[#allocation52_spill] sm:$0xff] %v10935_v19  ;;  %8162 = vmatmul.msk.bf16.gmra.mxu3 %vm1404_vm8, %v10704_v54  ;;  %v1519_v13 = vmul.f32 %v10935_v19, %v10935_v19 }
 0x17e   : > { %1560 = vadd.xlane.f32.xlu0 %v1559_v17  ;;  %v10991_v17 = vpop.permute.xlu1 %2471 }
 0x17f   : > { %v1562_v3 = vsel %vm1534_vm15, %v1519_v13, 0.0  ;;  %14435 = vst [vmem:[#allocation61_spill] sm:$0xff] %v10991_v17  ;;  %v10993_v13 = vpop.permute.xlu0 %2496 }
 0x180   : > { %1563 = vadd.xlane.f32.xlu2 %v1562_v3  ;;  %14436 = vst [vmem:[#allocation62_spill] sm:$0xff] %v10993_v13 }
 0x183   : > { %1557 = vadd.xlane.f32.xlu1 %v1556_v4  ;;  %v8788_v4 = vld [vmem:[%s14432_s3 + $0x20] sm:$0xff] }
 0x184   : > { %v10946_v7 = vpop.f32.mrf.mxu0  ;;  %2969 = vmatpush.bf16.msrb.mxu2 %v8788_v4 }
 0x185   : > { %14426 = vst [vmem:[#allocation53_spill] sm:$0xff] %v10946_v7  ;;  %v1520_v34 = vmul.f32 %v10946_v7, %v10946_v7 }
 0x186   : > { %v11017_v14 = vpop.permute.xlu1 %2491 }
 0x187   : > { %8175 = vmatmul.msk.bf16.gmra.mxu1 %vm1404_vm8, %v10699_v62  ;;  %v1565_v20 = vsel %vm1534_vm15, %v1520_v34, 0.0  ;;  %14440 = vst [vmem:[#allocation65_spill] sm:$0xff] %v11017_v14 }
 0x188   : > { %2970 = vmatpush.bf16.msrb.mxu2 %v8787_v51 }
 0x18b   : > { %1566 = vadd.xlane.f32.xlu1 %v1565_v20  ;;  %v2181_v20 = vld [vmem:[%s14438_s2] sm:$0x3] }
 0x18c   : > { %v10955_v8 = vpop.f32.mrf.mxu0 }
 0x18d   : > { %14428 = vst [vmem:[#allocation55_spill] sm:$0xff] %v10955_v8  ;;  %8163 = vmatmul.msk.bf16.gmra.mxu3 %vm1404_vm8, %v10728_v37  ;;  %v1521_v28 = vmul.f32 %v10955_v8, %v10955_v8 }
 0x18f   : > { %v1568_v27 = vsel %vm1534_vm15, %v1521_v28, 0.0  ;;  %v11007_v28 = vpop.permute.xlu2 %2451 }
 0x190   : > { %1569 = vadd.xlane.f32.xlu2 %v1568_v27  ;;  %14439 = vst [vmem:[#allocation64_spill] sm:$0xff] %v11007_v28 }
 0x194   : > { %v10964_v38 = vpop.f32.mrf.mxu0  ;;  %v2340_v24 = vpop.f32.mrf.mxu1 }
 0x195   : > { %14430 = vst [vmem:[#allocation57_spill] sm:$0xff] %v10964_v38  ;;  %v1522_v52 = vmul.f32 %v10964_v38, %v10964_v38 }
 0x197   : > { %8176 = vmatmul.msk.bf16.gmra.mxu1 %vm1404_vm8, %v10770_v21  ;;  %v1571_v61 = vsel %vm1534_vm15, %v1522_v52, 0.0  ;;  %v11044_v47 = vpop.permute.xlu2 %2456 }
 0x198   : > { %1572 = vadd.xlane.f32.xlu0 %v1571_v61  ;;  %v11010_v61 = vperm.slane %v2181_v20, 0  ;;  %14444 = vst [vmem:[#allocation68_spill] sm:$0xff] %v11044_v47 }
 0x19c   : > { %v10978_v42 = vpop.f32.mrf.mxu0  ;;  %v2342_v34 = vpop.f32.mrf.mxu1 }
 0x19d   : > { %14434 = vst [vmem:[#allocation60_spill] sm:$0xff] %v10978_v42  ;;  %8164 = vmatmul.msk.bf16.gmra.mxu3 %vm1404_vm8, %v10762_v0  ;;  %v1523_v40 = vmul.f32 %v10978_v42, %v10978_v42 }
 0x19f   : > { %v1574_v33 = vsel %vm1534_vm15, %v1523_v40, 0.0  ;;  %v11015_v40 = vperm.slane %v2181_v20, 1  ;;  %v8786_v20 = vld [vmem:[%s14432_s3 + $0x10] sm:$0xff]  ;;  %v11074_v8 = vpop.permute.xlu2 %2486 }
 0x1a0   : > { %v2235_v5 = vpop.f32.mrf.mxu3  ;;  %1575 = vadd.xlane.f32.xlu2 %v1574_v33  ;;  %2971 = vmatpush.bf16.msrb.mxu2 %v8786_v20  ;;  %14447 = vst [vmem:[#allocation71_spill] sm:$0xff] %v11074_v8 }
 0x1a1   : > { %v2341_v26 = vadd.f32 %v2340_v24, %v2235_v5  ;;  %v11037_v24 = vld [vmem:[%s14443_s10] ss:$0 sm:$0xff] }
 0x1a4   : > { %v10995_v10 = vpop.f32.mrf.mxu0  ;;  %v11042_v18 = vpop.f32.mrf.mxu1 }
 0x1a5   : > { %14437 = vst [vmem:[#allocation63_spill] sm:$0xff] %v10995_v10  ;;  %v1524_v3 = vmul.f32 %v10995_v10, %v10995_v10 }
 0x1a7   : > { %8177 = vmatmul.msk.bf16.gmra.mxu1 %vm1404_vm8, %v10796_v55  ;;  %v1577_v52 = vsel %vm1534_vm15, %v1524_v3, 0.0 }
 0x1a8   : > { %v2237_v27 = vpop.f32.mrf.mxu3  ;;  %1578 = vadd.xlane.f32.xlu1 %v1577_v52  ;;  %v2570_v52 = vmul.f32 %v11015_v40, %v11007_v28 }
 0x1a9   : > { %v2343_v2 = vadd.f32 %v2342_v34, %v2237_v27  ;;  %v2571_v34 = vmul.f32 %v11015_v40, %v11044_v47 }
 0x1ab   : > { %v11019_v33 = vpop.xlane.xlu0 %1536 }
 0x1ac   : > { %14441 = vst [vmem:[#allocation66_spill] sm:$0xff] %v11019_v33  ;;  %v2401_v36 = vmul.f32 %v11010_v61, %v11019_v33  ;;  %v11023_v3 = vpop.f32.mrf.mxu0  ;;  %v11071_v19 = vpop.f32.mrf.mxu1 }
 0x1ad   : > { %14442 = vst [vmem:[#allocation67_spill] sm:$0xff] %v11023_v3  ;;  %8165 = vmatmul.msk.bf16.gmra.mxu3 %vm1404_vm8, %v10826_v49  ;;  %v1525_v4 = vmul.f32 %v11023_v3, %v11023_v3 }
 0x1ae   : > { %v2425_v51 = vadd.f32 %v2401_v36, %v2341_v26  ;;  %v8785_v36 = vld [vmem:[%s14432_s3 + $0x8] sm:$0xff] }
 0x1af   : > { %v1580_v59 = vsel %vm1534_vm15, %v1525_v4, 0.0  ;;  %2972 = vmatpush.bf16.msrb.mxu2 %v8785_v36 }
 0x1b0   : > { %v11039_v5 = vpop.f32.mrf.mxu3  ;;  %1581 = vadd.xlane.f32.xlu0 %v1580_v59  ;;  %v2594_v63 = vadd.f32 %v2570_v52, %v2425_v51 }
 0x1b2   : > { %v11050_v26 = vadd.f32 %v11037_v24, %v2594_v63  ;;  %v8784_v63 = vld [vmem:[%s14432_s3] sm:$0xff] }
 0x1b3   : > { %v11052_v56 = vpop.xlane.xlu1 %1539  ;;  %2973 = vmatpush.bf16.msrb.mxu2 %v8784_v63 }
 0x1b4   : > { %14445 = vst [vmem:[#allocation69_spill] sm:$0xff] %v11052_v56  ;;  %v2402_v4 = vmul.f32 %v11010_v61, %v11052_v56  ;;  %v11056_v20 = vpop.f32.mrf.mxu0  ;;  %v2646_v59 = vand.u32 2147483647, %v11050_v26  ;;  %vm2790_vm0 = vcmp.ge.f32.partialorder %v11050_v26, 0.0 }
 0x1b5   : > { %14446 = vst [vmem:[#allocation70_spill] sm:$0xff] %v11056_v20  ;;  %v1526_v52 = vmul.f32 %v11056_v20, %v11056_v20 }
 0x1b6   : > { %v2426_v27 = vadd.f32 %v2402_v4, %v2343_v2  ;;  %v2670_v51 = vsub.f32 0.0, %v2646_v59 }
 0x1b7   : > { %8178 = vmatmul.msk.bf16.gmra.mxu1 %vm1404_vm8, %v10821_v25  ;;  %v1583_v36 = vsel %vm1534_vm15, %v1526_v52, 0.0 }
 0x1b8   : > { %v11069_v50 = vpop.f32.mrf.mxu3  ;;  %1584 = vadd.xlane.f32.xlu1 %v1583_v36  ;;  %v2595_v20 = vadd.f32 %v2571_v34, %v2426_v27  ;;  %v2694_v35 = vmul.f32 1.442695, %v2670_v51  ;;  %v2350_v51 = vpop.f32.mrf.mxu1 }
 0x1b9   : > { %v11084_v36 = vpop.permute.xlu2 %2506 }
 0x1ba   : > { %v2623_v7 = vadd.f32 %v11037_v24, %v2595_v20  ;;  %9010 = vpow2.f32 %v2694_v35  ;;  %v1055_v20 = vld [vmem:[%s10491_s6 + $0x68] sm:$0xff]  ;;  %14449 = vst [vmem:[#allocation73_spill] sm:$0xff] %v11084_v36 }
 0x1bc   : > { %v11076_v38 = vpop.f32.mrf.mxu0  ;;  %v2647_v2 = vand.u32 2147483647, %v2623_v7  ;;  %vm2791_vm13 = vcmp.ge.f32.partialorder %v2623_v7, 0.0 }
 0x1bd   : > { %14448 = vst [vmem:[#allocation72_spill] sm:$0xff] %v11076_v38  ;;  %8166 = vmatmul.msk.bf16.gmra.mxu3 %vm1404_vm8, %v10837_v9  ;;  %v1527_v4 = vmul.f32 %v11076_v38, %v11076_v38 }
 0x1be   : > { %v2671_v59 = vsub.f32 0.0, %v2647_v2  ;;  %v1059_v2 = vld [vmem:[%s10491_s6 + $0x88] sm:$0xff] }
 0x1bf   : > { %v1586_v52 = vsel %vm1534_vm15, %v1527_v4, 0.0 }
 0x1c0   : > { %v9011_v63 = vpop.eup %9010  ;;  %1587 = vadd.xlane.f32.xlu2 %v1586_v52  ;;  %v2696_v34 = vmul.f32 1.442695, %v2671_v59  ;;  %v2245_v27 = vpop.f32.mrf.mxu3 }
 0x1c1   : > { %v2742_v35 = vadd.f32 1.0, %v9011_v63  ;;  %v11091_v59 = vpop.xlane.xlu2 %1542 }
 0x1c2   : > { %9012 = vpow2.f32 %v2696_v34  ;;  %14450 = vst [vmem:[#allocation74_spill] sm:$0xff] %v11091_v59  ;;  %v2352_v34 = vpop.f32.mrf.mxu1 }
 0x1c3   : > { %9014 = vrcp.f32 %v2742_v35 }
 0x1c4   : > { %2516 = vperm.xlu0 %8992, %v1055_v20   ;;  %v1058_v20 = vld [vmem:[%s10491_s6 + $0x80] sm:$0xff] }
 0x1c7   : > { %8179 = vmatmul.msk.bf16.gmra.mxu1 %vm1404_vm8, %v10855_v60 }
 0x1c8   : > { %v9013_v38 = vpop.eup %9012  ;;  %v2247_v52 = vpop.f32.mrf.mxu3 }
 0x1c9   : > { %v2743_v3 = vadd.f32 1.0, %v9013_v38  ;;  %v9015_v4 = vpop.eup %9014 }
 0x1ca   : > { %v2814_v42 = vmul.f32 %v9015_v4, %v9011_v63  ;;  %v2346_v63 = vadd.f32 %v11042_v18, %v11039_v5  ;;  %v11111_v18 = vpop.permute.xlu0 %2501  ;;  %v1060_v5 = vld [vmem:[%s10491_s6 + $0x90] sm:$0xff] }
 0x1cb   : > { %9016 = vrcp.f32 %v2743_v3  ;;  %v2403_v3 = vmul.f32 %v11010_v61, %v11091_v59  ;;  %v11097_v49 = vpop.xlane.xlu2 %1548  ;;  %14453 = vst [vmem:[#allocation77_spill] sm:$0xff] %v11111_v18 }
 0x1cc   : > { %2536 = vperm.xlu0 %8992, %v1059_v2   ;;  %v2838_v9 = vsel %vm2790_vm0, %v9015_v4, %v2814_v42  ;;  %14451 = vst [vmem:[#allocation75_spill] sm:$0xff] %v11097_v49  ;;  %v2572_v42 = vmul.f32 %v11015_v40, %v10970_v43  ;;  %v1057_v4 = vld [vmem:[%s10491_s6 + $0x78] sm:$0xff] }
 0x1cd   : > { %8167 = vmatmul.msk.bf16.gmra.mxu3 %vm1404_vm8, %v10852_v22  ;;  %v1056_v22 = vld [vmem:[%s10491_s6 + $0x70] sm:$0xff]  ;;  %v2862_v47 = vmul.f32 %v2838_v9, %v11050_v26  ;;  %v2427_v33 = vadd.f32 %v2403_v3, %v2346_v63  ;;  %v2351_v26 = vadd.f32 %v2350_v51, %v2245_v27 }
 0x1d1   : > { %v9017_v10 = vpop.eup %9016  ;;  %2531 = vperm.xlu1 %8993, %v1058_v20   ;;  %v2250_v20 = vpop.f32.mrf.mxu3 }
 0x1d2   : > { %v2815_v35 = vmul.f32 %v9017_v10, %v9013_v38  ;;  %v2355_v38 = vpop.f32.mrf.mxu1 }
 0x1d4   : > { %v2839_v2 = vsel %vm2791_vm13, %v9017_v10, %v2815_v35  ;;  %v2596_v10 = vadd.f32 %v2572_v42, %v2427_v33  ;;  %v11106_v35 = vpop.xlane.xlu2 %1551 }
 0x1d5   : > { %v2863_v56 = vmul.f32 %v2839_v2, %v2623_v7  ;;  %14452 = vst [vmem:[#allocation76_spill] sm:$0xff] %v11106_v35  ;;  %v2353_v7 = vadd.f32 %v2352_v34, %v2247_v52  ;;  %v2575_v2 = vmul.f32 %v11015_v40, %v10961_v45  ;;  %v2574_v52 = vmul.f32 %v11015_v40, %v10991_v17  ;;  %v1061_v45 = vld [vmem:[%s10491_s6 + $0x98] sm:$0xff] }
 0x1d6   : > { %v11109_v9 = vadd.f32 %v11037_v24, %v2596_v10  ;;  %v2348_v34 = vadd.f32 %v11071_v19, %v11069_v50 }
 0x1d7   : > { %v2902_v28 = vpack.c.bf16 %v2863_v56, %v2862_v47  ;;  %v11113_v47 = vpop.f32.mrf.mxu0 }
 0x1d8   : > { %2521 = vperm.xlu2 %8994, %v1056_v22   ;;  %14454 = vst [vmem:[#allocation78_spill] sm:$0xff] %v11113_v47  ;;  %v2406_v22 = vmul.f32 %v11010_v61, %v11106_v35  ;;  %v2648_v33 = vand.u32 2147483647, %v11109_v9  ;;  %v11140_v35 = vpop.permute.xlu1 %2511  ;;  %vm2792_vm14 = vcmp.ge.f32.partialorder %v11109_v9, 0.0 }
 0x1d9   : > { %2974 = vmatmul.bf16.vlgmr.msrb.gmra.mxu2 %v2902_v28  ;;  %v2252_v59 = vpop.f32.mrf.mxu3  ;;  %v2405_v28 = vmul.f32 %v11010_v61, %v11097_v49  ;;  %14457 = vst [vmem:[#allocation81_spill] sm:$0xff] %v11140_v35 }
 0x1da   : > { %v2357_v56 = vpop.f32.mrf.mxu1  ;;  %v2430_v3 = vadd.f32 %v2406_v22, %v2353_v7  ;;  %v2672_v42 = vsub.f32 0.0, %v2648_v33  ;;  %v2573_v7 = vmul.f32 %v11015_v40, %v10948_v31 }
 0x1db   : > { %v2429_v63 = vadd.f32 %v2405_v28, %v2351_v26 }
 0x1dc   : > { %v2599_v51 = vadd.f32 %v2575_v2, %v2430_v3 }
 0x1dd   : > { %v2598_v26 = vadd.f32 %v2574_v52, %v2429_v63 }
 0x1de   : > { %v11143_v19 = vadd.f32 %v11037_v24, %v2599_v51 }
 0x1df   : > { %v11133_v22 = vpop.f32.mrf.mxu0  ;;  %v11149_v2 = vadd.f32 %v11037_v24, %v2598_v26 }
 0x1e0   : > { %2526 = vperm.xlu2 %8994, %v1057_v4   ;;  %14456 = vst [vmem:[#allocation80_spill] sm:$0xff] %v11133_v22  ;;  %v2651_v52 = vand.u32 2147483647, %v11143_v19  ;;  %v1529_v49 = vmul.f32 %v11133_v22, %v11133_v22  ;;  %vm2795_vm12 = vcmp.ge.f32.partialorder %v11143_v19, 0.0 }
 0x1e1   : > { %v11129_v4 = vpop.f32.mrf.mxu3  ;;  %v2650_v51 = vand.u32 2147483647, %v11149_v2  ;;  %vm2794_vm2 = vcmp.ge.f32.partialorder %v11149_v2, 0.0 }
 0x1e2   : > { %v11137_v28 = vpop.f32.mrf.mxu1  ;;  %v2675_v31 = vsub.f32 0.0, %v2651_v52  ;;  %v1592_v52 = vsel %vm1534_vm15, %v1529_v49, 0.0 }
 0x1e3   : > { %v2674_v62 = vsub.f32 0.0, %v2650_v51 }
 0x1e8   : > { %2541 = vperm.xlu2 %8994, %v1060_v5   ;;  %v2698_v5 = vmul.f32 1.442695, %v2672_v42  ;;  %v11153_v42 = vpop.xlane.xlu2 %1554 }
 0x1e9   : > { %v11123_v10 = vpop.xlane.xlu0 %1545  ;;  %14458 = vst [vmem:[#allocation82_spill] sm:$0xff] %v11153_v42 }
 0x1ea   : > { %14455 = vst [vmem:[#allocation79_spill] sm:$0xff] %v11123_v10  ;;  %v2404_v27 = vmul.f32 %v11010_v61, %v11123_v10  ;;  %9018 = vpow2.f32 %v2698_v5  ;;  %v2358_v10 = vadd.f32 %v2357_v56, %v2252_v59  ;;  %v2704_v59 = vmul.f32 1.442695, %v2675_v31 }
 0x1ec   : > { %v2428_v33 = vadd.f32 %v2404_v27, %v2348_v34  ;;  %v1528_v34 = vmul.f32 %v11113_v47, %v11113_v47  ;;  %v2407_v27 = vmul.f32 %v11010_v61, %v11153_v42  ;;  %v2362_v47 = vpop.f32.mrf.mxu1 }
 0x1ee   : > { %v2597_v50 = vadd.f32 %v2573_v7, %v2428_v33  ;;  %v11160_v7 = vpop.f32.mrf.mxu0  ;;  %v1589_v33 = vsel %vm1534_vm15, %v1528_v34, 0.0  ;;  %v2577_v34 = vmul.f32 %v11015_v40, %v11074_v8  ;;  %v2579_v8 = vmul.f32 %v11015_v40, %v10993_v13 }
 0x1ef   : > { %14459 = vst [vmem:[#allocation83_spill] sm:$0xff] %v11160_v7 }
 0x1f0   : > { %2546 = vperm.xlu2 %8994, %v1061_v45   ;;  %v11146_v3 = vadd.f32 %v11037_v24, %v2597_v50  ;;  %v2257_v45 = vpop.f32.mrf.mxu3  ;;  %v9019_v26 = vpop.eup %9018  ;;  %v2356_v50 = vadd.f32 %v2355_v38, %v2250_v20  ;;  %v1530_v20 = vmul.f32 %v11160_v7, %v11160_v7 }
 0x1f1   : > { %v11186_v31 = vpop.xlane.xlu0 %1560 }
 0x1f2   : > { %v2649_v63 = vand.u32 2147483647, %v11146_v3  ;;  %v2431_v0 = vadd.f32 %v2407_v27, %v2356_v50  ;;  %v1595_v51 = vsel %vm1534_vm15, %v1530_v20, 0.0  ;;  %14462 = vst [vmem:[#allocation86_spill] sm:$0xff] %v11186_v31  ;;  %vm2793_vm9 = vcmp.ge.f32.partialorder %v11146_v3, 0.0 }
 0x1f4   : > { %v2673_v5 = vsub.f32 0.0, %v2649_v63  ;;  %v2744_v63 = vadd.f32 1.0, %v9019_v26  ;;  %v11184_v49 = vpop.f32.mrf.mxu1 }
 0x1f6   : > { %v11163_v17 = vpop.xlane.xlu1 %1557  ;;  %1590 = vadd.xlane.f32.xlu0 %v1589_v33  ;;  %v2700_v43 = vmul.f32 1.442695, %v2673_v5  ;;  %v2576_v33 = vmul.f32 %v11015_v40, %v10976_v15  ;;  %v2702_v5 = vmul.f32 1.442695, %v2674_v62 }
 0x1f7   : > { %14460 = vst [vmem:[#allocation84_spill] sm:$0xff] %v11163_v17  ;;  %v2408_v42 = vmul.f32 %v11010_v61, %v11163_v17 }
 0x1f8   : > { %9020 = vpow2.f32 %v2700_v43  ;;  %v2600_v27 = vadd.f32 %v2576_v33, %v2431_v0  ;;  %v11177_v50 = vpop.f32.mrf.mxu3  ;;  %v2363_v33 = vadd.f32 %v2362_v47, %v2257_v45  ;;  %v2578_v47 = vmul.f32 %v11015_v40, %v11017_v14 }
 0x1f9   : > { %v2432_v38 = vadd.f32 %v2408_v42, %v2358_v10  ;;  %9022 = vrcp.f32 %v2744_v63  ;;  %v11182_v42 = vpop.xlane.xlu2 %1563 }
 0x1fa   : > { %9024 = vpow2.f32 %v2704_v59  ;;  %14461 = vst [vmem:[#allocation85_spill] sm:$0xff] %v11182_v42  ;;  %v11189_v62 = vadd.f32 %v11037_v24, %v2600_v27  ;;  %v2410_v43 = vmul.f32 %v11010_v61, %v11182_v42  ;;  %v2361_v59 = vadd.f32 %v11137_v28, %v11129_v4 }
 0x1fb   : > { %1593 = vadd.xlane.f32.xlu1 %v1592_v52  ;;  %v2601_v56 = vadd.f32 %v2577_v34, %v2432_v38  ;;  %9026 = vpow2.f32 %v2702_v5  ;;  %v2409_v38 = vmul.f32 %v11010_v61, %v11186_v31 }
 0x1fc   : > { %v2652_v52 = vand.u32 2147483647, %v11189_v62  ;;  %v2434_v5 = vadd.f32 %v2410_v43, %v2363_v33  ;;  %vm2796_vm7 = vcmp.ge.f32.partialorder %v11189_v62, 0.0 }
 0x1fd   : > { %v11180_v10 = vadd.f32 %v11037_v24, %v2601_v56  ;;  %v2433_v7 = vadd.f32 %v2409_v38, %v2361_v59 }
 0x1fe   : > { %1596 = vadd.xlane.f32.xlu0 %v1595_v51  ;;  %v9021_v22 = vpop.eup %9020  ;;  %v2676_v15 = vsub.f32 0.0, %v2652_v52  ;;  %v2603_v43 = vadd.f32 %v2579_v8, %v2434_v5  ;;  %v1063_v8 = vld [vmem:[%s10491_s6 + $0xa8] sm:$0xff] }
 0x1ff   : > { %v2745_v0 = vadd.f32 1.0, %v9021_v22  ;;  %v2653_v34 = vand.u32 2147483647, %v11180_v10  ;;  %v9023_v20 = vpop.eup %9022  ;;  %vm2797_vm10 = vcmp.ge.f32.partialorder %v11180_v10, 0.0 }
 0x200   : > { %v9025_v63 = vpop.eup %9024  ;;  %v2816_v27 = vmul.f32 %v9023_v20, %v9019_v26  ;;  %v2262_v17 = vpop.f32.mrf.mxu3  ;;  %v2706_v33 = vmul.f32 1.442695, %v2676_v15 }
 0x201   : > { %9028 = vrcp.f32 %v2745_v0  ;;  %v9027_v56 = vpop.eup %9026  ;;  %v2677_v51 = vsub.f32 0.0, %v2653_v34  ;;  %v2747_v42 = vadd.f32 1.0, %v9025_v63  ;;  %v2367_v0 = vpop.f32.mrf.mxu1  ;;  %v2602_v34 = vadd.f32 %v2578_v47, %v2433_v7 }
 0x202   : > { %v2746_v45 = vadd.f32 1.0, %v9027_v56  ;;  %v2840_v28 = vsel %vm2792_vm14, %v9023_v20, %v2816_v27  ;;  %v11216_v15 = vpop.f32.mrf.mxu0  ;;  %v2368_v47 = vadd.f32 %v2367_v0, %v2262_v17  ;;  %v2581_v17 = vmul.f32 %v11015_v40, %v11084_v36 }
 0x203   : > { %v2708_v26 = vmul.f32 1.442695, %v2677_v51  ;;  %9030 = vrcp.f32 %v2747_v42  ;;  %v2864_v52 = vmul.f32 %v2840_v28, %v11109_v9  ;;  %v11207_v13 = vpop.xlane.xlu2 %1569  ;;  %v11214_v5 = vadd.f32 %v11037_v24, %v2602_v34  ;;  %14464 = vst [vmem:[#allocation88_spill] sm:$0xff] %v11216_v15  ;;  %v11218_v42 = vpop.xlane.xlu1 %1566 }
 0x204   : > { %9032 = vrcp.f32 %v2746_v45  ;;  %14463 = vst [vmem:[#allocation87_spill] sm:$0xff] %v11207_v13  ;;  %v2412_v9 = vmul.f32 %v11010_v61, %v11207_v13 }
 0x205   : > { %9034 = vpow2.f32 %v2708_v26  ;;  %14465 = vst [vmem:[#allocation89_spill] sm:$0xff] %v11218_v42  ;;  %v2654_v45 = vand.u32 2147483647, %v11214_v5  ;;  %v2411_v26 = vmul.f32 %v11010_v61, %v11218_v42  ;;  %vm2798_vm11 = vcmp.ge.f32.partialorder %v11214_v5, 0.0 }
 0x206   : > { %9036 = vpow2.f32 %v2706_v33 }
 0x207   : > { %v9029_v31 = vpop.eup %9028 }
 0x208   : > { %v2817_v4 = vmul.f32 %v9029_v31, %v9021_v22  ;;  %v11210_v22 = vadd.f32 %v11037_v24, %v2603_v43  ;;  %v1531_v43 = vmul.f32 %v11216_v15, %v11216_v15 }
 0x209   : > { %v9031_v7 = vpop.eup %9030  ;;  %v2370_v28 = vpop.f32.mrf.mxu1 }
 0x20a   : > { %v2841_v38 = vsel %vm2793_vm9, %v9029_v31, %v2817_v4  ;;  %v2265_v31 = vpop.f32.mrf.mxu3  ;;  %v2655_v27 = vand.u32 2147483647, %v11210_v22  ;;  %v9033_v51 = vpop.eup %9032  ;;  %v2819_v34 = vmul.f32 %v9031_v7, %v9025_v63  ;;  %vm2799_vm5 = vcmp.ge.f32.partialorder %v11210_v22, 0.0 }
 0x20b   : > { %v2865_v59 = vmul.f32 %v2841_v38, %v11146_v3  ;;  %v1062_v3 = vld [vmem:[%s10491_s6 + $0xa0] sm:$0xff]  ;;  %v9035_v4 = vpop.eup %9034  ;;  %v2436_v38 = vadd.f32 %v2412_v9, %v2368_v47 }
 0x20c   : > { %v9037_v33 = vpop.eup %9036  ;;  %v2749_v0 = vadd.f32 1.0, %v9035_v4  ;;  %v2843_v42 = vsel %vm2795_vm12, %v9031_v7, %v2819_v34  ;;  %v11243_v34 = vpop.xlane.xlu0 %1572 }
 0x20d   : > { %v2903_v20 = vpack.c.bf16 %v2865_v59, %v2864_v52  ;;  %v2366_v52 = vadd.f32 %v11184_v49, %v11177_v50  ;;  %v2818_v59 = vmul.f32 %v9033_v51, %v9027_v56  ;;  %v2748_v63 = vadd.f32 1.0, %v9037_v33  ;;  %14466 = vst [vmem:[#allocation90_spill] sm:$0xff] %v11243_v34 }
 0x20e   : > { %v2605_v9 = vadd.f32 %v2581_v17, %v2436_v38  ;;  %v2580_v50 = vmul.f32 %v11015_v40, %v11111_v18  ;;  %9038 = vrcp.f32 %v2749_v0 }
 0x20f   : > { %2979 = vmatmul.bf16.gmra.mxu2 %v2903_v20  ;;  %v2679_v20 = vsub.f32 0.0, %v2655_v27  ;;  %v2435_v13 = vadd.f32 %v2411_v26, %v2366_v52  ;;  %v2842_v49 = vsel %vm2794_vm2, %v9033_v51, %v2818_v59  ;;  %v2867_v27 = vmul.f32 %v2843_v42, %v11143_v19 }
 0x210   : > { %v2866_v26 = vmul.f32 %v2842_v49, %v11149_v2  ;;  %9040 = vrcp.f32 %v2748_v63  ;;  %v11241_v7 = vadd.f32 %v11037_v24, %v2605_v9  ;;  %v2371_v59 = vadd.f32 %v2370_v28, %v2265_v31 }
 0x211   : > { %v2712_v56 = vmul.f32 1.442695, %v2679_v20  ;;  %v2582_v49 = vmul.f32 %v11015_v40, %v11140_v35 }
 0x212   : > { %2556 = vperm.xlu0 %8992, %v1063_v8   ;;  %v2678_v8 = vsub.f32 0.0, %v2654_v45  ;;  %v2267_v15 = vpop.f32.mrf.mxu3  ;;  %v2604_v45 = vadd.f32 %v2580_v50, %v2435_v13  ;;  %v2904_v38 = vpack.c.bf16 %v2867_v27, %v2866_v26  ;;  %v2657_v42 = vand.u32 2147483647, %v11241_v7 }
 0x213   : > { %9042 = vpow2.f32 %v2712_v56  ;;  %v2413_v13 = vmul.f32 %v11010_v61, %v11243_v34  ;;  %v11256_v26 = vpop.xlane.xlu2 %1575  ;;  %vm2801_vm3 = vcmp.ge.f32.partialorder %v11241_v7, 0.0 }
 0x214   : > { %2551 = vperm.xlu1 %8993, %v1062_v3   ;;  %v1598_v3 = vsel %vm1534_vm15, %v1531_v43, 0.0  ;;  %v2710_v47 = vmul.f32 1.442695, %v2678_v8  ;;  %v2372_v43 = vpop.f32.mrf.mxu1  ;;  %v11246_v51 = vadd.f32 %v11037_v24, %v2604_v45  ;;  %v9039_v19 = vpop.eup %9038  ;;  %v2681_v8 = vsub.f32 0.0, %v2657_v42  ;;  %14467 = vst [vmem:[#allocation91_spill] sm:$0xff] %v11256_v26 }
 0x215   : > { %v2821_v20 = vmul.f32 %v9039_v19, %v9035_v4 }
 0x216   : > { %9044 = vpow2.f32 %v2710_v47  ;;  %v9041_v2 = vpop.eup %9040  ;;  %v2656_v17 = vand.u32 2147483647, %v11246_v51  ;;  %v2716_v31 = vmul.f32 1.442695, %v2681_v8  ;;  %vm2800_vm6 = vcmp.ge.f32.partialorder %v11246_v51, 0.0 }
 0x217   : > { %v2820_v9 = vmul.f32 %v9041_v2, %v9037_v33  ;;  %v2845_v27 = vsel %vm2797_vm10, %v9039_v19, %v2821_v20 }
 0x218   : > { %v2680_v45 = vsub.f32 0.0, %v2656_v17  ;;  %v2869_v33 = vmul.f32 %v2845_v27, %v11180_v10 }
 0x219   : > { %1599 = vadd.xlane.f32.xlu2 %v1598_v3  ;;  %v9043_v52 = vpop.eup %9042  ;;  %v2437_v3 = vadd.f32 %v2413_v13, %v2371_v59  ;;  %v2844_v4 = vsel %vm2796_vm7, %v9041_v2, %v2820_v9  ;;  %v1064_v59 = vld [vmem:[%s10491_s6 + $0xb0] sm:$0xff] }
 0x21a   : > { %v2270_v63 = vpop.f32.mrf.mxu3  ;;  %v2751_v50 = vadd.f32 1.0, %v9043_v52  ;;  %v2714_v42 = vmul.f32 1.442695, %v2680_v45  ;;  %v2868_v13 = vmul.f32 %v2844_v4, %v11189_v62  ;;  %v2414_v62 = vmul.f32 %v11010_v61, %v11256_v26 }
 0x21b   : > { %v2606_v28 = vadd.f32 %v2582_v49, %v2437_v3  ;;  %v11271_v49 = vpop.xlane.xlu1 %1578  ;;  %v2373_v45 = vadd.f32 %v2372_v43, %v2267_v15 }
 0x21c   : > { %v9045_v0 = vpop.eup %9044  ;;  %v2375_v56 = vpop.f32.mrf.mxu1  ;;  %9046 = vrcp.f32 %v2751_v50  ;;  %v2905_v2 = vpack.c.bf16 %v2869_v33, %v2868_v13  ;;  %14470 = vst [vmem:[#allocation94_spill] sm:$0xff] %v11271_v49  ;;  %v1065_v33 = vld [vmem:[%s10491_s6 + $0xb8] sm:$0xff]  ;;  %v2415_v15 = vmul.f32 %v11010_v61, %v11271_v49  ;;  %s14496_s6 = sld [smem:[#allocation139_spill]] }
 0x21d   : > { %v2750_v47 = vadd.f32 1.0, %v9045_v0  ;;  %v11266_v20 = vadd.f32 %v11037_v24, %v2606_v28  ;;  %v2438_v26 = vadd.f32 %v2414_v62, %v2373_v45 }
 0x21f   : > { %2984 = vmatmul.bf16.gmra.mxu2 %v2904_v38  ;;  %v11259_v38 = vpop.f32.mrf.mxu0  ;;  %9048 = vrcp.f32 %v2750_v47  ;;  %v2658_v9 = vand.u32 2147483647, %v11266_v20  ;;  %vm2802_vm4 = vcmp.ge.f32.partialorder %v11266_v20, 0.0 }
 0x220   : > { %14468 = vst [vmem:[#allocation92_spill] sm:$0xff] %v11259_v38  ;;  %9050 = vpow2.f32 %v2716_v31 }
 0x221   : > { %9052 = vpow2.f32 %v2714_v42 }
 0x222   : > { %v2272_v17 = vpop.f32.mrf.mxu3  ;;  %v9047_v8 = vpop.eup %9046 }
 0x223   : > { %v11262_v19 = vpop.xlane.xlu0 %1581  ;;  %v2823_v47 = vmul.f32 %v9047_v8, %v9043_v52 }
 0x224   : > { %14469 = vst [vmem:[#allocation93_spill] sm:$0xff] %v11262_v19  ;;  %v2377_v3 = vpop.f32.mrf.mxu1 }
 0x225   : > { %v9049_v10 = vpop.eup %9048  ;;  %v2847_v43 = vsel %vm2799_vm5, %v9047_v8, %v2823_v47 }
 0x226   : > { %v9051_v50 = vpop.eup %9050  ;;  %v2822_v42 = vmul.f32 %v9049_v10, %v9045_v0 }
 0x227   : > { %v11275_v31 = vpop.eup %9052  ;;  %v11277_v4 = vpop.f32.mrf.mxu0  ;;  %v2753_v13 = vadd.f32 1.0, %v9051_v50 }
 0x228   : > { %14472 = vst [vmem:[#allocation96_spill] sm:$0xff] %v11277_v4  ;;  %v1533_v0 = vmul.f32 %v11277_v4, %v11277_v4  ;;  %v2846_v45 = vsel %vm2798_vm11, %v9049_v10, %v2822_v42 }
 0x229   : > { %9054 = vrcp.f32 %v2753_v13  ;;  %v2870_v10 = vmul.f32 %v2846_v45, %v11214_v5 }
 0x22a   : > { %v2275_v62 = vpop.f32.mrf.mxu3 }
 0x22b   : > { %v11293_v34 = vpop.xlane.xlu1 %1584 }
 0x22c   : > { %14474 = vst [vmem:[#allocation98_spill] sm:$0xff] %v11293_v34  ;;  %v2380_v47 = vpop.f32.mrf.mxu1 }
 0x22f   : > { %2989 = vmatmul.bf16.gmra.mxu2 %v2905_v2  ;;  %v1532_v2 = vmul.f32 %v11259_v38, %v11259_v38  ;;  %v2376_v38 = vadd.f32 %v2375_v56, %v2270_v63  ;;  %v1604_v56 = vsel %vm1534_vm15, %v1533_v0, 0.0 }
 0x231   : > { %2561 = vperm.xlu2 %8994, %v1064_v59   ;;  %v2682_v59 = vsub.f32 0.0, %v2658_v9  ;;  %v2752_v9 = vadd.f32 1.0, %v11275_v31  ;;  %v1601_v8 = vsel %vm1534_vm15, %v1532_v2, 0.0  ;;  %v9055_v2 = vpop.eup %9054 }
 0x232   : > { %v2825_v45 = vmul.f32 %v9055_v2, %v9051_v50 }
 0x233   : > { %v11273_v27 = vpop.xlane.xlu2 %1587  ;;  %9056 = vrcp.f32 %v2752_v9 }
 0x234   : > { %14471 = vst [vmem:[#allocation95_spill] sm:$0xff] %v11273_v27  ;;  %v2849_v4 = vsel %vm2801_vm3, %v9055_v2, %v2825_v45 }
 0x236   : > { %v11279_v28 = vpop.permute.xlu0 %2516 }
 0x237   : > { %14473 = vst [vmem:[#allocation97_spill] sm:$0xff] %v11279_v28  ;;  %v2583_v35 = vmul.f32 %v11015_v40, %v11279_v28  ;;  %v2718_v28 = vmul.f32 1.442695, %v2682_v59 }
 0x239   : > { %v2607_v52 = vadd.f32 %v2583_v35, %v2438_v26  ;;  %2566 = vperm.xlu2 %8994, %v1065_v33   ;;  %v2871_v35 = vmul.f32 %v2847_v43, %v11210_v22  ;;  %v2439_v33 = vadd.f32 %v2415_v15, %v2376_v38  ;;  %9058 = vpow2.f32 %v2718_v28  ;;  %v9057_v0 = vpop.eup %9056 }
 0x23a   : > { %v2416_v38 = vmul.f32 %v11010_v61, %v11262_v19 }
 0x23b   : > { %v11295_v36 = vpop.permute.xlu2 %2521  ;;  %v11300_v26 = vadd.f32 %v11037_v24, %v2607_v52  ;;  %v2906_v22 = vpack.c.bf16 %v2871_v35, %v2870_v10  ;;  %v2378_v52 = vadd.f32 %v2377_v3, %v2272_v17  ;;  %v2417_v35 = vmul.f32 %v11010_v61, %v11293_v34  ;;  %v2382_v10 = vpop.f32.mrf.mxu1 }
 0x23c   : > { %14475 = vst [vmem:[#allocation99_spill] sm:$0xff] %v11295_v36  ;;  %v2584_v63 = vmul.f32 %v11015_v40, %v11295_v36  ;;  %1602 = vadd.xlane.f32.xlu0 %v1601_v8  ;;  %v2277_v8 = vpop.f32.mrf.mxu3  ;;  %v2418_v3 = vmul.f32 %v11010_v61, %v11273_v27 }
 0x23d   : > { %v2659_v42 = vand.u32 2147483647, %v11300_v26  ;;  %vm2803_vm1 = vcmp.ge.f32.partialorder %v11300_v26, 0.0 }
 0x23e   : > { %v2608_v13 = vadd.f32 %v2584_v63, %v2439_v33  ;;  %1605 = vadd.xlane.f32.xlu1 %v1604_v56  ;;  %v11318_v33 = vpop.permute.xlu0 %2536  ;;  %v2440_v63 = vadd.f32 %v2416_v38, %v2378_v52 }
 0x23f   : > { %v2683_v59 = vsub.f32 0.0, %v2659_v42  ;;  %2994 = vmatmul.bf16.gmra.mxu2 %v2906_v22  ;;  %v9059_v28 = vpop.eup %9058  ;;  %14478 = vst [vmem:[#allocation102_spill] sm:$0xff] %v11318_v33  ;;  %v2381_v42 = vadd.f32 %v2380_v47, %v2275_v62  ;;  %v2824_v22 = vmul.f32 %v9057_v0, %v11275_v31  ;;  %v2587_v38 = vmul.f32 %v11015_v40, %v11318_v33 }
 0x240   : > { %v11310_v15 = vadd.f32 %v11037_v24, %v2608_v13  ;;  %v2873_v33 = vmul.f32 %v2849_v4, %v11241_v7 }
 0x241   : > { %v2720_v43 = vmul.f32 1.442695, %v2683_v59  ;;  %v2383_v59 = vadd.f32 %v2382_v10, %v2277_v8  ;;  %v2441_v52 = vadd.f32 %v2417_v35, %v2381_v42 }
 0x242   : > { %v2660_v17 = vand.u32 2147483647, %v11310_v15  ;;  %vm2804_vm13 = vcmp.ge.f32.partialorder %v11310_v15, 0.0 }
 0x243   : > { %v11312_v5 = vpop.permute.xlu1 %2531  ;;  %v11314_v9 = vpop.permute.xlu2 %2526  ;;  %9060 = vpow2.f32 %v2720_v43  ;;  %v2754_v43 = vadd.f32 1.0, %v9059_v28  ;;  %v2442_v47 = vadd.f32 %v2418_v3, %v2383_v59 }
 0x244   : > { %14476 = vst [vmem:[#allocation100_spill] sm:$0xff] %v11312_v5  ;;  %v2585_v56 = vmul.f32 %v11015_v40, %v11314_v9  ;;  %v2586_v50 = vmul.f32 %v11015_v40, %v11312_v5  ;;  %v2684_v27 = vsub.f32 0.0, %v2660_v17 }
 0x245   : > { %14477 = vst [vmem:[#allocation101_spill] sm:$0xff] %v11314_v9  ;;  %v2611_v10 = vadd.f32 %v2587_v38, %v2442_v47  ;;  %9062 = vrcp.f32 %v2754_v43 }
 0x246   : > { %v2609_v13 = vadd.f32 %v2585_v56, %v2440_v63  ;;  %v2610_v63 = vadd.f32 %v2586_v50, %v2441_v52  ;;  %v2848_v56 = vsel %vm2800_vm6, %v9057_v0, %v2824_v22  ;;  %v2722_v5 = vmul.f32 1.442695, %v2684_v27 }
 0x247   : > { %v2872_v2 = vmul.f32 %v2848_v56, %v11246_v51  ;;  %v11342_v17 = vadd.f32 %v11037_v24, %v2611_v10 }
 0x248   : > { %v11332_v34 = vadd.f32 %v11037_v24, %v2609_v13  ;;  %v11339_v35 = vadd.f32 %v11037_v24, %v2610_v63 }
 0x249   : > { %v9061_v62 = vpop.eup %9060  ;;  %v2907_v3 = vpack.c.bf16 %v2873_v33, %v2872_v2  ;;  %v2663_v27 = vand.u32 2147483647, %v11342_v17  ;;  %vm2807_vm12 = vcmp.ge.f32.partialorder %v11342_v17, 0.0 }
 0x24a   : > { %v2755_v31 = vadd.f32 1.0, %v9061_v62  ;;  %v2661_v8 = vand.u32 2147483647, %v11332_v34  ;;  %v2662_v7 = vand.u32 2147483647, %v11339_v35  ;;  %vm2805_vm0 = vcmp.ge.f32.partialorder %v11332_v34, 0.0 }
 0x24b   : > { %v9063_v42 = vpop.eup %9062  ;;  %v2687_v38 = vsub.f32 0.0, %v2663_v27  ;;  %v11359_v27 = vpop.permute.xlu2 %2541  ;;  %vm2806_vm9 = vcmp.ge.f32.partialorder %v11339_v35, 0.0 }
 0x24c   : > { %9064 = vrcp.f32 %v2755_v31  ;;  %v2685_v45 = vsub.f32 0.0, %v2661_v8  ;;  %v2686_v13 = vsub.f32 0.0, %v2662_v7  ;;  %v2826_v22 = vmul.f32 %v9063_v42, %v9059_v28  ;;  %v2385_v7 = vpop.f32.mrf.mxu1  ;;  %14481 = vst [vmem:[#allocation103_spill] sm:$0xff] %v11359_v27 }
 0x24d   : > { %9066 = vpow2.f32 %v2722_v5  ;;  %v11350_v5 = vld [vmem:[%s14479_s30] ss:$0 sm:$0xff]  ;;  %s11654_s30 = scalar_lea.vmem %s14495_s8, %s10318_s1  ;;  %s11784_s8 = scalar_lea.vmem %s14496_s6, %s10363_s27 }
 0x24e   : > { %v2724_v0 = vmul.f32 1.442695, %v2685_v45  ;;  %v2726_v47 = vmul.f32 1.442695, %v2686_v13  ;;  %v2850_v63 = vsel %vm2802_vm4, %v9063_v42, %v2826_v22  ;;  %v1080_v30 = vld [vmem:[%s11654_s30 + $0x30] sm:$0xff]  ;;  %s14745_s27 = sld [smem:[#allocation149_spill]] }
 0x24f   : > { %2999 = vmatmul.bf16.gmra.mxu2 %v2907_v3  ;;  %v2874_v8 = vmul.f32 %v2850_v63, %v11266_v20 }
 0x250   : > { %9068 = vpow2.f32 %v2724_v0  ;;  %v2280_v0 = vpop.f32.mrf.mxu3 }
 0x252   : > { %v9065_v4 = vpop.eup %9064 }
 0x253   : > { %v2827_v51 = vmul.f32 %v9065_v4, %v9061_v62  ;;  %v9067_v50 = vpop.eup %9066  ;;  %v2728_v62 = vmul.f32 1.442695, %v2687_v38 }
 0x254   : > { %v2756_v52 = vadd.f32 1.0, %v9067_v50 }
 0x255   : > { %v2851_v43 = vsel %vm2803_vm1, %v9065_v4, %v2827_v51 }
 0x256   : > { %v9069_v59 = vpop.eup %9068  ;;  %v2875_v56 = vmul.f32 %v2851_v43, %v11300_v26 }
 0x257   : > { %v2757_v33 = vadd.f32 1.0, %v9069_v59 }
 0x258   : > { %v2908_v2 = vpack.c.bf16 %v2875_v56, %v2874_v8  ;;  %v2386_v56 = vadd.f32 %v2385_v7, %v2280_v0  ;;  %v11375_v7 = vpop.permute.xlu2 %2546 }
 0x259   : > { %9070 = vrcp.f32 %v2757_v33  ;;  %14483 = vst [vmem:[#allocation105_spill] sm:$0xff] %v11375_v7 }
 0x25a   : > { %9072 = vrcp.f32 %v2756_v52 }
 0x25b   : > { %9074 = vpow2.f32 %v2726_v47 }
 0x25c   : > { %v2975_v28 = vpop.f32.mrf.mxu2  ;;  %9076 = vpow2.f32 %v2728_v62 }
 0x25d   : > { %v11355_v31 = vadd.f32 %v11350_v5, %v2975_v28 }
 0x25f   : > { %v3035_v10 = vand.u32 2147483647, %v11355_v31  ;;  %v9071_v45 = vpop.eup %9070  ;;  %3004 = vmatmul.bf16.gmra.mxu2 %v2908_v2  ;;  %v2282_v2 = vpop.f32.mrf.mxu3  ;;  %vm3179_vm14 = vcmp.ge.f32.partialorder %v11355_v31, 0.0 }
 0x260   : > { %v9073_v42 = vpop.eup %9072  ;;  %v2829_v13 = vmul.f32 %v9071_v45, %v9069_v59 }
 0x261   : > { %v3059_v3 = vsub.f32 0.0, %v3035_v10  ;;  %v9075_v4 = vpop.eup %9074  ;;  %v2828_v38 = vmul.f32 %v9073_v42, %v9067_v50 }
 0x262   : > { %v9077_v22 = vpop.eup %9076  ;;  %v2758_v33 = vadd.f32 1.0, %v9075_v4  ;;  %v2853_v52 = vsel %vm2805_vm0, %v9071_v45, %v2829_v13  ;;  %v2588_v45 = vmul.f32 %v11015_v40, %v11359_v27 }
 0x263   : > { %v3083_v26 = vmul.f32 1.442695, %v3059_v3  ;;  %v2759_v47 = vadd.f32 1.0, %v9077_v22  ;;  %v2852_v28 = vsel %vm2804_vm13, %v9073_v42, %v2828_v38  ;;  %v2877_v50 = vmul.f32 %v2853_v52, %v11332_v34 }
 0x264   : > { %v2977_v51 = vpop.f32.mrf.mxu2  ;;  %v2876_v0 = vmul.f32 %v2852_v28, %v11310_v15 }
 0x265   : > { %9078 = vpow2.f32 %v3083_v26  ;;  %v11362_v20 = vadd.f32 %v11350_v5, %v2977_v51  ;;  %v2387_v51 = vpop.f32.mrf.mxu1 }
 0x266   : > { %9080 = vrcp.f32 %v2758_v33  ;;  %v2388_v38 = vadd.f32 %v2387_v51, %v2282_v2  ;;  %v11394_v51 = vld [vmem:[%s14097_s13] ss:$0 sm:$0xff] }
 0x267   : > { %v3036_v43 = vand.u32 2147483647, %v11362_v20  ;;  %9082 = vrcp.f32 %v2759_v47  ;;  %v2589_v47 = vmul.f32 %v11015_v40, %v11375_v7  ;;  %vm3180_vm2 = vcmp.ge.f32.partialorder %v11362_v20, 0.0 }
 0x269   : > { %v3060_v63 = vsub.f32 0.0, %v3036_v43  ;;  %v11366_v62 = vpop.xlane.xlu0 %1590  ;;  %v2909_v43 = vpack.c.bf16 %v2877_v50, %v2876_v0 }
 0x26a   : > { %14482 = vst [vmem:[#allocation104_spill] sm:$0xff] %v11366_v62  ;;  %v2419_v59 = vmul.f32 %v11010_v61, %v11366_v62 }
 0x26b   : > { %v9079_v8 = vpop.eup %9078  ;;  %v3085_v10 = vmul.f32 1.442695, %v3060_v63 }
 0x26c   : > { %v3131_v3 = vadd.f32 1.0, %v9079_v8  ;;  %v2443_v26 = vadd.f32 %v2419_v59, %v2386_v56  ;;  %v9081_v52 = vpop.eup %9080 }
 0x26d   : > { %9084 = vpow2.f32 %v3085_v10  ;;  %v9083_v15 = vpop.eup %9082 }
 0x26e   : > { %9086 = vrcp.f32 %v3131_v3  ;;  %v11377_v42 = vpop.xlane.xlu1 %1593  ;;  %v2612_v13 = vadd.f32 %v2588_v45, %v2443_v26  ;;  %v2830_v45 = vmul.f32 %v9081_v52, %v9075_v4  ;;  %v2831_v0 = vmul.f32 %v9083_v15, %v9077_v22 }
 0x26f   : > { %14484 = vst [vmem:[#allocation106_spill] sm:$0xff] %v11377_v42  ;;  %v2420_v34 = vmul.f32 %v11010_v61, %v11377_v42  ;;  %3009 = vmatmul.bf16.gmra.mxu2 %v2909_v43 }
 0x270   : > { %v11382_v33 = vadd.f32 %v11037_v24, %v2612_v13 }
 0x271   : > { %v2444_v63 = vadd.f32 %v2420_v34, %v2388_v38 }
 0x272   : > { %v2664_v56 = vand.u32 2147483647, %v11382_v33  ;;  %vm2808_vm10 = vcmp.ge.f32.partialorder %v11382_v33, 0.0 }
 0x273   : > { %v9085_v59 = vpop.eup %9084  ;;  %v2613_v28 = vadd.f32 %v2589_v47, %v2444_v63  ;;  %v2855_v47 = vsel %vm2807_vm12, %v9083_v15, %v2831_v0 }
 0x274   : > { %v9087_v10 = vpop.eup %9086  ;;  %v3132_v2 = vadd.f32 1.0, %v9085_v59  ;;  %v2688_v3 = vsub.f32 0.0, %v2664_v56 }
 0x275   : > { %v3203_v26 = vmul.f32 %v9087_v10, %v9079_v8  ;;  %v11388_v50 = vadd.f32 %v11037_v24, %v2613_v28  ;;  %v2854_v24 = vsel %vm2806_vm9, %v9081_v52, %v2830_v45  ;;  %v2879_v28 = vmul.f32 %v2855_v47, %v11342_v17  ;;  %v2285_v52 = vpop.f32.mrf.mxu3 }
 0x276   : > { %9088 = vrcp.f32 %v3132_v2  ;;  %v2730_v13 = vmul.f32 1.442695, %v2688_v3  ;;  %v2878_v22 = vmul.f32 %v2854_v24, %v11339_v35  ;;  %v2390_v35 = vpop.f32.mrf.mxu1 }
 0x277   : > { %v3227_v38 = vsel %vm3179_vm14, %v9087_v10, %v3203_v26  ;;  %v2665_v4 = vand.u32 2147483647, %v11388_v50  ;;  %v11407_v26 = vpop.xlane.xlu0 %1596  ;;  %vm2809_vm7 = vcmp.ge.f32.partialorder %v11388_v50, 0.0 }
 0x278   : > { %v11399_v8 = vmul.f32 %v3227_v38, %v11355_v31  ;;  %9090 = vpow2.f32 %v2730_v13  ;;  %v2910_v2 = vpack.c.bf16 %v2879_v28, %v2878_v22  ;;  %14486 = vst [vmem:[#allocation108_spill] sm:$0xff] %v11407_v26  ;;  %v2421_v0 = vmul.f32 %v11010_v61, %v11407_v26 }
 0x279   : > { %v2689_v34 = vsub.f32 0.0, %v2665_v4  ;;  %v2391_v38 = vadd.f32 %v2390_v35, %v2285_v52 }
 0x27a   : > { %14485 = vst [vmem:[#allocation107_spill] sm:$0xff] %v11399_v8  ;;  %v3279_v43 = vmul.f32 %v11394_v51, %v11399_v8 }
 0x27b   : > { %v2732_v63 = vmul.f32 1.442695, %v2689_v34  ;;  %v2445_v34 = vadd.f32 %v2421_v0, %v2391_v38 }
 0x27c   : > { %v9089_v56 = vpop.eup %9088  ;;  %3303 = vadd.xlane.f32.xlu2 %v3279_v43 }
 0x27d   : > { %v3204_v10 = vmul.f32 %v9089_v56, %v9085_v59  ;;  %9092 = vpow2.f32 %v2732_v63  ;;  %v2287_v43 = vpop.f32.mrf.mxu3 }
 0x27e   : > { %v9091_v31 = vpop.eup %9090  ;;  %v2392_v63 = vpop.f32.mrf.mxu1 }
 0x27f   : > { %v3228_v45 = vsel %vm3180_vm2, %v9089_v56, %v3204_v10  ;;  %v2760_v3 = vadd.f32 1.0, %v9091_v31  ;;  %3014 = vmatmul.bf16.gmra.mxu2 %v2910_v2  ;;  %v11423_v56 = vld [vmem:[%s14443_s10] ss:$0 sm:$0xff]  ;;  %v2393_v52 = vadd.f32 %v2392_v63, %v2287_v43 }
 0x280   : > { %v11410_v15 = vmul.f32 %v3228_v45, %v11362_v20 }
 0x281   : > { %9094 = vrcp.f32 %v2760_v3 }
 0x282   : > { %14487 = vst [vmem:[#allocation109_spill] sm:$0xff] %v11410_v15  ;;  %v3280_v17 = vmul.f32 %v11394_v51, %v11410_v15 }
 0x283   : > { %v9093_v59 = vpop.eup %9092 }
 0x284   : > { %3305 = vadd.xlane.f32.xlu0 %v3280_v17  ;;  %v2761_v13 = vadd.f32 1.0, %v9093_v59  ;;  %v11428_v2 = vpop.permute.xlu0 %2556 }
 0x285   : > { %14489 = vst [vmem:[#allocation111_spill] sm:$0xff] %v11428_v2  ;;  %v2591_v0 = vmul.f32 %v11015_v40, %v11428_v2 }
 0x286   : > { %v11416_v4 = vpop.permute.xlu1 %2551  ;;  %9096 = vrcp.f32 %v2761_v13 }
 0x287   : > { %14488 = vst [vmem:[#allocation110_spill] sm:$0xff] %v11416_v4  ;;  %v9095_v24 = vpop.eup %9094  ;;  %v2590_v20 = vmul.f32 %v11015_v40, %v11416_v4 }
 0x288   : > { %v2832_v22 = vmul.f32 %v9095_v24, %v9091_v31 }
 0x289   : > { %v2614_v47 = vadd.f32 %v2590_v20, %v2445_v34 }
 0x28a   : > { %v2856_v17 = vsel %vm2808_vm10, %v9095_v24, %v2832_v22 }
 0x28b   : > { %v11426_v28 = vadd.f32 %v11423_v56, %v2614_v47  ;;  %v2880_v20 = vmul.f32 %v2856_v17, %v11382_v33 }
 0x28c   : > { %v9097_v10 = vpop.eup %9096  ;;  %v11430_v45 = vpop.xlane.xlu2 %1599 }
 0x28d   : > { %14490 = vst [vmem:[#allocation112_spill] sm:$0xff] %v11430_v45  ;;  %v2666_v3 = vand.u32 2147483647, %v11426_v28  ;;  %v2422_v31 = vmul.f32 %v11010_v61, %v11430_v45  ;;  %v2833_v35 = vmul.f32 %v9097_v10, %v9093_v59  ;;  %vm2810_vm5 = vcmp.ge.f32.partialorder %v11426_v28, 0.0 }
 0x28f   : > { %v2690_v13 = vsub.f32 0.0, %v2666_v3  ;;  %v2446_v38 = vadd.f32 %v2422_v31, %v2393_v52  ;;  %v2857_v34 = vsel %vm2809_vm7, %v9097_v10, %v2833_v35 }
 0x290   : > { %v2881_v43 = vmul.f32 %v2857_v34, %v11388_v50 }
 0x291   : > { %v2734_v47 = vmul.f32 1.442695, %v2690_v13  ;;  %v2615_v63 = vadd.f32 %v2591_v0, %v2446_v38 }
 0x292   : > { %v2911_v4 = vpack.c.bf16 %v2881_v43, %v2880_v20  ;;  %v2980_v59 = vpop.f32.mrf.mxu2 }
 0x293   : > { %v11442_v26 = vadd.f32 %v11423_v56, %v2615_v63  ;;  %9098 = vpow2.f32 %v2734_v47  ;;  %v2981_v24 = vadd.f32 %v11350_v5, %v2980_v59  ;;  %v2290_v59 = vpop.f32.mrf.mxu3 }
 0x294   : > { %3019 = vmatmul.bf16.gmra.mxu2 %v2911_v4 }
 0x295   : > { %v2667_v22 = vand.u32 2147483647, %v11442_v26  ;;  %v3037_v3 = vand.u32 2147483647, %v2981_v24  ;;  %vm3181_vm11 = vcmp.ge.f32.partialorder %v2981_v24, 0.0  ;;  %vm2811_vm3 = vcmp.ge.f32.partialorder %v11442_v26, 0.0 }
 0x297   : > { %v2691_v52 = vsub.f32 0.0, %v2667_v22  ;;  %v3061_v10 = vsub.f32 0.0, %v3037_v3  ;;  %v2395_v3 = vpop.f32.mrf.mxu1 }
 0x299   : > { %v9099_v31 = vpop.eup %9098  ;;  %v2736_v33 = vmul.f32 1.442695, %v2691_v52  ;;  %v3087_v35 = vmul.f32 1.442695, %v3061_v10  ;;  %v11453_v10 = vpop.permute.xlu2 %2561 }
 0x29a   : > { %v2982_v50 = vpop.f32.mrf.mxu2  ;;  %v2762_v0 = vadd.f32 1.0, %v9099_v31  ;;  %14491 = vst [vmem:[#allocation113_spill] sm:$0xff] %v11453_v10 }
 0x29b   : > { %9100 = vpow2.f32 %v2736_v33  ;;  %v11447_v17 = vadd.f32 %v11350_v5, %v2982_v50 }
 0x29c   : > { %9102 = vpow2.f32 %v3087_v35 }
 0x29d   : > { %v3038_v13 = vand.u32 2147483647, %v11447_v17  ;;  %9104 = vrcp.f32 %v2762_v0  ;;  %vm3182_vm6 = vcmp.ge.f32.partialorder %v11447_v17, 0.0 }
 0x29f   : > { %v3062_v4 = vsub.f32 0.0, %v3038_v13  ;;  %v2397_v27 = vpop.f32.mrf.mxu1 }
 0x2a1   : > { %v9101_v38 = vpop.eup %9100  ;;  %v3089_v20 = vmul.f32 1.442695, %v3062_v4  ;;  %v11468_v9 = vpop.permute.xlu2 %2566 }
 0x2a2   : > { %v9103_v34 = vpop.eup %9102  ;;  %v2763_v43 = vadd.f32 1.0, %v9101_v38  ;;  %v2985_v63 = vpop.f32.mrf.mxu2  ;;  %14493 = vst [vmem:[#allocation115_spill] sm:$0xff] %v11468_v9 }
 0x2a3   : > { %v3133_v47 = vadd.f32 1.0, %v9103_v34  ;;  %9106 = vpow2.f32 %v3089_v20  ;;  %v11451_v22 = vadd.f32 %v11350_v5, %v2985_v63  ;;  %v9105_v52 = vpop.eup %9104 }
 0x2a4   : > { %v2834_v50 = vmul.f32 %v9105_v52, %v9099_v31 }
 0x2a5   : > { %9108 = vrcp.f32 %v3133_v47  ;;  %v3039_v33 = vand.u32 2147483647, %v11451_v22  ;;  %vm3183_vm1 = vcmp.ge.f32.partialorder %v11451_v22, 0.0 }
 0x2a6   : > { %9110 = vrcp.f32 %v2763_v43  ;;  %v2858_v42 = vsel %vm2810_vm5, %v9105_v52, %v2834_v50  ;;  %v2292_v43 = vpop.f32.mrf.mxu3 }
 0x2a7   : > { %v3063_v35 = vsub.f32 0.0, %v3039_v33  ;;  %v2882_v52 = vmul.f32 %v2858_v42, %v11426_v28  ;;  %v2593_v42 = vmul.f32 %v11015_v40, %v11468_v9 }
 0x2a9   : > { %v9107_v0 = vpop.eup %9106  ;;  %v3091_v13 = vmul.f32 1.442695, %v3063_v35 }
 0x2aa   : > { %v3134_v2 = vadd.f32 1.0, %v9107_v0  ;;  %v2987_v45 = vpop.f32.mrf.mxu2 }
 0x2ab   : > { %v9109_v4 = vpop.eup %9108  ;;  %9112 = vpow2.f32 %v3091_v13  ;;  %v11457_v20 = vadd.f32 %v11350_v5, %v2987_v45  ;;  %v2396_v13 = vadd.f32 %v2395_v3, %v2290_v59 }
 0x2ac   : > { %v9111_v7 = vpop.eup %9110  ;;  %v3205_v63 = vmul.f32 %v9109_v4, %v9103_v34  ;;  %9114 = vrcp.f32 %v3134_v2 }
 0x2ad   : > { %v2835_v47 = vmul.f32 %v9111_v7, %v9101_v38  ;;  %v3040_v31 = vand.u32 2147483647, %v11457_v20  ;;  %vm3184_vm4 = vcmp.ge.f32.partialorder %v11457_v20, 0.0 }
 0x2ae   : > { %v3229_v35 = vsel %vm3181_vm11, %v9109_v4, %v3205_v63  ;;  %v2398_v4 = vadd.f32 %v2397_v27, %v2292_v43  ;;  %v2592_v63 = vmul.f32 %v11015_v40, %v11453_v10 }
 0x2af   : > { %v11461_v33 = vpop.xlane.xlu0 %1602  ;;  %v11466_v34 = vmul.f32 %v3229_v35, %v2981_v24  ;;  %v2859_v62 = vsel %vm2811_vm3, %v9111_v7, %v2835_v47  ;;  %v3064_v2 = vsub.f32 0.0, %v3040_v31 }
 0x2b0   : > { %14492 = vst [vmem:[#allocation114_spill] sm:$0xff] %v11461_v33  ;;  %v2423_v45 = vmul.f32 %v11010_v61, %v11461_v33  ;;  %v2883_v50 = vmul.f32 %v2859_v62, %v11442_v26 }
 0x2b1   : > { %v11470_v38 = vpop.xlane.xlu1 %1605  ;;  %v9113_v24 = vpop.eup %9112  ;;  %v3093_v35 = vmul.f32 1.442695, %v3064_v2  ;;  %v3281_v7 = vmul.f32 %v11394_v51, %v11466_v34 }
 0x2b2   : > { %14494 = vst [vmem:[#allocation116_spill] sm:$0xff] %v11470_v38  ;;  %v2447_v59 = vadd.f32 %v2423_v45, %v2396_v13  ;;  %v2424_v3 = vmul.f32 %v11010_v61, %v11470_v38  ;;  %v2912_v47 = vpack.c.bf16 %v2883_v50, %v2882_v52  ;;  %v9115_v31 = vpop.eup %9114  ;;  %v3135_v28 = vadd.f32 1.0, %v9113_v24  ;;  %v2990_v27 = vpop.f32.mrf.mxu2 }
 0x2b3   : > { %9116 = vpow2.f32 %v3093_v35  ;;  %v11483_v43 = vadd.f32 %v11350_v5, %v2990_v27  ;;  %3307 = vadd.xlane.f32.xlu0 %v3281_v7  ;;  %v3206_v61 = vmul.f32 %v9115_v31, %v9107_v0 }
 0x2b4   : > { %v2448_v62 = vadd.f32 %v2424_v3, %v2398_v4  ;;  %v2616_v26 = vadd.f32 %v2592_v63, %v2447_v59  ;;  %3024 = vmatmul.bf16.gmra.mxu2 %v2912_v47  ;;  %9118 = vrcp.f32 %v3135_v28 }
 0x2b5   : > { %v3041_v40 = vand.u32 2147483647, %v11483_v43  ;;  %v3230_v2 = vsel %vm3182_vm6, %v9115_v31, %v3206_v61  ;;  %vm3185_vm0 = vcmp.ge.f32.partialorder %v11483_v43, 0.0 }
 0x2b6   : > { %v2617_v13 = vadd.f32 %v2593_v42, %v2448_v62  ;;  %v11487_v45 = vadd.f32 %v11423_v56, %v2616_v26  ;;  %v11491_v52 = vmul.f32 %v3230_v2, %v11447_v17 }
 0x2b7   : > { %v3065_v63 = vsub.f32 0.0, %v3041_v40 }
 0x2b8   : > { %v11494_v50 = vadd.f32 %v11423_v56, %v2617_v13  ;;  %v2668_v4 = vand.u32 2147483647, %v11487_v45  ;;  %v3282_v0 = vmul.f32 %v11394_v51, %v11491_v52  ;;  %vm2812_vm13 = vcmp.ge.f32.partialorder %v11487_v45, 0.0 }
 0x2b9   : > { %v9117_v35 = vpop.eup %9116  ;;  %v3095_v7 = vmul.f32 1.442695, %v3065_v63 }
 0x2ba   : > { %v2669_v59 = vand.u32 2147483647, %v11494_v50  ;;  %v2692_v3 = vsub.f32 0.0, %v2668_v4  ;;  %v9119_v47 = vpop.eup %9118  ;;  %v3136_v42 = vadd.f32 1.0, %v9117_v35  ;;  %v2992_v31 = vpop.f32.mrf.mxu2  ;;  %3309 = vadd.xlane.f32.xlu1 %v3282_v0  ;;  %vm2813_vm14 = vcmp.ge.f32.partialorder %v11494_v50, 0.0 }
 0x2bb   : > { %9120 = vpow2.f32 %v3095_v7  ;;  %v11501_v56 = vadd.f32 %v11350_v5, %v2992_v31  ;;  %v3207_v62 = vmul.f32 %v9119_v47, %v9113_v24 }
 0x2bc   : > { %v2693_v17 = vsub.f32 0.0, %v2669_v59  ;;  %v2738_v28 = vmul.f32 1.442695, %v2692_v3  ;;  %9122 = vrcp.f32 %v3136_v42 }
 0x2bd   : > { %v3042_v26 = vand.u32 2147483647, %v11501_v56  ;;  %v3231_v61 = vsel %vm3183_vm1, %v9119_v47, %v3207_v62  ;;  %vm3186_vm9 = vcmp.ge.f32.partialorder %v11501_v56, 0.0 }
 0x2be   : > { %v2740_v27 = vmul.f32 1.442695, %v2693_v17  ;;  %9124 = vpow2.f32 %v2738_v28  ;;  %v11506_v13 = vmul.f32 %v3231_v61, %v11451_v22 }
 0x2bf   : > { %v3066_v40 = vsub.f32 0.0, %v3042_v26 }
 0x2c0   : > { %9126 = vpow2.f32 %v2740_v27  ;;  %v3283_v2 = vmul.f32 %v11394_v51, %v11506_v13 }
 0x2c1   : > { %v9121_v4 = vpop.eup %9120  ;;  %v3097_v63 = vmul.f32 1.442695, %v3066_v40 }
 0x2c2   : > { %v9123_v0 = vpop.eup %9122  ;;  %v3137_v24 = vadd.f32 1.0, %v9121_v4  ;;  %3311 = vadd.xlane.f32.xlu2 %v3283_v2  ;;  %v2995_v59 = vpop.f32.mrf.mxu2 }
 0x2c3   : > { %9128 = vpow2.f32 %v3097_v63  ;;  %v11511_v7 = vadd.f32 %v11350_v5, %v2995_v59  ;;  %v3208_v47 = vmul.f32 %v9123_v0, %v9117_v35 }
 0x2c4   : > { %v9125_v3 = vpop.eup %9124  ;;  %9130 = vrcp.f32 %v3137_v24 }
 0x2c5   : > { %v2764_v22 = vadd.f32 1.0, %v9125_v3  ;;  %v3043_v31 = vand.u32 2147483647, %v11511_v7  ;;  %v3232_v17 = vsel %vm3184_vm4, %v9123_v0, %v3208_v47  ;;  %vm3187_vm12 = vcmp.ge.f32.partialorder %v11511_v7, 0.0 }
 0x2c6   : > { %v9127_v42 = vpop.eup %9126  ;;  %v11516_v62 = vmul.f32 %v3232_v17, %v11457_v20 }
 0x2c7   : > { %v2765_v28 = vadd.f32 1.0, %v9127_v42  ;;  %9132 = vrcp.f32 %v2764_v22  ;;  %v3067_v27 = vsub.f32 0.0, %v3043_v31 }
 0x2c8   : > { %v3284_v26 = vmul.f32 %v11394_v51, %v11516_v62 }
 0x2c9   : > { %9134 = vrcp.f32 %v2765_v28  ;;  %v9129_v61 = vpop.eup %9128  ;;  %v3099_v35 = vmul.f32 1.442695, %v3067_v27 }
 0x2ca   : > { %v9131_v40 = vpop.eup %9130  ;;  %v3138_v2 = vadd.f32 1.0, %v9129_v61  ;;  %3313 = vadd.xlane.f32.xlu0 %v3284_v26  ;;  %v2997_v63 = vpop.f32.mrf.mxu2 }
 0x2cb   : > { %9136 = vpow2.f32 %v3099_v35  ;;  %v11521_v24 = vadd.f32 %v11350_v5, %v2997_v63  ;;  %v3209_v0 = vmul.f32 %v9131_v40, %v9121_v4 }
 0x2cc   : > { %9138 = vrcp.f32 %v3138_v2 }
 0x2cd   : > { %v9133_v59 = vpop.eup %9132  ;;  %v3044_v47 = vand.u32 2147483647, %v11521_v24  ;;  %v3233_v22 = vsel %vm3185_vm0, %v9131_v40, %v3209_v0  ;;  %vm3188_vm2 = vcmp.ge.f32.partialorder %v11521_v24, 0.0 }
 0x2ce   : > { %v2836_v31 = vmul.f32 %v9133_v59, %v9125_v3  ;;  %v11526_v17 = vmul.f32 %v3233_v22, %v11483_v43 }
 0x2cf   : > { %v9135_v20 = vpop.eup %9134  ;;  %v3068_v27 = vsub.f32 0.0, %v3044_v47 }
 0x2d0   : > { %v2837_v28 = vmul.f32 %v9135_v20, %v9127_v42  ;;  %v2860_v26 = vsel %vm2812_vm13, %v9133_v59, %v2836_v31  ;;  %v3285_v4 = vmul.f32 %v11394_v51, %v11526_v17 }
 0x2d1   : > { %v9137_v2 = vpop.eup %9136  ;;  %v3101_v63 = vmul.f32 1.442695, %v3068_v27  ;;  %v2884_v9 = vmul.f32 %v2860_v26, %v11487_v45 }
 0x2d2   : > { %v2861_v35 = vsel %vm2813_vm14, %v9135_v20, %v2837_v28  ;;  %v9139_v40 = vpop.eup %9138  ;;  %v3139_v43 = vadd.f32 1.0, %v9137_v2  ;;  %3315 = vadd.xlane.f32.xlu1 %v3285_v4  ;;  %v3000_v0 = vpop.f32.mrf.mxu2 }
 0x2d3   : > { %v2885_v3 = vmul.f32 %v2861_v35, %v11494_v50  ;;  %9140 = vpow2.f32 %v3101_v63  ;;  %v3001_v42 = vadd.f32 %v11350_v5, %v3000_v0  ;;  %v3210_v22 = vmul.f32 %v9139_v40, %v9129_v61 }
 0x2d4   : > { %9142 = vrcp.f32 %v3139_v43 }
 0x2d5   : > { %v2913_v47 = vpack.c.bf16 %v2885_v3, %v2884_v9  ;;  %v3045_v59 = vand.u32 2147483647, %v3001_v42  ;;  %v3234_v20 = vsel %vm3186_vm9, %v9139_v40, %v3210_v22  ;;  %vm3189_vm10 = vcmp.ge.f32.partialorder %v3001_v42, 0.0 }
 0x2d6   : > { %v11537_v31 = vmul.f32 %v3234_v20, %v11501_v56 }
 0x2d7   : > { %3029 = vmatmul.bf16.gmra.mxu2 %v2913_v47  ;;  %v3069_v45 = vsub.f32 0.0, %v3045_v59 }
 0x2d8   : > { %v3286_v50 = vmul.f32 %v11394_v51, %v11537_v31 }
 0x2d9   : > { %v9141_v28 = vpop.eup %9140  ;;  %v3103_v27 = vmul.f32 1.442695, %v3069_v45 }
 0x2da   : > { %v9143_v26 = vpop.eup %9142  ;;  %v3140_v4 = vadd.f32 1.0, %v9141_v28  ;;  %3317 = vadd.xlane.f32.xlu2 %v3286_v50  ;;  %v3002_v9 = vpop.f32.mrf.mxu2 }
 0x2db   : > { %9144 = vpow2.f32 %v3103_v27  ;;  %v3003_v61 = vadd.f32 %v11350_v5, %v3002_v9  ;;  %v3211_v35 = vmul.f32 %v9143_v26, %v9137_v2 }
 0x2dc   : > { %9146 = vrcp.f32 %v3140_v4 }
 0x2dd   : > { %v3046_v63 = vand.u32 2147483647, %v3003_v61  ;;  %v3235_v56 = vsel %vm3187_vm12, %v9143_v26, %v3211_v35  ;;  %vm3190_vm7 = vcmp.ge.f32.partialorder %v3003_v61, 0.0 }
 0x2de   : > { %v11544_v3 = vmul.f32 %v3235_v56, %v11511_v7 }
 0x2df   : > { %v3070_v40 = vsub.f32 0.0, %v3046_v63 }
 0x2e0   : > { %v3287_v43 = vmul.f32 %v11394_v51, %v11544_v3 }
 0x2e1   : > { %v9145_v0 = vpop.eup %9144  ;;  %v3105_v47 = vmul.f32 1.442695, %v3070_v40 }
 0x2e2   : > { %v9147_v22 = vpop.eup %9146  ;;  %v3141_v59 = vadd.f32 1.0, %v9145_v0  ;;  %3319 = vadd.xlane.f32.xlu1 %v3287_v43  ;;  %v3005_v20 = vpop.f32.mrf.mxu2 }
 0x2e3   : > { %9148 = vpow2.f32 %v3105_v47  ;;  %v3006_v2 = vadd.f32 %v11350_v5, %v3005_v20  ;;  %v3212_v45 = vmul.f32 %v9147_v22, %v9141_v28 }
 0x2e4   : > { %9150 = vrcp.f32 %v3141_v59 }
 0x2e5   : > { %v3047_v50 = vand.u32 2147483647, %v3006_v2  ;;  %v3236_v7 = vsel %vm3188_vm2, %v9147_v22, %v3212_v45  ;;  %vm3191_vm5 = vcmp.ge.f32.partialorder %v3006_v2, 0.0 }
 0x2e6   : > { %v11551_v27 = vmul.f32 %v3236_v7, %v11521_v24 }
 0x2e7   : > { %v3071_v26 = vsub.f32 0.0, %v3047_v50 }
 0x2e8   : > { %v3288_v4 = vmul.f32 %v11394_v51, %v11551_v27 }
 0x2e9   : > { %v9149_v9 = vpop.eup %9148  ;;  %v3107_v35 = vmul.f32 1.442695, %v3071_v26 }
 0x2ea   : > { %v9151_v63 = vpop.eup %9150  ;;  %v3142_v56 = vadd.f32 1.0, %v9149_v9  ;;  %3321 = vadd.xlane.f32.xlu0 %v3288_v4  ;;  %v3007_v40 = vpop.f32.mrf.mxu2 }
 0x2eb   : > { %9152 = vpow2.f32 %v3107_v35  ;;  %v3008_v28 = vadd.f32 %v11350_v5, %v3007_v40  ;;  %v3213_v43 = vmul.f32 %v9151_v63, %v9145_v0 }
 0x2ec   : > { %9154 = vrcp.f32 %v3142_v56 }
 0x2ed   : > { %v3048_v47 = vand.u32 2147483647, %v3008_v28  ;;  %v3237_v22 = vsel %vm3189_vm10, %v9151_v63, %v3213_v43  ;;  %vm3192_vm11 = vcmp.ge.f32.partialorder %v3008_v28, 0.0 }
 0x2ee   : > { %v11556_v24 = vmul.f32 %v3237_v22, %v3001_v42 }
 0x2ef   : > { %v3072_v59 = vsub.f32 0.0, %v3048_v47 }
 0x2f0   : > { %v3289_v20 = vmul.f32 %v11394_v51, %v11556_v24 }
 0x2f1   : > { %v9153_v45 = vpop.eup %9152  ;;  %v3109_v50 = vmul.f32 1.442695, %v3072_v59 }
 0x2f2   : > { %v9155_v7 = vpop.eup %9154  ;;  %v3143_v26 = vadd.f32 1.0, %v9153_v45  ;;  %3323 = vadd.xlane.f32.xlu1 %v3289_v20  ;;  %v3010_v4 = vpop.f32.mrf.mxu2 }
 0x2f3   : > { %9156 = vpow2.f32 %v3109_v50  ;;  %v3011_v35 = vadd.f32 %v11350_v5, %v3010_v4  ;;  %v3214_v0 = vmul.f32 %v9155_v7, %v9149_v9 }
 0x2f4   : > { %9158 = vrcp.f32 %v3143_v26 }
 0x2f5   : > { %v3049_v56 = vand.u32 2147483647, %v3011_v35  ;;  %v3238_v63 = vsel %vm3190_vm7, %v9155_v7, %v3214_v0  ;;  %vm3193_vm3 = vcmp.ge.f32.partialorder %v3011_v35, 0.0 }
 0x2f6   : > { %v11561_v42 = vmul.f32 %v3238_v63, %v3003_v61 }
 0x2f7   : > { %v3073_v40 = vsub.f32 0.0, %v3049_v56 }
 0x2f8   : > { %v3290_v43 = vmul.f32 %v11394_v51, %v11561_v42 }
 0x2f9   : > { %v9157_v47 = vpop.eup %9156  ;;  %v3111_v22 = vmul.f32 1.442695, %v3073_v40 }
 0x2fa   : > { %v9159_v59 = vpop.eup %9158  ;;  %v3144_v38 = vadd.f32 1.0, %v9157_v47  ;;  %3325 = vadd.xlane.f32.xlu0 %v3290_v43  ;;  %v3012_v20 = vpop.f32.mrf.mxu2 }
 0x2fb   : > { %9160 = vpow2.f32 %v3111_v22  ;;  %v3013_v50 = vadd.f32 %v11350_v5, %v3012_v20  ;;  %v3215_v9 = vmul.f32 %v9159_v59, %v9153_v45 }
 0x2fc   : > { %9162 = vrcp.f32 %v3144_v38 }
 0x2fd   : > { %v3050_v26 = vand.u32 2147483647, %v3013_v50  ;;  %v3239_v7 = vsel %vm3191_vm5, %v9159_v59, %v3215_v9  ;;  %vm3194_vm6 = vcmp.ge.f32.partialorder %v3013_v50, 0.0 }
 0x2fe   : > { %v11566_v61 = vmul.f32 %v3239_v7, %v3006_v2 }
 0x2ff   : > { %v3074_v4 = vsub.f32 0.0, %v3050_v26 }
 0x300   : > { %v3291_v0 = vmul.f32 %v11394_v51, %v11566_v61 }
 0x301   : > { %v9161_v56 = vpop.eup %9160  ;;  %v3113_v63 = vmul.f32 1.442695, %v3074_v4 }
 0x302   : > { %v9163_v40 = vpop.eup %9162  ;;  %v3145_v10 = vadd.f32 1.0, %v9161_v56  ;;  %3327 = vadd.xlane.f32.xlu2 %v3291_v0  ;;  %v3015_v43 = vpop.f32.mrf.mxu2 }
 0x303   : > { %9164 = vpow2.f32 %v3113_v63  ;;  %v3016_v22 = vadd.f32 %v11350_v5, %v3015_v43  ;;  %v3216_v45 = vmul.f32 %v9163_v40, %v9157_v47 }
 0x304   : > { %9166 = vrcp.f32 %v3145_v10 }
 0x305   : > { %v3051_v38 = vand.u32 2147483647, %v3016_v22  ;;  %v3240_v59 = vsel %vm3192_vm11, %v9163_v40, %v3216_v45  ;;  %vm3195_vm1 = vcmp.ge.f32.partialorder %v3016_v22, 0.0 }
 0x306   : > { %v11571_v2 = vmul.f32 %v3240_v59, %v3008_v28 }
 0x307   : > { %v3075_v20 = vsub.f32 0.0, %v3051_v38 }
 0x308   : > { %v3292_v9 = vmul.f32 %v11394_v51, %v11571_v2 }
 0x309   : > { %v9165_v26 = vpop.eup %9164  ;;  %v3115_v7 = vmul.f32 1.442695, %v3075_v20 }
 0x30a   : > { %v9167_v4 = vpop.eup %9166  ;;  %v3146_v33 = vadd.f32 1.0, %v9165_v26  ;;  %3329 = vadd.xlane.f32.xlu0 %v3292_v9  ;;  %v3017_v0 = vpop.f32.mrf.mxu2 }
 0x30b   : > { %9168 = vpow2.f32 %v3115_v7  ;;  %v3018_v63 = vadd.f32 %v11350_v5, %v3017_v0  ;;  %v3217_v47 = vmul.f32 %v9167_v4, %v9161_v56 }
 0x30c   : > { %9170 = vrcp.f32 %v3146_v33 }
 0x30d   : > { %v3052_v10 = vand.u32 2147483647, %v3018_v63  ;;  %v3241_v40 = vsel %vm3193_vm3, %v9167_v4, %v3217_v47  ;;  %vm3196_vm4 = vcmp.ge.f32.partialorder %v3018_v63, 0.0 }
 0x30e   : > { %v11576_v28 = vmul.f32 %v3241_v40, %v3011_v35 }
 0x30f   : > { %v3076_v43 = vsub.f32 0.0, %v3052_v10 }
 0x310   : > { %v3293_v45 = vmul.f32 %v11394_v51, %v11576_v28 }
 0x311   : > { %v9169_v38 = vpop.eup %9168  ;;  %v3117_v59 = vmul.f32 1.442695, %v3076_v43 }
 0x312   : > { %v9171_v20 = vpop.eup %9170  ;;  %v3147_v19 = vadd.f32 1.0, %v9169_v38  ;;  %3331 = vadd.xlane.f32.xlu0 %v3293_v45 }
 0x313   : > { %9172 = vpow2.f32 %v3117_v59  ;;  %v3218_v9 = vmul.f32 %v9171_v20, %v9165_v26 }
 0x314   : > { %9174 = vrcp.f32 %v3147_v19 }
 0x315   : > { %v3242_v7 = vsel %vm3194_vm6, %v9171_v20, %v3218_v9 }
 0x316   : > { %v11581_v4 = vmul.f32 %v3242_v7, %v3013_v50 }
 0x317   : > { %v3020_v56 = vpop.f32.mrf.mxu2 }
 0x318   : > { %v3021_v33 = vadd.f32 %v11350_v5, %v3020_v56  ;;  %v3294_v0 = vmul.f32 %v11394_v51, %v11581_v4 }
 0x319   : > { %v9173_v47 = vpop.eup %9172 }
 0x31a   : > { %v3053_v35 = vand.u32 2147483647, %v3021_v33  ;;  %v9175_v10 = vpop.eup %9174  ;;  %v3148_v40 = vadd.f32 1.0, %v9173_v47  ;;  %3333 = vadd.xlane.f32.xlu1 %v3294_v0  ;;  %vm3197_vm0 = vcmp.ge.f32.partialorder %v3021_v33, 0.0 }
 0x31b   : > { %v3219_v45 = vmul.f32 %v9175_v10, %v9169_v38 }
 0x31c   : > { %v3077_v43 = vsub.f32 0.0, %v3053_v35  ;;  %9176 = vrcp.f32 %v3148_v40 }
 0x31d   : > { %v3243_v59 = vsel %vm3195_vm1, %v9175_v10, %v3219_v45 }
 0x31e   : > { %v3119_v26 = vmul.f32 1.442695, %v3077_v43  ;;  %v11586_v50 = vmul.f32 %v3243_v59, %v3016_v22 }
 0x31f   : > { %v3022_v19 = vpop.f32.mrf.mxu2 }
 0x320   : > { %9178 = vpow2.f32 %v3119_v26  ;;  %v3023_v20 = vadd.f32 %v11350_v5, %v3022_v19  ;;  %v3295_v56 = vmul.f32 %v11394_v51, %v11586_v50 }
 0x322   : > { %v3054_v9 = vand.u32 2147483647, %v3023_v20  ;;  %v9177_v7 = vpop.eup %9176  ;;  %3335 = vadd.xlane.f32.xlu1 %v3295_v56  ;;  %vm3198_vm13 = vcmp.ge.f32.partialorder %v3023_v20, 0.0 }
 0x323   : > { %v3220_v35 = vmul.f32 %v9177_v7, %v9173_v47 }
 0x324   : > { %v3078_v36 = vsub.f32 0.0, %v3054_v9 }
 0x325   : > { %v3244_v43 = vsel %vm3196_vm4, %v9177_v7, %v3220_v35 }
 0x326   : > { %v9179_v0 = vpop.eup %9178  ;;  %v3121_v38 = vmul.f32 1.442695, %v3078_v36  ;;  %v11590_v10 = vmul.f32 %v3244_v43, %v3018_v63 }
 0x327   : > { %v3149_v40 = vadd.f32 1.0, %v9179_v0 }
 0x328   : > { %9180 = vpow2.f32 %v3121_v38  ;;  %v3296_v22 = vmul.f32 %v11394_v51, %v11590_v10 }
 0x329   : > { %9182 = vrcp.f32 %v3149_v40 }
 0x32a   : > { %3337 = vadd.xlane.f32.xlu2 %v3296_v22 }
 0x32e   : > { %v9181_v45 = vpop.eup %9180 }
 0x32f   : > { %v9183_v26 = vpop.eup %9182  ;;  %v3150_v19 = vadd.f32 1.0, %v9181_v45 }
 0x330   : > { %v3221_v59 = vmul.f32 %v9183_v26, %v9179_v0 }
 0x331   : > { %9184 = vrcp.f32 %v3150_v19 }
 0x332   : > { %v3245_v47 = vsel %vm3197_vm0, %v9183_v26, %v3221_v59 }
 0x333   : > { %v11594_v9 = vmul.f32 %v3245_v47, %v3021_v33 }
 0x335   : > { %v3297_v36 = vmul.f32 %v11394_v51, %v11594_v9 }
 0x337   : > { %v9185_v56 = vpop.eup %9184  ;;  %3339 = vadd.xlane.f32.xlu0 %v3297_v36  ;;  %v3025_v63 = vpop.f32.mrf.mxu2 }
 0x338   : > { %v3222_v7 = vmul.f32 %v9185_v56, %v9181_v45  ;;  %v3026_v35 = vadd.f32 %v11350_v5, %v3025_v63  ;;  %v11604_v45 = vpop.xlane.xlu1 %3309 }
 0x33a   : > { %v3246_v38 = vsel %vm3198_vm13, %v9185_v56, %v3222_v7  ;;  %v3055_v40 = vand.u32 2147483647, %v3026_v35  ;;  %vm3199_vm14 = vcmp.ge.f32.partialorder %v3026_v35, 0.0 }
 0x33b   : > { %v11599_v43 = vmul.f32 %v3246_v38, %v3023_v20  ;;  %v11606_v20 = vpop.xlane.xlu0 %3305 }
 0x33c   : > { %v3079_v0 = vsub.f32 0.0, %v3055_v40 }
 0x33d   : > { %v3298_v22 = vmul.f32 %v11394_v51, %v11599_v43 }
 0x33e   : > { %v3123_v33 = vmul.f32 1.442695, %v3079_v0 }
 0x33f   : > { %3341 = vadd.xlane.f32.xlu1 %v3298_v22  ;;  %v3027_v26 = vpop.f32.mrf.mxu2 }
 0x340   : > { %v3028_v19 = vadd.f32 %v11350_v5, %v3027_v26  ;;  %9186 = vpow2.f32 %v3123_v33  ;;  %v11608_v5 = vpop.xlane.xlu2 %3303 }
 0x342   : > { %v3056_v59 = vand.u32 2147483647, %v3028_v19  ;;  %vm3200_vm9 = vcmp.ge.f32.partialorder %v3028_v19, 0.0 }
 0x344   : > { %v3080_v47 = vsub.f32 0.0, %v3056_v59  ;;  %v11615_v59 = vld [vmem:[%s14098_s14] ss:$0 sm:$0xff] }
 0x345   : > { %v3316_v7 = vpop.xlane.xlu1 %3315 }
 0x346   : > { %v3125_v36 = vmul.f32 1.442695, %v3080_v47  ;;  %v9187_v63 = vpop.eup %9186  ;;  %v11617_v47 = vpop.xlane.xlu0 %3307 }
 0x347   : > { %v3151_v56 = vadd.f32 1.0, %v9187_v63 }
 0x348   : > { %9188 = vpow2.f32 %v3125_v36 }
 0x349   : > { %9190 = vrcp.f32 %v3151_v56 }
 0x34e   : > { %v9189_v38 = vpop.eup %9188 }
 0x34f   : > { %v9191_v40 = vpop.eup %9190  ;;  %v3152_v0 = vadd.f32 1.0, %v9189_v38 }
 0x350   : > { %v3223_v22 = vmul.f32 %v9191_v40, %v9187_v63 }
 0x351   : > { %9192 = vrcp.f32 %v3152_v0 }
 0x352   : > { %v3247_v33 = vsel %vm3199_vm14, %v9191_v40, %v3223_v22 }
 0x353   : > { %v11610_v26 = vmul.f32 %v3247_v33, %v3026_v35  ;;  %v9987_v35 = vld [vmem:[%s14480_s0] ss:$0 sm:$0xff]  ;;  %v11627_v33 = vpop.xlane.xlu2 %3311 }
 0x355   : > { %v3320_v36 = vpop.xlane.xlu1 %3319  ;;  %v3299_v56 = vmul.f32 %v11394_v51, %v11610_v26 }
 0x356   : > { %v3363_v63 = vadd.f32 %v11615_v59, %v3320_v36 }
 0x357   : > { %v9193_v49 = vpop.eup %9192  ;;  %3343 = vadd.xlane.f32.xlu1 %v3299_v56  ;;  %v11632_v56 = vpop.xlane.xlu0 %3313 }
 0x358   : > { %v3387_v0 = vand.u32 2147483647, %v3363_v63  ;;  %v3224_v40 = vmul.f32 %v9193_v49, %v9189_v38  ;;  %vm3531_vm12 = vcmp.ge.f32.partialorder %v3363_v63, 0.0 }
 0x35a   : > { %v3030_v18 = vpop.f32.mrf.mxu2  ;;  %v3411_v14 = vsub.f32 0.0, %v3387_v0  ;;  %v3248_v37 = vsel %vm3200_vm9, %v9193_v49, %v3224_v40 }
 0x35b   : > { %v11625_v22 = vadd.f32 %v9987_v35, %v3030_v18  ;;  %v11630_v54 = vmul.f32 %v3248_v37, %v3028_v19  ;;  %v11637_v18 = vadd.f32 %v11615_v59, %v3316_v7  ;;  %v3318_v0 = vpop.xlane.xlu2 %3317 }
 0x35c   : > { %v3443_v36 = vmul.f32 1.442695, %v3411_v14 }
 0x35d   : > { %v3057_v32 = vand.u32 2147483647, %v11625_v22  ;;  %v3300_v38 = vmul.f32 %v11394_v51, %v11630_v54  ;;  %v3385_v19 = vand.u32 2147483647, %v11637_v18  ;;  %vm3201_vm2 = vcmp.ge.f32.partialorder %v11625_v22, 0.0 }
 0x35e   : > { %9194 = vpow2.f32 %v3443_v36  ;;  %vm3529_vm5 = vcmp.ge.f32.partialorder %v11637_v18, 0.0 }
 0x35f   : > { %v3081_v12 = vsub.f32 0.0, %v3057_v32  ;;  %3345 = vadd.xlane.f32.xlu0 %v3300_v38  ;;  %v11644_v32 = vadd.f32 %v11615_v59, %v3318_v0  ;;  %v3409_v38 = vsub.f32 0.0, %v3385_v19 }
 0x361   : > { %v3127_v6 = vmul.f32 1.442695, %v3081_v12  ;;  %v3322_v12 = vpop.xlane.xlu0 %3321  ;;  %v3439_v29 = vmul.f32 1.442695, %v3409_v38  ;;  %vm3530_vm11 = vcmp.ge.f32.partialorder %v11644_v32, 0.0 }
 0x362   : > { %v3032_v41 = vpop.f32.mrf.mxu2 }
 0x363   : > { %9196 = vpow2.f32 %v3127_v6  ;;  %v11639_v49 = vadd.f32 %v9987_v35, %v3032_v41  ;;  %v3386_v41 = vand.u32 2147483647, %v11644_v32  ;;  %v11648_v35 = vadd.f32 %v11615_v59, %v3322_v12 }
 0x364   : > { %v9195_v14 = vpop.eup %9194 }
 0x365   : > { %v3058_v37 = vand.u32 2147483647, %v11639_v49  ;;  %v3483_v51 = vadd.f32 1.0, %v9195_v14  ;;  %v3324_v58 = vpop.xlane.xlu1 %3323  ;;  %vm3202_vm10 = vcmp.ge.f32.partialorder %v11639_v49, 0.0  ;;  %vm3532_vm3 = vcmp.ge.f32.partialorder %v11648_v35, 0.0 }
 0x366   : > { %v11657_v19 = vadd.f32 %v11615_v59, %v3324_v58 }
 0x367   : > { %v3082_v40 = vsub.f32 0.0, %v3058_v37  ;;  %9198 = vrcp.f32 %v3483_v51  ;;  %v3410_v37 = vsub.f32 0.0, %v3386_v41 }
 0x368   : > { %v3389_v58 = vand.u32 2147483647, %v11657_v19  ;;  %vm3533_vm6 = vcmp.ge.f32.partialorder %v11657_v19, 0.0 }
 0x369   : > { %v9197_v36 = vpop.eup %9196  ;;  %v3129_v7 = vmul.f32 1.442695, %v3082_v40  ;;  %v3441_v41 = vmul.f32 1.442695, %v3410_v37 }
 0x36a   : > { %v3153_v6 = vadd.f32 1.0, %v9197_v36 }
 0x36b   : > { %9200 = vpow2.f32 %v3129_v7  ;;  %v3388_v7 = vand.u32 2147483647, %v11648_v35 }
 0x36c   : > { %9202 = vrcp.f32 %v3153_v6  ;;  %v1082_v6 = vld [vmem:[%s11654_s30 + $0x40] sm:$0xff] }
 0x36d   : > { %v9199_v0 = vpop.eup %9198  ;;  %v3326_v51 = vpop.xlane.xlu0 %3325  ;;  %9204 = vpow2.f32 %v3439_v29  ;;  %v3413_v29 = vsub.f32 0.0, %v3389_v58 }
 0x36e   : > { %v3555_v40 = vmul.f32 %v9199_v0, %v9195_v14  ;;  %v11661_v12 = vadd.f32 %v11615_v59, %v3326_v51  ;;  %v3412_v14 = vsub.f32 0.0, %v3388_v7 }
 0x370   : > { %v3579_v16 = vsel %vm3531_vm12, %v9199_v0, %v3555_v40  ;;  %v3390_v23 = vand.u32 2147483647, %v11661_v12  ;;  %v3445_v37 = vmul.f32 1.442695, %v3412_v14  ;;  %vm3534_vm7 = vcmp.ge.f32.partialorder %v11661_v12, 0.0 }
 0x371   : > { %v9201_v38 = vpop.eup %9200  ;;  %v3603_v1 = vmul.f32 %v3579_v16, %v1082_v6 }
 0x372   : > { %v9203_v44 = vpop.eup %9202  ;;  %v3154_v11 = vadd.f32 1.0, %v9201_v38  ;;  %v3414_v51 = vsub.f32 0.0, %v3390_v23 }
 0x373   : > { %v3225_v53 = vmul.f32 %v9203_v44, %v9197_v36  ;;  %3661 = vperm.xlu2 %8994, %v3603_v1   ;;  %v9205_v40 = vpop.eup %9204  ;;  %v3447_v1 = vmul.f32 1.442695, %v3413_v29 }
 0x374   : > { %9206 = vrcp.f32 %v3154_v11  ;;  %v3449_v57 = vmul.f32 1.442695, %v3414_v51  ;;  %v9988_v11 = vld [vmem:[%s14097_s13] ss:$0 sm:$0xff] }
 0x375   : > { %v3249_v46 = vsel %vm3201_vm2, %v9203_v44, %v3225_v53  ;;  %9208 = vpow2.f32 %v3441_v41  ;;  %v3328_v0 = vpop.xlane.xlu2 %3327 }
 0x376   : > { %v11668_v63 = vmul.f32 %v3249_v46, %v11625_v22  ;;  %9210 = vpow2.f32 %v3449_v57  ;;  %v11671_v16 = vadd.f32 %v11615_v59, %v3328_v0  ;;  %v3481_v22 = vadd.f32 1.0, %v9205_v40 }
 0x377   : > { %9212 = vpow2.f32 %v3445_v37 }
 0x378   : > { %v3301_v23 = vmul.f32 %v9988_v11, %v11668_v63  ;;  %v3391_v46 = vand.u32 2147483647, %v11671_v16  ;;  %9214 = vpow2.f32 %v3447_v1  ;;  %vm3535_vm4 = vcmp.ge.f32.partialorder %v11671_v16, 0.0 }
 0x379   : > { %9216 = vrcp.f32 %v3481_v22 }
 0x37a   : > { %v9207_v53 = vpop.eup %9206  ;;  %3347 = vadd.xlane.f32.xlu1 %v3301_v23  ;;  %v3415_v58 = vsub.f32 0.0, %v3391_v46 }
 0x37b   : > { %v3226_v44 = vmul.f32 %v9207_v53, %v9201_v38  ;;  %v9209_v57 = vpop.eup %9208 }
 0x37c   : > { %v9211_v7 = vpop.eup %9210  ;;  %v3482_v51 = vadd.f32 1.0, %v9209_v57  ;;  %v3451_v23 = vmul.f32 1.442695, %v3415_v58 }
 0x37d   : > { %v3250_v36 = vsel %vm3202_vm10, %v9207_v53, %v3226_v44  ;;  %v3486_v41 = vadd.f32 1.0, %v9211_v7  ;;  %v3330_v14 = vpop.xlane.xlu0 %3329  ;;  %v9213_v0 = vpop.eup %9212 }
 0x37e   : > { %v11680_v6 = vmul.f32 %v3250_v36, %v11639_v49  ;;  %v11683_v29 = vadd.f32 %v11615_v59, %v3330_v14  ;;  %v9215_v53 = vpop.eup %9214  ;;  %v3484_v1 = vadd.f32 1.0, %v9213_v0 }
 0x37f   : > { %9218 = vrcp.f32 %v3486_v41  ;;  %v9217_v46 = vpop.eup %9216  ;;  %v3485_v14 = vadd.f32 1.0, %v9215_v53  ;;  %v1085_v41 = vld [vmem:[%s11654_s30 + $0x58] sm:$0xff] }
 0x380   : > { %v3302_v38 = vmul.f32 %v9988_v11, %v11680_v6  ;;  %v3392_v37 = vand.u32 2147483647, %v11683_v29  ;;  %9220 = vrcp.f32 %v3482_v51  ;;  %v3553_v51 = vmul.f32 %v9217_v46, %v9205_v40 }
 0x381   : > { %9222 = vpow2.f32 %v3451_v23  ;;  %vm3536_vm1 = vcmp.ge.f32.partialorder %v11683_v29, 0.0 }
 0x382   : > { %3349 = vadd.xlane.f32.xlu0 %v3302_v38  ;;  %v3416_v49 = vsub.f32 0.0, %v3392_v37 }
 0x384   : > { %v3453_v44 = vmul.f32 1.442695, %v3416_v49 }
 0x385   : > { %v9219_v22 = vpop.eup %9218  ;;  %v3332_v36 = vpop.xlane.xlu0 %3331 }
 0x386   : > { %9224 = vpow2.f32 %v3453_v44  ;;  %v11688_v11 = vadd.f32 %v11615_v59, %v3332_v36  ;;  %v3558_v48 = vmul.f32 %v9219_v22, %v9211_v7  ;;  %v9221_v58 = vpop.eup %9220  ;;  %v3577_v7 = vsel %vm3529_vm5, %v9217_v46, %v3553_v51 }
 0x387   : > { %9226 = vrcp.f32 %v3484_v1  ;;  %v9223_v39 = vpop.eup %9222  ;;  %v3554_v44 = vmul.f32 %v9221_v58, %v9209_v57  ;;  %v3601_v18 = vmul.f32 %v3577_v7, %v1080_v30  ;;  %v1081_v57 = vld [vmem:[%s11654_s30 + $0x38] sm:$0xff]  ;;  %v1084_v7 = vld [vmem:[%s11654_s30 + $0x50] sm:$0xff] }
 0x388   : > { %v3393_v38 = vand.u32 2147483647, %v11688_v11  ;;  %v3582_v37 = vsel %vm3534_vm7, %v9219_v22, %v3558_v48  ;;  %9228 = vrcp.f32 %v3485_v14  ;;  %v3487_v40 = vadd.f32 1.0, %v9223_v39 }
 0x389   : > { %v3606_v49 = vmul.f32 %v3582_v37, %v1085_v41  ;;  %v3578_v22 = vsel %vm3530_vm11, %v9221_v58, %v3554_v44  ;;  %vm3537_vm0 = vcmp.ge.f32.partialorder %v11688_v11, 0.0 }
 0x38a   : > { %v3417_v23 = vsub.f32 0.0, %v3393_v38  ;;  %v3602_v51 = vmul.f32 %v3578_v22, %v1081_v57 }
 0x38b   : > { %3676 = vperm.xlu2 %8994, %v3606_v49  }
 0x38c   : > { %v9225_v36 = vpop.eup %9224  ;;  %v3455_v1 = vmul.f32 1.442695, %v3417_v23 }
 0x38d   : > { %v9227_v8 = vpop.eup %9226  ;;  %v3488_v12 = vadd.f32 1.0, %v9225_v36  ;;  %v3334_v15 = vpop.xlane.xlu1 %3333 }
 0x38e   : > { %9230 = vpow2.f32 %v3455_v1  ;;  %v3370_v48 = vadd.f32 %v11615_v59, %v3334_v15  ;;  %v9229_v14 = vpop.eup %9228  ;;  %v3556_v38 = vmul.f32 %v9227_v8, %v9213_v0  ;;  %v1083_v15 = vld [vmem:[%s11654_s30 + $0x48] sm:$0xff] }
 0x38f   : > { %9232 = vrcp.f32 %v3488_v12  ;;  %v3557_v32 = vmul.f32 %v9229_v14, %v9215_v53 }
 0x390   : > { %v3394_v41 = vand.u32 2147483647, %v3370_v48  ;;  %9234 = vrcp.f32 %v3487_v40  ;;  %v3580_v58 = vsel %vm3532_vm3, %v9227_v8, %v3556_v38  ;;  %v1087_v8 = vld [vmem:[%s11654_s30 + $0x68] sm:$0xff]  ;;  %vm3538_vm13 = vcmp.ge.f32.partialorder %v3370_v48, 0.0 }
 0x391   : > { %v3581_v0 = vsel %vm3533_vm6, %v9229_v14, %v3557_v32  ;;  %v3604_v44 = vmul.f32 %v3580_v58, %v1083_v15  ;;  %v1089_v32 = vld [vmem:[%s11654_s30 + $0x78] sm:$0xff] }
 0x392   : > { %v3418_v46 = vsub.f32 0.0, %v3394_v41  ;;  %v3605_v35 = vmul.f32 %v3581_v0, %v1084_v7  ;;  %v1086_v41 = vld [vmem:[%s11654_s30 + $0x60] sm:$0xff] }
 0x393   : > { %3651 = vperm.xlu1 %8993, %v3601_v18  }
 0x394   : > { %v9231_v37 = vpop.eup %9230  ;;  %v3457_v49 = vmul.f32 1.442695, %v3418_v46 }
 0x395   : > { %v9233_v23 = vpop.eup %9232  ;;  %v3489_v30 = vadd.f32 1.0, %v9231_v37  ;;  %v11709_v58 = vpop.xlane.xlu1 %3335 }
 0x396   : > { %3656 = vperm.xlu0 %8992, %v3602_v51   ;;  %9236 = vpow2.f32 %v3457_v49  ;;  %v9235_v1 = vpop.eup %9234  ;;  %v3560_v12 = vmul.f32 %v9233_v23, %v9225_v36 }
 0x397   : > { %9238 = vrcp.f32 %v3489_v30  ;;  %v3559_v53 = vmul.f32 %v9235_v1, %v9223_v39  ;;  %v1088_v39 = vld [vmem:[%s11654_s30 + $0x70] sm:$0xff] }
 0x398   : > { %v3584_v22 = vsel %vm3536_vm1, %v9233_v23, %v3560_v12 }
 0x399   : > { %v3583_v57 = vsel %vm3535_vm4, %v9235_v1, %v3559_v53  ;;  %v3608_v14 = vmul.f32 %v3584_v22, %v1087_v8 }
 0x39a   : > { %v3607_v38 = vmul.f32 %v3583_v57, %v1086_v41 }
 0x39b   : > { %3666 = vperm.xlu1 %8993, %v3604_v44  }
 0x39c   : > { %v9237_v40 = vpop.eup %9236 }
 0x39d   : > { %v9239_v18 = vpop.eup %9238  ;;  %v3490_v19 = vadd.f32 1.0, %v9237_v40 }
 0x39e   : > { %3671 = vperm.xlu0 %8992, %v3605_v35   ;;  %v3561_v36 = vmul.f32 %v9239_v18, %v9231_v37 }
 0x39f   : > { %9240 = vrcp.f32 %v3490_v19 }
 0x3a0   : > { %v3585_v29 = vsel %vm3537_vm0, %v9239_v18, %v3561_v36  ;;  %v1092_v18 = vld [vmem:[%s11654_s30 + $0x90] sm:$0xff]  ;;  %v11716_v36 = vadd.f32 %v11615_v59, %v11632_v56 }
 0x3a1   : > { %v3609_v49 = vmul.f32 %v3585_v29, %v1088_v39  ;;  %v1093_v39 = vld [vmem:[%s11654_s30 + $0x98] sm:$0xff] }
 0x3a2   : > { %vm3528_vm10 = vcmp.ge.f32.partialorder %v11716_v36, 0.0 }
 0x3a3   : > { %3686 = vperm.xlu1 %8993, %v3608_v14  }
 0x3a5   : > { %v9241_v46 = vpop.eup %9240 }
 0x3a6   : > { %3681 = vperm.xlu0 %8992, %v3607_v38   ;;  %v3562_v51 = vmul.f32 %v9241_v46, %v9237_v40 }
 0x3a8   : > { %v3586_v15 = vsel %vm3538_vm13, %v9241_v46, %v3562_v51 }
 0x3a9   : > { %v3610_v30 = vmul.f32 %v3586_v15, %v1089_v32 }
 0x3aa   : > { %v3340_v16 = vpop.xlane.xlu0 %3339 }
 0x3ab   : > { %v3373_v23 = vadd.f32 %v11615_v59, %v3340_v16  ;;  %3691 = vperm.xlu1 %8993, %v3609_v49   ;;  %3696 = vperm.xlu2 %8994, %v3610_v30   ;;  %v3384_v49 = vand.u32 2147483647, %v11716_v36 }
 0x3ad   : > { %v3397_v37 = vand.u32 2147483647, %v3373_v23  ;;  %vm3541_vm14 = vcmp.ge.f32.partialorder %v3373_v23, 0.0  ;;  %v11723_v23 = vadd.f32 %v11615_v59, %v11617_v47  ;;  %v3408_v30 = vsub.f32 0.0, %v3384_v49 }
 0x3af   : > { %v3421_v11 = vsub.f32 0.0, %v3397_v37  ;;  %vm3525_vm7 = vcmp.ge.f32.partialorder %v11723_v23, 0.0 }
 0x3b1   : > { %v3463_v0 = vmul.f32 1.442695, %v3421_v11 }
 0x3b2   : > { %v3342_v44 = vpop.xlane.xlu1 %3341 }
 0x3b3   : > { %9242 = vpow2.f32 %v3463_v0  ;;  %v3374_v7 = vadd.f32 %v11615_v59, %v3342_v44  ;;  %v3381_v0 = vand.u32 2147483647, %v11723_v23  ;;  %v3437_v44 = vmul.f32 1.442695, %v3408_v30 }
 0x3b5   : > { %v3398_v1 = vand.u32 2147483647, %v3374_v7  ;;  %vm3542_vm9 = vcmp.ge.f32.partialorder %v3374_v7, 0.0 }
 0x3b7   : > { %v3422_v48 = vsub.f32 0.0, %v3398_v1 }
 0x3b9   : > { %v9243_v12 = vpop.eup %9242  ;;  %v3465_v35 = vmul.f32 1.442695, %v3422_v48  ;;  %v11729_v48 = vadd.f32 %v11615_v59, %v11606_v20  ;;  %v11734_v20 = vadd.f32 %v11615_v59, %v11709_v58  ;;  %v11744_v58 = vadd.f32 %v11615_v59, %v11627_v33 }
 0x3ba   : > { %v3493_v53 = vadd.f32 1.0, %v9243_v12 }
 0x3bb   : > { %9244 = vpow2.f32 %v3465_v35  ;;  %v3405_v35 = vsub.f32 0.0, %v3381_v0  ;;  %v1095_v0 = vld [vmem:[%s11654_s30 + $0xa8] sm:$0xff]  ;;  %vm3524_vm5 = vcmp.ge.f32.partialorder %v11729_v48, 0.0  ;;  %vm3539_vm3 = vcmp.ge.f32.partialorder %v11734_v20, 0.0 }
 0x3bc   : > { %9246 = vrcp.f32 %v3493_v53  ;;  %vm3527_vm4 = vcmp.ge.f32.partialorder %v11744_v58, 0.0 }
 0x3c1   : > { %v9245_v40 = vpop.eup %9244 }
 0x3c2   : > { %v9247_v8 = vpop.eup %9246  ;;  %v3494_v22 = vadd.f32 1.0, %v9245_v40 }
 0x3c3   : > { %v3565_v19 = vmul.f32 %v9247_v8, %v9243_v12 }
 0x3c4   : > { %9248 = vrcp.f32 %v3494_v22 }
 0x3c5   : > { %v3589_v57 = vsel %vm3541_vm14, %v9247_v8, %v3565_v19  ;;  %v3431_v8 = vmul.f32 1.442695, %v3405_v35 }
 0x3c6   : > { %v3613_v14 = vmul.f32 %v3589_v57, %v1092_v18 }
 0x3c8   : > { %3711 = vperm.xlu2 %8994, %v3613_v14  }
 0x3ca   : > { %v9249_v41 = vpop.eup %9248  ;;  %v3344_v29 = vpop.xlane.xlu1 %3343 }
 0x3cb   : > { %v3566_v38 = vmul.f32 %v9249_v41, %v9245_v40  ;;  %v3375_v51 = vadd.f32 %v11615_v59, %v3344_v29  ;;  %v3380_v40 = vand.u32 2147483647, %v11729_v48 }
 0x3cd   : > { %v3590_v46 = vsel %vm3542_vm9, %v9249_v41, %v3566_v38  ;;  %v3399_v15 = vand.u32 2147483647, %v3375_v51  ;;  %v3404_v18 = vsub.f32 0.0, %v3380_v40  ;;  %vm3543_vm12 = vcmp.ge.f32.partialorder %v3375_v51, 0.0 }
 0x3ce   : > { %v3614_v32 = vmul.f32 %v3590_v46, %v1093_v39  ;;  %v1094_v39 = vld [vmem:[%s11654_s30 + $0xa0] sm:$0xff] }
 0x3cf   : > { %v3423_v16 = vsub.f32 0.0, %v3399_v15  ;;  %v3429_v29 = vmul.f32 1.442695, %v3404_v18 }
 0x3d0   : > { %3716 = vperm.xlu1 %8993, %v3614_v32   ;;  %v3395_v32 = vand.u32 2147483647, %v11734_v20 }
 0x3d1   : > { %v3467_v56 = vmul.f32 1.442695, %v3423_v16  ;;  %v11740_v16 = vadd.f32 %v11615_v59, %v11604_v45  ;;  %v3383_v45 = vand.u32 2147483647, %v11744_v58 }
 0x3d2   : > { %v3346_v37 = vpop.xlane.xlu0 %3345  ;;  %v3419_v51 = vsub.f32 0.0, %v3395_v32 }
 0x3d3   : > { %9250 = vpow2.f32 %v3467_v56  ;;  %v3376_v11 = vadd.f32 %v11615_v59, %v3346_v37  ;;  %vm3526_vm1 = vcmp.ge.f32.partialorder %v11740_v16, 0.0 }
 0x3d4   : > { %9252 = vpow2.f32 %v3437_v44  ;;  %v3459_v33 = vmul.f32 1.442695, %v3419_v51 }
 0x3d5   : > { %v3400_v7 = vand.u32 2147483647, %v3376_v11  ;;  %vm3544_vm2 = vcmp.ge.f32.partialorder %v3376_v11, 0.0 }
 0x3d7   : > { %v3424_v1 = vsub.f32 0.0, %v3400_v7 }
 0x3d9   : > { %v9251_v12 = vpop.eup %9250  ;;  %v3469_v47 = vmul.f32 1.442695, %v3424_v1 }
 0x3da   : > { %v3495_v53 = vadd.f32 1.0, %v9251_v12  ;;  %v9253_v22 = vpop.eup %9252 }
 0x3db   : > { %9254 = vpow2.f32 %v3469_v47  ;;  %v3480_v14 = vadd.f32 1.0, %v9253_v22 }
 0x3dc   : > { %9256 = vrcp.f32 %v3495_v53 }
 0x3dd   : > { %9258 = vpow2.f32 %v3431_v8  ;;  %v3338_v8 = vpop.xlane.xlu2 %3337 }
 0x3e1   : > { %v9255_v19 = vpop.eup %9254 }
 0x3e2   : > { %v9257_v57 = vpop.eup %9256  ;;  %v3496_v41 = vadd.f32 1.0, %v9255_v19 }
 0x3e3   : > { %v3567_v38 = vmul.f32 %v9257_v57, %v9251_v12  ;;  %v9259_v15 = vpop.eup %9258  ;;  %v3382_v12 = vand.u32 2147483647, %v11740_v16 }
 0x3e4   : > { %9260 = vrcp.f32 %v3496_v41  ;;  %v3477_v56 = vadd.f32 1.0, %v9259_v15  ;;  %v11755_v41 = vadd.f32 %v11615_v59, %v3338_v8  ;;  %v1076_v8 = vld [vmem:[%s11654_s30 + $0x10] sm:$0xff] }
 0x3e5   : > { %v3591_v46 = vsel %vm3543_vm12, %v9257_v57, %v3567_v38  ;;  %9262 = vrcp.f32 %v3480_v14  ;;  %v3406_v57 = vsub.f32 0.0, %v3382_v12  ;;  %v3407_v14 = vsub.f32 0.0, %v3383_v45 }
 0x3e6   : > { %v3615_v49 = vmul.f32 %v3591_v46, %v1094_v39  ;;  %9264 = vpow2.f32 %v3429_v29  ;;  %v1079_v29 = vld [vmem:[%s11654_s30 + $0x28] sm:$0xff]  ;;  %vm3540_vm0 = vcmp.ge.f32.partialorder %v11755_v41, 0.0 }
 0x3e7   : > { %9266 = vrcp.f32 %v3477_v56  ;;  %v3396_v56 = vand.u32 2147483647, %v11755_v41 }
 0x3e8   : > { %3721 = vperm.xlu0 %8992, %v3615_v49   ;;  %9268 = vpow2.f32 %v3459_v33 }
 0x3e9   : > { %v3420_v45 = vsub.f32 0.0, %v3396_v56 }
 0x3ea   : > { %v9261_v30 = vpop.eup %9260 }
 0x3eb   : > { %v3568_v44 = vmul.f32 %v9261_v30, %v9255_v19  ;;  %v9263_v7 = vpop.eup %9262 }
 0x3ec   : > { %v9265_v47 = vpop.eup %9264  ;;  %v3552_v18 = vmul.f32 %v9263_v7, %v9253_v22  ;;  %v3433_v22 = vmul.f32 1.442695, %v3406_v57 }
 0x3ed   : > { %v3348_v37 = vpop.xlane.xlu1 %3347  ;;  %v3592_v35 = vsel %vm3544_vm2, %v9261_v30, %v3568_v44  ;;  %v3476_v11 = vadd.f32 1.0, %v9265_v47  ;;  %v9267_v32 = vpop.eup %9266  ;;  %v3435_v30 = vmul.f32 1.442695, %v3407_v14 }
 0x3ee   : > { %v11748_v1 = vadd.f32 %v11615_v59, %v3348_v37  ;;  %v3616_v40 = vmul.f32 %v3592_v35, %v1095_v0  ;;  %v3576_v46 = vsel %vm3528_vm10, %v9263_v7, %v3552_v18  ;;  %v3549_v37 = vmul.f32 %v9267_v32, %v9259_v15  ;;  %v9269_v0 = vpop.eup %9268 }
 0x3ef   : > { %v3600_v51 = vmul.f32 %v3576_v46, %v1079_v29  ;;  %v11765_v7 = vadd.f32 %v11615_v59, %v11608_v5 }
 0x3f0   : > { %v3401_v53 = vand.u32 2147483647, %v11748_v1  ;;  %3726 = vperm.xlu2 %8994, %v3616_v40   ;;  %v3573_v18 = vsel %vm3525_vm7, %v9267_v32, %v3549_v37  ;;  %vm3545_vm11 = vcmp.ge.f32.partialorder %v11748_v1, 0.0 }
 0x3f1   : > { %v3379_v15 = vand.u32 2147483647, %v11765_v7  ;;  %v3597_v5 = vmul.f32 %v3573_v18, %v1076_v8  ;;  %vm3523_vm13 = vcmp.ge.f32.partialorder %v11765_v7, 0.0 }
 0x3f2   : > { %v3425_v19 = vsub.f32 0.0, %v3401_v53  ;;  %v3491_v53 = vadd.f32 1.0, %v9269_v0 }
 0x3f3   : > { %v3403_v14 = vsub.f32 0.0, %v3379_v15  ;;  %v1097_v15 = vld [vmem:[%s11654_s30 + $0xb8] sm:$0xff] }
 0x3f4   : > { %v3471_v38 = vmul.f32 1.442695, %v3425_v19  ;;  %v3461_v19 = vmul.f32 1.442695, %v3420_v45 }
 0x3f5   : > { %v3350_v39 = vpop.xlane.xlu0 %3349 }
 0x3f6   : > { %9270 = vpow2.f32 %v3471_v38  ;;  %v11759_v49 = vadd.f32 %v11615_v59, %v3350_v39 }
 0x3f7   : > { %9272 = vrcp.f32 %v3476_v11 }
 0x3f8   : > { %v3402_v36 = vand.u32 2147483647, %v11759_v49  ;;  %3646 = vperm.xlu2 %8994, %v3600_v51   ;;  %9274 = vpow2.f32 %v3433_v22  ;;  %v1075_v22 = vld [vmem:[%s11654_s30 + $0x8] sm:$0xff]  ;;  %vm3546_vm6 = vcmp.ge.f32.partialorder %v11759_v49, 0.0 }
 0x3f9   : > { %9276 = vpow2.f32 %v3435_v30 }
 0x3fa   : > { %v3426_v44 = vsub.f32 0.0, %v3402_v36  ;;  %v1096_v36 = vld [vmem:[%s11654_s30 + $0xb0] sm:$0xff] }
 0x3fc   : > { %v9271_v12 = vpop.eup %9270  ;;  %v3473_v35 = vmul.f32 1.442695, %v3426_v44 }
 0x3fd   : > { %v9273_v33 = vpop.eup %9272  ;;  %v3497_v40 = vadd.f32 1.0, %v9271_v12 }
 0x3fe   : > { %9278 = vpow2.f32 %v3473_v35  ;;  %v9275_v59 = vpop.eup %9274  ;;  %v3548_v11 = vmul.f32 %v9273_v33, %v9265_v47  ;;  %v3427_v47 = vmul.f32 1.442695, %v3403_v14 }
 0x3ff   : > { %9280 = vrcp.f32 %v3497_v40  ;;  %v9277_v23 = vpop.eup %9276  ;;  %v3478_v38 = vadd.f32 1.0, %v9275_v59 }
 0x400   : > { %9282 = vrcp.f32 %v3491_v53  ;;  %3631 = vperm.xlu2 %8994, %v3597_v5   ;;  %v3479_v29 = vadd.f32 1.0, %v9277_v23  ;;  %v3572_v30 = vsel %vm3524_vm5, %v9273_v33, %v3548_v11  ;;  %v1067_v11 = vld [vmem:[%s11784_s8 + $0x8] sm:$0xff] }
 0x401   : > { %9284 = vpow2.f32 %v3461_v19  ;;  %v3596_v48 = vmul.f32 %v3572_v30, %v1075_v22 }
 0x404   : > { %v9279_v57 = vpop.eup %9278 }
 0x405   : > { %v9281_v39 = vpop.eup %9280  ;;  %v3498_v46 = vadd.f32 1.0, %v9279_v57  ;;  %v11771_v32 = vpop.permute.xlu1 %3651 }
 0x406   : > { %v3569_v56 = vmul.f32 %v9281_v39, %v9271_v12  ;;  %v9283_v51 = vpop.eup %9282  ;;  %v11778_v12 = vpop.permute.xlu2 %3661 }
 0x407   : > { %9286 = vrcp.f32 %v3498_v46  ;;  %v9285_v35 = vpop.eup %9284  ;;  %v3563_v53 = vmul.f32 %v9283_v51, %v9269_v0  ;;  %v1090_v0 = vld [vmem:[%s11654_s30 + $0x80] sm:$0xff] }
 0x408   : > { %9288 = vrcp.f32 %v3478_v38  ;;  %v3593_v37 = vsel %vm3545_vm11, %v9281_v39, %v3569_v56  ;;  %v11776_v44 = vpop.permute.xlu0 %3656  ;;  %3626 = vperm.xlu2 %8994, %v3596_v48   ;;  %v3492_v33 = vadd.f32 1.0, %v9285_v35 }
 0x409   : > { %9290 = vrcp.f32 %v3479_v29  ;;  %v3617_v45 = vmul.f32 %v3593_v37, %v1096_v36  ;;  %v3587_v18 = vsel %vm3539_vm3, %v9283_v51, %v3563_v53  ;;  %v1077_v36 = vld [vmem:[%s11654_s30 + $0x18] sm:$0xff]  ;;  %v1078_v51 = vld [vmem:[%s11654_s30 + $0x20] sm:$0xff]  ;;  %v3746_v7 = vmul.f32 %v11776_v44, %v11537_v31 }
 0x40a   : > { %9292 = vpow2.f32 %v3427_v47  ;;  %v3611_v38 = vmul.f32 %v3587_v18, %v1090_v0  ;;  %v1091_v18 = vld [vmem:[%s11654_s30 + $0x88] sm:$0xff] }
 0x40b   : > { %3731 = vperm.xlu1 %8993, %v3617_v45   ;;  %9294 = vrcp.f32 %v3492_v33 }
 0x40d   : > { %v9287_v1 = vpop.eup %9286  ;;  %v11787_v40 = vpop.permute.xlu1 %3666 }
 0x40e   : > { %v9289_v8 = vpop.eup %9288  ;;  %v3570_v19 = vmul.f32 %v9287_v1, %v9279_v57  ;;  %v3677_v22 = vpop.permute.xlu2 %3676 }
 0x40f   : > { %v9291_v5 = vpop.eup %9290  ;;  %v3550_v20 = vmul.f32 %v9289_v8, %v9275_v59  ;;  %v1069_v59 = vld [vmem:[%s11784_s8 + $0x18] sm:$0xff] }
 0x410   : > { %v3594_v14 = vsel %vm3546_vm6, %v9287_v1, %v3570_v19  ;;  %v9293_v29 = vpop.eup %9292  ;;  %4283 = vperm.xlu2 %8994, %v1067_v11   ;;  %v3551_v46 = vmul.f32 %v9291_v5, %v9277_v23  ;;  %v3672_v30 = vpop.permute.xlu0 %3671 }
 0x411   : > { %v3618_v39 = vmul.f32 %v3594_v14, %v1097_v15  ;;  %v3475_v57 = vadd.f32 1.0, %v9293_v29  ;;  %v3574_v56 = vsel %vm3526_vm1, %v9289_v8, %v3550_v20  ;;  %v9295_v37 = vpop.eup %9294  ;;  %v1071_v15 = vld [vmem:[%s11784_s8 + $0x28] sm:$0xff]  ;;  %v3749_v41 = vmul.f32 %v3672_v30, %v11556_v24  ;;  %v1070_v30 = vld [vmem:[%s11784_s8 + $0x20] sm:$0xff] }
 0x412   : > { %v3575_v47 = vsel %vm3527_vm4, %v9291_v5, %v3551_v46  ;;  %v3598_v23 = vmul.f32 %v3574_v56, %v1077_v36  ;;  %v3564_v45 = vmul.f32 %v9295_v37, %v9285_v35  ;;  %v3747_v24 = vmul.f32 %v11778_v12, %v11544_v3  ;;  %v1072_v3 = vld [vmem:[%s11784_s8 + $0x30] sm:$0xff] }
 0x413   : > { %3701 = vperm.xlu1 %8993, %v3611_v38   ;;  %3736 = vperm.xlu0 %8992, %v3618_v39   ;;  %9296 = vrcp.f32 %v3475_v57  ;;  %v3599_v48 = vmul.f32 %v3575_v47, %v1078_v51  ;;  %v3750_v39 = vmul.f32 %v3677_v22, %v11561_v42  ;;  %v3745_v46 = vmul.f32 %v11771_v32, %v11526_v17 }
 0x414   : > { %v3588_v1 = vsel %vm3540_vm0, %v9295_v37, %v3564_v45 }
 0x415   : > { %v3687_v49 = vpop.permute.xlu1 %3686  ;;  %v3612_v5 = vmul.f32 %v3588_v1, %v1091_v18  ;;  %v3766_v22 = vpack.c.bf16 %v3746_v7, %v3745_v46  ;;  %v8793_v7 = vld [vmem:[%s14099_s15 + $0x8] sm:$0xff]  ;;  %v8802_v46 = vld [vmem:[%s14100_s16 + $0x10] sm:$0xff] }
 0x416   : > { %v3697_v53 = vpop.permute.xlu2 %3696  ;;  %v3752_v14 = vmul.f32 %v3687_v49, %v11571_v2  ;;  %v3768_v2 = vpack.c.bf16 %v3750_v39, %v3749_v41  ;;  %v8806_v41 = vld [vmem:[%s14100_s16 + $0x30] sm:$0xff]  ;;  %v8804_v39 = vld [vmem:[%s14100_s16 + $0x20] sm:$0xff] }
 0x417   : > { %v3754_v33 = vmul.f32 %v3697_v53, %v11581_v4 }
 0x418   : > { %4293 = vperm.xlu2 %8994, %v1069_v59   ;;  %v3682_v16 = vpop.permute.xlu0 %3681 }
 0x419   : > { %v9297_v0 = vpop.eup %9296  ;;  %v3751_v35 = vmul.f32 %v3682_v16, %v11566_v61  ;;  %v1073_v61 = vld [vmem:[%s11784_s8 + $0x38] sm:$0xff] }
 0x41a   : > { %v3547_v11 = vmul.f32 %v9297_v0, %v9293_v29  ;;  %v3748_v29 = vmul.f32 %v11787_v40, %v11551_v27  ;;  %v1066_v27 = vld [vmem:[%s11784_s8] sm:$0xff]  ;;  %v1068_v40 = vld [vmem:[%s11784_s8 + $0x10] sm:$0xff]  ;;  %s927_s8 = sand.u32 1, %s10092_s5  }
 0x41b   : > { %3636 = vperm.xlu1 %8993, %v3598_v23   ;;  %3641 = vperm.xlu0 %8992, %v3599_v48   ;;  %v3769_v4 = vpack.c.bf16 %v3752_v14, %v3751_v35  ;;  %v8798_v14 = vld [vmem:[%s14099_s15 + $0x30] sm:$0xff]  ;;  %s8067_s25 = sshll.u32 %s927_s8, 6 }
 0x41c   : > { %v3571_v38 = vsel %vm3523_vm13, %v9297_v0, %v3547_v11  ;;  %v3767_v42 = vpack.c.bf16 %v3748_v29, %v3747_v24  ;;  %v8807_v11 = vld [vmem:[%s14100_s16 + $0x38] sm:$0xff]  ;;  %s13026_s26 = scalar_lea.vmem [#allocation2], %s8067_s25 }
 0x41d   : > { %v3692_v58 = vpop.permute.xlu1 %3691  ;;  %v8803_v29 = vld [vmem:[%s14100_s16 + $0x18] sm:$0xff]  ;;  %s7898_s28 = sshll.u32 %s13026_s26, 4  ;;  %s7899_s28 = int_to_ptr.vmem [resolvable:$true] %s7898_s28 }
 0x41e   : > { %v3753_v8 = vmul.f32 %v3692_v58, %v11576_v28  ;;  %v1074_v28 = vld [vmem:[%s11654_s30] sm:$0xff] }
 0x41f   : > { %v3595_v20 = vmul.f32 %v3571_v38, %v1074_v28  ;;  %v8805_v28 = vld [vmem:[%s14100_s16 + $0x28] sm:$0xff]  ;;  %v8796_v38 = vld [vmem:[%s14099_s15 + $0x20] sm:$0xff] }
 0x420   : > { %v3770_v19 = vpack.c.bf16 %v3754_v33, %v3753_v8  ;;  %4303 = vperm.xlu2 %8994, %v1071_v15   ;;  %v14497_v15 = vld [vmem:[#allocation109_spill] sm:$0xff] }
 0x422   : > { %3819 = vmatpush.bf16.msra.mxu0 %v3770_v19  ;;  %v3712_v31 = vpop.permute.xlu2 %3711 }
 0x423   : > { %3706 = vperm.xlu0 %8992, %v3612_v5   ;;  %v3757_v16 = vmul.f32 %v3712_v31, %v11594_v9 }
 0x426   : > { %3820 = vmatpush.bf16.msra.mxu0 %v3769_v4  ;;  %v8797_v4 = vld [vmem:[%s14099_s15 + $0x28] sm:$0xff] }
 0x428   : > { %4313 = vperm.xlu2 %8994, %v1073_v61   ;;  %v8795_v61 = vld [vmem:[%s14099_s15 + $0x18] sm:$0xff] }
 0x42a   : > { %3821 = vmatpush.bf16.msra.mxu0 %v3768_v2 }
 0x42b   : > { %3621 = vperm.xlu0 %8992, %v3595_v20   ;;  %v8794_v20 = vld [vmem:[%s14099_s15 + $0x10] sm:$0xff] }
 0x42e   : > { %3822 = vmatpush.bf16.msra.mxu0 %v3767_v42  ;;  %v8792_v42 = vld [vmem:[%s14099_s15] sm:$0xff] }
 0x432   : > { %3823 = vmatpush.bf16.msra.mxu0 %v3766_v22  ;;  %v8801_v22 = vld [vmem:[%s14100_s16 + $0x8] sm:$0xff] }
 0x433   : > { %4278 = vperm.xlu0 %8992, %v1066_v27   ;;  %v14503_v27 = vld [vmem:[#allocation14_spill] sm:$0xff] }
 0x43b   : > { %4288 = vperm.xlu0 %8992, %v1068_v40   ;;  %v8800_v40 = vld [vmem:[%s14100_s16] sm:$0xff] }
 0x442   : > { %v3717_v44 = vpop.permute.xlu1 %3716 }
 0x443   : > { %4298 = vperm.xlu0 %8992, %v1070_v30   ;;  %v3758_v23 = vmul.f32 %v3717_v44, %v11599_v43 }
 0x445   : > { %v3772_v33 = vpack.c.bf16 %v3758_v23, %v3757_v16  ;;  %v8814_v16 = vld [vmem:[%s14102_s18 + $0x30] sm:$0xff] }
 0x44a   : > { %v3727_v17 = vpop.permute.xlu2 %3726 }
 0x44b   : > { %4308 = vperm.xlu0 %8992, %v1072_v3   ;;  %v3760_v59 = vmul.f32 %v3727_v17, %v11630_v54  ;;  %v14504_v3 = vld [vmem:[#allocation15_spill] sm:$0xff]  ;;  %v14505_v17 = vld [vmem:[#allocation16_spill] sm:$0xff] }
 0x450   : > { %3791 = vxpose.xlu1.c.b16.start [1/4] (short) (narrow) %v10770_v21, 64 }
 0x452   : > { %v3647_v57 = vpop.permute.xlu2 %3646 }
 0x453   : > { %v3744_v58 = vmul.f32 %v3647_v57, %v11516_v62 }
 0x45a   : > { %v3722_v32 = vpop.permute.xlu0 %3721 }
 0x45b   : > { %v3759_v47 = vmul.f32 %v3722_v32, %v11610_v26 }
 0x45d   : > { %v3773_v48 = vpack.c.bf16 %v3760_v59, %v3759_v47  ;;  %v14506_v47 = vld [vmem:[#allocation17_spill] sm:$0xff] }
 0x460   : > { %3792 = vxpose.xlu1.c.b16.cont [2/4] (short) (narrow) %v10796_v55, 64 }
 0x470   : > { %3793 = vxpose.xlu1.c.b16.cont [3/4] (short) (narrow) %v10821_v25, 64 }
 0x47d   : > { %v3732_v12 = vpop.permute.xlu1 %3731 }
 0x47e   : > { %v3761_v36 = vmul.f32 %v3732_v12, %v11668_v63  ;;  %v3632_v63 = vpop.permute.xlu2 %3631 }
 0x47f   : > { %v3741_v54 = vmul.f32 %v3632_v63, %v11466_v34  ;;  %v8813_v63 = vld [vmem:[%s14102_s18 + $0x28] sm:$0xff] }
 0x480   : > { %3794 = vxpose.xlu1.c.b16.end [4/4] (short) (narrow) %v10855_v60, 64 }
 0x485   : > { %v3702_v49 = vpop.permute.xlu1 %3701  ;;  %v3737_v56 = vpop.permute.xlu0 %3736 }
 0x486   : > { %v3762_v51 = vmul.f32 %v3737_v56, %v11680_v6  ;;  %v3755_v18 = vmul.f32 %v3702_v49, %v11586_v50 }
 0x488   : > { %v3774_v37 = vpack.c.bf16 %v3762_v51, %v3761_v36 }
 0x48a   : > { %3852 = vmatpush.bf16.msrb.mxu3 %v3774_v37 }
 0x48d   : > { %v3637_v45 = vpop.permute.xlu1 %3636  ;;  %v3642_v53 = vpop.permute.xlu0 %3641 }
 0x48e   : > { %v3743_v1 = vmul.f32 %v3642_v53, %v11506_v13  ;;  %3853 = vmatpush.bf16.msrb.mxu3 %v3773_v48  ;;  %v3742_v6 = vmul.f32 %v3637_v45, %v11491_v52  ;;  %v3627_v13 = vpop.permute.xlu2 %3626  ;;  %v14498_v52 = vld [vmem:[#allocation107_spill] sm:$0xff]  ;;  %v8815_v53 = vld [vmem:[%s14102_s18 + $0x38] sm:$0xff] }
 0x48f   : > { %v3740_v35 = vmul.f32 %v3627_v13, %v14497_v15  ;;  %4227 = vmatpush.bf16.msra.mxu1 %v8815_v53 }
 0x490   : > { %v3765_v26 = vpack.c.bf16 %v3744_v58, %v3743_v1  ;;  %v3764_v43 = vpack.c.bf16 %v3742_v6, %v3741_v54  ;;  %v8812_v6 = vld [vmem:[%s14102_s18 + $0x20] sm:$0xff] }
 0x492   : > { %3824 = vmatpush.bf16.msra.mxu0 %v3765_v26  ;;  %3854 = vmatpush.bf16.msrb.mxu3 %v3772_v33 }
 0x493   : > { %4228 = vmatpush.bf16.msra.mxu1 %v8814_v16 }
 0x495   : > { %v3707_v8 = vpop.permute.xlu0 %3706 }
 0x496   : > { %v3756_v9 = vmul.f32 %v3707_v8, %v11590_v10  ;;  %3825 = vmatpush.bf16.msra.mxu0 %v3764_v43  ;;  %v8799_v10 = vld [vmem:[%s14099_s15 + $0x38] sm:$0xff] }
 0x497   : > { %4229 = vmatpush.bf16.msra.mxu1 %v8813_v63 }
 0x498   : > { %v3771_v62 = vpack.c.bf16 %v3756_v9, %v3755_v18 }
 0x49a   : > { %3855 = vmatpush.bf16.msrb.mxu3 %v3771_v62 }
 0x49b   : > { %4230 = vmatpush.bf16.msra.mxu1 %v8812_v6 }
 0x49d   : > { %v3622_v0 = vpop.permute.xlu0 %3621 }
 0x49e   : > { %v3739_v19 = vmul.f32 %v3622_v0, %v14498_v52  ;;  %4038 = vmatpush.bf16.msra.mxu3 %v8799_v10 }
 0x4a0   : > { %v3763_v5 = vpack.c.bf16 %v3740_v35, %v3739_v19  ;;  %v8811_v19 = vld [vmem:[%s14102_s18 + $0x18] sm:$0xff] }
 0x4a1   : > { %4231 = vmatpush.bf16.msra.mxu1 %v8811_v19 }
 0x4a2   : > { %3826 = vmatpush.bf16.msra.mxu0 %v3763_v5  ;;  %4039 = vmatpush.bf16.msra.mxu3 %v8798_v14  ;;  %v11926_v5 = vld [vmem:[%s14101_s17] ss:$0 sm:$0xff]  ;;  %v8810_v14 = vld [vmem:[%s14102_s18 + $0x10] sm:$0xff] }
 0x4a5   : > { %8907 = vmatmul.lmr.bf16.vlgmr.msra.gmra.8.mxu0  ;;  %4232 = vmatpush.bf16.msra.mxu1 %v8810_v14 }
 0x4a6   : > { %3961 = vmatpush.bf16.msra.mxu0 %v8807_v11  ;;  %4040 = vmatpush.bf16.msra.mxu3 %v8797_v4 }
 0x4aa   : > { %3962 = vmatpush.bf16.msra.mxu0 %v8806_v41  ;;  %4041 = vmatpush.bf16.msra.mxu3 %v8796_v38 }
 0x4ad   : > { %8908 = vmatmul.lmr.bf16.gmra.8.mxu0 }
 0x4ae   : > { %3963 = vmatpush.bf16.msra.mxu0 %v8805_v28  ;;  %4042 = vmatpush.bf16.msra.mxu3 %v8795_v61  ;;  %v8809_v28 = vld [vmem:[%s14102_s18 + $0x8] sm:$0xff] }
 0x4af   : > { %4233 = vmatpush.bf16.msra.mxu1 %v8809_v28 }
 0x4b2   : > { %3964 = vmatpush.bf16.msra.mxu0 %v8804_v39  ;;  %4043 = vmatpush.bf16.msra.mxu3 %v8794_v20 }
 0x4b5   : > { %8909 = vmatmul.lmr.bf16.gmra.8.mxu0 }
 0x4b6   : > { %3965 = vmatpush.bf16.msra.mxu0 %v8803_v29  ;;  %4044 = vmatpush.bf16.msra.mxu3 %v8793_v7  ;;  %v8808_v7 = vld [vmem:[%s14102_s18] sm:$0xff] }
 0x4b7   : > { %4234 = vmatpush.bf16.msra.mxu1 %v8808_v7 }
 0x4ba   : > { %4045 = vmatpush.bf16.msra.mxu3 %v8792_v42  ;;  %3966 = vmatpush.bf16.msra.mxu0 %v8802_v46 }
 0x4bd   : > { %8910 = vmatmul.lmr.bf16.gmra.8.mxu0 }
 0x4be   : > { %3967 = vmatpush.bf16.msra.mxu0 %v8801_v22 }
 0x4c2   : > { %3968 = vmatpush.bf16.msra.mxu0 %v8800_v40 }
 0x4c5   : > { %8911 = vmatmul.lmr.bf16.gmra.8.mxu0 }
 0x4cd   : > { %8912 = vmatmul.lmr.bf16.gmra.8.mxu0 }
 0x4d5   : > { %8913 = vmatmul.lmr.bf16.gmra.8.mxu0 }
 0x4dd   : > { %8914 = vmatmul.lmr.bf16.gmra.8.mxu0 }
 0x4fc   : > { %v11840_v34 = vpop.trf.xlu1 }
 0x4fd   : > { %14499 = vst [vmem:[#allocation109_spill] sm:$0xff] %v11840_v34  ;;  %8212 = vmatmul.msk.bf16.vlgmr.msrb.gmra.mxu3 %vm1404_vm8, %v11840_v34 }
 0x50c   : > { %v11844_v50 = vpop.trf.xlu1 }
 0x50d   : > { %14500 = vst [vmem:[#allocation107_spill] sm:$0xff] %v11844_v50  ;;  %8213 = vmatmul.msk.bf16.gmra.mxu3 %vm1404_vm8, %v11844_v50 }
 0x51c   : > { %v11878_v2 = vpop.trf.xlu1 }
 0x51d   : > { %14501 = vst [vmem:[#allocation117_spill] sm:$0xff] %v11878_v2  ;;  %8214 = vmatmul.msk.bf16.gmra.mxu3 %vm1404_vm8, %v11878_v2 }
 0x522   : > { %v3828_v30 = vpop.f32.mrf.mxu0 }
 0x52a   : > { %v3830_v31 = vpop.f32.mrf.mxu0 }
 0x52c   : > { %v11885_v24 = vpop.trf.xlu1 }
 0x52d   : > { %14502 = vst [vmem:[#allocation118_spill] sm:$0xff] %v11885_v24  ;;  %8215 = vmatmul.msk.bf16.gmra.mxu3 %vm1404_vm8, %v11885_v24 }
 0x532   : > { %v3833_v32 = vpop.f32.mrf.mxu0 }
 0x53a   : > { %v3835_v36 = vpop.f32.mrf.mxu0 }
 0x53d   : > { %4046 = vmatmul.bf16.vlgmr.msra.gmra.mxu3 %v14503_v27 }
 0x542   : > { %v3838_v59 = vpop.f32.mrf.mxu0 }
 0x54a   : > { %v3840_v1 = vpop.f32.mrf.mxu0 }
 0x54d   : > { %4051 = vmatmul.bf16.gmra.mxu3 %v14504_v3 }
 0x552   : > { %v3843_v8 = vpop.f32.mrf.mxu0 }
 0x55a   : > { %v3845_v9 = vpop.f32.mrf.mxu0 }
 0x55d   : > { %4056 = vmatmul.bf16.gmra.mxu3 %v14505_v17 }
 0x56d   : > { %4061 = vmatmul.bf16.gmra.mxu3 %v14506_v47 }
 0x580   : > { %v3857_v44 = vpop.f32.mrf.mxu3 }
 0x581   : > { %v3858_v57 = vadd.f32 %v3857_v44, %v3828_v30 }
 0x588   : > { %v3859_v12 = vpop.f32.mrf.mxu3 }
 0x589   : > { %v3860_v49 = vadd.f32 %v3859_v12, %v3830_v31 }
 0x58b   : > { %v3909_v56 = vpack.c.bf16 %v3860_v49, %v3858_v57 }
 0x58d   : > { %3969 = vmatmul.bf16.vlgmr.msra.gmra.mxu0 %v3909_v56 }
 0x590   : > { %v3862_v51 = vpop.f32.mrf.mxu3 }
 0x591   : > { %v3863_v23 = vadd.f32 %v3862_v51, %v3833_v32 }
 0x598   : > { %v3864_v37 = vpop.f32.mrf.mxu3 }
 0x599   : > { %v3865_v48 = vadd.f32 %v3864_v37, %v3835_v36 }
 0x59b   : > { %v3910_v45 = vpack.c.bf16 %v3865_v48, %v3863_v23 }
 0x59d   : > { %3974 = vmatmul.bf16.gmra.mxu0 %v3910_v45 }
 0x5a0   : > { %v3867_v58 = vpop.f32.mrf.mxu3 }
 0x5a1   : > { %v3868_v33 = vadd.f32 %v3867_v58, %v3838_v59 }
 0x5a8   : > { %v3869_v26 = vpop.f32.mrf.mxu3 }
 0x5a9   : > { %v3870_v54 = vadd.f32 %v3869_v26, %v3840_v1 }
 0x5ab   : > { %v3911_v43 = vpack.c.bf16 %v3870_v54, %v3868_v33 }
 0x5ad   : > { %3979 = vmatmul.bf16.gmra.mxu0 %v3911_v43 }
 0x5b0   : > { %v3872_v18 = vpop.f32.mrf.mxu3 }
 0x5b1   : > { %v3873_v13 = vadd.f32 %v3872_v18, %v3843_v8 }
 0x5b8   : > { %v3874_v62 = vpop.f32.mrf.mxu3 }
 0x5b9   : > { %v3875_v0 = vadd.f32 %v3874_v62, %v3845_v9 }
 0x5bb   : > { %v3912_v15 = vpack.c.bf16 %v3875_v0, %v3873_v13 }
 0x5bd   : > { %3984 = vmatmul.bf16.gmra.mxu0 %v3912_v15 }
 0x5c0   : > { %v4047_v35 = vpop.f32.mrf.mxu3 }
 0x5c8   : > { %v4049_v52 = vpop.f32.mrf.mxu3 }
 0x5d0   : > { %v4052_v38 = vpop.f32.mrf.mxu3 }
 0x5d8   : > { %v4054_v40 = vpop.f32.mrf.mxu3 }
 0x5e0   : > { %v4057_v47 = vpop.f32.mrf.mxu3 }
 0x5e8   : > { %v4059_v43 = vpop.f32.mrf.mxu3 }
 0x5f0   : > { %v4062_v28 = vpop.f32.mrf.mxu3 }
 0x60a   : > { %v3970_v10 = vpop.f32.mrf.mxu0 }
 0x60b   : > { %v4048_v11 = vadd.f32 %v4047_v35, %v3970_v10 }
 0x60d   : > { %v4071_v41 = vadd.f32 %v11926_v5, %v4048_v11 }
 0x60f   : > { %v4079_v4 = vand.u32 2147483647, %v4071_v41  ;;  %vm4127_vm14 = vcmp.ge.f32.partialorder %v4071_v41, 0.0 }
 0x611   : > { %v4087_v39 = vsub.f32 0.0, %v4079_v4 }
 0x612   : > { %v3972_v61 = vpop.f32.mrf.mxu0 }
 0x613   : > { %v4095_v29 = vmul.f32 1.442695, %v4087_v39  ;;  %v4050_v20 = vadd.f32 %v4049_v52, %v3972_v61 }
 0x615   : > { %9298 = vpow2.f32 %v4095_v29  ;;  %v4072_v42 = vadd.f32 %v11926_v5, %v4050_v20 }
 0x617   : > { %v4080_v46 = vand.u32 2147483647, %v4072_v42  ;;  %vm4128_vm9 = vcmp.ge.f32.partialorder %v4072_v42, 0.0 }
 0x619   : > { %v4088_v22 = vsub.f32 0.0, %v4080_v46 }
 0x61a   : > { %v3975_v27 = vpop.f32.mrf.mxu0 }
 0x61b   : > { %v9299_v30 = vpop.eup %9298  ;;  %v4097_v3 = vmul.f32 1.442695, %v4088_v22  ;;  %v4053_v31 = vadd.f32 %v4052_v38, %v3975_v27 }
 0x61c   : > { %v4111_v44 = vadd.f32 1.0, %v9299_v30 }
 0x61d   : > { %9300 = vpow2.f32 %v4097_v3  ;;  %v11940_v17 = vadd.f32 %v11926_v5, %v4053_v31 }
 0x61e   : > { %9302 = vrcp.f32 %v4111_v44 }
 0x61f   : > { %v4081_v32 = vand.u32 2147483647, %v11940_v17  ;;  %vm4129_vm12 = vcmp.ge.f32.partialorder %v11940_v17, 0.0 }
 0x621   : > { %v4089_v12 = vsub.f32 0.0, %v4081_v32 }
 0x622   : > { %v3977_v57 = vpop.f32.mrf.mxu0 }
 0x623   : > { %v9301_v49 = vpop.eup %9300  ;;  %v4099_v56 = vmul.f32 1.442695, %v4089_v12  ;;  %v4055_v36 = vadd.f32 %v4054_v40, %v3977_v57  ;;  %v4064_v57 = vpop.f32.mrf.mxu3 }
 0x624   : > { %v4112_v51 = vadd.f32 1.0, %v9301_v49  ;;  %v9303_v59 = vpop.eup %9302 }
 0x625   : > { %9304 = vpow2.f32 %v4099_v56  ;;  %v4074_v37 = vadd.f32 %v11926_v5, %v4055_v36  ;;  %v4135_v48 = vmul.f32 %v9303_v59, %v9299_v30 }
 0x626   : > { %9306 = vrcp.f32 %v4112_v51 }
 0x627   : > { %v4082_v23 = vand.u32 2147483647, %v4074_v37  ;;  %v4143_v26 = vsel %vm4127_vm14, %v9303_v59, %v4135_v48  ;;  %vm4130_vm2 = vcmp.ge.f32.partialorder %v4074_v37, 0.0  ;;  %v8822_v59 = vld [vmem:[%s14373_s4 + $0x70] sm:$0xff]  ;;  %v8821_v48 = vld [vmem:[%s14373_s4 + $0x68] sm:$0xff] }
 0x628   : > { %v4151_v9 = vmul.f32 %v4143_v26, %v4071_v41  ;;  %v8823_v41 = vld [vmem:[%s14373_s4 + $0x78] sm:$0xff] }
 0x629   : > { %v4090_v45 = vsub.f32 0.0, %v4082_v23  ;;  %4393 = vmatpush.bf16.msra.mxu2 %v8823_v41 }
 0x62a   : > { %v3980_v53 = vpop.f32.mrf.mxu0 }
 0x62b   : > { %v9305_v16 = vpop.eup %9304  ;;  %v4101_v58 = vmul.f32 1.442695, %v4090_v45  ;;  %v4058_v1 = vadd.f32 %v4057_v47, %v3980_v53  ;;  %v8830_v53 = vld [vmem:[%s14374_s11 + $0x70] sm:$0xff] }
 0x62c   : > { %v9307_v63 = vpop.eup %9306  ;;  %v4113_v6 = vadd.f32 1.0, %v9305_v16 }
 0x62d   : > { %v4136_v33 = vmul.f32 %v9307_v63, %v9301_v49  ;;  %9308 = vpow2.f32 %v4101_v58  ;;  %v11945_v54 = vadd.f32 %v11926_v5, %v4058_v1  ;;  %4394 = vmatpush.bf16.msra.mxu2 %v8822_v59  ;;  %v9991_v59 = vld [vmem:[%s10378_s7 + $0x10] sm:$0xff] }
 0x62e   : > { %9310 = vrcp.f32 %v4113_v6  ;;  %v8829_v6 = vld [vmem:[%s14374_s11 + $0x68] sm:$0xff] }
 0x62f   : > { %v4144_v8 = vsel %vm4128_vm9, %v9307_v63, %v4136_v33  ;;  %v4083_v18 = vand.u32 2147483647, %v11945_v54  ;;  %vm4131_vm10 = vcmp.ge.f32.partialorder %v11945_v54, 0.0 }
 0x630   : > { %v4152_v62 = vmul.f32 %v4144_v8, %v4072_v42 }
 0x631   : > { %v4091_v13 = vsub.f32 0.0, %v4083_v18  ;;  %4395 = vmatpush.bf16.msra.mxu2 %v8821_v48  ;;  %v8819_v18 = vld [vmem:[%s14373_s4 + $0x58] sm:$0xff] }
 0x632   : > { %v4175_v0 = vpack.c.bf16 %v4152_v62, %v4151_v9  ;;  %v3982_v15 = vpop.f32.mrf.mxu0  ;;  %v8828_v62 = vld [vmem:[%s14374_s11 + $0x60] sm:$0xff]  ;;  %v9992_v48 = vld [vmem:[%s10378_s7 + $0x18] sm:$0xff] }
 0x633   : > { %v9309_v35 = vpop.eup %9308  ;;  %v4103_v52 = vmul.f32 1.442695, %v4091_v13  ;;  %v4060_v19 = vadd.f32 %v4059_v43, %v3982_v15 }
 0x634   : > { %v4114_v10 = vadd.f32 1.0, %v9309_v35  ;;  %4235 = vmatmul.bf16.vlgmr.msra.gmra.mxu1 %v4175_v0  ;;  %v9311_v14 = vpop.eup %9310 }
 0x635   : > { %9312 = vpow2.f32 %v4103_v52  ;;  %v11949_v11 = vadd.f32 %v11926_v5, %v4060_v19  ;;  %v4137_v39 = vmul.f32 %v9311_v14, %v9305_v16 }
 0x636   : > { %9314 = vrcp.f32 %v4114_v10 }
 0x637   : > { %v4084_v4 = vand.u32 2147483647, %v11949_v11  ;;  %v4145_v40 = vsel %vm4129_vm12, %v9311_v14, %v4137_v39  ;;  %vm4132_vm7 = vcmp.ge.f32.partialorder %v11949_v11, 0.0  ;;  %v8827_v39 = vld [vmem:[%s14374_s11 + $0x58] sm:$0xff] }
 0x638   : > { %v4153_v31 = vmul.f32 %v4145_v40, %v11940_v17  ;;  %v8831_v17 = vld [vmem:[%s14374_s11 + $0x78] sm:$0xff] }
 0x639   : > { %v4092_v38 = vsub.f32 0.0, %v4084_v4  ;;  %4487 = vmatpush.bf16.msra.mxu0 %v8831_v17 }
 0x63a   : > { %v3985_v61 = vpop.f32.mrf.mxu0 }
 0x63b   : > { %v9313_v29 = vpop.eup %9312  ;;  %v4105_v20 = vmul.f32 1.442695, %v4092_v38  ;;  %v4063_v7 = vadd.f32 %v4062_v28, %v3985_v61  ;;  %v8818_v61 = vld [vmem:[%s14373_s4 + $0x50] sm:$0xff] }
 0x63c   : > { %v9315_v42 = vpop.eup %9314  ;;  %v4115_v46 = vadd.f32 1.0, %v9313_v29 }
 0x63d   : > { %9316 = vpow2.f32 %v4105_v20  ;;  %v11957_v22 = vadd.f32 %v11926_v5, %v4063_v7  ;;  %v4138_v27 = vmul.f32 %v9315_v42, %v9309_v35  ;;  %4488 = vmatpush.bf16.msra.mxu0 %v8830_v53  ;;  %v8817_v20 = vld [vmem:[%s14373_s4 + $0x48] sm:$0xff] }
 0x63e   : > { %9318 = vrcp.f32 %v4115_v46  ;;  %v8825_v7 = vld [vmem:[%s14374_s11 + $0x48] sm:$0xff]  ;;  %v8824_v46 = vld [vmem:[%s14374_s11 + $0x40] sm:$0xff] }
 0x63f   : > { %v4085_v30 = vand.u32 2147483647, %v11957_v22  ;;  %v4146_v3 = vsel %vm4130_vm2, %v9315_v42, %v4138_v27  ;;  %vm4133_vm5 = vcmp.ge.f32.partialorder %v11957_v22, 0.0  ;;  %v8816_v42 = vld [vmem:[%s14373_s4 + $0x40] sm:$0xff] }
 0x640   : > { %v4154_v44 = vmul.f32 %v4146_v3, %v4074_v37  ;;  %v9989_v27 = vld [vmem:[%s10378_s7] sm:$0xff] }
 0x641   : > { %v4093_v32 = vsub.f32 0.0, %v4085_v30  ;;  %4489 = vmatpush.bf16.msra.mxu0 %v8829_v6  ;;  %v9000_v30 = vld [vmem:[%s14103_s19] ss:$0 sm:$0xff] }
 0x642   : > { %v3987_v12 = vpop.f32.mrf.mxu0  ;;  %v4176_v49 = vpack.c.bf16 %v4154_v44, %v4153_v31  ;;  %v9990_v44 = vld [vmem:[%s10378_s7 + $0x8] sm:$0xff] }
 0x643   : > { %v9317_v56 = vpop.eup %9316  ;;  %v4107_v36 = vmul.f32 1.442695, %v4093_v32  ;;  %v4065_v51 = vadd.f32 %v4064_v57, %v3987_v12  ;;  %v12018_v57 = vpop.permute.xlu2 %4283 }
 0x644   : > { %v4116_v47 = vadd.f32 1.0, %v9317_v56  ;;  %4240 = vmatmul.bf16.gmra.mxu1 %v4176_v49  ;;  %v9319_v37 = vpop.eup %9318  ;;  %14507 = vst [vmem:[#allocation14_spill] sm:$0xff] %v12018_v57  ;;  %v12020_v49 = vpop.permute.xlu0 %4278 }
 0x645   : > { %9320 = vpow2.f32 %v4107_v36  ;;  %v4078_v23 = vadd.f32 %v11926_v5, %v4065_v51  ;;  %v4139_v58 = vmul.f32 %v9319_v37, %v9313_v29  ;;  %v8820_v5 = vld [vmem:[%s14373_s4 + $0x60] sm:$0xff]  ;;  %4490 = vmatpush.bf16.msra.mxu0 %v8828_v62  ;;  %v8826_v29 = vld [vmem:[%s14374_s11 + $0x50] sm:$0xff]  ;;  %14508 = vst [vmem:[#allocation15_spill] sm:$0xff] %v12020_v49 }
 0x646   : > { %9322 = vrcp.f32 %v4116_v47  ;;  %4396 = vmatpush.bf16.msra.mxu2 %v8820_v5 }
 0x647   : > { %v4086_v45 = vand.u32 2147483647, %v4078_v23  ;;  %v4147_v8 = vsel %vm4131_vm10, %v9319_v37, %v4139_v58  ;;  %vm4134_vm11 = vcmp.ge.f32.partialorder %v4078_v23, 0.0 }
 0x648   : > { %v4155_v13 = vmul.f32 %v4147_v8, %v11945_v54 }
 0x649   : > { %v4094_v16 = vsub.f32 0.0, %v4086_v45  ;;  %4491 = vmatpush.bf16.msra.mxu0 %v8827_v39 }
 0x64a   : > { %4397 = vmatpush.bf16.msra.mxu2 %v8819_v18  ;;  %v9994_v18 = vld [vmem:[%s10378_s7 + $0x28] sm:$0xff] }
 0x64b   : > { %v9321_v1 = vpop.eup %9320  ;;  %v4109_v63 = vmul.f32 1.442695, %v4094_v16  ;;  %v12036_v16 = vpop.permute.xlu2 %4293 }
 0x64c   : > { %v9323_v26 = vpop.eup %9322  ;;  %v4117_v33 = vadd.f32 1.0, %v9321_v1  ;;  %14511 = vst [vmem:[#allocation119_spill] sm:$0xff] %v12036_v16  ;;  %v12038_v58 = vpop.permute.xlu0 %4288 }
 0x64d   : > { %9324 = vpow2.f32 %v4109_v63  ;;  %v4140_v43 = vmul.f32 %v9323_v26, %v9317_v56  ;;  %4492 = vmatpush.bf16.msra.mxu0 %v8826_v29  ;;  %14512 = vst [vmem:[#allocation120_spill] sm:$0xff] %v12038_v58 }
 0x64e   : > { %9326 = vrcp.f32 %v4117_v33  ;;  %4398 = vmatpush.bf16.msra.mxu2 %v8818_v61 }
 0x64f   : > { %v4148_v9 = vsel %vm4132_vm7, %v9323_v26, %v4140_v43  ;;  %v9993_v26 = vld [vmem:[%s10378_s7 + $0x20] sm:$0xff] }
 0x650   : > { %v4156_v0 = vmul.f32 %v4148_v9, %v11949_v11 }
 0x651   : > { %4493 = vmatpush.bf16.msra.mxu0 %v8825_v7 }
 0x652   : > { %v4177_v15 = vpack.c.bf16 %v4156_v0, %v4155_v13  ;;  %4399 = vmatpush.bf16.msra.mxu2 %v8817_v20 }
 0x653   : > { %v9325_v35 = vpop.eup %9324  ;;  %v12054_v13 = vpop.permute.xlu2 %4303 }
 0x654   : > { %v4118_v52 = vadd.f32 1.0, %v9325_v35  ;;  %4245 = vmatmul.bf16.gmra.mxu1 %v4177_v15  ;;  %v9327_v19 = vpop.eup %9326  ;;  %14515 = vst [vmem:[#allocation123_spill] sm:$0xff] %v12054_v13  ;;  %v12056_v0 = vpop.permute.xlu0 %4298 }
 0x655   : > { %v4141_v10 = vmul.f32 %v9327_v19, %v9321_v1  ;;  %4494 = vmatpush.bf16.msra.mxu0 %v8824_v46  ;;  %14516 = vst [vmem:[#allocation124_spill] sm:$0xff] %v12056_v0 }
 0x656   : > { %9328 = vrcp.f32 %v4118_v52  ;;  %4400 = vmatpush.bf16.msra.mxu2 %v8816_v42 }
 0x657   : > { %v4149_v4 = vsel %vm4133_vm5, %v9327_v19, %v4141_v10  ;;  %v9995_v10 = vld [vmem:[%s10378_s7 + $0x30] sm:$0xff] }
 0x658   : > { %v4157_v54 = vmul.f32 %v4149_v4, %v11957_v22 }
 0x65c   : > { %v9329_v14 = vpop.eup %9328  ;;  %v12074_v39 = vpop.permute.xlu0 %4308 }
 0x65d   : > { %v4142_v41 = vmul.f32 %v9329_v14, %v9325_v35  ;;  %14520 = vst [vmem:[#allocation128_spill] sm:$0xff] %v12074_v39 }
 0x65f   : > { %v4150_v28 = vsel %vm4134_vm11, %v9329_v14, %v4142_v41 }
 0x660   : > { %v4158_v38 = vmul.f32 %v4150_v28, %v4078_v23  ;;  %v9996_v28 = vld [vmem:[%s10378_s7 + $0x38] sm:$0xff]  ;;  %s14685_s7 = sld [smem:[#allocation147_spill]] }
 0x662   : > { %v4178_v11 = vpack.c.bf16 %v4158_v38, %v4157_v54 }
 0x664   : > { %4250 = vmatmul.bf16.gmra.mxu1 %v4178_v11  ;;  %v12072_v11 = vpop.permute.xlu2 %4313 }
 0x665   : > { %14519 = vst [vmem:[#allocation127_spill] sm:$0xff] %v12072_v11 }
 0x6b1   : > { %v4236_v22 = vpop.f32.mrf.mxu1 }
 0x6b2   : > { %v4256_v40 = vadd.f32 %v9989_v27, %v4236_v22 }
 0x6b4   : > { %v4268_v31 = vadd.f32 %v9000_v30, %v4256_v40 }
 0x6b6   : > { %v12023_v56 = vmul.f32 %v12020_v49, %v4268_v31 }
 0x6b8   : > { %14509 = vst [vmem:[#allocation16_spill] sm:$0xff] %v12023_v56 }
 0x6b9   : > { %v4238_v3 = vpop.f32.mrf.mxu1 }
 0x6ba   : > { %v4257_v32 = vadd.f32 %v9990_v44, %v4238_v3 }
 0x6bc   : > { %v4269_v12 = vadd.f32 %v9000_v30, %v4257_v32 }
 0x6be   : > { %v12026_v36 = vmul.f32 %v12018_v57, %v4269_v12 }
 0x6c0   : > { %14510 = vst [vmem:[#allocation17_spill] sm:$0xff] %v12026_v36  ;;  %v12030_v51 = vpack.c.bf16 %v12026_v36, %v12023_v56  ;;  %v12682_v36 = vld [vmem:[%s11654_s30 + $0x40] sm:$0xff] }
 0x6c1   : > { %v4241_v47 = vpop.f32.mrf.mxu1 }
 0x6c2   : > { %4401 = vmatmul.bf16.vlgmr.msra.gmra.mxu2 %v12030_v51  ;;  %4495 = vmatmul.bf16.vlgmr.msra.gmra.mxu0 %v12030_v51  ;;  %v4258_v23 = vadd.f32 %v9991_v59, %v4241_v47 }
 0x6c4   : > { %v4270_v37 = vadd.f32 %v9000_v30, %v4258_v23 }
 0x6c6   : > { %v12041_v5 = vmul.f32 %v12038_v58, %v4270_v37 }
 0x6c8   : > { %14513 = vst [vmem:[#allocation121_spill] sm:$0xff] %v12041_v5 }
 0x6c9   : > { %v4243_v17 = vpop.f32.mrf.mxu1 }
 0x6ca   : > { %v4259_v45 = vadd.f32 %v9992_v48, %v4243_v17 }
 0x6cc   : > { %v4271_v53 = vadd.f32 %v9000_v30, %v4259_v45 }
 0x6ce   : > { %v12044_v1 = vmul.f32 %v12036_v16, %v4271_v53 }
 0x6d0   : > { %14514 = vst [vmem:[#allocation122_spill] sm:$0xff] %v12044_v1  ;;  %v12048_v63 = vpack.c.bf16 %v12044_v1, %v12041_v5 }
 0x6d1   : > { %v4246_v6 = vpop.f32.mrf.mxu1 }
 0x6d2   : > { %4406 = vmatmul.bf16.gmra.mxu2 %v12048_v63  ;;  %4500 = vmatmul.bf16.gmra.mxu0 %v12048_v63  ;;  %v4260_v33 = vadd.f32 %v9993_v26, %v4246_v6 }
 0x6d4   : > { %v4272_v8 = vadd.f32 %v9000_v30, %v4260_v33 }
 0x6d6   : > { %v12059_v15 = vmul.f32 %v12056_v0, %v4272_v8 }
 0x6d8   : > { %14517 = vst [vmem:[#allocation125_spill] sm:$0xff] %v12059_v15 }
 0x6d9   : > { %v4248_v43 = vpop.f32.mrf.mxu1 }
 0x6da   : > { %v4261_v9 = vadd.f32 %v9994_v18, %v4248_v43  ;;  %v14523_v43 = vld [vmem:[#allocation20_spill] sm:$0xff]  ;;  %v14524_v18 = vld [vmem:[#allocation21_spill] sm:$0xff] }
 0x6dc   : > { %v4273_v62 = vadd.f32 %v9000_v30, %v4261_v9  ;;  %v14525_v9 = vld [vmem:[#allocation22_spill] sm:$0xff] }
 0x6de   : > { %v12062_v35 = vmul.f32 %v12054_v13, %v4273_v62  ;;  %v14526_v62 = vld [vmem:[#allocation19_spill] sm:$0xff] }
 0x6e0   : > { %14518 = vst [vmem:[#allocation126_spill] sm:$0xff] %v12062_v35  ;;  %v12066_v52 = vpack.c.bf16 %v12062_v35, %v12059_v15 }
 0x6e1   : > { %v4251_v19 = vpop.f32.mrf.mxu1 }
 0x6e2   : > { %4411 = vmatmul.bf16.gmra.mxu2 %v12066_v52  ;;  %4505 = vmatmul.bf16.gmra.mxu0 %v12066_v52  ;;  %v4262_v14 = vadd.f32 %v9995_v10, %v4251_v19  ;;  %v14527_v19 = vld [vmem:[#allocation23_spill] sm:$0xff]  ;;  %v14528_v10 = vld [vmem:[#allocation24_spill] sm:$0xff] }
 0x6e4   : > { %v4274_v4 = vadd.f32 %v9000_v30, %v4262_v14  ;;  %v14529_v14 = vld [vmem:[#allocation27_spill] sm:$0xff] }
 0x6e6   : > { %v12077_v61 = vmul.f32 %v12074_v39, %v4274_v4  ;;  %v14531_v4 = vld [vmem:[#allocation28_spill] sm:$0xff] }
 0x6e8   : > { %14521 = vst [vmem:[#allocation129_spill] sm:$0xff] %v12077_v61 }
 0x6e9   : > { %v4253_v41 = vpop.f32.mrf.mxu1 }
 0x6ea   : > { %v4263_v54 = vadd.f32 %v9996_v28, %v4253_v41  ;;  %v14530_v41 = vld [vmem:[#allocation25_spill] sm:$0xff]  ;;  %v14532_v28 = vld [vmem:[#allocation26_spill] sm:$0xff] }
 0x6ec   : > { %v4275_v38 = vadd.f32 %v9000_v30, %v4263_v54  ;;  %v14533_v54 = vld [vmem:[#allocation29_spill] sm:$0xff] }
 0x6ee   : > { %v12080_v29 = vmul.f32 %v12072_v11, %v4275_v38  ;;  %v14534_v38 = vld [vmem:[#allocation30_spill] sm:$0xff] }
 0x6f0   : > { %14522 = vst [vmem:[#allocation130_spill] sm:$0xff] %v12080_v29  ;;  %v12084_v20 = vpack.c.bf16 %v12080_v29, %v12077_v61 }
 0x6f2   : > { %4416 = vmatmul.bf16.gmra.mxu2 %v12084_v20  ;;  %4510 = vmatmul.bf16.gmra.mxu0 %v12084_v20 }
 0x73f   : > { %v4496_v7 = vpop.f32.mrf.mxu0 }
 0x745   : > { %v4402_v42 = vpop.f32.mrf.mxu2 }
 0x747   : > { %v4498_v46 = vpop.f32.mrf.mxu0 }
 0x748   : > { %v4522_v26 = vpack.c.bf16 %v4498_v46, %v4496_v7  ;;  %v14535_v7 = vld [vmem:[#allocation33_spill] sm:$0xff]  ;;  %v14537_v46 = vld [vmem:[#allocation34_spill] sm:$0xff] }
 0x74d   : > { %v4404_v22 = vpop.f32.mrf.mxu2 }
 0x74e   : > { %v4518_v8 = vpack.c.bf16 %v4404_v22, %v4402_v42  ;;  %v14536_v42 = vld [vmem:[#allocation31_spill] sm:$0xff]  ;;  %v8839_v22 = vld [vmem:[%s14432_s3 + $0x78] sm:$0xff] }
 0x74f   : > { %v4501_v27 = vpop.f32.mrf.mxu0  ;;  %5113 = vmatpush.bf16.msrb.mxu2 %v8839_v22 }
 0x755   : > { %v4407_v40 = vpop.f32.mrf.mxu2 }
 0x757   : > { %v4503_v30 = vpop.f32.mrf.mxu0 }
 0x758   : > { %v4523_v53 = vpack.c.bf16 %v4503_v30, %v4501_v27  ;;  %v14538_v27 = vld [vmem:[#allocation32_spill] sm:$0xff] }
 0x759   : > { %v8837_v30 = vld [vmem:[%s14432_s3 + $0x68] sm:$0xff] }
 0x75d   : > { %v4409_v3 = vpop.f32.mrf.mxu2 }
 0x75e   : > { %v4519_v33 = vpack.c.bf16 %v4409_v3, %v4407_v40  ;;  %v8838_v40 = vld [vmem:[%s14432_s3 + $0x70] sm:$0xff]  ;;  %v8408_v3 = vld [vmem:[%s14438_s2 + $0x2] sm:$0x3] }
 0x75f   : > { %v4506_v31 = vpop.f32.mrf.mxu0  ;;  %5114 = vmatpush.bf16.msrb.mxu2 %v8838_v40  ;;  %v8834_v40 = vld [vmem:[%s14432_s3 + $0x50] sm:$0xff] }
 0x763   : > { %5115 = vmatpush.bf16.msrb.mxu2 %v8837_v30 }
 0x765   : > { %v4412_v44 = vpop.f32.mrf.mxu2 }
 0x767   : > { %v4508_v32 = vpop.f32.mrf.mxu0 }
 0x768   : > { %v4524_v37 = vpack.c.bf16 %v4508_v32, %v4506_v31  ;;  %v14539_v31 = vld [vmem:[#allocation35_spill] sm:$0xff] }
 0x769   : > { %v8836_v32 = vld [vmem:[%s14432_s3 + $0x60] sm:$0xff] }
 0x76a   : > { %5116 = vmatpush.bf16.msrb.mxu2 %v8836_v32 }
 0x76d   : > { %v4414_v12 = vpop.f32.mrf.mxu2 }
 0x76e   : > { %v4520_v6 = vpack.c.bf16 %v4414_v12, %v4412_v44  ;;  %v12134_v44 = vperm.slane %v8408_v3, 0  ;;  %v12139_v12 = vperm.slane %v8408_v3, 1 }
 0x76f   : > { %v4511_v47 = vpop.f32.mrf.mxu0 }
 0x775   : > { %v4417_v59 = vpop.f32.mrf.mxu2 }
 0x777   : > { %v4513_v23 = vpop.f32.mrf.mxu0 }
 0x778   : > { %v4525_v17 = vpack.c.bf16 %v4513_v23, %v4511_v47  ;;  %v8847_v23 = vld [vmem:[%s14099_s15 + $0x78] sm:$0xff] }
 0x77a   : > { %4530 = vmatpush.bf16.msrb.mxu3 %v4525_v17 }
 0x77d   : > { %v4419_v48 = vpop.f32.mrf.mxu2 }
 0x77e   : > { %v4521_v45 = vpack.c.bf16 %v4419_v48, %v4417_v59  ;;  %4531 = vmatpush.bf16.msrb.mxu3 %v4524_v37  ;;  %v14540_v37 = vld [vmem:[#allocation66_spill] sm:$0xff] }
 0x77f   : > { %v4665_v48 = vmul.f32 %v12134_v44, %v14540_v37 }
 0x780   : > { %4599 = vmatpush.bf16.msrb.mxu1 %v4521_v45  ;;  %v8835_v45 = vld [vmem:[%s14432_s3 + $0x58] sm:$0xff] }
 0x781   : > { %5117 = vmatpush.bf16.msrb.mxu2 %v8835_v45  ;;  %v8833_v45 = vld [vmem:[%s14432_s3 + $0x48] sm:$0xff] }
 0x782   : > { %4532 = vmatpush.bf16.msrb.mxu3 %v4523_v53  ;;  %v14541_v53 = vld [vmem:[#allocation64_spill] sm:$0xff] }
 0x784   : > { %4600 = vmatpush.bf16.msrb.mxu1 %v4520_v6  ;;  %v4714_v6 = vmul.f32 %v12139_v12, %v14541_v53 }
 0x785   : > { %5118 = vmatpush.bf16.msrb.mxu2 %v8834_v40  ;;  %v8844_v40 = vld [vmem:[%s14099_s15 + $0x60] sm:$0xff] }
 0x786   : > { %4533 = vmatpush.bf16.msrb.mxu3 %v4522_v26 }
 0x788   : > { %4601 = vmatpush.bf16.msrb.mxu1 %v4519_v33  ;;  %v12154_v33 = vld [vmem:[%s14443_s10 + $0x1] ss:$0 sm:$0xff] }
 0x789   : > { %8409 = vmatmul.msk.bf16.vlgmr.msrb.gmra.mxu3 %vm1404_vm8, %v14523_v43  ;;  %5119 = vmatpush.bf16.msrb.mxu2 %v8833_v45 }
 0x78a   : > { %6145 = vmatpush.bf16.msra.mxu3 %v8847_v23 }
 0x78c   : > { %4602 = vmatpush.bf16.msrb.mxu1 %v4518_v8  ;;  %v8846_v8 = vld [vmem:[%s14099_s15 + $0x70] sm:$0xff] }
 0x78e   : > { %6146 = vmatpush.bf16.msra.mxu3 %v8846_v8 }
 0x78f   : > { %8421 = vmatmul.msk.bf16.vlgmr.msrb.gmra.mxu1 %vm1404_vm8, %v14524_v18 }
 0x799   : > { %8410 = vmatmul.msk.bf16.gmra.mxu3 %vm1404_vm8, %v14525_v9 }
 0x79f   : > { %8422 = vmatmul.msk.bf16.gmra.mxu1 %vm1404_vm8, %v14526_v62 }
 0x7a9   : > { %8411 = vmatmul.msk.bf16.gmra.mxu3 %vm1404_vm8, %v14527_v19 }
 0x7af   : > { %8423 = vmatmul.msk.bf16.gmra.mxu1 %vm1404_vm8, %v14528_v10 }
 0x7b9   : > { %8412 = vmatmul.msk.bf16.gmra.mxu3 %vm1404_vm8, %v14529_v14 }
 0x7bf   : > { %8424 = vmatmul.msk.bf16.gmra.mxu1 %vm1404_vm8, %v14530_v41 }
 0x7c9   : > { %8413 = vmatmul.msk.bf16.gmra.mxu3 %vm1404_vm8, %v14531_v4 }
 0x7cf   : > { %8425 = vmatmul.msk.bf16.gmra.mxu1 %vm1404_vm8, %v14532_v28 }
 0x7d9   : > { %8414 = vmatmul.msk.bf16.gmra.mxu3 %vm1404_vm8, %v14533_v54 }
 0x7df   : > { %8426 = vmatmul.msk.bf16.gmra.mxu1 %vm1404_vm8, %v14534_v38 }
 0x7e9   : > { %8415 = vmatmul.msk.bf16.gmra.mxu3 %vm1404_vm8, %v14535_v7 }
 0x7ef   : > { %8427 = vmatmul.msk.bf16.gmra.mxu1 %vm1404_vm8, %v14536_v42 }
 0x7f9   : > { %8416 = vmatmul.msk.bf16.gmra.mxu3 %vm1404_vm8, %v14537_v46  ;;  %v14549_v46 = vld [vmem:[#allocation40_spill] sm:$0xff] }
 0x7ff   : > { %8428 = vmatmul.msk.bf16.gmra.mxu1 %vm1404_vm8, %v14538_v27 }
 0x809   : > { %8417 = vmatmul.msk.bf16.gmra.mxu3 %vm1404_vm8, %v14539_v31 }
 0x80c   : > { %v4535_v47 = vpop.f32.mrf.mxu3  ;;  %v4604_v59 = vpop.f32.mrf.mxu1 }
 0x80d   : > { %v4605_v17 = vadd.f32 %v4604_v59, %v4535_v47  ;;  %v8845_v47 = vld [vmem:[%s14099_s15 + $0x68] sm:$0xff] }
 0x80e   : > { %6147 = vmatpush.bf16.msra.mxu3 %v8845_v47 }
 0x80f   : > { %v4689_v26 = vadd.f32 %v4665_v48, %v4605_v17  ;;  %8429 = vmatmul.msk.bf16.gmra.mxu1 %vm1404_vm8, %v10770_v21  ;;  %v14542_v17 = vld [vmem:[#allocation69_spill] sm:$0xff] }
 0x810   : > { %v4666_v48 = vmul.f32 %v12134_v44, %v14542_v17  ;;  %v8832_v17 = vld [vmem:[%s14432_s3 + $0x40] sm:$0xff] }
 0x811   : > { %v4738_v22 = vadd.f32 %v4714_v6, %v4689_v26  ;;  %v14543_v6 = vld [vmem:[#allocation68_spill] sm:$0xff]  ;;  %5120 = vmatpush.bf16.msrb.mxu2 %v8832_v17  ;;  %v8842_v17 = vld [vmem:[%s14099_s15 + $0x50] sm:$0xff] }
 0x812   : > { %v4715_v26 = vmul.f32 %v12139_v12, %v14543_v6  ;;  %6148 = vmatpush.bf16.msra.mxu3 %v8844_v40 }
 0x813   : > { %v12165_v30 = vadd.f32 %v12154_v33, %v4738_v22 }
 0x814   : > { %v4537_v3 = vpop.f32.mrf.mxu3  ;;  %v4606_v32 = vpop.f32.mrf.mxu1 }
 0x815   : > { %v4791_v59 = vand.u32 2147483647, %v12165_v30  ;;  %v4607_v23 = vadd.f32 %v4606_v32, %v4537_v3  ;;  %v14544_v32 = vld [vmem:[#allocation39_spill] sm:$0xff]  ;;  %vm4935_vm3 = vcmp.ge.f32.partialorder %v12165_v30, 0.0 }
 0x817   : > { %v4815_v8 = vsub.f32 0.0, %v4791_v59  ;;  %v4690_v22 = vadd.f32 %v4666_v48, %v4607_v23  ;;  %v8843_v48 = vld [vmem:[%s14099_s15 + $0x58] sm:$0xff] }
 0x818   : > { %6149 = vmatpush.bf16.msra.mxu3 %v8843_v48 }
 0x819   : > { %v4839_v21 = vmul.f32 1.442695, %v4815_v8  ;;  %v4739_v3 = vadd.f32 %v4715_v26, %v4690_v22  ;;  %8418 = vmatmul.msk.bf16.gmra.mxu3 %vm1404_vm8, %v14544_v32  ;;  %v14545_v8 = vld [vmem:[#allocation74_spill] sm:$0xff] }
 0x81a   : > { %v4667_v22 = vmul.f32 %v12134_v44, %v14545_v8  ;;  %v14546_v32 = vld [vmem:[#allocation58_spill] sm:$0xff] }
 0x81b   : > { %9330 = vpow2.f32 %v4839_v21  ;;  %v12187_v47 = vadd.f32 %v12154_v33, %v4739_v3  ;;  %v4716_v21 = vmul.f32 %v12139_v12, %v14546_v32 }
 0x81c   : > { %v4540_v59 = vpop.f32.mrf.mxu3  ;;  %v4609_v23 = vpop.f32.mrf.mxu1  ;;  %6150 = vmatpush.bf16.msra.mxu3 %v8842_v17 }
 0x81d   : > { %v4792_v45 = vand.u32 2147483647, %v12187_v47  ;;  %v4610_v26 = vadd.f32 %v4609_v23, %v4540_v59  ;;  %vm4936_vm6 = vcmp.ge.f32.partialorder %v12187_v47, 0.0 }
 0x81f   : > { %v4816_v40 = vsub.f32 0.0, %v4792_v45  ;;  %v4691_v3 = vadd.f32 %v4667_v22, %v4610_v26  ;;  %8430 = vmatmul.msk.bf16.gmra.mxu1 %vm1404_vm8, %v10796_v55  ;;  %v8841_v45 = vld [vmem:[%s14099_s15 + $0x48] sm:$0xff]  ;;  %v14547_v55 = vld [vmem:[#allocation79_spill] sm:$0xff] }
 0x820   : > { %v4668_v8 = vmul.f32 %v12134_v44, %v14547_v55  ;;  %6151 = vmatpush.bf16.msra.mxu3 %v8841_v45 }
 0x821   : > { %v9331_v6 = vpop.eup %9330  ;;  %v4841_v53 = vmul.f32 1.442695, %v4816_v40  ;;  %v4740_v37 = vadd.f32 %v4716_v21, %v4691_v3  ;;  %v14548_v21 = vld [vmem:[#allocation54_spill] sm:$0xff]  ;;  %v8840_v3 = vld [vmem:[%s14099_s15 + $0x40] sm:$0xff] }
 0x822   : > { %v4887_v59 = vadd.f32 1.0, %v9331_v6 }
 0x823   : > { %9332 = vpow2.f32 %v4841_v53  ;;  %v12203_v23 = vadd.f32 %v12154_v33, %v4740_v37  ;;  %v4717_v53 = vmul.f32 %v12139_v12, %v14548_v21  ;;  %v14550_v21 = vld [vmem:[#allocation75_spill] sm:$0xff] }
 0x824   : > { %v4542_v48 = vpop.f32.mrf.mxu3  ;;  %v4611_v32 = vpop.f32.mrf.mxu1  ;;  %9334 = vrcp.f32 %v4887_v59  ;;  %6152 = vmatpush.bf16.msra.mxu3 %v8840_v3 }
 0x825   : > { %v4793_v26 = vand.u32 2147483647, %v12203_v23  ;;  %v4612_v22 = vadd.f32 %v4611_v32, %v4542_v48  ;;  %vm4937_vm1 = vcmp.ge.f32.partialorder %v12203_v23, 0.0 }
 0x827   : > { %v4817_v40 = vsub.f32 0.0, %v4793_v26  ;;  %v4692_v37 = vadd.f32 %v4668_v8, %v4612_v22 }
 0x829   : > { %v9333_v17 = vpop.eup %9332  ;;  %v4843_v31 = vmul.f32 1.442695, %v4817_v40  ;;  %v4741_v27 = vadd.f32 %v4717_v53, %v4692_v37  ;;  %8419 = vmatmul.msk.bf16.gmra.mxu3 %vm1404_vm8, %v14549_v46  ;;  %v4669_v40 = vmul.f32 %v12134_v44, %v14550_v21  ;;  %v14551_v53 = vld [vmem:[#allocation61_spill] sm:$0xff] }
 0x82a   : > { %v4888_v32 = vadd.f32 1.0, %v9333_v17  ;;  %v9335_v48 = vpop.eup %9334  ;;  %v4718_v37 = vmul.f32 %v12139_v12, %v14551_v53 }
 0x82b   : > { %9336 = vpow2.f32 %v4843_v31  ;;  %v12219_v59 = vadd.f32 %v12154_v33, %v4741_v27  ;;  %v4959_v46 = vmul.f32 %v9335_v48, %v9331_v6 }
 0x82c   : > { %9338 = vrcp.f32 %v4888_v32  ;;  %v4545_v45 = vpop.f32.mrf.mxu3  ;;  %v4614_v8 = vpop.f32.mrf.mxu1 }
 0x82d   : > { %v4794_v26 = vand.u32 2147483647, %v12219_v59  ;;  %v4615_v22 = vadd.f32 %v4614_v8, %v4545_v45  ;;  %v4983_v45 = vsel %vm4935_vm3, %v9335_v48, %v4959_v46  ;;  %vm4938_vm4 = vcmp.ge.f32.partialorder %v12219_v59, 0.0 }
 0x82f   : > { %v4818_v55 = vsub.f32 0.0, %v4794_v26  ;;  %v4693_v3 = vadd.f32 %v4669_v40, %v4615_v22  ;;  %8431 = vmatmul.msk.bf16.gmra.mxu1 %vm1404_vm8, %v10821_v25 }
 0x831   : > { %v9337_v27 = vpop.eup %9336  ;;  %v4845_v31 = vmul.f32 1.442695, %v4818_v55  ;;  %v4742_v32 = vadd.f32 %v4718_v37, %v4693_v3  ;;  %v14552_v55 = vld [vmem:[#allocation76_spill] sm:$0xff]  ;;  %v5007_v3 = vmul.f32 %v4983_v45, %v12165_v30 }
 0x832   : > { %v9339_v42 = vpop.eup %9338  ;;  %v4889_v7 = vadd.f32 1.0, %v9337_v27  ;;  %v4670_v37 = vmul.f32 %v12134_v44, %v14552_v55 }
 0x833   : > { %v4960_v8 = vmul.f32 %v9339_v42, %v9333_v17  ;;  %9340 = vpow2.f32 %v4845_v31  ;;  %v12230_v21 = vadd.f32 %v12154_v33, %v4742_v32  ;;  %v14553_v17 = vld [vmem:[#allocation56_spill] sm:$0xff] }
 0x834   : > { %v4547_v6 = vpop.f32.mrf.mxu3  ;;  %v4616_v26 = vpop.f32.mrf.mxu1  ;;  %9342 = vrcp.f32 %v4889_v7  ;;  %v4719_v48 = vmul.f32 %v12139_v12, %v14553_v17 }
 0x835   : > { %v4984_v22 = vsel %vm4936_vm6, %v9339_v42, %v4960_v8  ;;  %v4795_v40 = vand.u32 2147483647, %v12230_v21  ;;  %v4617_v25 = vadd.f32 %v4616_v26, %v4547_v6  ;;  %v14554_v8 = vld [vmem:[#allocation41_spill] sm:$0xff]  ;;  %vm4939_vm0 = vcmp.ge.f32.partialorder %v12230_v21, 0.0 }
 0x836   : > { %v5008_v46 = vmul.f32 %v4984_v22, %v12187_v47  ;;  %v14555_v22 = vld [vmem:[#allocation82_spill] sm:$0xff] }
 0x837   : > { %v4819_v31 = vsub.f32 0.0, %v4795_v40  ;;  %v4694_v32 = vadd.f32 %v4670_v37, %v4617_v25  ;;  %v4671_v40 = vmul.f32 %v12134_v44, %v14555_v22  ;;  %v14556_v37 = vld [vmem:[#allocation59_spill] sm:$0xff] }
 0x838   : > { %v5048_v53 = vpack.c.bf16 %v5008_v46, %v5007_v3  ;;  %v4720_v3 = vmul.f32 %v12139_v12, %v14556_v37 }
 0x839   : > { %v9341_v38 = vpop.eup %9340  ;;  %v4847_v54 = vmul.f32 1.442695, %v4819_v31  ;;  %v4743_v42 = vadd.f32 %v4719_v48, %v4694_v32  ;;  %8420 = vmatmul.msk.bf16.gmra.mxu3 %vm1404_vm8, %v14554_v8 }
 0x83a   : > { %5121 = vmatmul.bf16.vlgmr.msrb.gmra.mxu2 %v5048_v53  ;;  %v4890_v6 = vadd.f32 1.0, %v9341_v38  ;;  %v9343_v47 = vpop.eup %9342 }
 0x83b   : > { %9344 = vpow2.f32 %v4847_v54  ;;  %v12243_v30 = vadd.f32 %v12154_v33, %v4743_v42  ;;  %v4961_v54 = vmul.f32 %v9343_v47, %v9337_v27 }
 0x83c   : > { %v4550_v7 = vpop.f32.mrf.mxu3  ;;  %v4619_v45 = vpop.f32.mrf.mxu1  ;;  %9346 = vrcp.f32 %v4890_v6 }
 0x83d   : > { %v4796_v26 = vand.u32 2147483647, %v12243_v30  ;;  %v4620_v25 = vadd.f32 %v4619_v45, %v4550_v7  ;;  %v4985_v22 = vsel %vm4937_vm1, %v9343_v47, %v4961_v54  ;;  %vm4940_vm13 = vcmp.ge.f32.partialorder %v12243_v30, 0.0 }
 0x83f   : > { %v4820_v46 = vsub.f32 0.0, %v4796_v26  ;;  %v4695_v53 = vadd.f32 %v4671_v40, %v4620_v25  ;;  %8432 = vmatmul.msk.bf16.gmra.mxu1 %vm1404_vm8, %v10855_v60  ;;  %v14557_v40 = vld [vmem:[#allocation84_spill] sm:$0xff] }
 0x841   : > { %v9345_v48 = vpop.eup %9344  ;;  %v4849_v31 = vmul.f32 1.442695, %v4820_v46  ;;  %v4744_v32 = vadd.f32 %v4720_v3, %v4695_v53  ;;  %v4672_v3 = vmul.f32 %v12134_v44, %v14557_v40  ;;  %v5009_v53 = vmul.f32 %v4985_v22, %v12203_v23 }
 0x842   : > { %v9347_v42 = vpop.eup %9346  ;;  %v4891_v6 = vadd.f32 1.0, %v9345_v48 }
 0x843   : > { %9348 = vpow2.f32 %v4849_v31  ;;  %v12254_v7 = vadd.f32 %v12154_v33, %v4744_v32  ;;  %v4962_v45 = vmul.f32 %v9347_v42, %v9341_v38  ;;  %v14558_v32 = vld [vmem:[#allocation71_spill] sm:$0xff] }
 0x844   : > { %v4552_v37 = vpop.f32.mrf.mxu3  ;;  %v4621_v26 = vpop.f32.mrf.mxu1  ;;  %9350 = vrcp.f32 %v4891_v6  ;;  %v4721_v38 = vmul.f32 %v12139_v12, %v14558_v32 }
 0x845   : > { %v4797_v25 = vand.u32 2147483647, %v12254_v7  ;;  %v4622_v27 = vadd.f32 %v4621_v26, %v4552_v37  ;;  %v4986_v46 = vsel %vm4938_vm4, %v9347_v42, %v4962_v45  ;;  %v14559_v26 = vld [vmem:[#allocation86_spill] sm:$0xff]  ;;  %vm4941_vm14 = vcmp.ge.f32.partialorder %v12254_v7, 0.0 }
 0x846   : > { %v5010_v31 = vmul.f32 %v4986_v46, %v12219_v59 }
 0x847   : > { %v4821_v47 = vsub.f32 0.0, %v4797_v25  ;;  %v4696_v54 = vadd.f32 %v4672_v3, %v4622_v27  ;;  %v4673_v25 = vmul.f32 %v12134_v44, %v14559_v26  ;;  %v14560_v27 = vld [vmem:[#allocation65_spill] sm:$0xff] }
 0x848   : > { %v5049_v60 = vpack.c.bf16 %v5010_v31, %v5009_v53  ;;  %v4722_v3 = vmul.f32 %v12139_v12, %v14560_v27 }
 0x849   : > { %v9349_v8 = vpop.eup %9348  ;;  %v4851_v17 = vmul.f32 1.442695, %v4821_v47  ;;  %v4745_v55 = vadd.f32 %v4721_v38, %v4696_v54  ;;  %6153 = vmatmul.bf16.vlgmr.msra.gmra.mxu3 %v12030_v51 }
 0x84a   : > { %5126 = vmatmul.bf16.gmra.mxu2 %v5049_v60  ;;  %v4892_v37 = vadd.f32 1.0, %v9349_v8  ;;  %v9351_v23 = vpop.eup %9350 }
 0x84b   : > { %9352 = vpow2.f32 %v4851_v17  ;;  %v12266_v42 = vadd.f32 %v12154_v33, %v4745_v55  ;;  %v4963_v46 = vmul.f32 %v9351_v23, %v9345_v48 }
 0x84c   : > { %v4555_v59 = vpop.f32.mrf.mxu3  ;;  %v4624_v22 = vpop.f32.mrf.mxu1  ;;  %9354 = vrcp.f32 %v4892_v37 }
 0x84d   : > { %v4798_v6 = vand.u32 2147483647, %v12266_v42  ;;  %v4625_v45 = vadd.f32 %v4624_v22, %v4555_v59  ;;  %v4987_v37 = vsel %vm4939_vm0, %v9351_v23, %v4963_v46  ;;  %vm4942_vm9 = vcmp.ge.f32.partialorder %v12266_v42, 0.0 }
 0x84f   : > { %v4822_v51 = vsub.f32 0.0, %v4798_v6  ;;  %v4697_v60 = vadd.f32 %v4673_v25, %v4625_v45  ;;  %v14561_v45 = vld [vmem:[#allocation85_spill] sm:$0xff] }
 0x850   : > { %v4674_v25 = vmul.f32 %v12134_v44, %v14561_v45 }
 0x851   : > { %v9353_v17 = vpop.eup %9352  ;;  %v4853_v53 = vmul.f32 1.442695, %v4822_v51  ;;  %v4746_v55 = vadd.f32 %v4722_v3, %v4697_v60  ;;  %v5011_v51 = vmul.f32 %v4987_v37, %v12230_v21 }
 0x852   : > { %v9355_v31 = vpop.eup %9354  ;;  %v4893_v38 = vadd.f32 1.0, %v9353_v17 }
 0x853   : > { %9356 = vpow2.f32 %v4853_v53  ;;  %v12275_v47 = vadd.f32 %v12154_v33, %v4746_v55  ;;  %v4964_v54 = vmul.f32 %v9355_v31, %v9349_v8  ;;  %v14562_v53 = vld [vmem:[#allocation62_spill] sm:$0xff] }
 0x854   : > { %v4557_v59 = vpop.f32.mrf.mxu3  ;;  %v4626_v22 = vpop.f32.mrf.mxu1  ;;  %9358 = vrcp.f32 %v4893_v38  ;;  %v4723_v8 = vmul.f32 %v12139_v12, %v14562_v53 }
 0x855   : > { %v4799_v6 = vand.u32 2147483647, %v12275_v47  ;;  %v4627_v48 = vadd.f32 %v4626_v22, %v4557_v59  ;;  %v4988_v3 = vsel %vm4940_vm13, %v9355_v31, %v4964_v54  ;;  %v14563_v22 = vld [vmem:[#allocation89_spill] sm:$0xff]  ;;  %vm4943_vm12 = vcmp.ge.f32.partialorder %v12275_v47, 0.0 }
 0x856   : > { %v5012_v60 = vmul.f32 %v4988_v3, %v12243_v30 }
 0x857   : > { %v4823_v23 = vsub.f32 0.0, %v4799_v6  ;;  %v4698_v46 = vadd.f32 %v4674_v25, %v4627_v48  ;;  %v4675_v6 = vmul.f32 %v12134_v44, %v14563_v22  ;;  %v14564_v48 = vld [vmem:[#allocation77_spill] sm:$0xff] }
 0x858   : > { %v5050_v55 = vpack.c.bf16 %v5012_v60, %v5011_v51  ;;  %v4724_v25 = vmul.f32 %v12139_v12, %v14564_v48 }
 0x859   : > { %v9357_v27 = vpop.eup %9356  ;;  %v4855_v26 = vmul.f32 1.442695, %v4823_v23  ;;  %v4747_v32 = vadd.f32 %v4723_v8, %v4698_v46  ;;  %6158 = vmatmul.bf16.gmra.mxu3 %v12048_v63 }
 0x85a   : > { %5131 = vmatmul.bf16.gmra.mxu2 %v5050_v55  ;;  %v4894_v59 = vadd.f32 1.0, %v9357_v27  ;;  %v9359_v21 = vpop.eup %9358 }
 0x85b   : > { %9360 = vpow2.f32 %v4855_v26  ;;  %v12287_v31 = vadd.f32 %v12154_v33, %v4747_v32  ;;  %v4965_v51 = vmul.f32 %v9359_v21, %v9353_v17 }
 0x85c   : > { %v4560_v30 = vpop.f32.mrf.mxu3  ;;  %v4629_v38 = vpop.f32.mrf.mxu1  ;;  %9362 = vrcp.f32 %v4894_v59 }
 0x85d   : > { %v4800_v54 = vand.u32 2147483647, %v12287_v31  ;;  %v4630_v37 = vadd.f32 %v4629_v38, %v4560_v30  ;;  %v4989_v59 = vsel %vm4941_vm14, %v9359_v21, %v4965_v51  ;;  %vm4944_vm2 = vcmp.ge.f32.partialorder %v12287_v31, 0.0 }
 0x85f   : > { %v4824_v63 = vsub.f32 0.0, %v4800_v54  ;;  %v4699_v3 = vadd.f32 %v4675_v6, %v4630_v37  ;;  %v14565_v37 = vld [vmem:[#allocation87_spill] sm:$0xff] }
 0x860   : > { %v4676_v6 = vmul.f32 %v12134_v44, %v14565_v37 }
 0x861   : > { %v9361_v26 = vpop.eup %9360  ;;  %v4857_v60 = vmul.f32 1.442695, %v4824_v63  ;;  %v4748_v32 = vadd.f32 %v4724_v25, %v4699_v3  ;;  %v5013_v63 = vmul.f32 %v4989_v59, %v12254_v7 }
 0x862   : > { %v9363_v8 = vpop.eup %9362  ;;  %v4895_v23 = vadd.f32 1.0, %v9361_v26 }
 0x863   : > { %9364 = vpow2.f32 %v4857_v60  ;;  %v12296_v46 = vadd.f32 %v12154_v33, %v4748_v32  ;;  %v4966_v55 = vmul.f32 %v9363_v8, %v9357_v27  ;;  %v14566_v60 = vld [vmem:[#allocation73_spill] sm:$0xff] }
 0x864   : > { %v4562_v30 = vpop.f32.mrf.mxu3  ;;  %v4631_v38 = vpop.f32.mrf.mxu1  ;;  %9366 = vrcp.f32 %v4895_v23  ;;  %v4725_v27 = vmul.f32 %v12139_v12, %v14566_v60 }
 0x865   : > { %v4801_v54 = vand.u32 2147483647, %v12296_v46  ;;  %v4632_v17 = vadd.f32 %v4631_v38, %v4562_v30  ;;  %v4990_v25 = vsel %vm4942_vm9, %v9363_v8, %v4966_v55  ;;  %v14567_v38 = vld [vmem:[#allocation90_spill] sm:$0xff]  ;;  %vm4945_vm10 = vcmp.ge.f32.partialorder %v12296_v46, 0.0 }
 0x866   : > { %v5014_v3 = vmul.f32 %v4990_v25, %v12266_v42 }
 0x867   : > { %v4825_v21 = vsub.f32 0.0, %v4801_v54  ;;  %v4700_v51 = vadd.f32 %v4676_v6, %v4632_v17  ;;  %v4677_v54 = vmul.f32 %v12134_v44, %v14567_v38  ;;  %v14568_v17 = vld [vmem:[#allocation81_spill] sm:$0xff] }
 0x868   : > { %v5051_v32 = vpack.c.bf16 %v5014_v3, %v5013_v63  ;;  %v4726_v6 = vmul.f32 %v12139_v12, %v14568_v17 }
 0x869   : > { %v9365_v48 = vpop.eup %9364  ;;  %v4859_v22 = vmul.f32 1.442695, %v4825_v21  ;;  %v4749_v53 = vadd.f32 %v4725_v27, %v4700_v51  ;;  %6163 = vmatmul.bf16.gmra.mxu3 %v12066_v52 }
 0x86a   : > { %5136 = vmatmul.bf16.gmra.mxu2 %v5051_v32  ;;  %v4896_v30 = vadd.f32 1.0, %v9365_v48  ;;  %v9367_v7 = vpop.eup %9366 }
 0x86b   : > { %9368 = vpow2.f32 %v4859_v22  ;;  %v12308_v8 = vadd.f32 %v12154_v33, %v4749_v53  ;;  %v4967_v63 = vmul.f32 %v9367_v7, %v9361_v26 }
 0x86c   : > { %v4565_v42 = vpop.f32.mrf.mxu3  ;;  %v4634_v23 = vpop.f32.mrf.mxu1  ;;  %9370 = vrcp.f32 %v4896_v30 }
 0x86d   : > { %v4802_v55 = vand.u32 2147483647, %v12308_v8  ;;  %v4635_v59 = vadd.f32 %v4634_v23, %v4565_v42  ;;  %v4991_v30 = vsel %vm4943_vm12, %v9367_v7, %v4967_v63  ;;  %vm4946_vm7 = vcmp.ge.f32.partialorder %v12308_v8, 0.0 }
 0x86f   : > { %v4826_v52 = vsub.f32 0.0, %v4802_v55  ;;  %v4701_v25 = vadd.f32 %v4677_v54, %v4635_v59  ;;  %v14569_v59 = vld [vmem:[#allocation91_spill] sm:$0xff] }
 0x870   : > { %v4678_v54 = vmul.f32 %v12134_v44, %v14569_v59 }
 0x871   : > { %v9369_v22 = vpop.eup %9368  ;;  %v4861_v3 = vmul.f32 1.442695, %v4826_v52  ;;  %v4750_v53 = vadd.f32 %v4726_v6, %v4701_v25  ;;  %v5015_v52 = vmul.f32 %v4991_v30, %v12275_v47 }
 0x872   : > { %v9371_v27 = vpop.eup %9370  ;;  %v4897_v21 = vadd.f32 1.0, %v9369_v22 }
 0x873   : > { %9372 = vpow2.f32 %v4861_v3  ;;  %v12317_v51 = vadd.f32 %v12154_v33, %v4750_v53  ;;  %v4968_v32 = vmul.f32 %v9371_v27, %v9365_v48  ;;  %v14570_v3 = vld [vmem:[#allocation97_spill] sm:$0xff] }
 0x874   : > { %v4567_v42 = vpop.f32.mrf.mxu3  ;;  %v4636_v23 = vpop.f32.mrf.mxu1  ;;  %9374 = vrcp.f32 %v4897_v21  ;;  %v4727_v48 = vmul.f32 %v12139_v12, %v14570_v3 }
 0x875   : > { %v4803_v55 = vand.u32 2147483647, %v12317_v51  ;;  %v4637_v26 = vadd.f32 %v4636_v23, %v4567_v42  ;;  %v4992_v6 = vsel %vm4944_vm2, %v9371_v27, %v4968_v32  ;;  %v14571_v23 = vld [vmem:[#allocation94_spill] sm:$0xff]  ;;  %vm4947_vm5 = vcmp.ge.f32.partialorder %v12317_v51, 0.0 }
 0x876   : > { %v5016_v25 = vmul.f32 %v4992_v6, %v12287_v31 }
 0x877   : > { %v4827_v7 = vsub.f32 0.0, %v4803_v55  ;;  %v4702_v63 = vadd.f32 %v4678_v54, %v4637_v26  ;;  %v4679_v55 = vmul.f32 %v12134_v44, %v14571_v23  ;;  %v14572_v26 = vld [vmem:[#allocation99_spill] sm:$0xff] }
 0x878   : > { %v5052_v53 = vpack.c.bf16 %v5016_v25, %v5015_v52  ;;  %v4728_v54 = vmul.f32 %v12139_v12, %v14572_v26 }
 0x879   : > { %v9373_v17 = vpop.eup %9372  ;;  %v4863_v38 = vmul.f32 1.442695, %v4827_v7  ;;  %v4751_v60 = vadd.f32 %v4727_v48, %v4702_v63  ;;  %6168 = vmatmul.bf16.gmra.mxu3 %v12084_v20 }
 0x87a   : > { %5141 = vmatmul.bf16.gmra.mxu2 %v5052_v53  ;;  %v4898_v42 = vadd.f32 1.0, %v9373_v17  ;;  %v9375_v47 = vpop.eup %9374 }
 0x87b   : > { %9376 = vpow2.f32 %v4863_v38  ;;  %v12329_v27 = vadd.f32 %v12154_v33, %v4751_v60  ;;  %v4969_v52 = vmul.f32 %v9375_v47, %v9369_v22 }
 0x87c   : > { %v4570_v31 = vpop.f32.mrf.mxu3  ;;  %v4639_v21 = vpop.f32.mrf.mxu1  ;;  %9378 = vrcp.f32 %v4898_v42 }
 0x87d   : > { %v4804_v32 = vand.u32 2147483647, %v12329_v27  ;;  %v4640_v30 = vadd.f32 %v4639_v21, %v4570_v31  ;;  %v4993_v42 = vsel %vm4945_vm10, %v9375_v47, %v4969_v52  ;;  %vm4948_vm11 = vcmp.ge.f32.partialorder %v12329_v27, 0.0 }
 0x87f   : > { %v4828_v20 = vsub.f32 0.0, %v4804_v32  ;;  %v4703_v6 = vadd.f32 %v4679_v55, %v4640_v30  ;;  %v14573_v30 = vld [vmem:[#allocation93_spill] sm:$0xff] }
 0x880   : > { %v4680_v55 = vmul.f32 %v12134_v44, %v14573_v30 }
 0x881   : > { %v9377_v38 = vpop.eup %9376  ;;  %v4865_v25 = vmul.f32 1.442695, %v4828_v20  ;;  %v4752_v60 = vadd.f32 %v4728_v54, %v4703_v6  ;;  %v5017_v20 = vmul.f32 %v4993_v42, %v12296_v46  ;;  %v14575_v42 = vld [vmem:[#allocation98_spill] sm:$0xff] }
 0x882   : > { %v9379_v48 = vpop.eup %9378  ;;  %v4899_v7 = vadd.f32 1.0, %v9377_v38 }
 0x883   : > { %9380 = vpow2.f32 %v4865_v25  ;;  %v12338_v63 = vadd.f32 %v12154_v33, %v4752_v60  ;;  %v4970_v53 = vmul.f32 %v9379_v48, %v9373_v17  ;;  %v14574_v25 = vld [vmem:[#allocation101_spill] sm:$0xff] }
 0x884   : > { %v4572_v31 = vpop.f32.mrf.mxu3  ;;  %v4641_v21 = vpop.f32.mrf.mxu1  ;;  %9382 = vrcp.f32 %v4899_v7  ;;  %v4729_v17 = vmul.f32 %v12139_v12, %v14574_v25 }
 0x885   : > { %v4805_v32 = vand.u32 2147483647, %v12338_v63  ;;  %v4642_v22 = vadd.f32 %v4641_v21, %v4572_v31  ;;  %v4994_v54 = vsel %vm4946_vm7, %v9379_v48, %v4970_v53  ;;  %vm4949_vm3 = vcmp.ge.f32.partialorder %v12338_v63, 0.0 }
 0x886   : > { %v5018_v6 = vmul.f32 %v4994_v54, %v12308_v8 }
 0x887   : > { %v4829_v47 = vsub.f32 0.0, %v4805_v32  ;;  %v4704_v52 = vadd.f32 %v4680_v55, %v4642_v22  ;;  %v4681_v32 = vmul.f32 %v12134_v44, %v14575_v42  ;;  %v14576_v22 = vld [vmem:[#allocation100_spill] sm:$0xff] }
 0x888   : > { %v5053_v60 = vpack.c.bf16 %v5018_v6, %v5017_v20  ;;  %v4730_v55 = vmul.f32 %v12139_v12, %v14576_v22 }
 0x889   : > { %v9381_v26 = vpop.eup %9380  ;;  %v4867_v23 = vmul.f32 1.442695, %v4829_v47  ;;  %v4753_v3 = vadd.f32 %v4729_v17, %v4704_v52 }
 0x88a   : > { %5146 = vmatmul.bf16.gmra.mxu2 %v5053_v60  ;;  %v4900_v31 = vadd.f32 1.0, %v9381_v26  ;;  %v9383_v48 = vpop.eup %9382 }
 0x88b   : > { %9384 = vpow2.f32 %v4867_v23  ;;  %v12349_v21 = vadd.f32 %v12154_v33, %v4753_v3  ;;  %v4971_v6 = vmul.f32 %v9383_v48, %v9377_v38 }
 0x88c   : > { %v4575_v46 = vpop.f32.mrf.mxu3  ;;  %v4644_v53 = vpop.f32.mrf.mxu1  ;;  %9386 = vrcp.f32 %v4900_v31 }
 0x88d   : > { %v4806_v8 = vand.u32 2147483647, %v12349_v21  ;;  %v4645_v7 = vadd.f32 %v4644_v53, %v4575_v46  ;;  %v4995_v46 = vsel %vm4947_vm5, %v9383_v48, %v4971_v6  ;;  %vm4950_vm6 = vcmp.ge.f32.partialorder %v12349_v21, 0.0 }
 0x88f   : > { %v4830_v54 = vsub.f32 0.0, %v4806_v8  ;;  %v4705_v20 = vadd.f32 %v4681_v32, %v4645_v7  ;;  %v14577_v7 = vld [vmem:[#allocation95_spill] sm:$0xff] }
 0x890   : > { %v4682_v32 = vmul.f32 %v12134_v44, %v14577_v7 }
 0x891   : > { %v9385_v23 = vpop.eup %9384  ;;  %v4869_v17 = vmul.f32 1.442695, %v4830_v54  ;;  %v4754_v3 = vadd.f32 %v4730_v55, %v4705_v20  ;;  %v5019_v54 = vmul.f32 %v4995_v46, %v12317_v51  ;;  %v14579_v46 = vld [vmem:[#allocation104_spill] sm:$0xff] }
 0x892   : > { %v9387_v47 = vpop.eup %9386  ;;  %v4901_v52 = vadd.f32 1.0, %v9385_v23 }
 0x893   : > { %9388 = vpow2.f32 %v4869_v17  ;;  %v12358_v60 = vadd.f32 %v12154_v33, %v4754_v3  ;;  %v4972_v31 = vmul.f32 %v9387_v47, %v9381_v26  ;;  %v14578_v17 = vld [vmem:[#allocation102_spill] sm:$0xff] }
 0x894   : > { %v4577_v53 = vpop.f32.mrf.mxu3  ;;  %v4646_v42 = vpop.f32.mrf.mxu1  ;;  %9390 = vrcp.f32 %v4901_v52  ;;  %v4731_v26 = vmul.f32 %v12139_v12, %v14578_v17 }
 0x895   : > { %v4807_v8 = vand.u32 2147483647, %v12358_v60  ;;  %v4647_v38 = vadd.f32 %v4646_v42, %v4577_v53  ;;  %v4996_v55 = vsel %vm4948_vm11, %v9387_v47, %v4972_v31  ;;  %vm4951_vm1 = vcmp.ge.f32.partialorder %v12358_v60, 0.0 }
 0x896   : > { %v5020_v20 = vmul.f32 %v4996_v55, %v12329_v27 }
 0x897   : > { %v4831_v48 = vsub.f32 0.0, %v4807_v8  ;;  %v4706_v6 = vadd.f32 %v4682_v32, %v4647_v38  ;;  %v4683_v8 = vmul.f32 %v12134_v44, %v14579_v46  ;;  %v14580_v38 = vld [vmem:[#allocation103_spill] sm:$0xff] }
 0x898   : > { %v5054_v3 = vpack.c.bf16 %v5020_v20, %v5019_v54  ;;  %v4732_v32 = vmul.f32 %v12139_v12, %v14580_v38 }
 0x899   : > { %v9389_v22 = vpop.eup %9388  ;;  %v4871_v25 = vmul.f32 1.442695, %v4831_v48  ;;  %v4755_v30 = vadd.f32 %v4731_v26, %v4706_v6 }
 0x89a   : > { %5151 = vmatmul.bf16.gmra.mxu2 %v5054_v3  ;;  %v4902_v42 = vadd.f32 1.0, %v9389_v22  ;;  %v9391_v47 = vpop.eup %9390 }
 0x89b   : > { %9392 = vpow2.f32 %v4871_v25  ;;  %v12369_v53 = vadd.f32 %v12154_v33, %v4755_v30  ;;  %v4973_v20 = vmul.f32 %v9391_v47, %v9385_v23 }
 0x89c   : > { %v4580_v51 = vpop.f32.mrf.mxu3  ;;  %v4649_v31 = vpop.f32.mrf.mxu1  ;;  %9394 = vrcp.f32 %v4902_v42 }
 0x89d   : > { %v4808_v27 = vand.u32 2147483647, %v12369_v53  ;;  %v4650_v52 = vadd.f32 %v4649_v31, %v4580_v51  ;;  %v4997_v51 = vsel %vm4949_vm3, %v9391_v47, %v4973_v20  ;;  %vm4952_vm4 = vcmp.ge.f32.partialorder %v12369_v53, 0.0 }
 0x89f   : > { %v4832_v55 = vsub.f32 0.0, %v4808_v27  ;;  %v4707_v54 = vadd.f32 %v4683_v8, %v4650_v52  ;;  %v14581_v52 = vld [vmem:[#allocation106_spill] sm:$0xff] }
 0x8a0   : > { %v4684_v8 = vmul.f32 %v12134_v44, %v14581_v52 }
 0x8a1   : > { %v9393_v25 = vpop.eup %9392  ;;  %v4873_v26 = vmul.f32 1.442695, %v4832_v55  ;;  %v4756_v30 = vadd.f32 %v4732_v32, %v4707_v54  ;;  %v5021_v55 = vmul.f32 %v4997_v51, %v12338_v63  ;;  %v14583_v51 = vld [vmem:[#allocation108_spill] sm:$0xff] }
 0x8a2   : > { %v9395_v48 = vpop.eup %9394  ;;  %v4903_v6 = vadd.f32 1.0, %v9393_v25 }
 0x8a3   : > { %9396 = vpow2.f32 %v4873_v26  ;;  %v12378_v3 = vadd.f32 %v12154_v33, %v4756_v30  ;;  %v4974_v42 = vmul.f32 %v9395_v48, %v9389_v22  ;;  %v14582_v26 = vld [vmem:[#allocation105_spill] sm:$0xff] }
 0x8a4   : > { %v4582_v31 = vpop.f32.mrf.mxu3  ;;  %v4651_v46 = vpop.f32.mrf.mxu1  ;;  %9398 = vrcp.f32 %v4903_v6  ;;  %v4733_v22 = vmul.f32 %v12139_v12, %v14582_v26 }
 0x8a5   : > { %v4809_v27 = vand.u32 2147483647, %v12378_v3  ;;  %v4652_v23 = vadd.f32 %v4651_v46, %v4582_v31  ;;  %v4998_v32 = vsel %vm4950_vm6, %v9395_v48, %v4974_v42  ;;  %vm4953_vm0 = vcmp.ge.f32.partialorder %v12378_v3, 0.0 }
 0x8a6   : > { %v5022_v54 = vmul.f32 %v4998_v32, %v12349_v21 }
 0x8a7   : > { %v4833_v47 = vsub.f32 0.0, %v4809_v27  ;;  %v4708_v20 = vadd.f32 %v4684_v8, %v4652_v23  ;;  %v4685_v27 = vmul.f32 %v12134_v44, %v14583_v51  ;;  %v14584_v23 = vld [vmem:[#allocation110_spill] sm:$0xff] }
 0x8a8   : > { %v5055_v30 = vpack.c.bf16 %v5022_v54, %v5021_v55  ;;  %v4734_v8 = vmul.f32 %v12139_v12, %v14584_v23 }
 0x8a9   : > { %v9397_v38 = vpop.eup %9396  ;;  %v4875_v17 = vmul.f32 1.442695, %v4833_v47  ;;  %v4757_v7 = vadd.f32 %v4733_v22, %v4708_v20 }
 0x8aa   : > { %5156 = vmatmul.bf16.gmra.mxu2 %v5055_v30  ;;  %v4904_v46 = vadd.f32 1.0, %v9397_v38  ;;  %v9399_v48 = vpop.eup %9398 }
 0x8ab   : > { %9400 = vpow2.f32 %v4875_v17  ;;  %v12389_v31 = vadd.f32 %v12154_v33, %v4757_v7  ;;  %v4975_v54 = vmul.f32 %v9399_v48, %v9393_v25 }
 0x8ac   : > { %v4585_v63 = vpop.f32.mrf.mxu3  ;;  %v4654_v42 = vpop.f32.mrf.mxu1  ;;  %9402 = vrcp.f32 %v4904_v46 }
 0x8ad   : > { %v4810_v21 = vand.u32 2147483647, %v12389_v31  ;;  %v4655_v6 = vadd.f32 %v4654_v42, %v4585_v63  ;;  %v4999_v63 = vsel %vm4951_vm1, %v9399_v48, %v4975_v54  ;;  %vm4954_vm13 = vcmp.ge.f32.partialorder %v12389_v31, 0.0 }
 0x8af   : > { %v4834_v32 = vsub.f32 0.0, %v4810_v21  ;;  %v4709_v55 = vadd.f32 %v4685_v27, %v4655_v6  ;;  %v14585_v6 = vld [vmem:[#allocation112_spill] sm:$0xff] }
 0x8b0   : > { %v4686_v27 = vmul.f32 %v12134_v44, %v14585_v6 }
 0x8b1   : > { %v9401_v17 = vpop.eup %9400  ;;  %v4877_v22 = vmul.f32 1.442695, %v4834_v32  ;;  %v4758_v7 = vadd.f32 %v4734_v8, %v4709_v55  ;;  %v5023_v32 = vmul.f32 %v4999_v63, %v12358_v60  ;;  %v14587_v63 = vld [vmem:[#allocation114_spill] sm:$0xff] }
 0x8b2   : > { %v9403_v47 = vpop.eup %9402  ;;  %v4905_v20 = vadd.f32 1.0, %v9401_v17 }
 0x8b3   : > { %9404 = vpow2.f32 %v4877_v22  ;;  %v12398_v30 = vadd.f32 %v12154_v33, %v4758_v7  ;;  %v4976_v46 = vmul.f32 %v9403_v47, %v9397_v38  ;;  %v14586_v22 = vld [vmem:[#allocation111_spill] sm:$0xff] }
 0x8b4   : > { %v4587_v42 = vpop.f32.mrf.mxu3  ;;  %v4656_v51 = vpop.f32.mrf.mxu1  ;;  %9406 = vrcp.f32 %v4905_v20  ;;  %v4735_v38 = vmul.f32 %v12139_v12, %v14586_v22 }
 0x8b5   : > { %v4811_v21 = vand.u32 2147483647, %v12398_v30  ;;  %v4657_v25 = vadd.f32 %v4656_v51, %v4587_v42  ;;  %v5000_v8 = vsel %vm4952_vm4, %v9403_v47, %v4976_v46  ;;  %vm4955_vm14 = vcmp.ge.f32.partialorder %v12398_v30, 0.0 }
 0x8b6   : > { %v5024_v55 = vmul.f32 %v5000_v8, %v12369_v53 }
 0x8b7   : > { %v4835_v48 = vsub.f32 0.0, %v4811_v21  ;;  %v4710_v54 = vadd.f32 %v4686_v27, %v4657_v25  ;;  %v4687_v21 = vmul.f32 %v12134_v44, %v14587_v63  ;;  %v14588_v27 = vld [vmem:[#allocation113_spill] sm:$0xff] }
 0x8b8   : > { %v5056_v7 = vpack.c.bf16 %v5024_v55, %v5023_v32  ;;  %v4736_v8 = vmul.f32 %v12139_v12, %v14588_v27 }
 0x8b9   : > { %v9405_v23 = vpop.eup %9404  ;;  %v4879_v26 = vmul.f32 1.442695, %v4835_v48  ;;  %v4759_v52 = vadd.f32 %v4735_v38, %v4710_v54 }
 0x8ba   : > { %5161 = vmatmul.bf16.gmra.mxu2 %v5056_v7  ;;  %v4906_v51 = vadd.f32 1.0, %v9405_v23  ;;  %v9407_v47 = vpop.eup %9406 }
 0x8bb   : > { %9408 = vpow2.f32 %v4879_v26  ;;  %v12409_v42 = vadd.f32 %v12154_v33, %v4759_v52  ;;  %v4977_v26 = vmul.f32 %v9407_v47, %v9401_v17 }
 0x8bc   : > { %v4590_v60 = vpop.f32.mrf.mxu3  ;;  %v4659_v46 = vpop.f32.mrf.mxu1  ;;  %9410 = vrcp.f32 %v4906_v51 }
 0x8bd   : > { %v4812_v53 = vand.u32 2147483647, %v12409_v42  ;;  %v4660_v20 = vadd.f32 %v4659_v46, %v4590_v60  ;;  %v5122_v25 = vpop.f32.mrf.mxu2  ;;  %v5001_v46 = vsel %vm4953_vm0, %v9407_v47, %v4977_v26  ;;  %vm4956_vm9 = vcmp.ge.f32.partialorder %v12409_v42, 0.0 }
 0x8bf   : > { %v4836_v32 = vsub.f32 0.0, %v4812_v53  ;;  %v4711_v55 = vadd.f32 %v4687_v21, %v4660_v20  ;;  %v14589_v20 = vld [vmem:[#allocation116_spill] sm:$0xff] }
 0x8c0   : > { %v4688_v21 = vmul.f32 %v12134_v44, %v14589_v20 }
 0x8c1   : > { %v9409_v38 = vpop.eup %9408  ;;  %v4881_v52 = vmul.f32 1.442695, %v4836_v32  ;;  %v4760_v48 = vadd.f32 %v4736_v8, %v4711_v55  ;;  %v5025_v55 = vmul.f32 %v5001_v46, %v12378_v3 }
 0x8c2   : > { %v9411_v54 = vpop.eup %9410  ;;  %v4907_v7 = vadd.f32 1.0, %v9409_v38 }
 0x8c3   : > { %9412 = vpow2.f32 %v4881_v52  ;;  %v12418_v51 = vadd.f32 %v12154_v33, %v4760_v48  ;;  %v4978_v60 = vmul.f32 %v9411_v54, %v9405_v23  ;;  %v14590_v23 = vld [vmem:[#allocation115_spill] sm:$0xff] }
 0x8c4   : > { %v4592_v63 = vpop.f32.mrf.mxu3  ;;  %v4661_v22 = vpop.f32.mrf.mxu1  ;;  %9414 = vrcp.f32 %v4907_v7  ;;  %v4737_v47 = vmul.f32 %v12139_v12, %v14590_v23 }
 0x8c5   : > { %v4813_v53 = vand.u32 2147483647, %v12418_v51  ;;  %v4662_v17 = vadd.f32 %v4661_v22, %v4592_v63  ;;  %v12424_v8 = vpop.f32.mrf.mxu2  ;;  %v5002_v32 = vsel %vm4954_vm13, %v9411_v54, %v4978_v60  ;;  %vm4957_vm12 = vcmp.ge.f32.partialorder %v12418_v51, 0.0 }
 0x8c6   : > { %v5026_v52 = vmul.f32 %v5002_v32, %v12389_v31  ;;  %v12434_v31 = vld [vmem:[%s14480_s0 + $0x1] ss:$0 sm:$0xff] }
 0x8c7   : > { %v4837_v26 = vsub.f32 0.0, %v4813_v53  ;;  %v4712_v48 = vadd.f32 %v4688_v21, %v4662_v17 }
 0x8c8   : > { %v5057_v27 = vpack.c.bf16 %v5026_v52, %v5025_v55 }
 0x8c9   : > { %v9413_v6 = vpop.eup %9412  ;;  %v4883_v59 = vmul.f32 1.442695, %v4837_v26  ;;  %v4761_v22 = vadd.f32 %v4737_v47, %v4712_v48 }
 0x8ca   : > { %5166 = vmatmul.bf16.gmra.mxu2 %v5057_v27  ;;  %v4908_v63 = vadd.f32 1.0, %v9413_v6  ;;  %v9415_v54 = vpop.eup %9414 }
 0x8cb   : > { %9416 = vpow2.f32 %v4883_v59  ;;  %v4790_v44 = vadd.f32 %v12154_v33, %v4761_v22  ;;  %v4979_v7 = vmul.f32 %v9415_v54, %v9409_v38  ;;  %v12445_v22 = vadd.f32 %v12434_v31, %v5122_v25 }
 0x8cc   : > { %9418 = vrcp.f32 %v4908_v63 }
 0x8cd   : > { %v4814_v3 = vand.u32 2147483647, %v4790_v44  ;;  %v5127_v60 = vpop.f32.mrf.mxu2  ;;  %v5003_v21 = vsel %vm4955_vm14, %v9415_v54, %v4979_v7  ;;  %vm4958_vm2 = vcmp.ge.f32.partialorder %v4790_v44, 0.0  ;;  %vm5326_vm5 = vcmp.ge.f32.partialorder %v12445_v22, 0.0 }
 0x8ce   : > { %v12437_v17 = vadd.f32 %v12434_v31, %v5127_v60  ;;  %v5027_v38 = vmul.f32 %v5003_v21, %v12398_v30 }
 0x8cf   : > { %v4838_v12 = vsub.f32 0.0, %v4814_v3  ;;  %v5182_v3 = vand.u32 2147483647, %v12445_v22 }
 0x8d0   : > { %v5184_v32 = vand.u32 2147483647, %v12437_v17  ;;  %vm5328_vm7 = vcmp.ge.f32.partialorder %v12437_v17, 0.0 }
 0x8d1   : > { %v9417_v46 = vpop.eup %9416  ;;  %v4885_v53 = vmul.f32 1.442695, %v4838_v12 }
 0x8d2   : > { %v9419_v27 = vpop.eup %9418  ;;  %v4909_v33 = vadd.f32 1.0, %v9417_v46  ;;  %v5208_v63 = vsub.f32 0.0, %v5184_v32 }
 0x8d3   : > { %9420 = vpow2.f32 %v4885_v53  ;;  %v4980_v59 = vmul.f32 %v9419_v27, %v9413_v6 }
 0x8d4   : > { %9422 = vrcp.f32 %v4909_v33  ;;  %v5234_v60 = vmul.f32 1.442695, %v5208_v63 }
 0x8d5   : > { %v5129_v55 = vpop.f32.mrf.mxu2  ;;  %v5004_v52 = vsel %vm4956_vm9, %v9419_v27, %v4980_v59 }
 0x8d6   : > { %v5028_v47 = vmul.f32 %v5004_v52, %v12409_v42  ;;  %v5206_v42 = vsub.f32 0.0, %v5182_v3 }
 0x8d8   : > { %v5058_v26 = vpack.c.bf16 %v5028_v47, %v5027_v38  ;;  %v5230_v32 = vmul.f32 1.442695, %v5206_v42 }
 0x8d9   : > { %v9421_v48 = vpop.eup %9420 }
 0x8da   : > { %5171 = vmatmul.bf16.gmra.mxu2 %v5058_v26  ;;  %v4910_v6 = vadd.f32 1.0, %v9421_v48  ;;  %v9423_v54 = vpop.eup %9422 }
 0x8db   : > { %v4981_v30 = vmul.f32 %v9423_v54, %v9417_v46 }
 0x8dc   : > { %9424 = vrcp.f32 %v4910_v6 }
 0x8dd   : > { %v5132_v12 = vpop.f32.mrf.mxu2  ;;  %9426 = vpow2.f32 %v5234_v60  ;;  %v5005_v59 = vsel %vm4957_vm12, %v9423_v54, %v4981_v30  ;;  %v12456_v60 = vadd.f32 %v12434_v31, %v5129_v55 }
 0x8de   : > { %v5133_v7 = vadd.f32 %v12434_v31, %v5132_v12  ;;  %v5029_v46 = vmul.f32 %v5005_v59, %v12418_v51 }
 0x8df   : > { %vm5329_vm1 = vcmp.ge.f32.partialorder %v12456_v60, 0.0 }
 0x8e0   : > { %v5186_v53 = vand.u32 2147483647, %v5133_v7  ;;  %vm5330_vm10 = vcmp.ge.f32.partialorder %v5133_v7, 0.0 }
 0x8e2   : > { %v9425_v27 = vpop.eup %9424  ;;  %v5210_v33 = vsub.f32 0.0, %v5186_v53  ;;  %v5185_v53 = vand.u32 2147483647, %v12456_v60 }
 0x8e3   : > { %v4982_v25 = vmul.f32 %v9425_v27, %v9421_v48  ;;  %v9427_v63 = vpop.eup %9426 }
 0x8e4   : > { %v5238_v21 = vmul.f32 1.442695, %v5210_v33  ;;  %v5280_v48 = vadd.f32 1.0, %v9427_v63  ;;  %v5209_v33 = vsub.f32 0.0, %v5185_v53 }
 0x8e5   : > { %v5134_v52 = vpop.f32.mrf.mxu2  ;;  %v5006_v38 = vsel %vm4958_vm2, %v9425_v27, %v4982_v25  ;;  %v12465_v25 = vadd.f32 %v12434_v31, %v12424_v8 }
 0x8e6   : > { %9428 = vpow2.f32 %v5238_v21  ;;  %v12451_v47 = vadd.f32 %v12434_v31, %v5134_v52  ;;  %v5030_v26 = vmul.f32 %v5006_v38, %v4790_v44 }
 0x8e7   : > { %9430 = vpow2.f32 %v5230_v32  ;;  %vm5327_vm4 = vcmp.ge.f32.partialorder %v12465_v25, 0.0 }
 0x8e8   : > { %v5187_v6 = vand.u32 2147483647, %v12451_v47  ;;  %v5059_v3 = vpack.c.bf16 %v5030_v26, %v5029_v46  ;;  %9432 = vrcp.f32 %v5280_v48  ;;  %v5236_v46 = vmul.f32 1.442695, %v5209_v33 }
 0x8e9   : > { %vm5331_vm3 = vcmp.ge.f32.partialorder %v12451_v47, 0.0 }
 0x8ea   : > { %v5211_v54 = vsub.f32 0.0, %v5187_v6  ;;  %5176 = vmatmul.bf16.gmra.mxu2 %v5059_v3  ;;  %v5183_v3 = vand.u32 2147483647, %v12465_v25 }
 0x8ec   : > { %v9429_v12 = vpop.eup %9428  ;;  %v5240_v30 = vmul.f32 1.442695, %v5211_v54 }
 0x8ed   : > { %v5282_v42 = vadd.f32 1.0, %v9429_v12  ;;  %v5137_v27 = vpop.f32.mrf.mxu2  ;;  %v9431_v44 = vpop.eup %9430 }
 0x8ee   : > { %v12460_v51 = vadd.f32 %v12434_v31, %v5137_v27  ;;  %v5278_v21 = vadd.f32 1.0, %v9431_v44  ;;  %v9433_v32 = vpop.eup %9432 }
 0x8ef   : > { %9434 = vrcp.f32 %v5282_v42 }
 0x8f0   : > { %9436 = vpow2.f32 %v5240_v30  ;;  %v5188_v55 = vand.u32 2147483647, %v12460_v51  ;;  %v5352_v30 = vmul.f32 %v9433_v32, %v9427_v63  ;;  %vm5332_vm11 = vcmp.ge.f32.partialorder %v12460_v51, 0.0 }
 0x8f2   : > { %v5212_v59 = vsub.f32 0.0, %v5188_v55  ;;  %v12477_v55 = vld [vmem:[%s14097_s13 + $0x1] ss:$0 sm:$0xff] }
 0x8f4   : > { %v5242_v52 = vmul.f32 1.442695, %v5212_v59 }
 0x8f5   : > { %v9435_v38 = vpop.eup %9434  ;;  %v5139_v26 = vpop.f32.mrf.mxu2 }
 0x8f6   : > { %v9437_v6 = vpop.eup %9436  ;;  %v5354_v48 = vmul.f32 %v9435_v38, %v9429_v12  ;;  %9438 = vpow2.f32 %v5242_v52  ;;  %v12469_v54 = vadd.f32 %v12434_v31, %v5139_v26  ;;  %v5207_v12 = vsub.f32 0.0, %v5183_v3 }
 0x8f7   : > { %9440 = vrcp.f32 %v5278_v21  ;;  %v5283_v27 = vadd.f32 1.0, %v9437_v6  ;;  %v5376_v21 = vsel %vm5328_vm7, %v9433_v32, %v5352_v30 }
 0x8f8   : > { %v5378_v8 = vsel %vm5330_vm10, %v9435_v38, %v5354_v48  ;;  %v5189_v53 = vand.u32 2147483647, %v12469_v54  ;;  %9442 = vpow2.f32 %v5236_v46  ;;  %v5232_v26 = vmul.f32 1.442695, %v5207_v12 }
 0x8f9   : > { %v12472_v42 = vmul.f32 %v5378_v8, %v5133_v7  ;;  %9444 = vrcp.f32 %v5283_v27  ;;  %v12486_v8 = vmul.f32 %v5376_v21, %v12437_v17  ;;  %vm5333_vm6 = vcmp.ge.f32.partialorder %v12469_v54, 0.0 }
 0x8fa   : > { %v5213_v33 = vsub.f32 0.0, %v5189_v53 }
 0x8fb   : > { %v5431_v59 = vmul.f32 %v12477_v55, %v12472_v42  ;;  %v5429_v12 = vmul.f32 %v12477_v55, %v12486_v8 }
 0x8fc   : > { %v9439_v63 = vpop.eup %9438  ;;  %v5244_v52 = vmul.f32 1.442695, %v5213_v33 }
 0x8fd   : > { %v9441_v38 = vpop.eup %9440  ;;  %v5284_v7 = vadd.f32 1.0, %v9439_v63  ;;  %v5142_v46 = vpop.f32.mrf.mxu2  ;;  %5459 = vadd.xlane.f32.xlu2 %v5431_v59 }
 0x8fe   : > { %9446 = vpow2.f32 %v5244_v52  ;;  %v12483_v48 = vadd.f32 %v12434_v31, %v5142_v46  ;;  %v9443_v3 = vpop.eup %9442  ;;  %v5350_v53 = vmul.f32 %v9441_v38, %v9431_v44 }
 0x8ff   : > { %9448 = vrcp.f32 %v5284_v7  ;;  %v5281_v32 = vadd.f32 1.0, %v9443_v3  ;;  %v9445_v27 = vpop.eup %9444 }
 0x900   : > { %v5190_v23 = vand.u32 2147483647, %v12483_v48  ;;  %9450 = vpow2.f32 %v5232_v26  ;;  %v5374_v59 = vsel %vm5326_vm5, %v9441_v38, %v5350_v53  ;;  %v5355_v53 = vmul.f32 %v9445_v27, %v9437_v6 }
 0x901   : > { %9452 = vrcp.f32 %v5281_v32  ;;  %vm5334_vm13 = vcmp.ge.f32.partialorder %v12483_v48, 0.0 }
 0x902   : > { %v5214_v30 = vsub.f32 0.0, %v5190_v23  ;;  %v12496_v23 = vmul.f32 %v5374_v59, %v12445_v22 }
 0x904   : > { %v9447_v33 = vpop.eup %9446  ;;  %v5246_v52 = vmul.f32 1.442695, %v5214_v30 }
 0x905   : > { %v9449_v46 = vpop.eup %9448  ;;  %v5285_v20 = vadd.f32 1.0, %v9447_v33  ;;  %v5144_v17 = vpop.f32.mrf.mxu2  ;;  %5455 = vadd.xlane.f32.xlu2 %v5429_v12  ;;  %v5427_v12 = vmul.f32 %v12477_v55, %v12496_v23 }
 0x906   : > { %v5356_v44 = vmul.f32 %v9449_v46, %v9439_v63  ;;  %v12493_v21 = vadd.f32 %v12434_v31, %v5144_v17  ;;  %v9451_v7 = vpop.eup %9450 }
 0x907   : > { %9454 = vrcp.f32 %v5285_v20  ;;  %v5279_v63 = vadd.f32 1.0, %v9451_v7  ;;  %v9453_v20 = vpop.eup %9452 }
 0x908   : > { %v5380_v26 = vsel %vm5332_vm11, %v9449_v46, %v5356_v44  ;;  %9456 = vpow2.f32 %v5246_v52  ;;  %v5191_v38 = vand.u32 2147483647, %v12493_v21  ;;  %v5379_v46 = vsel %vm5331_vm3, %v9445_v27, %v5355_v53 }
 0x909   : > { %v12501_v30 = vmul.f32 %v5380_v26, %v12460_v51  ;;  %v12513_v26 = vmul.f32 %v5379_v46, %v12451_v47  ;;  %v5353_v27 = vmul.f32 %v9453_v20, %v9443_v3  ;;  %vm5335_vm0 = vcmp.ge.f32.partialorder %v12493_v21, 0.0 }
 0x90a   : > { %v5215_v32 = vsub.f32 0.0, %v5191_v38 }
 0x90b   : > { %v5433_v22 = vmul.f32 %v12477_v55, %v12501_v30  ;;  %v5377_v46 = vsel %vm5329_vm1, %v9453_v20, %v5353_v27 }
 0x90c   : > { %v5248_v59 = vmul.f32 1.442695, %v5215_v32 }
 0x90d   : > { %v9455_v52 = vpop.eup %9454  ;;  %v5147_v17 = vpop.f32.mrf.mxu2  ;;  %5463 = vadd.xlane.f32.xlu0 %v5433_v22  ;;  %5451 = vadd.xlane.f32.xlu2 %v5427_v12 }
 0x90e   : > { %v9457_v6 = vpop.eup %9456  ;;  %9458 = vpow2.f32 %v5248_v59  ;;  %v12509_v51 = vadd.f32 %v12434_v31, %v5147_v17  ;;  %v5357_v44 = vmul.f32 %v9455_v52, %v9447_v33 }
 0x90f   : > { %9460 = vrcp.f32 %v5279_v63  ;;  %v5286_v53 = vadd.f32 1.0, %v9457_v6  ;;  %v5432_v63 = vmul.f32 %v12477_v55, %v12513_v26 }
 0x910   : > { %v5192_v38 = vand.u32 2147483647, %v12509_v51  ;;  %v5381_v32 = vsel %vm5333_vm6, %v9455_v52, %v5357_v44  ;;  %v12528_v44 = vmul.f32 %v5377_v46, %v12456_v60  ;;  %vm5336_vm14 = vcmp.ge.f32.partialorder %v12509_v51, 0.0 }
 0x911   : > { %v12517_v22 = vmul.f32 %v5381_v32, %v12469_v54  ;;  %9462 = vrcp.f32 %v5286_v53 }
 0x912   : > { %v5216_v12 = vsub.f32 0.0, %v5192_v38  ;;  %v5430_v20 = vmul.f32 %v12477_v55, %v12528_v44 }
 0x913   : > { %v5434_v33 = vmul.f32 %v12477_v55, %v12517_v22 }
 0x914   : > { %v9459_v59 = vpop.eup %9458  ;;  %v5250_v47 = vmul.f32 1.442695, %v5216_v12 }
 0x915   : > { %v9461_v17 = vpop.eup %9460  ;;  %v5287_v52 = vadd.f32 1.0, %v9459_v59  ;;  %v5149_v3 = vpop.f32.mrf.mxu2  ;;  %5465 = vadd.xlane.f32.xlu1 %v5434_v33  ;;  %5461 = vadd.xlane.f32.xlu0 %v5432_v63 }
 0x916   : > { %9464 = vpow2.f32 %v5250_v47  ;;  %v12525_v54 = vadd.f32 %v12434_v31, %v5149_v3  ;;  %v5351_v32 = vmul.f32 %v9461_v17, %v9451_v7 }
 0x917   : > { %9466 = vrcp.f32 %v5287_v52  ;;  %v9463_v12 = vpop.eup %9462 }
 0x918   : > { %v5193_v38 = vand.u32 2147483647, %v12525_v54  ;;  %v5375_v33 = vsel %vm5327_vm4, %v9461_v17, %v5351_v32  ;;  %v5358_v52 = vmul.f32 %v9463_v12, %v9457_v6  ;;  %vm5337_vm9 = vcmp.ge.f32.partialorder %v12525_v54, 0.0 }
 0x919   : > { %v12539_v7 = vmul.f32 %v5375_v33, %v12465_v25 }
 0x91a   : > { %v5217_v37 = vsub.f32 0.0, %v5193_v38 }
 0x91c   : > { %v9465_v27 = vpop.eup %9464  ;;  %v5252_v53 = vmul.f32 1.442695, %v5217_v37 }
 0x91d   : > { %v9467_v63 = vpop.eup %9466  ;;  %v5288_v47 = vadd.f32 1.0, %v9465_v27  ;;  %v5152_v3 = vpop.f32.mrf.mxu2  ;;  %5457 = vadd.xlane.f32.xlu0 %v5430_v20  ;;  %v5428_v20 = vmul.f32 %v12477_v55, %v12539_v7 }
 0x91e   : > { %9468 = vpow2.f32 %v5252_v53  ;;  %v12535_v60 = vadd.f32 %v12434_v31, %v5152_v3  ;;  %v5359_v46 = vmul.f32 %v9467_v63, %v9459_v59 }
 0x91f   : > { %9470 = vrcp.f32 %v5288_v47  ;;  %v5382_v47 = vsel %vm5334_vm13, %v9463_v12, %v5358_v52 }
 0x920   : > { %v5194_v38 = vand.u32 2147483647, %v12535_v60  ;;  %v5383_v37 = vsel %vm5335_vm0, %v9467_v63, %v5359_v46  ;;  %v12552_v63 = vmul.f32 %v5382_v47, %v12483_v48  ;;  %vm5338_vm12 = vcmp.ge.f32.partialorder %v12535_v60, 0.0 }
 0x921   : > { %v12543_v17 = vmul.f32 %v5383_v37, %v12493_v21 }
 0x922   : > { %v5218_v32 = vsub.f32 0.0, %v5194_v38  ;;  %v5435_v12 = vmul.f32 %v12477_v55, %v12552_v63 }
 0x923   : > { %v5436_v59 = vmul.f32 %v12477_v55, %v12543_v17 }
 0x924   : > { %v9469_v53 = vpop.eup %9468  ;;  %v5254_v25 = vmul.f32 1.442695, %v5218_v32 }
 0x925   : > { %v9471_v33 = vpop.eup %9470  ;;  %v5289_v6 = vadd.f32 1.0, %v9469_v53  ;;  %v5154_v3 = vpop.f32.mrf.mxu2  ;;  %5453 = vadd.xlane.f32.xlu0 %v5428_v20  ;;  %5469 = vadd.xlane.f32.xlu2 %v5436_v59 }
 0x926   : > { %9472 = vpow2.f32 %v5254_v25  ;;  %v5155_v21 = vadd.f32 %v12434_v31, %v5154_v3  ;;  %v5360_v46 = vmul.f32 %v9471_v33, %v9465_v27 }
 0x927   : > { %9474 = vrcp.f32 %v5289_v6 }
 0x928   : > { %v5195_v38 = vand.u32 2147483647, %v5155_v21  ;;  %v5384_v32 = vsel %vm5336_vm14, %v9471_v33, %v5360_v46  ;;  %vm5339_vm2 = vcmp.ge.f32.partialorder %v5155_v21, 0.0 }
 0x929   : > { %v12559_v27 = vmul.f32 %v5384_v32, %v12509_v51 }
 0x92a   : > { %v5219_v37 = vsub.f32 0.0, %v5195_v38 }
 0x92b   : > { %v5437_v46 = vmul.f32 %v12477_v55, %v12559_v27 }
 0x92c   : > { %v9473_v52 = vpop.eup %9472  ;;  %v5256_v45 = vmul.f32 1.442695, %v5219_v37 }
 0x92d   : > { %v9475_v20 = vpop.eup %9474  ;;  %v5290_v59 = vadd.f32 1.0, %v9473_v52  ;;  %v5157_v25 = vpop.f32.mrf.mxu2  ;;  %5467 = vadd.xlane.f32.xlu0 %v5435_v12 }
 0x92e   : > { %9476 = vpow2.f32 %v5256_v45  ;;  %v5158_v48 = vadd.f32 %v12434_v31, %v5157_v25  ;;  %v5361_v47 = vmul.f32 %v9475_v20, %v9469_v53 }
 0x92f   : > { %9478 = vrcp.f32 %v5290_v59 }
 0x930   : > { %v5196_v6 = vand.u32 2147483647, %v5158_v48  ;;  %v5385_v3 = vsel %vm5337_vm9, %v9475_v20, %v5361_v47  ;;  %vm5340_vm10 = vcmp.ge.f32.partialorder %v5158_v48, 0.0 }
 0x931   : > { %v12563_v38 = vmul.f32 %v5385_v3, %v12525_v54 }
 0x932   : > { %v5220_v33 = vsub.f32 0.0, %v5196_v6 }
 0x933   : > { %v5438_v45 = vmul.f32 %v12477_v55, %v12563_v38 }
 0x934   : > { %v9477_v37 = vpop.eup %9476  ;;  %v5258_v53 = vmul.f32 1.442695, %v5220_v33 }
 0x935   : > { %v9479_v12 = vpop.eup %9478  ;;  %v5291_v51 = vadd.f32 1.0, %v9477_v37  ;;  %v5159_v32 = vpop.f32.mrf.mxu2  ;;  %5471 = vadd.xlane.f32.xlu0 %v5437_v46  ;;  %5473 = vadd.xlane.f32.xlu2 %v5438_v45 }
 0x936   : > { %v5362_v59 = vmul.f32 %v9479_v12, %v9473_v52  ;;  %9480 = vpow2.f32 %v5258_v53  ;;  %v5160_v20 = vadd.f32 %v12434_v31, %v5159_v32 }
 0x937   : > { %9482 = vrcp.f32 %v5291_v51 }
 0x938   : > { %v5386_v54 = vsel %vm5338_vm12, %v9479_v12, %v5362_v59  ;;  %v5197_v25 = vand.u32 2147483647, %v5160_v20  ;;  %vm5341_vm7 = vcmp.ge.f32.partialorder %v5160_v20, 0.0 }
 0x939   : > { %v12572_v47 = vmul.f32 %v5386_v54, %v12535_v60 }
 0x93a   : > { %v5221_v6 = vsub.f32 0.0, %v5197_v25 }
 0x93b   : > { %v5439_v3 = vmul.f32 %v12477_v55, %v12572_v47 }
 0x93c   : > { %v9481_v33 = vpop.eup %9480  ;;  %v5260_v40 = vmul.f32 1.442695, %v5221_v6 }
 0x93d   : > { %v9483_v46 = vpop.eup %9482  ;;  %v5292_v45 = vadd.f32 1.0, %v9481_v33  ;;  %v12576_v52 = vpop.f32.mrf.mxu2  ;;  %5475 = vadd.xlane.f32.xlu0 %v5439_v3 }
 0x93e   : > { %9484 = vpow2.f32 %v5260_v40  ;;  %v5363_v53 = vmul.f32 %v9483_v46, %v9477_v37 }
 0x93f   : > { %9486 = vrcp.f32 %v5292_v45 }
 0x940   : > { %v5387_v12 = vsel %vm5339_vm2, %v9483_v46, %v5363_v53 }
 0x941   : > { %v12578_v51 = vmul.f32 %v5387_v12, %v5155_v21 }
 0x943   : > { %v5440_v60 = vmul.f32 %v12477_v55, %v12578_v51 }
 0x944   : > { %v9485_v32 = vpop.eup %9484 }
 0x945   : > { %v9487_v59 = vpop.eup %9486  ;;  %v5293_v54 = vadd.f32 1.0, %v9485_v32  ;;  %v5164_v25 = vpop.f32.mrf.mxu2  ;;  %5477 = vadd.xlane.f32.xlu2 %v5440_v60 }
 0x946   : > { %v5364_v6 = vmul.f32 %v9487_v59, %v9481_v33 }
 0x947   : > { %9488 = vrcp.f32 %v5293_v54 }
 0x948   : > { %v5388_v28 = vsel %vm5340_vm10, %v9487_v59, %v5364_v6 }
 0x949   : > { %v12582_v3 = vmul.f32 %v5388_v28, %v5158_v48 }
 0x94b   : > { %v5441_v40 = vmul.f32 %v12477_v55, %v12582_v3 }
 0x94d   : > { %v9489_v37 = vpop.eup %9488  ;;  %v5167_v21 = vpop.f32.mrf.mxu2  ;;  %5479 = vadd.xlane.f32.xlu0 %v5441_v40 }
 0x94e   : > { %v5168_v46 = vadd.f32 %v12434_v31, %v5167_v21  ;;  %v5365_v45 = vmul.f32 %v9489_v37, %v9485_v32 }
 0x950   : > { %v5200_v53 = vand.u32 2147483647, %v5168_v46  ;;  %v5389_v12 = vsel %vm5341_vm7, %v9489_v37, %v5365_v45  ;;  %vm5344_vm5 = vcmp.ge.f32.partialorder %v5168_v46, 0.0 }
 0x951   : > { %v12587_v4 = vmul.f32 %v5389_v12, %v5160_v20 }
 0x952   : > { %v5224_v33 = vsub.f32 0.0, %v5200_v53  ;;  %v12594_v53 = vadd.f32 %v12434_v31, %v5164_v25 }
 0x953   : > { %v5442_v60 = vmul.f32 %v12477_v55, %v12587_v4 }
 0x954   : > { %v5266_v28 = vmul.f32 1.442695, %v5224_v33  ;;  %vm5343_vm4 = vcmp.ge.f32.partialorder %v12594_v53, 0.0 }
 0x955   : > { %v5169_v48 = vpop.f32.mrf.mxu2  ;;  %5481 = vadd.xlane.f32.xlu2 %v5442_v60 }
 0x956   : > { %9490 = vpow2.f32 %v5266_v28  ;;  %v5170_v59 = vadd.f32 %v12434_v31, %v5169_v48 }
 0x958   : > { %v5201_v54 = vand.u32 2147483647, %v5170_v59  ;;  %vm5345_vm11 = vcmp.ge.f32.partialorder %v5170_v59, 0.0 }
 0x95a   : > { %v5225_v6 = vsub.f32 0.0, %v5201_v54 }
 0x95c   : > { %v9491_v40 = vpop.eup %9490  ;;  %v5268_v21 = vmul.f32 1.442695, %v5225_v6  ;;  %v5199_v6 = vand.u32 2147483647, %v12594_v53 }
 0x95d   : > { %v5296_v32 = vadd.f32 1.0, %v9491_v40  ;;  %v5172_v41 = vpop.f32.mrf.mxu2 }
 0x95e   : > { %9492 = vpow2.f32 %v5268_v21  ;;  %v5173_v20 = vadd.f32 %v12434_v31, %v5172_v41  ;;  %v5223_v25 = vsub.f32 0.0, %v5199_v6 }
 0x95f   : > { %9494 = vrcp.f32 %v5296_v32 }
 0x960   : > { %v5202_v37 = vand.u32 2147483647, %v5173_v20  ;;  %vm5346_vm3 = vcmp.ge.f32.partialorder %v5173_v20, 0.0 }
 0x962   : > { %v5226_v45 = vsub.f32 0.0, %v5202_v37 }
 0x964   : > { %v9493_v12 = vpop.eup %9492  ;;  %v5270_v33 = vmul.f32 1.442695, %v5226_v45 }
 0x965   : > { %v9495_v60 = vpop.eup %9494  ;;  %v5297_v28 = vadd.f32 1.0, %v9493_v12  ;;  %v5174_v48 = vpop.f32.mrf.mxu2 }
 0x966   : > { %v5368_v14 = vmul.f32 %v9495_v60, %v9491_v40  ;;  %9496 = vpow2.f32 %v5270_v33  ;;  %v5175_v54 = vadd.f32 %v12434_v31, %v5174_v48  ;;  %v12605_v48 = vld [vmem:[%s14098_s14 + $0x1] ss:$0 sm:$0xff] }
 0x967   : > { %9498 = vrcp.f32 %v5297_v28 }
 0x968   : > { %v5392_v41 = vsel %vm5344_vm5, %v9495_v60, %v5368_v14  ;;  %v5203_v21 = vand.u32 2147483647, %v5175_v54  ;;  %v5264_v60 = vmul.f32 1.442695, %v5223_v25  ;;  %vm5347_vm6 = vcmp.ge.f32.partialorder %v5175_v54, 0.0 }
 0x969   : > { %v12598_v32 = vmul.f32 %v5392_v41, %v5168_v46 }
 0x96a   : > { %v5227_v37 = vsub.f32 0.0, %v5203_v21 }
 0x96b   : > { %v5445_v45 = vmul.f32 %v12477_v55, %v12598_v32 }
 0x96c   : > { %v9497_v10 = vpop.eup %9496  ;;  %v5272_v19 = vmul.f32 1.442695, %v5227_v37 }
 0x96d   : > { %v9499_v62 = vpop.eup %9498  ;;  %v5298_v40 = vadd.f32 1.0, %v9497_v10  ;;  %v5177_v33 = vpop.f32.mrf.mxu2  ;;  %5487 = vadd.xlane.f32.xlu1 %v5445_v45 }
 0x96e   : > { %9500 = vpow2.f32 %v5272_v19  ;;  %v5178_v14 = vadd.f32 %v12434_v31, %v5177_v33  ;;  %v5369_v46 = vmul.f32 %v9499_v62, %v9493_v12 }
 0x96f   : > { %9502 = vrcp.f32 %v5298_v40 }
 0x970   : > { %v5204_v28 = vand.u32 2147483647, %v5178_v14  ;;  %v5460_v6 = vpop.xlane.xlu2 %5459  ;;  %v5393_v41 = vsel %vm5345_vm11, %v9499_v62, %v5369_v46  ;;  %9504 = vpow2.f32 %v5264_v60  ;;  %vm5348_vm1 = vcmp.ge.f32.partialorder %v5178_v14, 0.0 }
 0x971   : > { %v12609_v21 = vadd.f32 %v12605_v48, %v5460_v6  ;;  %v12611_v37 = vmul.f32 %v5393_v41, %v5170_v59 }
 0x972   : > { %v5228_v45 = vsub.f32 0.0, %v5204_v28 }
 0x973   : > { %v5532_v9 = vand.u32 2147483647, %v12609_v21  ;;  %v5446_v19 = vmul.f32 %v12477_v55, %v12611_v37  ;;  %vm5676_vm0 = vcmp.ge.f32.partialorder %v12609_v21, 0.0 }
 0x974   : > { %v9501_v33 = vpop.eup %9500  ;;  %v5274_v12 = vmul.f32 1.442695, %v5228_v45 }
 0x975   : > { %v9503_v25 = vpop.eup %9502  ;;  %v5299_v18 = vadd.f32 1.0, %v9501_v33  ;;  %v5556_v40 = vsub.f32 0.0, %v5532_v9  ;;  %5489 = vadd.xlane.f32.xlu2 %v5446_v19 }
 0x976   : > { %v5370_v43 = vmul.f32 %v9503_v25, %v9497_v10  ;;  %9506 = vpow2.f32 %v5274_v12  ;;  %v9505_v46 = vpop.eup %9504 }
 0x977   : > { %9508 = vrcp.f32 %v5299_v18  ;;  %v5584_v62 = vmul.f32 1.442695, %v5556_v40  ;;  %v5295_v41 = vadd.f32 1.0, %v9505_v46 }
 0x978   : > { %v5394_v59 = vsel %vm5346_vm3, %v9503_v25, %v5370_v43 }
 0x979   : > { %v12616_v28 = vmul.f32 %v5394_v59, %v5173_v20  ;;  %9510 = vpow2.f32 %v5584_v62 }
 0x97b   : > { %v5447_v60 = vmul.f32 %v12477_v55, %v12616_v28 }
 0x97c   : > { %v9507_v6 = vpop.eup %9506 }
 0x97d   : > { %v9509_v45 = vpop.eup %9508  ;;  %v5300_v11 = vadd.f32 1.0, %v9507_v6  ;;  %5491 = vadd.xlane.f32.xlu0 %v5447_v60 }
 0x97e   : > { %v5371_v9 = vmul.f32 %v9509_v45, %v9501_v33 }
 0x97f   : > { %9512 = vrcp.f32 %v5300_v11  ;;  %v9511_v19 = vpop.eup %9510 }
 0x980   : > { %9514 = vrcp.f32 %v5295_v41  ;;  %v5464_v10 = vpop.xlane.xlu0 %5463  ;;  %v5395_v18 = vsel %vm5347_vm6, %v9509_v45, %v5371_v9  ;;  %v5628_v25 = vadd.f32 1.0, %v9511_v19 }
 0x981   : > { %v5510_v43 = vadd.f32 %v12605_v48, %v5464_v10  ;;  %v12621_v20 = vmul.f32 %v5395_v18, %v5175_v54 }
 0x982   : > { %9516 = vrcp.f32 %v5628_v25 }
 0x983   : > { %v5534_v12 = vand.u32 2147483647, %v5510_v43  ;;  %v5448_v40 = vmul.f32 %v12477_v55, %v12621_v20  ;;  %vm5678_vm13 = vcmp.ge.f32.partialorder %v5510_v43, 0.0 }
 0x985   : > { %v9513_v62 = vpop.eup %9512  ;;  %v5558_v59 = vsub.f32 0.0, %v5534_v12  ;;  %5493 = vadd.xlane.f32.xlu0 %v5448_v40  ;;  %v5179_v12 = vpop.f32.mrf.mxu2 }
 0x986   : > { %v9515_v29 = vpop.eup %9514  ;;  %v5372_v60 = vmul.f32 %v9513_v62, %v9507_v6 }
 0x987   : > { %v5588_v11 = vmul.f32 1.442695, %v5558_v59  ;;  %v5367_v54 = vmul.f32 %v9515_v29, %v9505_v46  ;;  %v12638_v46 = vadd.f32 %v12434_v31, %v5179_v12  ;;  %v5456_v59 = vpop.xlane.xlu2 %5455  ;;  %v12655_v12 = vld [vmem:[%s11654_s30 + $0x30] sm:$0xff] }
 0x988   : > { %v5396_v33 = vsel %vm5348_vm1, %v9513_v62, %v5372_v60  ;;  %v12625_v41 = vpop.xlane.xlu0 %5461  ;;  %v9517_v18 = vpop.eup %9516 }
 0x989   : > { %v12627_v45 = vmul.f32 %v5396_v33, %v5178_v14  ;;  %9518 = vpow2.f32 %v5588_v11  ;;  %v5391_v10 = vsel %vm5343_vm4, %v9515_v29, %v5367_v54  ;;  %v5700_v14 = vmul.f32 %v9517_v18, %v9511_v19  ;;  %v12648_v19 = vld [vmem:[%s11654_s30 + $0x20] sm:$0xff] }
 0x98a   : > { %v12635_v25 = vmul.f32 %v5391_v10, %v12594_v53  ;;  %v5205_v11 = vand.u32 2147483647, %v12638_v46  ;;  %v12645_v33 = vadd.f32 %v12605_v48, %v5456_v59  ;;  %vm5349_vm14 = vcmp.ge.f32.partialorder %v12638_v46, 0.0 }
 0x98b   : > { %v5449_v9 = vmul.f32 %v12477_v55, %v12627_v45  ;;  %v5724_v60 = vsel %vm5676_vm0, %v9517_v18, %v5700_v14 }
 0x98c   : > { %14591 = vst [vmem:[#allocation131_spill] sm:$0xff] %v12635_v25  ;;  %v5444_v29 = vmul.f32 %v12477_v55, %v12635_v25  ;;  %v5748_v31 = vmul.f32 %v12648_v19, %v5724_v60  ;;  %v5530_v10 = vand.u32 2147483647, %v12645_v33  ;;  %vm5674_vm12 = vcmp.ge.f32.partialorder %v12645_v33, 0.0 }
 0x98d   : > { %5495 = vadd.xlane.f32.xlu2 %v5449_v9  ;;  %v5229_v9 = vsub.f32 0.0, %v5205_v11 }
 0x98f   : > { %v9519_v6 = vpop.eup %9518  ;;  %v5452_v14 = vpop.xlane.xlu2 %5451  ;;  %v5276_v59 = vmul.f32 1.442695, %v5229_v9 }
 0x990   : > { %v5630_v40 = vadd.f32 1.0, %v9519_v6  ;;  %v12632_v62 = vpop.xlane.xlu0 %5457  ;;  %v12659_v39 = vadd.f32 %v12605_v48, %v5452_v14 }
 0x992   : > { %9520 = vrcp.f32 %v5630_v40  ;;  %v5528_v11 = vand.u32 2147483647, %v12659_v39  ;;  %vm5672_vm2 = vcmp.ge.f32.partialorder %v12659_v39, 0.0 }
 0x993   : > { %9522 = vpow2.f32 %v5276_v59 }
 0x994   : > { %v5552_v9 = vsub.f32 0.0, %v5528_v11 }
 0x995   : > { %5485 = vadd.xlane.f32.xlu2 %v5444_v29  ;;  %v5554_v29 = vsub.f32 0.0, %v5530_v10 }
 0x996   : > { %v5576_v13 = vmul.f32 1.442695, %v5552_v9 }
 0x997   : > { %v5580_v43 = vmul.f32 1.442695, %v5554_v29 }
 0x998   : > { %v9521_v53 = vpop.eup %9520  ;;  %v12651_v54 = vpop.xlane.xlu0 %5453 }
 0x999   : > { %v5702_v21 = vmul.f32 %v9521_v53, %v9519_v6  ;;  %5790 = vperm.xlu0 %8992, %v5748_v31   ;;  %v12663_v61 = vpop.xlane.xlu2 %5469  ;;  %9524 = vpow2.f32 %v5580_v43 }
 0x99b   : > { %v5726_v18 = vsel %vm5678_vm13, %v9521_v53, %v5702_v21  ;;  %v5466_v21 = vpop.xlane.xlu1 %5465 }
 0x99c   : > { %v5750_v40 = vmul.f32 %v12655_v12, %v5726_v18  ;;  %v9523_v18 = vpop.eup %9522  ;;  %v12666_v10 = vadd.f32 %v12605_v48, %v5466_v21 }
 0x99d   : > { %v5301_v14 = vadd.f32 1.0, %v9523_v18 }
 0x99e   : > { %5800 = vperm.xlu1 %8993, %v5750_v40   ;;  %v5535_v29 = vand.u32 2147483647, %v12666_v10  ;;  %vm5679_vm10 = vcmp.ge.f32.partialorder %v12666_v10, 0.0  ;;  %v12735_v10 = vadd.f32 %v12605_v48, %v12651_v54 }
 0x9a0   : > { %v5468_v60 = vpop.xlane.xlu0 %5467  ;;  %v5559_v16 = vsub.f32 0.0, %v5535_v29 }
 0x9a1   : > { %v5512_v6 = vadd.f32 %v12605_v48, %v5468_v60  ;;  %v9525_v60 = vpop.eup %9524 }
 0x9a2   : > { %v5626_v0 = vadd.f32 1.0, %v9525_v60 }
 0x9a3   : > { %v5536_v31 = vand.u32 2147483647, %v5512_v6  ;;  %vm5680_vm9 = vcmp.ge.f32.partialorder %v5512_v6, 0.0 }
 0x9a5   : > { %v5560_v53 = vsub.f32 0.0, %v5536_v31 }
 0x9a7   : > { %v5592_v40 = vmul.f32 1.442695, %v5560_v53 }
 0x9a8   : > { %v5472_v59 = vpop.xlane.xlu0 %5471  ;;  %v5474_v35 = vpop.xlane.xlu2 %5473 }
 0x9a9   : > { %9526 = vpow2.f32 %v5592_v40  ;;  %v12670_v43 = vadd.f32 %v12605_v48, %v5474_v35  ;;  %v5590_v40 = vmul.f32 1.442695, %v5559_v16  ;;  %v12690_v6 = vadd.f32 %v12605_v48, %v5472_v59 }
 0x9aa   : > { %9528 = vrcp.f32 %v5301_v14 }
 0x9ab   : > { %9530 = vpow2.f32 %v5576_v13  ;;  %v5539_v9 = vand.u32 2147483647, %v12670_v43  ;;  %vm5683_vm7 = vcmp.ge.f32.partialorder %v12670_v43, 0.0  ;;  %vm5682_vm6 = vcmp.ge.f32.partialorder %v12690_v6, 0.0 }
 0x9ad   : > { %v5563_v35 = vsub.f32 0.0, %v5539_v9 }
 0x9af   : > { %v9527_v31 = vpop.eup %9526  ;;  %v5598_v9 = vmul.f32 1.442695, %v5563_v35 }
 0x9b0   : > { %v5632_v15 = vadd.f32 1.0, %v9527_v31  ;;  %v9529_v11 = vpop.eup %9528  ;;  %v5476_v53 = vpop.xlane.xlu0 %5475 }
 0x9b1   : > { %v9531_v21 = vpop.eup %9530  ;;  %v12674_v1 = vadd.f32 %v12605_v48, %v5476_v53  ;;  %v5373_v14 = vmul.f32 %v9529_v11, %v9523_v18 }
 0x9b2   : > { %9532 = vrcp.f32 %v5632_v15  ;;  %v5624_v58 = vadd.f32 1.0, %v9531_v21 }
 0x9b3   : > { %9534 = vrcp.f32 %v5626_v0  ;;  %v5540_v57 = vand.u32 2147483647, %v12674_v1  ;;  %v5397_v53 = vsel %vm5349_vm14, %v9529_v11, %v5373_v14  ;;  %vm5684_vm11 = vcmp.ge.f32.partialorder %v12674_v1, 0.0  ;;  %v12755_v1 = vld [vmem:[%s11654_s30 + $0x68] sm:$0xff] }
 0x9b4   : > { %9536 = vpow2.f32 %v5590_v40  ;;  %vm5673_vm14 = vcmp.ge.f32.partialorder %v12735_v10, 0.0 }
 0x9b5   : > { %9538 = vrcp.f32 %v5624_v58 }
 0x9b6   : > { %9540 = vpow2.f32 %v5598_v9  ;;  %v12706_v9 = vadd.f32 %v12605_v48, %v12663_v61 }
 0x9b8   : > { %v9533_v13 = vpop.eup %9532  ;;  %v5478_v5 = vpop.xlane.xlu2 %5477  ;;  %v5537_v61 = vand.u32 2147483647, %v12706_v9  ;;  %vm5681_vm4 = vcmp.ge.f32.partialorder %v12706_v9, 0.0 }
 0x9b9   : > { %v5704_v29 = vmul.f32 %v9533_v13, %v9527_v31  ;;  %v12677_v15 = vadd.f32 %v12605_v48, %v5478_v5  ;;  %v9535_v0 = vpop.eup %9534  ;;  %v12687_v5 = vmul.f32 %v5397_v53, %v12638_v46 }
 0x9ba   : > { %v5698_v31 = vmul.f32 %v9535_v0, %v9525_v60  ;;  %v9537_v49 = vpop.eup %9536 }
 0x9bb   : > { %v5728_v16 = vsel %vm5680_vm9, %v9533_v13, %v5704_v29  ;;  %v5541_v40 = vand.u32 2147483647, %v12677_v15  ;;  %v5564_v13 = vsub.f32 0.0, %v5540_v57  ;;  %v9539_v60 = vpop.eup %9538  ;;  %v5631_v35 = vadd.f32 1.0, %v9537_v49  ;;  %v12701_v57 = vld [vmem:[%s11654_s30 + $0x10] sm:$0xff] }
 0x9bc   : > { %v5752_v18 = vmul.f32 %v12682_v36, %v5728_v16  ;;  %v5722_v14 = vsel %vm5674_vm12, %v9535_v0, %v5698_v31  ;;  %v5450_v46 = vmul.f32 %v12477_v55, %v12687_v5  ;;  %v5538_v16 = vand.u32 2147483647, %v12690_v6  ;;  %v9541_v31 = vpop.eup %9540  ;;  %v10008_v6 = vld [vmem:[%s14480_s0 + $0x1] ss:$0 sm:$0xff]  ;;  %s7881_s0 = scalar_lea.sflag [#allocation3], %s927_s8 }
 0x9bd   : > { %v5565_v58 = vsub.f32 0.0, %v5541_v40  ;;  %v5600_v53 = vmul.f32 1.442695, %v5564_v13  ;;  %v5746_v33 = vmul.f32 %v12701_v57, %v5722_v14  ;;  %v5696_v0 = vmul.f32 %v9539_v60, %v9531_v21 }
 0x9be   : > { %5810 = vperm.xlu1 %8993, %v5752_v18   ;;  %9542 = vrcp.f32 %v5631_v35  ;;  %v5562_v55 = vsub.f32 0.0, %v5538_v16  ;;  %v12711_v21 = vadd.f32 %v12605_v48, %v12625_v41  ;;  %v5635_v35 = vadd.f32 1.0, %v9541_v31 }
 0x9bf   : > { %v5602_v18 = vmul.f32 1.442695, %v5565_v58  ;;  %9544 = vpow2.f32 %v5600_v53  ;;  %v5720_v14 = vsel %vm5672_vm2, %v9539_v60, %v5696_v0  ;;  %v12725_v0 = vadd.f32 %v12605_v48, %v12632_v62 }
 0x9c0   : > { %v5480_v11 = vpop.xlane.xlu0 %5479  ;;  %vm5685_vm3 = vcmp.ge.f32.partialorder %v12677_v15, 0.0  ;;  %vm5677_vm0 = vcmp.ge.f32.partialorder %v12711_v21, 0.0 }
 0x9c1   : > { %v12694_v29 = vadd.f32 %v12605_v48, %v5480_v11  ;;  %9546 = vpow2.f32 %v5602_v18  ;;  %v5531_v62 = vand.u32 2147483647, %v12725_v0  ;;  %vm5675_vm13 = vcmp.ge.f32.partialorder %v12725_v0, 0.0 }
 0x9c3   : > { %v5542_v59 = vand.u32 2147483647, %v12694_v29  ;;  %5497 = vadd.xlane.f32.xlu0 %v5450_v46  ;;  %v5596_v46 = vmul.f32 1.442695, %v5562_v55  ;;  %vm5686_vm5 = vcmp.ge.f32.partialorder %v12694_v29, 0.0 }
 0x9c4   : > { %v9543_v53 = vpop.eup %9542 }
 0x9c5   : > { %v5566_v40 = vsub.f32 0.0, %v5542_v59  ;;  %v12719_v59 = vld [vmem:[%s11654_s30] sm:$0xff]  ;;  %v9545_v60 = vpop.eup %9544  ;;  %v5703_v55 = vmul.f32 %v9543_v53, %v9537_v49 }
 0x9c6   : > { %5780 = vperm.xlu1 %8993, %v5746_v33   ;;  %v5744_v39 = vmul.f32 %v12719_v59, %v5720_v14  ;;  %v5533_v33 = vand.u32 2147483647, %v12711_v21  ;;  %v5636_v56 = vadd.f32 1.0, %v9545_v60 }
 0x9c7   : > { %v5604_v13 = vmul.f32 1.442695, %v5566_v40  ;;  %v9547_v18 = vpop.eup %9546  ;;  %v5727_v2 = vsel %vm5679_vm10, %v9543_v53, %v5703_v55 }
 0x9c8   : > { %v5482_v11 = vpop.xlane.xlu2 %5481  ;;  %v5557_v14 = vsub.f32 0.0, %v5533_v33  ;;  %v5555_v33 = vsub.f32 0.0, %v5531_v62 }
 0x9c9   : > { %9548 = vpow2.f32 %v5604_v13  ;;  %v12714_v58 = vadd.f32 %v12605_v48, %v5482_v11  ;;  %v5561_v13 = vsub.f32 0.0, %v5537_v61  ;;  %v12730_v61 = vld [vmem:[%s11654_s30 + $0x38] sm:$0xff] }
 0x9ca   : > { %9550 = vrcp.f32 %v5635_v35  ;;  %v5586_v49 = vmul.f32 1.442695, %v5557_v14  ;;  %v5529_v14 = vand.u32 2147483647, %v12735_v10 }
 0x9cb   : > { %v5543_v16 = vand.u32 2147483647, %v12714_v58  ;;  %9552 = vpow2.f32 %v5596_v46  ;;  %v5594_v50 = vmul.f32 1.442695, %v5561_v13  ;;  %v5751_v46 = vmul.f32 %v12730_v61, %v5727_v2 }
 0x9cc   : > { %vm5687_vm1 = vcmp.ge.f32.partialorder %v12714_v58, 0.0 }
 0x9cd   : > { %v5567_v41 = vsub.f32 0.0, %v5543_v16  ;;  %v5637_v16 = vadd.f32 1.0, %v9547_v18 }
 0x9ce   : > { %5770 = vperm.xlu1 %8993, %v5744_v39  }
 0x9cf   : > { %v9549_v40 = vpop.eup %9548  ;;  %v5606_v11 = vmul.f32 1.442695, %v5567_v41 }
 0x9d0   : > { %v5638_v24 = vadd.f32 1.0, %v9549_v40  ;;  %v9551_v35 = vpop.eup %9550 }
 0x9d1   : > { %9554 = vpow2.f32 %v5606_v11  ;;  %v9553_v39 = vpop.eup %9552  ;;  %v5582_v11 = vmul.f32 1.442695, %v5555_v33  ;;  %v5553_v33 = vsub.f32 0.0, %v5529_v14 }
 0x9d2   : > { %9556 = vrcp.f32 %v5638_v24  ;;  %v5707_v24 = vmul.f32 %v9551_v35, %v9541_v31  ;;  %v5634_v55 = vadd.f32 1.0, %v9553_v39  ;;  %v12741_v31 = vld [vmem:[%s11654_s30 + $0x70] sm:$0xff] }
 0x9d3   : > { %9558 = vrcp.f32 %v5636_v56 }
 0x9d4   : > { %9560 = vrcp.f32 %v5637_v16  ;;  %v5731_v54 = vsel %vm5683_vm7, %v9551_v35, %v5707_v24 }
 0x9d5   : > { %9562 = vpow2.f32 %v5594_v50 }
 0x9d6   : > { %9564 = vpow2.f32 %v5586_v49 }
 0x9d7   : > { %v9555_v41 = vpop.eup %9554  ;;  %5805 = vperm.xlu0 %8992, %v5751_v46   ;;  %9566 = vrcp.f32 %v5634_v55 }
 0x9d8   : > { %v9557_v53 = vpop.eup %9556  ;;  %v5639_v2 = vadd.f32 1.0, %v9555_v41 }
 0x9d9   : > { %v5710_v56 = vmul.f32 %v9557_v53, %v9549_v40  ;;  %v9559_v13 = vpop.eup %9558  ;;  %v12745_v40 = vld [vmem:[%s11654_s30 + $0x58] sm:$0xff] }
 0x9da   : > { %v9561_v50 = vpop.eup %9560  ;;  %v5708_v46 = vmul.f32 %v9559_v13, %v9545_v60  ;;  %v5755_v43 = vmul.f32 %v12745_v40, %v5731_v54  ;;  %9568 = vrcp.f32 %v5639_v2  ;;  %v5578_v60 = vmul.f32 1.442695, %v5553_v33  ;;  %v12751_v2 = vld [vmem:[%s11654_s30 + $0x60] sm:$0xff] }
 0x9db   : > { %v5734_v16 = vsel %vm5686_vm5, %v9557_v53, %v5710_v56  ;;  %v9563_v49 = vpop.eup %9562  ;;  %9570 = vpow2.f32 %v5582_v11  ;;  %v5709_v35 = vmul.f32 %v9561_v50, %v9547_v18 }
 0x9dc   : > { %v5758_v62 = vmul.f32 %v12741_v31, %v5734_v16  ;;  %v9565_v29 = vpop.eup %9564  ;;  %v5633_v24 = vadd.f32 1.0, %v9563_v49  ;;  %v5732_v53 = vsel %vm5684_vm11, %v9559_v13, %v5708_v46 }
 0x9dd   : > { %v9567_v55 = vpop.eup %9566  ;;  %v5629_v56 = vadd.f32 1.0, %v9565_v29  ;;  %v5733_v16 = vsel %vm5685_vm3, %v9561_v50, %v5709_v35  ;;  %v5756_v11 = vmul.f32 %v12751_v2, %v5732_v53  ;;  %v12765_v53 = vld [vmem:[%s11654_s30 + $0x50] sm:$0xff] }
 0x9de   : > { %5840 = vperm.xlu2 %8994, %v5758_v62   ;;  %9572 = vrcp.f32 %v5633_v24  ;;  %v5706_v62 = vmul.f32 %v9567_v55, %v9553_v39  ;;  %v5757_v13 = vmul.f32 %v12755_v1, %v5733_v16  ;;  %v12775_v16 = vld [vmem:[%s11654_s30 + $0x78] sm:$0xff] }
 0x9df   : > { %5825 = vperm.xlu0 %8992, %v5755_v43   ;;  %9574 = vrcp.f32 %v5629_v56 }
 0x9e0   : > { %v9569_v54 = vpop.eup %9568  ;;  %v5488_v14 = vpop.xlane.xlu1 %5487  ;;  %9576 = vpow2.f32 %v5578_v60  ;;  %v5730_v43 = vsel %vm5682_vm6, %v9567_v55, %v5706_v62  ;;  %v12772_v55 = vadd.f32 %v10008_v6, %v12576_v52 }
 0x9e1   : > { %v9571_v18 = vpop.eup %9570  ;;  %v5711_v15 = vmul.f32 %v9569_v54, %v9555_v41  ;;  %v12759_v50 = vadd.f32 %v12605_v48, %v5488_v14  ;;  %v5754_v41 = vmul.f32 %v12765_v53, %v5730_v43 }
 0x9e2   : > { %v5627_v46 = vadd.f32 1.0, %v9571_v18  ;;  %v5198_v52 = vand.u32 2147483647, %v12772_v55  ;;  %vm5342_vm10 = vcmp.ge.f32.partialorder %v12772_v55, 0.0 }
 0x9e3   : > { %v5735_v39 = vsel %vm5687_vm1, %v9569_v54, %v5711_v15  ;;  %v5546_v35 = vand.u32 2147483647, %v12759_v50  ;;  %vm5690_vm12 = vcmp.ge.f32.partialorder %v12759_v50, 0.0 }
 0x9e4   : > { %v9573_v33 = vpop.eup %9572  ;;  %9578 = vrcp.f32 %v5627_v46  ;;  %v5759_v58 = vmul.f32 %v12775_v16, %v5735_v39  ;;  %v5222_v6 = vsub.f32 0.0, %v5198_v52 }
 0x9e5   : > { %v9575_v24 = vpop.eup %9574  ;;  %v5705_v60 = vmul.f32 %v9573_v33, %v9563_v49 }
 0x9e6   : > { %5830 = vperm.xlu2 %8994, %v5756_v11   ;;  %v9577_v56 = vpop.eup %9576  ;;  %v5701_v54 = vmul.f32 %v9575_v24, %v9565_v29  ;;  %v5570_v11 = vsub.f32 0.0, %v5546_v35  ;;  %v12783_v29 = vld [vmem:[%s11654_s30 + $0x48] sm:$0xff] }
 0x9e7   : > { %5835 = vperm.xlu0 %8992, %v5757_v13   ;;  %v5625_v14 = vadd.f32 1.0, %v9577_v56  ;;  %v5729_v62 = vsel %vm5681_vm4, %v9573_v33, %v5705_v60  ;;  %v12787_v33 = vld [vmem:[%s11654_s30 + $0x28] sm:$0xff] }
 0x9e8   : > { %v5725_v46 = vsel %vm5677_vm0, %v9575_v24, %v5701_v54  ;;  %v5612_v43 = vmul.f32 1.442695, %v5570_v11  ;;  %v5753_v35 = vmul.f32 %v12783_v29, %v5729_v62  ;;  %v12791_v24 = vpop.xlane.xlu2 %5489 }
 0x9e9   : > { %9580 = vrcp.f32 %v5625_v14  ;;  %v5749_v60 = vmul.f32 %v12787_v33, %v5725_v46 }
 0x9ea   : > { %v9579_v15 = vpop.eup %9578  ;;  %9582 = vpow2.f32 %v5612_v43 }
 0x9eb   : > { %v5699_v9 = vmul.f32 %v9579_v15, %v9571_v18  ;;  %v5262_v18 = vmul.f32 1.442695, %v5222_v6 }
 0x9ed   : > { %v5723_v21 = vsel %vm5675_vm13, %v9579_v15, %v5699_v9 }
 0x9ee   : > { %5820 = vperm.xlu2 %8994, %v5754_v41  }
 0x9ef   : > { %5845 = vperm.xlu0 %8992, %v5759_v58   ;;  %v9581_v11 = vpop.eup %9580 }
 0x9f0   : > { %v5492_v49 = vpop.xlane.xlu0 %5491  ;;  %v9583_v46 = vpop.eup %9582  ;;  %v5697_v43 = vmul.f32 %v9581_v11, %v9577_v56 }
 0x9f1   : > { %v5524_v13 = vadd.f32 %v12605_v48, %v5492_v49  ;;  %v12795_v49 = vld [vmem:[%s11654_s30 + $0x18] sm:$0xff] }
 0x9f2   : > { %14592 = vst [vmem:[#allocation132_spill] sm:$0xff] %v12795_v49  ;;  %v5747_v62 = vmul.f32 %v12795_v49, %v5723_v21 }
 0x9f3   : > { %v5548_v39 = vand.u32 2147483647, %v5524_v13  ;;  %vm5692_vm9 = vcmp.ge.f32.partialorder %v5524_v13, 0.0 }
 0x9f5   : > { %v5572_v41 = vsub.f32 0.0, %v5548_v39  ;;  %v5642_v39 = vadd.f32 1.0, %v9583_v46 }
 0x9f6   : > { %5815 = vperm.xlu2 %8994, %v5753_v35  }
 0x9f7   : > { %v5616_v58 = vmul.f32 1.442695, %v5572_v41  ;;  %5795 = vperm.xlu0 %8992, %v5749_v60   ;;  %v5721_v41 = vsel %vm5673_vm14, %v9581_v11, %v5697_v43 }
 0x9f8   : > { %v5494_v54 = vpop.xlane.xlu0 %5493 }
 0x9f9   : > { %9584 = vpow2.f32 %v5616_v58  ;;  %v5525_v14 = vadd.f32 %v12605_v48, %v5494_v54  ;;  %v12800_v58 = vld [vmem:[%s11654_s30 + $0x8] sm:$0xff] }
 0x9fa   : > { %9586 = vpow2.f32 %v5262_v18  ;;  %14593 = vst [vmem:[#allocation133_spill] sm:$0xff] %v12800_v58  ;;  %v5745_v21 = vmul.f32 %v12800_v58, %v5721_v41  ;;  %v10014_v41 = vld [vmem:[%s11654_s30 + $0xa0] sm:$0xff] }
 0x9fb   : > { %v5549_v52 = vand.u32 2147483647, %v5525_v14  ;;  %vm5693_vm2 = vcmp.ge.f32.partialorder %v5525_v14, 0.0  ;;  %v10017_v14 = vld [vmem:[%s14097_s13 + $0x1] ss:$0 sm:$0xff] }
 0x9fd   : > { %v5573_v0 = vsub.f32 0.0, %v5549_v52 }
 0x9fe   : > { %5785 = vperm.xlu2 %8994, %v5747_v62  }
 0x9ff   : > { %v9585_v15 = vpop.eup %9584  ;;  %v5618_v9 = vmul.f32 1.442695, %v5573_v0 }
 0xa00   : > { %v5644_v35 = vadd.f32 1.0, %v9585_v15  ;;  %v5496_v6 = vpop.xlane.xlu2 %5495  ;;  %v9587_v60 = vpop.eup %9586 }
 0xa01   : > { %v5294_v56 = vadd.f32 1.0, %v9587_v60  ;;  %v12804_v54 = vadd.f32 %v12605_v48, %v5496_v6 }
 0xa02   : > { %9588 = vrcp.f32 %v5644_v35 }
 0xa03   : > { %9590 = vpow2.f32 %v5618_v9  ;;  %v5550_v9 = vand.u32 2147483647, %v12804_v54  ;;  %vm5694_vm5 = vcmp.ge.f32.partialorder %v12804_v54, 0.0 }
 0xa04   : > { %9592 = vrcp.f32 %v5642_v39 }
 0xa05   : > { %9594 = vrcp.f32 %v5294_v56 }
 0xa06   : > { %5775 = vperm.xlu2 %8994, %v5745_v21  }
 0xa08   : > { %v9589_v10 = vpop.eup %9588  ;;  %v5486_v52 = vpop.xlane.xlu2 %5485 }
 0xa09   : > { %v9591_v18 = vpop.eup %9590  ;;  %v5716_v62 = vmul.f32 %v9589_v10, %v9585_v15  ;;  %v5521_v0 = vadd.f32 %v12605_v48, %v5486_v52  ;;  %v5574_v15 = vsub.f32 0.0, %v5550_v9 }
 0xa0a   : > { %v9593_v11 = vpop.eup %9592  ;;  %v5645_v43 = vadd.f32 1.0, %v9591_v18 }
 0xa0b   : > { %v5740_v35 = vsel %vm5692_vm9, %v9589_v10, %v5716_v62  ;;  %v5545_v21 = vand.u32 2147483647, %v5521_v0  ;;  %v5714_v6 = vmul.f32 %v9593_v11, %v9583_v46  ;;  %v9595_v25 = vpop.eup %9594  ;;  %v5620_v10 = vmul.f32 1.442695, %v5574_v15  ;;  %v10015_v62 = vld [vmem:[%s11654_s30 + $0x90] sm:$0xff] }
 0xa0c   : > { %v5764_v39 = vmul.f32 %v10014_v41, %v5740_v35  ;;  %9596 = vrcp.f32 %v5645_v43  ;;  %v5366_v35 = vmul.f32 %v9595_v25, %v9587_v60  ;;  %v10016_v41 = vld [vmem:[%s11654_s30 + $0xa8] sm:$0xff]  ;;  %vm5689_vm7 = vcmp.ge.f32.partialorder %v5521_v0, 0.0 }
 0xa0d   : > { %v5569_v34 = vsub.f32 0.0, %v5545_v21  ;;  %v5738_v58 = vsel %vm5690_vm12, %v9593_v11, %v5714_v6  ;;  %v10018_v21 = vld [vmem:[%s11654_s30 + $0x88] sm:$0xff] }
 0xa0e   : > { %5870 = vperm.xlu2 %8994, %v5764_v39   ;;  %v5762_v49 = vmul.f32 %v10015_v62, %v5738_v58  ;;  %v12828_v62 = vld [vmem:[%s11654_s30 + $0xb0] sm:$0xff] }
 0xa0f   : > { %v5610_v13 = vmul.f32 1.442695, %v5569_v34  ;;  %v5390_v34 = vsel %vm5342_vm10, %v9595_v25, %v5366_v35 }
 0xa11   : > { %9598 = vpow2.f32 %v5610_v13  ;;  %v5523_v13 = vadd.f32 %v12605_v48, %v12791_v24 }
 0xa12   : > { %v9597_v52 = vpop.eup %9596  ;;  %9600 = vpow2.f32 %v5620_v10 }
 0xa13   : > { %v5717_v56 = vmul.f32 %v9597_v52, %v9591_v18  ;;  %v12814_v18 = vmul.f32 %v5390_v34, %v12772_v55  ;;  %v5547_v10 = vand.u32 2147483647, %v5523_v13  ;;  %vm5691_vm3 = vcmp.ge.f32.partialorder %v5523_v13, 0.0 }
 0xa15   : > { %v5741_v43 = vsel %vm5693_vm2, %v9597_v52, %v5717_v56  ;;  %v12823_v52 = vpop.permute.xlu0 %5790  ;;  %v5571_v35 = vsub.f32 0.0, %v5547_v10  ;;  %v10021_v10 = vld [vmem:[%s11654_s30 + $0x98] sm:$0xff] }
 0xa16   : > { %v5765_v46 = vmul.f32 %v10016_v41, %v5741_v43  ;;  %5860 = vperm.xlu2 %8994, %v5762_v49   ;;  %v5443_v49 = vmul.f32 %v10017_v14, %v12814_v18 }
 0xa17   : > { %v9599_v39 = vpop.eup %9598  ;;  %v5614_v24 = vmul.f32 1.442695, %v5571_v35 }
 0xa18   : > { %5875 = vperm.xlu1 %8993, %v5765_v46   ;;  %v5641_v50 = vadd.f32 1.0, %v9599_v39  ;;  %v9601_v11 = vpop.eup %9600 }
 0xa19   : > { %v5646_v58 = vadd.f32 1.0, %v9601_v11 }
 0xa1a   : > { %9602 = vrcp.f32 %v5641_v50 }
 0xa1b   : > { %9604 = vrcp.f32 %v5646_v58 }
 0xa1c   : > { %9606 = vpow2.f32 %v5614_v24 }
 0xa20   : > { %v9603_v60 = vpop.eup %9602 }
 0xa21   : > { %v5713_v9 = vmul.f32 %v9603_v60, %v9599_v39  ;;  %5483 = vadd.xlane.f32.xlu0 %v5443_v49  ;;  %v9605_v55 = vpop.eup %9604 }
 0xa22   : > { %v5718_v15 = vmul.f32 %v9605_v55, %v9601_v11  ;;  %v9607_v54 = vpop.eup %9606 }
 0xa23   : > { %v5737_v25 = vsel %vm5689_vm7, %v9603_v60, %v5713_v9  ;;  %v5643_v50 = vadd.f32 1.0, %v9607_v54 }
 0xa24   : > { %v5761_v6 = vmul.f32 %v10018_v21, %v5737_v25  ;;  %v5742_v56 = vsel %vm5694_vm5, %v9605_v55, %v5718_v15 }
 0xa25   : > { %v5766_v0 = vmul.f32 %v12828_v62, %v5742_v56 }
 0xa26   : > { %5855 = vperm.xlu2 %8994, %v5761_v6   ;;  %v12835_v6 = vld [vmem:[%s11654_s30 + $0xb8] sm:$0xff] }
 0xa2e   : > { %7706 = vperm.xlu2 %8994, %v12741_v31  }
 0xa35   : > { %5880 = vperm.xlu0 %8992, %v5766_v0  }
 0xa36   : > { %v5498_v43 = vpop.xlane.xlu0 %5497  ;;  %7701 = vperm.xlu2 %8994, %v12755_v1  }
 0xa37   : > { %v5527_v41 = vadd.f32 %v12605_v48, %v5498_v43  ;;  %v5801_v43 = vpop.permute.xlu1 %5800 }
 0xa38   : > { %v5841_v58 = vpop.permute.xlu2 %5840 }
 0xa39   : > { %v5551_v46 = vand.u32 2147483647, %v5527_v41  ;;  %vm5695_vm11 = vcmp.ge.f32.partialorder %v5527_v41, 0.0  ;;  %v5902_v41 = vmul.f32 %v5841_v58, %v12582_v3 }
 0xa3b   : > { %v5575_v39 = vsub.f32 0.0, %v5551_v46 }
 0xa3d   : > { %v5622_v31 = vmul.f32 1.442695, %v5575_v39 }
 0xa3e   : > { %7676 = vperm.xlu2 %8994, %v12682_v36  }
 0xa3f   : > { %9608 = vpow2.f32 %v5622_v31 }
 0xa40   : > { %v5831_v25 = vpop.permute.xlu2 %5830 }
 0xa41   : > { %v5900_v13 = vmul.f32 %v5831_v25, %v12572_v47 }
 0xa45   : > { %v9609_v34 = vpop.eup %9608 }
 0xa46   : > { %v5647_v11 = vadd.f32 1.0, %v9609_v34 }
 0xa48   : > { %9610 = vrcp.f32 %v5647_v11  ;;  %v5821_v35 = vpop.permute.xlu2 %5820 }
 0xa49   : > { %v5806_v14 = vpop.permute.xlu0 %5805  ;;  %9612 = vrcp.f32 %v5643_v50 }
 0xa4e   : > { %v9611_v1 = vpop.eup %9610 }
 0xa4f   : > { %v5719_v49 = vmul.f32 %v9611_v1, %v9609_v34  ;;  %v9613_v60 = vpop.eup %9612  ;;  %v5811_v34 = vpop.permute.xlu1 %5810 }
 0xa50   : > { %v5715_v55 = vmul.f32 %v9613_v60, %v9607_v54  ;;  %v5816_v54 = vpop.permute.xlu2 %5815 }
 0xa51   : > { %v5743_v9 = vsel %vm5695_vm11, %v9611_v1, %v5719_v49  ;;  %v5826_v21 = vpop.permute.xlu0 %5825  ;;  %v5898_v1 = vmul.f32 %v5821_v35, %v12559_v27  ;;  %v5897_v3 = vmul.f32 %v5816_v54, %v12543_v17  ;;  %v5892_v17 = vmul.f32 %v12823_v52, %v12472_v42 }
 0xa52   : > { %v5767_v36 = vmul.f32 %v12835_v6, %v5743_v9  ;;  %v5739_v15 = vsel %vm5691_vm3, %v9613_v60, %v5715_v55  ;;  %v5899_v50 = vmul.f32 %v5826_v21, %v12563_v38  ;;  %v5894_v38 = vmul.f32 %v5801_v43, %v12501_v30 }
 0xa53   : > { %v5763_v0 = vmul.f32 %v10021_v10, %v5739_v15 }
 0xa54   : > { %5885 = vperm.xlu1 %8993, %v5767_v36   ;;  %v5917_v58 = vpack.c.bf16 %v5899_v50, %v5898_v1  ;;  %v10022_v36 = vld [vmem:[%s11654_s30 + $0x80] sm:$0xff]  ;;  %v8853_v50 = vld [vmem:[%s14100_s16 + $0x68] sm:$0xff]  ;;  %v8851_v1 = vld [vmem:[%s14100_s16 + $0x58] sm:$0xff] }
 0xa57   : > { %v5781_v49 = vpop.permute.xlu1 %5780 }
 0xa59   : > { %v5836_v56 = vpop.permute.xlu0 %5835 }
 0xa5a   : > { %v5901_v39 = vmul.f32 %v5836_v56, %v12578_v51  ;;  %v5786_v51 = vpop.permute.xlu2 %5785 }
 0xa5c   : > { %5865 = vperm.xlu1 %8993, %v5763_v0   ;;  %v5918_v11 = vpack.c.bf16 %v5901_v39, %v5900_v13 }
 0xa61   : > { %v5846_v24 = vpop.permute.xlu0 %5845 }
 0xa62   : > { %v5903_v46 = vmul.f32 %v5846_v24, %v12587_v4  ;;  %v5896_v4 = vmul.f32 %v5811_v34, %v12552_v63  ;;  %v5891_v63 = vmul.f32 %v5786_v51, %v12528_v44  ;;  %v5776_v25 = vpop.permute.xlu2 %5775  ;;  %v14598_v34 = vld [vmem:[#allocation107_spill] sm:$0xff] }
 0xa63   : > { %v5889_v30 = vmul.f32 %v5776_v25, %v12539_v7 }
 0xa64   : > { %v5919_v31 = vpack.c.bf16 %v5903_v46, %v5902_v41  ;;  %7711 = vperm.xlu1 %8993, %v12775_v16   ;;  %v5895_v16 = vmul.f32 %v5806_v14, %v12517_v22  ;;  %v5916_v47 = vpack.c.bf16 %v5897_v3, %v5896_v4  ;;  %v5890_v22 = vmul.f32 %v5781_v49, %v12486_v8  ;;  %v5771_v14 = vpop.permute.xlu1 %5770  ;;  %v8850_v49 = vld [vmem:[%s14100_s16 + $0x50] sm:$0xff] }
 0xa66   : > { %5924 = vmatpush.bf16.msra.mxu0 %v5919_v31  ;;  %v5915_v9 = vpack.c.bf16 %v5895_v16, %v5894_v38  ;;  %v5913_v21 = vpack.c.bf16 %v5891_v63, %v5890_v22  ;;  %v8849_v38 = vld [vmem:[%s14100_s16 + $0x48] sm:$0xff] }
 0xa69   : > { %v5796_v60 = vpop.permute.xlu0 %5795 }
 0xa6a   : > { %5925 = vmatpush.bf16.msra.mxu0 %v5918_v11  ;;  %v5893_v27 = vmul.f32 %v5796_v60, %v12513_v26  ;;  %v5888_v26 = vmul.f32 %v5771_v14, %v12496_v23  ;;  %v8852_v11 = vld [vmem:[%s14100_s16 + $0x60] sm:$0xff] }
 0xa6c   : > { %7681 = vperm.xlu1 %8993, %v12783_v29   ;;  %v5914_v29 = vpack.c.bf16 %v5893_v27, %v5892_v17 }
 0xa6e   : > { %5926 = vmatpush.bf16.msra.mxu0 %v5917_v58  ;;  %v14600_v58 = vld [vmem:[#allocation118_spill] sm:$0xff] }
 0xa72   : > { %5927 = vmatpush.bf16.msra.mxu0 %v5916_v47 }
 0xa74   : > { %7666 = vperm.xlu1 %8993, %v12655_v12   ;;  %v5912_v12 = vpack.c.bf16 %v5889_v30, %v5888_v26 }
 0xa76   : > { %5928 = vmatpush.bf16.msra.mxu0 %v5915_v9  ;;  %v8848_v9 = vld [vmem:[%s14100_s16 + $0x40] sm:$0xff] }
 0xa7a   : > { %5929 = vmatpush.bf16.msra.mxu0 %v5914_v29 }
 0xa7c   : > { %7656 = vperm.xlu1 %8993, %v12648_v19  }
 0xa7e   : > { %5930 = vmatpush.bf16.msra.mxu0 %v5913_v21 }
 0xa82   : > { %5931 = vmatpush.bf16.msra.mxu0 %v5912_v12 }
 0xa84   : > { %7661 = vperm.xlu1 %8993, %v12787_v33  }
 0xa85   : > { %8915 = vmatmul.lmr.bf16.vlgmr.msra.gmra.8.mxu0 }
 0xa8a   : > { %v5876_v55 = vpop.permute.xlu1 %5875 }
 0xa8b   : > { %v5909_v35 = vmul.f32 %v5876_v55, %v12621_v20  ;;  %v14595_v20 = vld [vmem:[#allocation133_spill] sm:$0xff] }
 0xa8c   : > { %7646 = vperm.xlu1 %8993, %v12701_v57  }
 0xa8d   : > { %8916 = vmatmul.lmr.bf16.gmra.8.mxu0 }
 0xa94   : > { %v5484_v42 = vpop.xlane.xlu0 %5483  ;;  %7636 = vperm.xlu1 %8993, %v12719_v59  }
 0xa95   : > { %v5520_v8 = vadd.f32 %v12605_v48, %v5484_v42  ;;  %8917 = vmatmul.lmr.bf16.gmra.8.mxu0 }
 0xa97   : > { %v5544_v44 = vand.u32 2147483647, %v5520_v8  ;;  %vm5688_vm6 = vcmp.ge.f32.partialorder %v5520_v8, 0.0  ;;  %v8863_v8 = vld [vmem:[%s14102_s18 + $0x78] sm:$0xff] }
 0xa98   : > { %6336 = vmatpush.bf16.msra.mxu1 %v8863_v8 }
 0xa99   : > { %v5568_v7 = vsub.f32 0.0, %v5544_v44  ;;  %v8862_v44 = vld [vmem:[%s14102_s18 + $0x70] sm:$0xff] }
 0xa9b   : > { %v5608_v19 = vmul.f32 1.442695, %v5568_v7 }
 0xa9c   : > { %7746 = vperm.xlu1 %8993, %v12828_v62   ;;  %v5871_v62 = vpop.permute.xlu2 %5870  ;;  %6337 = vmatpush.bf16.msra.mxu1 %v8862_v44 }
 0xa9d   : > { %9614 = vpow2.f32 %v5608_v19  ;;  %8918 = vmatmul.lmr.bf16.gmra.8.mxu0  ;;  %v5908_v24 = vmul.f32 %v5871_v62, %v12616_v28  ;;  %v8861_v19 = vld [vmem:[%s14102_s18 + $0x68] sm:$0xff] }
 0xa9f   : > { %v5922_v41 = vpack.c.bf16 %v5909_v35, %v5908_v24  ;;  %v12931_v35 = vld [vmem:[%s14101_s17 + $0x1] ss:$0 sm:$0xff]  ;;  %v8858_v24 = vld [vmem:[%s14102_s18 + $0x50] sm:$0xff] }
 0xaa0   : > { %6338 = vmatpush.bf16.msra.mxu1 %v8861_v19 }
 0xaa3   : > { %v9615_v23 = vpop.eup %9614 }
 0xaa4   : > { %v5640_v33 = vadd.f32 1.0, %v9615_v23 }
 0xaa5   : > { %8919 = vmatmul.lmr.bf16.gmra.8.mxu0 }
 0xaa6   : > { %9616 = vrcp.f32 %v5640_v33 }
 0xaa7   : > { %v5881_v15 = vpop.permute.xlu0 %5880 }
 0xaa8   : > { %v5910_v10 = vmul.f32 %v5881_v15, %v12627_v45  ;;  %v14594_v45 = vld [vmem:[#allocation132_spill] sm:$0xff] }
 0xaac   : > { %v9617_v57 = vpop.eup %9616 }
 0xaad   : > { %v5712_v52 = vmul.f32 %v9617_v57, %v9615_v23  ;;  %8920 = vmatmul.lmr.bf16.gmra.8.mxu0  ;;  %v8860_v23 = vld [vmem:[%s14102_s18 + $0x60] sm:$0xff] }
 0xaae   : > { %6339 = vmatpush.bf16.msra.mxu1 %v8860_v23 }
 0xaaf   : > { %v5736_v59 = vsel %vm5688_vm6, %v9617_v57, %v5712_v52 }
 0xab0   : > { %v5760_v48 = vmul.f32 %v10022_v36, %v5736_v59 }
 0xab2   : > { %5850 = vperm.xlu0 %8992, %v5760_v48  }
 0xab5   : > { %8921 = vmatmul.lmr.bf16.gmra.8.mxu0 }
 0xaba   : > { %7696 = vperm.xlu0 %8992, %v12751_v2   ;;  %v5861_v2 = vpop.permute.xlu2 %5860 }
 0xabb   : > { %v5906_v39 = vmul.f32 %v5861_v2, %v12598_v32 }
 0xabd   : > { %8922 = vmatmul.lmr.bf16.gmra.8.mxu0 }
 0xac2   : > { %7686 = vperm.xlu0 %8992, %v12765_v53   ;;  %v5856_v28 = vpop.permute.xlu2 %5855 }
 0xac6   : > { %v5886_v56 = vpop.permute.xlu1 %5885 }
 0xac7   : > { %v5911_v0 = vmul.f32 %v5886_v56, %v12687_v5  ;;  %v6154_v56 = vpop.f32.mrf.mxu3 }
 0xac9   : > { %v5923_v43 = vpack.c.bf16 %v5911_v0, %v5910_v10  ;;  %v8859_v0 = vld [vmem:[%s14102_s18 + $0x58] sm:$0xff] }
 0xaca   : > { %7691 = vperm.xlu0 %8992, %v12745_v40   ;;  %v14596_v40 = vld [vmem:[#allocation131_spill] sm:$0xff]  ;;  %6340 = vmatpush.bf16.msra.mxu1 %v8859_v0  ;;  %v8871_v0 = vld [vmem:[%s14104_s20 + $0x38] sm:$0xff] }
 0xacb   : > { %5957 = vmatpush.bf16.msra.mxu0 %v5923_v43  ;;  %v5905_v54 = vmul.f32 %v5856_v28, %v14596_v40  ;;  %6462 = vmatpush.bf16.msra.mxu2 %v8871_v0  ;;  %v8875_v0 = vld [vmem:[%s14105_s21 + $0x18] sm:$0xff] }
 0xace   : > { %v5866_v46 = vpop.permute.xlu1 %5865  ;;  %6341 = vmatpush.bf16.msra.mxu1 %v8858_v24 }
 0xacf   : > { %v5907_v53 = vmul.f32 %v5866_v46, %v12611_v37  ;;  %5958 = vmatpush.bf16.msra.mxu0 %v5922_v41  ;;  %v14597_v37 = vld [vmem:[#allocation109_spill] sm:$0xff]  ;;  %v6156_v10 = vpop.f32.mrf.mxu3  ;;  %v8857_v46 = vld [vmem:[%s14102_s18 + $0x48] sm:$0xff] }
 0xad1   : > { %v5921_v31 = vpack.c.bf16 %v5907_v53, %v5906_v39 }
 0xad2   : > { %7671 = vperm.xlu0 %8992, %v12730_v61   ;;  %v8855_v61 = vld [vmem:[%s14100_s16 + $0x78] sm:$0xff]  ;;  %6342 = vmatpush.bf16.msra.mxu1 %v8857_v46 }
 0xad3   : > { %5959 = vmatpush.bf16.msra.mxu0 %v5921_v31 }
 0xad7   : > { %v6159_v53 = vpop.f32.mrf.mxu3 }
 0xada   : > { %7651 = vperm.xlu0 %8992, %v14594_v45  }
 0xae2   : > { %7641 = vperm.xlu0 %8992, %v14595_v20   ;;  %v8856_v20 = vld [vmem:[%s14102_s18 + $0x40] sm:$0xff] }
 0xae3   : > { %6343 = vmatpush.bf16.msra.mxu1 %v8856_v20 }
 0xaea   : > { %7751 = vperm.xlu0 %8992, %v12835_v6   ;;  %v14599_v6 = vld [vmem:[#allocation117_spill] sm:$0xff] }
 0xb02   : > { %v5933_v3 = vpop.f32.mrf.mxu0 }
 0xb0a   : > { %v5935_v4 = vpop.f32.mrf.mxu0 }
 0xb12   : > { %v5938_v51 = vpop.f32.mrf.mxu0 }
 0xb1a   : > { %v5940_v16 = vpop.f32.mrf.mxu0 }
 0xb22   : > { %v5943_v47 = vpop.f32.mrf.mxu0 }
 0xb24   : > { %v5851_v5 = vpop.permute.xlu0 %5850 }
 0xb25   : > { %v5904_v13 = vmul.f32 %v5851_v5, %v12814_v18  ;;  %v8854_v18 = vld [vmem:[%s14100_s16 + $0x70] sm:$0xff] }
 0xb27   : > { %v5920_v32 = vpack.c.bf16 %v5905_v54, %v5904_v13 }
 0xb29   : > { %5960 = vmatpush.bf16.msra.mxu0 %v5920_v32  ;;  %v6161_v32 = vpop.f32.mrf.mxu3 }
 0xb2a   : > { %v5945_v60 = vpop.f32.mrf.mxu0 }
 0xb2c   : > { %8485 = vmatmul.msk.bf16.vlgmr.msra.gmra.mxu0 %vm1404_vm8, %v14597_v37 }
 0xb2d   : > { %6068 = vmatpush.bf16.msra.mxu0 %v8855_v61 }
 0xb31   : > { %6069 = vmatpush.bf16.msra.mxu0 %v8854_v18 }
 0xb32   : > { %v5948_v27 = vpop.f32.mrf.mxu0 }
 0xb35   : > { %6070 = vmatpush.bf16.msra.mxu0 %v8853_v50 }
 0xb39   : > { %6071 = vmatpush.bf16.msra.mxu0 %v8852_v11 }
 0xb3a   : > { %v5950_v17 = vpop.f32.mrf.mxu0 }
 0xb3c   : > { %8486 = vmatmul.msk.bf16.gmra.mxu0 %vm1404_vm8, %v14598_v34 }
 0xb3d   : > { %6072 = vmatpush.bf16.msra.mxu0 %v8851_v1 }
 0xb41   : > { %6073 = vmatpush.bf16.msra.mxu0 %v8850_v49 }
 0xb45   : > { %6074 = vmatpush.bf16.msra.mxu0 %v8849_v38  ;;  %v6164_v38 = vpop.f32.mrf.mxu3 }
 0xb49   : > { %6075 = vmatpush.bf16.msra.mxu0 %v8848_v9 }
 0xb4c   : > { %8487 = vmatmul.msk.bf16.gmra.mxu0 %vm1404_vm8, %v14599_v6 }
 0xb5c   : > { %8488 = vmatmul.msk.bf16.gmra.mxu0 %vm1404_vm8, %v14600_v58 }
 0xba9   : > { %v5962_v63 = vpop.f32.mrf.mxu0 }
 0xbaa   : > { %v5963_v25 = vadd.f32 %v5962_v63, %v5933_v3 }
 0xbb1   : > { %v5964_v29 = vpop.f32.mrf.mxu0 }
 0xbb2   : > { %v5965_v22 = vadd.f32 %v5964_v29, %v5935_v4 }
 0xbb4   : > { %v6016_v14 = vpack.c.bf16 %v5965_v22, %v5963_v25 }
 0xbb6   : > { %6076 = vmatmul.bf16.vlgmr.msra.gmra.mxu0 %v6016_v14 }
 0xbb9   : > { %v5967_v21 = vpop.f32.mrf.mxu0 }
 0xbba   : > { %v5968_v26 = vadd.f32 %v5967_v21, %v5938_v51 }
 0xbc1   : > { %v5969_v30 = vpop.f32.mrf.mxu0 }
 0xbc2   : > { %v5970_v12 = vadd.f32 %v5969_v30, %v5940_v16 }
 0xbc4   : > { %v6017_v42 = vpack.c.bf16 %v5970_v12, %v5968_v26 }
 0xbc6   : > { %6081 = vmatmul.bf16.gmra.mxu0 %v6017_v42 }
 0xbc9   : > { %v5972_v7 = vpop.f32.mrf.mxu0 }
 0xbca   : > { %v5973_v57 = vadd.f32 %v5972_v7, %v5943_v47  ;;  %v6166_v7 = vpop.f32.mrf.mxu3 }
 0xbd1   : > { %v5974_v33 = vpop.f32.mrf.mxu0 }
 0xbd2   : > { %v5975_v52 = vadd.f32 %v5974_v33, %v5945_v60  ;;  %v6169_v24 = vpop.f32.mrf.mxu3 }
 0xbd4   : > { %v6018_v59 = vpack.c.bf16 %v5975_v52, %v5973_v57 }
 0xbd6   : > { %6086 = vmatmul.bf16.gmra.mxu0 %v6018_v59 }
 0xbd9   : > { %v5977_v36 = vpop.f32.mrf.mxu0 }
 0xbda   : > { %v5978_v55 = vadd.f32 %v5977_v36, %v5948_v27 }
 0xbe1   : > { %v5979_v48 = vpop.f32.mrf.mxu0 }
 0xbe2   : > { %v5980_v62 = vadd.f32 %v5979_v48, %v5950_v17 }
 0xbe4   : > { %v6019_v15 = vpack.c.bf16 %v5980_v62, %v5978_v55 }
 0xbe6   : > { %6091 = vmatmul.bf16.gmra.mxu0 %v6019_v15 }
 0xc33   : > { %v6077_v43 = vpop.f32.mrf.mxu0 }
 0xc34   : > { %v6155_v2 = vadd.f32 %v6154_v56, %v6077_v43 }
 0xc36   : > { %v6179_v41 = vadd.f32 %v12931_v35, %v6155_v2 }
 0xc38   : > { %v6187_v39 = vand.u32 2147483647, %v6179_v41  ;;  %vm6235_vm1 = vcmp.ge.f32.partialorder %v6179_v41, 0.0 }
 0xc3a   : > { %v6195_v31 = vsub.f32 0.0, %v6187_v39 }
 0xc3b   : > { %v6079_v45 = vpop.f32.mrf.mxu0 }
 0xc3c   : > { %v6203_v28 = vmul.f32 1.442695, %v6195_v31  ;;  %v6157_v5 = vadd.f32 %v6156_v10, %v6079_v45 }
 0xc3e   : > { %9618 = vpow2.f32 %v6203_v28  ;;  %v6180_v40 = vadd.f32 %v12931_v35, %v6157_v5 }
 0xc40   : > { %v6188_v54 = vand.u32 2147483647, %v6180_v40  ;;  %vm6236_vm4 = vcmp.ge.f32.partialorder %v6180_v40, 0.0 }
 0xc42   : > { %v6196_v13 = vsub.f32 0.0, %v6188_v54 }
 0xc43   : > { %v6082_v61 = vpop.f32.mrf.mxu0 }
 0xc44   : > { %v9619_v18 = vpop.eup %9618  ;;  %v6205_v50 = vmul.f32 1.442695, %v6196_v13  ;;  %v6160_v11 = vadd.f32 %v6159_v53, %v6082_v61 }
 0xc45   : > { %v6219_v1 = vadd.f32 1.0, %v9619_v18 }
 0xc46   : > { %9620 = vpow2.f32 %v6205_v50  ;;  %v12945_v3 = vadd.f32 %v12931_v35, %v6160_v11  ;;  %v6171_v50 = vpop.f32.mrf.mxu3 }
 0xc47   : > { %9622 = vrcp.f32 %v6219_v1 }
 0xc48   : > { %v6189_v4 = vand.u32 2147483647, %v12945_v3  ;;  %vm6237_vm0 = vcmp.ge.f32.partialorder %v12945_v3, 0.0 }
 0xc4a   : > { %v6197_v51 = vsub.f32 0.0, %v6189_v4 }
 0xc4b   : > { %v6084_v16 = vpop.f32.mrf.mxu0 }
 0xc4c   : > { %v9621_v47 = vpop.eup %9620  ;;  %v6207_v49 = vmul.f32 1.442695, %v6197_v51  ;;  %v6162_v60 = vadd.f32 %v6161_v32, %v6084_v16 }
 0xc4d   : > { %v6220_v9 = vadd.f32 1.0, %v9621_v47  ;;  %v9623_v17 = vpop.eup %9622 }
 0xc4e   : > { %9624 = vpow2.f32 %v6207_v49  ;;  %v6182_v27 = vadd.f32 %v12931_v35, %v6162_v60  ;;  %v6243_v29 = vmul.f32 %v9623_v17, %v9619_v18  ;;  %v8870_v49 = vld [vmem:[%s14104_s20 + $0x30] sm:$0xff] }
 0xc4f   : > { %9626 = vrcp.f32 %v6220_v9  ;;  %6463 = vmatpush.bf16.msra.mxu2 %v8870_v49  ;;  %v8869_v9 = vld [vmem:[%s14104_s20 + $0x28] sm:$0xff] }
 0xc50   : > { %v6190_v63 = vand.u32 2147483647, %v6182_v27  ;;  %v6251_v42 = vsel %vm6235_vm1, %v9623_v17, %v6243_v29  ;;  %vm6238_vm13 = vcmp.ge.f32.partialorder %v6182_v27, 0.0  ;;  %v8878_v17 = vld [vmem:[%s14105_s21 + $0x30] sm:$0xff] }
 0xc51   : > { %v6259_v33 = vmul.f32 %v6251_v42, %v6179_v41  ;;  %v8867_v42 = vld [vmem:[%s14104_s20 + $0x18] sm:$0xff] }
 0xc52   : > { %v6198_v25 = vsub.f32 0.0, %v6190_v63 }
 0xc53   : > { %v6087_v22 = vpop.f32.mrf.mxu0  ;;  %6464 = vmatpush.bf16.msra.mxu2 %v8869_v9 }
 0xc54   : > { %v9625_v14 = vpop.eup %9624  ;;  %v6209_v21 = vmul.f32 1.442695, %v6198_v25  ;;  %v6165_v30 = vadd.f32 %v6164_v38, %v6087_v22 }
 0xc55   : > { %v9627_v26 = vpop.eup %9626  ;;  %v6221_v12 = vadd.f32 1.0, %v9625_v14 }
 0xc56   : > { %v6244_v8 = vmul.f32 %v9627_v26, %v9621_v47  ;;  %9628 = vpow2.f32 %v6209_v21  ;;  %v12950_v44 = vadd.f32 %v12931_v35, %v6165_v30 }
 0xc57   : > { %9630 = vrcp.f32 %v6221_v12 }
 0xc58   : > { %v6252_v19 = vsel %vm6236_vm4, %v9627_v26, %v6244_v8  ;;  %v6191_v23 = vand.u32 2147483647, %v12950_v44  ;;  %vm6239_vm14 = vcmp.ge.f32.partialorder %v12950_v44, 0.0 }
 0xc59   : > { %v6260_v57 = vmul.f32 %v6252_v19, %v6180_v40 }
 0xc5a   : > { %v6199_v52 = vsub.f32 0.0, %v6191_v23 }
 0xc5b   : > { %v6284_v59 = vpack.c.bf16 %v6260_v57, %v6259_v33  ;;  %v6089_v36 = vpop.f32.mrf.mxu0 }
 0xc5c   : > { %v9629_v48 = vpop.eup %9628  ;;  %v6211_v55 = vmul.f32 1.442695, %v6199_v52  ;;  %v6167_v62 = vadd.f32 %v6166_v7, %v6089_v36  ;;  %v8876_v7 = vld [vmem:[%s14105_s21 + $0x20] sm:$0xff] }
 0xc5d   : > { %v6222_v15 = vadd.f32 1.0, %v9629_v48  ;;  %6344 = vmatmul.bf16.vlgmr.msra.gmra.mxu1 %v6284_v59  ;;  %v9631_v10 = vpop.eup %9630 }
 0xc5e   : > { %9632 = vpow2.f32 %v6211_v55  ;;  %v12954_v56 = vadd.f32 %v12931_v35, %v6167_v62  ;;  %v6245_v41 = vmul.f32 %v9631_v10, %v9625_v14  ;;  %v8877_v14 = vld [vmem:[%s14105_s21 + $0x28] sm:$0xff] }
 0xc5f   : > { %9634 = vrcp.f32 %v6222_v15 }
 0xc60   : > { %v6192_v43 = vand.u32 2147483647, %v12954_v56  ;;  %v6253_v40 = vsel %vm6237_vm0, %v9631_v10, %v6245_v41  ;;  %vm6240_vm9 = vcmp.ge.f32.partialorder %v12954_v56, 0.0  ;;  %v8873_v41 = vld [vmem:[%s14105_s21 + $0x8] sm:$0xff] }
 0xc61   : > { %v6261_v32 = vmul.f32 %v6253_v40, %v12945_v3  ;;  %v8879_v3 = vld [vmem:[%s14105_s21 + $0x38] sm:$0xff] }
 0xc62   : > { %v6200_v2 = vsub.f32 0.0, %v6192_v43  ;;  %6555 = vmatpush.bf16.msra.mxu0 %v8879_v3  ;;  %v8866_v43 = vld [vmem:[%s14104_s20 + $0x10] sm:$0xff]  ;;  %v14607_v3 = vld [vmem:[#allocation122_spill] sm:$0xff] }
 0xc63   : > { %v6092_v46 = vpop.f32.mrf.mxu0 }
 0xc64   : > { %v9633_v39 = vpop.eup %9632  ;;  %v6213_v53 = vmul.f32 1.442695, %v6200_v2  ;;  %v6170_v31 = vadd.f32 %v6169_v24, %v6092_v46  ;;  %v8874_v24 = vld [vmem:[%s14105_s21 + $0x10] sm:$0xff]  ;;  %v8865_v2 = vld [vmem:[%s14104_s20 + $0x8] sm:$0xff]  ;;  %v8864_v46 = vld [vmem:[%s14104_s20] sm:$0xff] }
 0xc65   : > { %v9635_v45 = vpop.eup %9634  ;;  %v6223_v20 = vadd.f32 1.0, %v9633_v39 }
 0xc66   : > { %9636 = vpow2.f32 %v6213_v53  ;;  %v12962_v28 = vadd.f32 %v12931_v35, %v6170_v31  ;;  %v6246_v5 = vmul.f32 %v9635_v45, %v9629_v48  ;;  %6556 = vmatpush.bf16.msra.mxu0 %v8878_v17  ;;  %v9006_v53 = vld [vmem:[%s14103_s19 + $0x1] ss:$0 sm:$0xff] }
 0xc67   : > { %9638 = vrcp.f32 %v6223_v20 }
 0xc68   : > { %v6193_v54 = vand.u32 2147483647, %v12962_v28  ;;  %v6254_v13 = vsel %vm6238_vm13, %v9635_v45, %v6246_v5  ;;  %vm6241_vm12 = vcmp.ge.f32.partialorder %v12962_v28, 0.0  ;;  %v14601_v45 = vld [vmem:[#allocation16_spill] sm:$0xff]  ;;  %v14602_v5 = vld [vmem:[#allocation15_spill] sm:$0xff] }
 0xc69   : > { %v6262_v61 = vmul.f32 %v6254_v13, %v6182_v27  ;;  %v14603_v13 = vld [vmem:[#allocation17_spill] sm:$0xff] }
 0xc6a   : > { %v6201_v18 = vsub.f32 0.0, %v6193_v54  ;;  %6557 = vmatpush.bf16.msra.mxu0 %v8877_v14  ;;  %v14610_v14 = vld [vmem:[#allocation124_spill] sm:$0xff] }
 0xc6b   : > { %v6094_v11 = vpop.f32.mrf.mxu0  ;;  %v6285_v1 = vpack.c.bf16 %v6262_v61, %v6261_v32 }
 0xc6c   : > { %v9637_v4 = vpop.eup %9636  ;;  %v6215_v51 = vmul.f32 1.442695, %v6201_v18  ;;  %v6172_v16 = vadd.f32 %v6171_v50, %v6094_v11  ;;  %v14604_v18 = vld [vmem:[#allocation14_spill] sm:$0xff] }
 0xc6d   : > { %v6224_v47 = vadd.f32 1.0, %v9637_v4  ;;  %6349 = vmatmul.bf16.gmra.mxu1 %v6285_v1  ;;  %v9639_v38 = vpop.eup %9638 }
 0xc6e   : > { %9640 = vpow2.f32 %v6215_v51  ;;  %v6186_v60 = vadd.f32 %v12931_v35, %v6172_v16  ;;  %v6247_v29 = vmul.f32 %v9639_v38, %v9633_v39  ;;  %v8868_v35 = vld [vmem:[%s14104_s20 + $0x20] sm:$0xff]  ;;  %6558 = vmatpush.bf16.msra.mxu0 %v8876_v7 }
 0xc6f   : > { %9642 = vrcp.f32 %v6224_v47  ;;  %6465 = vmatpush.bf16.msra.mxu2 %v8868_v35  ;;  %v8872_v39 = vld [vmem:[%s14105_s21] sm:$0xff]  ;;  %v14606_v47 = vld [vmem:[#allocation120_spill] sm:$0xff]  ;;  %v14609_v35 = vld [vmem:[#allocation125_spill] sm:$0xff] }
 0xc70   : > { %v6194_v27 = vand.u32 2147483647, %v6186_v60  ;;  %v6255_v12 = vsel %vm6239_vm14, %v9639_v38, %v6247_v29  ;;  %vm6242_vm2 = vcmp.ge.f32.partialorder %v6186_v60, 0.0 }
 0xc71   : > { %v6263_v19 = vmul.f32 %v6255_v12, %v12950_v44 }
 0xc72   : > { %v6202_v63 = vsub.f32 0.0, %v6194_v27  ;;  %6559 = vmatpush.bf16.msra.mxu0 %v8875_v0  ;;  %v14608_v27 = vld [vmem:[#allocation119_spill] sm:$0xff] }
 0xc73   : > { %6466 = vmatpush.bf16.msra.mxu2 %v8867_v42 }
 0xc74   : > { %v9641_v25 = vpop.eup %9640  ;;  %v6217_v22 = vmul.f32 1.442695, %v6202_v63 }
 0xc75   : > { %v9643_v21 = vpop.eup %9642  ;;  %v6225_v30 = vadd.f32 1.0, %v9641_v25 }
 0xc76   : > { %9644 = vpow2.f32 %v6217_v22  ;;  %v6248_v26 = vmul.f32 %v9643_v21, %v9637_v4  ;;  %6560 = vmatpush.bf16.msra.mxu0 %v8874_v24  ;;  %v14605_v4 = vld [vmem:[#allocation121_spill] sm:$0xff] }
 0xc77   : > { %9646 = vrcp.f32 %v6225_v30  ;;  %6467 = vmatpush.bf16.msra.mxu2 %v8866_v43 }
 0xc78   : > { %v6256_v8 = vsel %vm6240_vm9, %v9643_v21, %v6248_v26  ;;  %v14611_v26 = vld [vmem:[#allocation126_spill] sm:$0xff] }
 0xc79   : > { %v6264_v23 = vmul.f32 %v6256_v8, %v12954_v56  ;;  %v14612_v8 = vld [vmem:[#allocation123_spill] sm:$0xff] }
 0xc7a   : > { %6561 = vmatpush.bf16.msra.mxu0 %v8873_v41 }
 0xc7b   : > { %v6286_v33 = vpack.c.bf16 %v6264_v23, %v6263_v19  ;;  %6468 = vmatpush.bf16.msra.mxu2 %v8865_v2 }
 0xc7c   : > { %v9645_v57 = vpop.eup %9644 }
 0xc7d   : > { %v6226_v52 = vadd.f32 1.0, %v9645_v57  ;;  %6354 = vmatmul.bf16.gmra.mxu1 %v6286_v33  ;;  %v9647_v59 = vpop.eup %9646  ;;  %v14613_v33 = vld [vmem:[#allocation129_spill] sm:$0xff] }
 0xc7e   : > { %v6249_v36 = vmul.f32 %v9647_v59, %v9641_v25  ;;  %6562 = vmatpush.bf16.msra.mxu0 %v8872_v39 }
 0xc7f   : > { %9648 = vrcp.f32 %v6226_v52  ;;  %6469 = vmatpush.bf16.msra.mxu2 %v8864_v46 }
 0xc80   : > { %v6257_v62 = vsel %vm6241_vm12, %v9647_v59, %v6249_v36  ;;  %v14614_v59 = vld [vmem:[#allocation128_spill] sm:$0xff] }
 0xc81   : > { %v6265_v44 = vmul.f32 %v6257_v62, %v12962_v28 }
 0xc85   : > { %v9649_v48 = vpop.eup %9648 }
 0xc86   : > { %v6250_v55 = vmul.f32 %v9649_v48, %v9645_v57 }
 0xc88   : > { %v6258_v15 = vsel %vm6242_vm2, %v9649_v48, %v6250_v55  ;;  %v14615_v55 = vld [vmem:[#allocation130_spill] sm:$0xff] }
 0xc89   : > { %v6266_v10 = vmul.f32 %v6258_v15, %v6186_v60 }
 0xc8b   : > { %v6287_v56 = vpack.c.bf16 %v6266_v10, %v6265_v44  ;;  %v14616_v44 = vld [vmem:[#allocation127_spill] sm:$0xff] }
 0xc8d   : > { %6359 = vmatmul.bf16.gmra.mxu1 %v6287_v56 }
 0xcda   : > { %v6345_v31 = vpop.f32.mrf.mxu1 }
 0xcdb   : > { %v6365_v20 = vadd.f32 %v6345_v31, %v14601_v45 }
 0xcdd   : > { %v6378_v28 = vadd.f32 %v9006_v53, %v6365_v20 }
 0xcdf   : > { %v6386_v40 = vmul.f32 %v6378_v28, %v14602_v5 }
 0xce1   : > { %7864 = vst [vmem:[%s13026_s26] sm:$0xff] %v6386_v40 }
 0xce2   : > { %v6347_v54 = vpop.f32.mrf.mxu1 }
 0xce3   : > { %v6366_v32 = vadd.f32 %v6347_v54, %v14603_v13 }
 0xce5   : > { %v6379_v61 = vadd.f32 %v9006_v53, %v6366_v32 }
 0xce7   : > { %v6387_v50 = vmul.f32 %v6379_v61, %v14604_v18 }
 0xce9   : > { %v6410_v11 = vpack.c.bf16 %v6387_v50, %v6386_v40  ;;  %7865 = vst [vmem:[%s13026_s26 + $0x8] sm:$0xff] %v6387_v50 }
 0xcea   : > { %v6350_v1 = vpop.f32.mrf.mxu1 }
 0xceb   : > { %v6367_v51 = vadd.f32 %v6350_v1, %v14605_v4  ;;  %6470 = vmatmul.bf16.vlgmr.msra.gmra.mxu2 %v6410_v11  ;;  %6563 = vmatmul.bf16.vlgmr.msra.gmra.mxu0 %v6410_v11 }
 0xced   : > { %v6380_v16 = vadd.f32 %v9006_v53, %v6367_v51 }
 0xcef   : > { %v6388_v49 = vmul.f32 %v6380_v16, %v14606_v47 }
 0xcf1   : > { %7866 = vst [vmem:[%s13026_s26 + $0x10] sm:$0xff] %v6388_v49 }
 0xcf2   : > { %v6352_v60 = vpop.f32.mrf.mxu1 }
 0xcf3   : > { %v6368_v38 = vadd.f32 %v6352_v60, %v14607_v3  ;;  %v14618_v3 = vld [vmem:[#allocation21_spill] sm:$0xff] }
 0xcf5   : > { %v6381_v9 = vadd.f32 %v9006_v53, %v6368_v38  ;;  %v14619_v38 = vld [vmem:[#allocation22_spill] sm:$0xff] }
 0xcf7   : > { %v6389_v17 = vmul.f32 %v6381_v9, %v14608_v27  ;;  %v14620_v9 = vld [vmem:[#allocation19_spill] sm:$0xff] }
 0xcf9   : > { %7867 = vst [vmem:[%s13026_s26 + $0x18] sm:$0xff] %v6389_v17  ;;  %v6411_v63 = vpack.c.bf16 %v6389_v17, %v6388_v49  ;;  %v14617_v49 = vld [vmem:[#allocation20_spill] sm:$0xff]  ;;  %v14621_v17 = vld [vmem:[#allocation23_spill] sm:$0xff] }
 0xcfa   : > { %v6355_v29 = vpop.f32.mrf.mxu1 }
 0xcfb   : > { %v6369_v25 = vadd.f32 %v6355_v29, %v14609_v35  ;;  %6475 = vmatmul.bf16.gmra.mxu2 %v6411_v63  ;;  %6568 = vmatmul.bf16.gmra.mxu0 %v6411_v63  ;;  %v14622_v63 = vld [vmem:[#allocation24_spill] sm:$0xff]  ;;  %v14623_v29 = vld [vmem:[#allocation27_spill] sm:$0xff]  ;;  %v14624_v35 = vld [vmem:[#allocation25_spill] sm:$0xff] }
 0xcfd   : > { %v6382_v22 = vadd.f32 %v9006_v53, %v6369_v25  ;;  %v14625_v25 = vld [vmem:[#allocation28_spill] sm:$0xff] }
 0xcff   : > { %v6390_v21 = vmul.f32 %v6382_v22, %v14610_v14  ;;  %v14626_v22 = vld [vmem:[#allocation26_spill] sm:$0xff] }
 0xd01   : > { %7868 = vst [vmem:[%s13026_s26 + $0x20] sm:$0xff] %v6390_v21 }
 0xd02   : > { %v6357_v30 = vpop.f32.mrf.mxu1 }
 0xd03   : > { %v6370_v12 = vadd.f32 %v6357_v30, %v14611_v26  ;;  %v14628_v30 = vld [vmem:[#allocation30_spill] sm:$0xff]  ;;  %v14629_v26 = vld [vmem:[#allocation33_spill] sm:$0xff] }
 0xd05   : > { %v6383_v42 = vadd.f32 %v9006_v53, %v6370_v12  ;;  %v14630_v12 = vld [vmem:[#allocation31_spill] sm:$0xff] }
 0xd07   : > { %v6391_v7 = vmul.f32 %v6383_v42, %v14612_v8  ;;  %v14631_v42 = vld [vmem:[#allocation34_spill] sm:$0xff] }
 0xd09   : > { %7869 = vst [vmem:[%s13026_s26 + $0x28] sm:$0xff] %v6391_v7  ;;  %v6412_v19 = vpack.c.bf16 %v6391_v7, %v6390_v21  ;;  %v14627_v21 = vld [vmem:[#allocation29_spill] sm:$0xff]  ;;  %v8887_v7 = vld [vmem:[%s14108_s24 + $0x38] sm:$0xff] }
 0xd0a   : > { %v6360_v23 = vpop.f32.mrf.mxu1  ;;  %7177 = vmatpush.bf16.msrb.mxu2 %v8887_v7 }
 0xd0b   : > { %v6371_v57 = vadd.f32 %v6360_v23, %v14613_v33  ;;  %6480 = vmatmul.bf16.gmra.mxu2 %v6412_v19  ;;  %6573 = vmatmul.bf16.gmra.mxu0 %v6412_v19  ;;  %v14632_v19 = vld [vmem:[#allocation32_spill] sm:$0xff]  ;;  %v8886_v23 = vld [vmem:[%s14108_s24 + $0x30] sm:$0xff] }
 0xd0c   : > { %v8885_v33 = vld [vmem:[%s14108_s24 + $0x28] sm:$0xff] }
 0xd0d   : > { %v6384_v52 = vadd.f32 %v9006_v53, %v6371_v57  ;;  %v6584_v57 = vld [vmem:[%s14106_s22] sm:$0x3] }
 0xd0e   : > { %7178 = vmatpush.bf16.msrb.mxu2 %v8886_v23 }
 0xd0f   : > { %v6392_v36 = vmul.f32 %v6384_v52, %v14614_v59  ;;  %v8884_v52 = vld [vmem:[%s14108_s24 + $0x20] sm:$0xff] }
 0xd11   : > { %7870 = vst [vmem:[%s13026_s26 + $0x30] sm:$0xff] %v6392_v36 }
 0xd12   : > { %v6362_v48 = vpop.f32.mrf.mxu1  ;;  %7179 = vmatpush.bf16.msrb.mxu2 %v8885_v33 }
 0xd13   : > { %v6372_v62 = vadd.f32 %v6362_v48, %v14615_v55  ;;  %v13099_v48 = vperm.slane %v6584_v57, 0  ;;  %v13101_v55 = vperm.slane %v6584_v57, 1 }
 0xd15   : > { %v6385_v15 = vadd.f32 %v9006_v53, %v6372_v62 }
 0xd16   : > { %7180 = vmatpush.bf16.msrb.mxu2 %v8884_v52 }
 0xd17   : > { %v6393_v10 = vmul.f32 %v6385_v15, %v14616_v44 }
 0xd19   : > { %7871 = vst [vmem:[%s13026_s26 + $0x38] sm:$0xff] %v6393_v10  ;;  %v6413_v56 = vpack.c.bf16 %v6393_v10, %v6392_v36  ;;  %v14633_v36 = vld [vmem:[#allocation35_spill] sm:$0xff]  ;;  %v8883_v10 = vld [vmem:[%s14108_s24 + $0x18] sm:$0xff]  ;;  %s10058_s26 = scalar_lea.hbm %s14745_s27, 128 }
 0xd1a   : > { %7181 = vmatpush.bf16.msrb.mxu2 %v8883_v10  ;;  %v14644_v10 = vld [vmem:[#allocation54_spill] sm:$0xff] }
 0xd1b   : > { %6485 = vmatmul.bf16.gmra.mxu2 %v6413_v56  ;;  %6578 = vmatmul.bf16.gmra.mxu0 %v6413_v56 }
 0xd68   : > { %v6564_v0 = vpop.f32.mrf.mxu0 }
 0xd6e   : > { %v6471_v43 = vpop.f32.mrf.mxu2 }
 0xd70   : > { %v6566_v24 = vpop.f32.mrf.mxu0 }
 0xd71   : > { %v6589_v51 = vpack.c.bf16 %v6566_v24, %v6564_v0  ;;  %v14634_v0 = vld [vmem:[#allocation66_spill] sm:$0xff]  ;;  %v14635_v24 = vld [vmem:[#allocation64_spill] sm:$0xff] }
 0xd76   : > { %v6473_v2 = vpop.f32.mrf.mxu2 }
 0xd77   : > { %v6585_v60 = vpack.c.bf16 %v6473_v2, %v6471_v43  ;;  %v6732_v43 = vmul.f32 %v13099_v48, %v14634_v0  ;;  %v6781_v2 = vmul.f32 %v13101_v55, %v14635_v24 }
 0xd78   : > { %v6569_v41 = vpop.f32.mrf.mxu0 }
 0xd7e   : > { %v6476_v46 = vpop.f32.mrf.mxu2 }
 0xd80   : > { %v6571_v39 = vpop.f32.mrf.mxu0 }
 0xd81   : > { %v6590_v1 = vpack.c.bf16 %v6571_v39, %v6569_v41  ;;  %v14636_v39 = vld [vmem:[#allocation36_spill] sm:$0xff] }
 0xd86   : > { %v6478_v31 = vpop.f32.mrf.mxu2 }
 0xd87   : > { %v6586_v16 = vpack.c.bf16 %v6478_v31, %v6476_v46  ;;  %v13113_v46 = vld [vmem:[%s14107_s23] ss:$0 sm:$0xff]  ;;  %v8882_v31 = vld [vmem:[%s14108_s24 + $0x10] sm:$0xff] }
 0xd88   : > { %v6574_v45 = vpop.f32.mrf.mxu0  ;;  %7182 = vmatpush.bf16.msrb.mxu2 %v8882_v31  ;;  %v14645_v31 = vld [vmem:[#allocation40_spill] sm:$0xff] }
 0xd8e   : > { %v6481_v20 = vpop.f32.mrf.mxu2 }
 0xd90   : > { %v6576_v28 = vpop.f32.mrf.mxu0 }
 0xd91   : > { %v6591_v61 = vpack.c.bf16 %v6576_v28, %v6574_v45 }
 0xd96   : > { %v6483_v40 = vpop.f32.mrf.mxu2 }
 0xd97   : > { %v6587_v4 = vpack.c.bf16 %v6483_v40, %v6481_v20 }
 0xd98   : > { %v6579_v54 = vpop.f32.mrf.mxu0 }
 0xd9e   : > { %v6486_v53 = vpop.f32.mrf.mxu2 }
 0xda0   : > { %v6581_v13 = vpop.f32.mrf.mxu0 }
 0xda1   : > { %v6592_v32 = vpack.c.bf16 %v6581_v13, %v6579_v54  ;;  %v8881_v54 = vld [vmem:[%s14108_s24 + $0x8] sm:$0xff] }
 0xda2   : > { %7183 = vmatpush.bf16.msrb.mxu2 %v8881_v54 }
 0xda3   : > { %6597 = vmatpush.bf16.msrb.mxu3 %v6592_v32  ;;  %v14637_v32 = vld [vmem:[#allocation69_spill] sm:$0xff] }
 0xda6   : > { %v6488_v50 = vpop.f32.mrf.mxu2 }
 0xda7   : > { %v6588_v11 = vpack.c.bf16 %v6488_v50, %v6486_v53  ;;  %6598 = vmatpush.bf16.msrb.mxu3 %v6591_v61  ;;  %v6733_v61 = vmul.f32 %v13099_v48, %v14637_v32  ;;  %v14638_v50 = vld [vmem:[#allocation68_spill] sm:$0xff] }
 0xda9   : > { %6666 = vmatpush.bf16.msrb.mxu1 %v6588_v11  ;;  %v6782_v11 = vmul.f32 %v13101_v55, %v14638_v50  ;;  %v14646_v50 = vld [vmem:[#allocation75_spill] sm:$0xff] }
 0xdab   : > { %6599 = vmatpush.bf16.msrb.mxu3 %v6590_v1 }
 0xdad   : > { %6667 = vmatpush.bf16.msrb.mxu1 %v6587_v4 }
 0xdaf   : > { %6600 = vmatpush.bf16.msrb.mxu3 %v6589_v51  ;;  %v8880_v51 = vld [vmem:[%s14108_s24] sm:$0xff] }
 0xdb0   : > { %7184 = vmatpush.bf16.msrb.mxu2 %v8880_v51 }
 0xdb1   : > { %6668 = vmatpush.bf16.msrb.mxu1 %v6586_v16 }
 0xdb2   : > { %8699 = vmatmul.msk.bf16.vlgmr.msrb.gmra.mxu3 %vm1404_vm8, %v14617_v49 }
 0xdb5   : > { %6669 = vmatpush.bf16.msrb.mxu1 %v6585_v60  ;;  %v14639_v60 = vld [vmem:[#allocation39_spill] sm:$0xff] }
 0xdb8   : > { %8711 = vmatmul.msk.bf16.vlgmr.msrb.gmra.mxu1 %vm1404_vm8, %v14618_v3 }
 0xdc2   : > { %8700 = vmatmul.msk.bf16.gmra.mxu3 %vm1404_vm8, %v14619_v38 }
 0xdc8   : > { %8712 = vmatmul.msk.bf16.gmra.mxu1 %vm1404_vm8, %v14620_v9 }
 0xdd2   : > { %8701 = vmatmul.msk.bf16.gmra.mxu3 %vm1404_vm8, %v14621_v17 }
 0xdd8   : > { %8713 = vmatmul.msk.bf16.gmra.mxu1 %vm1404_vm8, %v14622_v63 }
 0xde2   : > { %8702 = vmatmul.msk.bf16.gmra.mxu3 %vm1404_vm8, %v14623_v29  ;;  %v14640_v29 = vld [vmem:[#allocation74_spill] sm:$0xff] }
 0xde8   : > { %8714 = vmatmul.msk.bf16.gmra.mxu1 %vm1404_vm8, %v14624_v35  ;;  %v6734_v35 = vmul.f32 %v13099_v48, %v14640_v29 }
 0xdf2   : > { %8703 = vmatmul.msk.bf16.gmra.mxu3 %vm1404_vm8, %v14625_v25  ;;  %v14641_v25 = vld [vmem:[#allocation58_spill] sm:$0xff] }
 0xdf8   : > { %8715 = vmatmul.msk.bf16.gmra.mxu1 %vm1404_vm8, %v14626_v22  ;;  %v6783_v22 = vmul.f32 %v13101_v55, %v14641_v25 }
 0xe02   : > { %8704 = vmatmul.msk.bf16.gmra.mxu3 %vm1404_vm8, %v14627_v21 }
 0xe08   : > { %8716 = vmatmul.msk.bf16.gmra.mxu1 %vm1404_vm8, %v14628_v30 }
 0xe12   : > { %8705 = vmatmul.msk.bf16.gmra.mxu3 %vm1404_vm8, %v14629_v26  ;;  %v14642_v26 = vld [vmem:[#allocation37_spill] sm:$0xff] }
 0xe18   : > { %8717 = vmatmul.msk.bf16.gmra.mxu1 %vm1404_vm8, %v14630_v12 }
 0xe22   : > { %8706 = vmatmul.msk.bf16.gmra.mxu3 %vm1404_vm8, %v14631_v42 }
 0xe28   : > { %8718 = vmatmul.msk.bf16.gmra.mxu1 %vm1404_vm8, %v14632_v19 }
 0xe32   : > { %8707 = vmatmul.msk.bf16.gmra.mxu3 %vm1404_vm8, %v14633_v36 }
 0xe35   : > { %v6602_v62 = vpop.f32.mrf.mxu3  ;;  %v6671_v15 = vpop.f32.mrf.mxu1 }
 0xe36   : > { %v6672_v56 = vadd.f32 %v6671_v15, %v6602_v62  ;;  %v14643_v62 = vld [vmem:[#allocation79_spill] sm:$0xff] }
 0xe37   : > { %v6735_v15 = vmul.f32 %v13099_v48, %v14643_v62 }
 0xe38   : > { %v6756_v41 = vadd.f32 %v6732_v43, %v6672_v56  ;;  %8719 = vmatmul.msk.bf16.gmra.mxu1 %vm1404_vm8, %v14636_v39  ;;  %v6784_v56 = vmul.f32 %v13101_v55, %v14644_v10 }
 0xe3a   : > { %v6805_v45 = vadd.f32 %v6781_v2, %v6756_v41 }
 0xe3c   : > { %v13121_v20 = vadd.f32 %v13113_v46, %v6805_v45 }
 0xe3d   : > { %v6604_v28 = vpop.f32.mrf.mxu3  ;;  %v6673_v40 = vpop.f32.mrf.mxu1 }
 0xe3e   : > { %v6857_v53 = vand.u32 2147483647, %v13121_v20  ;;  %v6674_v13 = vadd.f32 %v6673_v40, %v6604_v28  ;;  %vm7001_vm10 = vcmp.ge.f32.partialorder %v13121_v20, 0.0 }
 0xe40   : > { %v6881_v1 = vsub.f32 0.0, %v6857_v53  ;;  %v6757_v4 = vadd.f32 %v6733_v61, %v6674_v13 }
 0xe42   : > { %v6905_v16 = vmul.f32 1.442695, %v6881_v1  ;;  %v6806_v49 = vadd.f32 %v6782_v11, %v6757_v4  ;;  %8708 = vmatmul.msk.bf16.gmra.mxu3 %vm1404_vm8, %v14639_v60  ;;  %v6736_v11 = vmul.f32 %v13099_v48, %v14646_v50  ;;  %v14647_v1 = vld [vmem:[#allocation61_spill] sm:$0xff]  ;;  %v14648_v60 = vld [vmem:[#allocation38_spill] sm:$0xff] }
 0xe43   : > { %v6785_v4 = vmul.f32 %v13101_v55, %v14647_v1 }
 0xe44   : > { %9650 = vpow2.f32 %v6905_v16  ;;  %v6834_v3 = vadd.f32 %v13113_v46, %v6806_v49 }
 0xe45   : > { %v6607_v38 = vpop.f32.mrf.mxu3  ;;  %v6676_v9 = vpop.f32.mrf.mxu1 }
 0xe46   : > { %v6858_v17 = vand.u32 2147483647, %v6834_v3  ;;  %v6677_v63 = vadd.f32 %v6676_v9, %v6607_v38  ;;  %vm7002_vm7 = vcmp.ge.f32.partialorder %v6834_v3, 0.0 }
 0xe48   : > { %v6882_v21 = vsub.f32 0.0, %v6858_v17  ;;  %v6758_v30 = vadd.f32 %v6734_v35, %v6677_v63  ;;  %8720 = vmatmul.msk.bf16.gmra.mxu1 %vm1404_vm8, %v14642_v26 }
 0xe4a   : > { %v9651_v12 = vpop.eup %9650  ;;  %v6907_v42 = vmul.f32 1.442695, %v6882_v21  ;;  %v6807_v7 = vadd.f32 %v6783_v22, %v6758_v30 }
 0xe4b   : > { %v6953_v19 = vadd.f32 1.0, %v9651_v12 }
 0xe4c   : > { %9652 = vpow2.f32 %v6907_v42  ;;  %v13144_v23 = vadd.f32 %v13113_v46, %v6807_v7 }
 0xe4d   : > { %v6609_v33 = vpop.f32.mrf.mxu3  ;;  %v6678_v57 = vpop.f32.mrf.mxu1  ;;  %9654 = vrcp.f32 %v6953_v19  ;;  %v14649_v19 = vld [vmem:[#allocation76_spill] sm:$0xff] }
 0xe4e   : > { %v6859_v52 = vand.u32 2147483647, %v13144_v23  ;;  %v6679_v36 = vadd.f32 %v6678_v57, %v6609_v33  ;;  %v6737_v33 = vmul.f32 %v13099_v48, %v14649_v19  ;;  %vm7003_vm5 = vcmp.ge.f32.partialorder %v13144_v23, 0.0 }
 0xe50   : > { %v6883_v43 = vsub.f32 0.0, %v6859_v52  ;;  %v6759_v24 = vadd.f32 %v6735_v15, %v6679_v36  ;;  %v14650_v36 = vld [vmem:[#allocation56_spill] sm:$0xff] }
 0xe51   : > { %v6786_v15 = vmul.f32 %v13101_v55, %v14650_v36 }
 0xe52   : > { %v9653_v2 = vpop.eup %9652  ;;  %v6909_v41 = vmul.f32 1.442695, %v6883_v43  ;;  %v6808_v39 = vadd.f32 %v6784_v56, %v6759_v24  ;;  %8709 = vmatmul.msk.bf16.gmra.mxu3 %vm1404_vm8, %v14645_v31 }
 0xe53   : > { %v6954_v45 = vadd.f32 1.0, %v9653_v2  ;;  %v9655_v40 = vpop.eup %9654 }
 0xe54   : > { %9656 = vpow2.f32 %v6909_v41  ;;  %v13154_v28 = vadd.f32 %v13113_v46, %v6808_v39  ;;  %v7025_v51 = vmul.f32 %v9655_v40, %v9651_v12  ;;  %v14651_v39 = vld [vmem:[#allocation41_spill] sm:$0xff] }
 0xe55   : > { %9658 = vrcp.f32 %v6954_v45  ;;  %v6612_v54 = vpop.f32.mrf.mxu3  ;;  %v6681_v53 = vpop.f32.mrf.mxu1 }
 0xe56   : > { %v6860_v13 = vand.u32 2147483647, %v13154_v28  ;;  %v6682_v61 = vadd.f32 %v6681_v53, %v6612_v54  ;;  %v7049_v25 = vsel %vm7001_vm10, %v9655_v40, %v7025_v51  ;;  %vm7004_vm11 = vcmp.ge.f32.partialorder %v13154_v28, 0.0 }
 0xe57   : > { %v7073_v57 = vmul.f32 %v7049_v25, %v13121_v20 }
 0xe58   : > { %v6884_v16 = vsub.f32 0.0, %v6860_v13  ;;  %v6760_v49 = vadd.f32 %v6736_v11, %v6682_v61  ;;  %8721 = vmatmul.msk.bf16.gmra.mxu1 %vm1404_vm8, %v14648_v60  ;;  %v14652_v13 = vld [vmem:[#allocation82_spill] sm:$0xff]  ;;  %v14653_v11 = vld [vmem:[#allocation59_spill] sm:$0xff] }
 0xe59   : > { %v6738_v61 = vmul.f32 %v13099_v48, %v14652_v13  ;;  %v6787_v1 = vmul.f32 %v13101_v55, %v14653_v11  ;;  %v14658_v11 = vld [vmem:[#allocation65_spill] sm:$0xff] }
 0xe5a   : > { %v9657_v38 = vpop.eup %9656  ;;  %v6911_v9 = vmul.f32 1.442695, %v6884_v16  ;;  %v6809_v17 = vadd.f32 %v6785_v4, %v6760_v49  ;;  %v14654_v16 = vld [vmem:[#allocation42_spill] sm:$0xff] }
 0xe5b   : > { %v9659_v63 = vpop.eup %9658  ;;  %v6955_v35 = vadd.f32 1.0, %v9657_v38 }
 0xe5c   : > { %v7026_v22 = vmul.f32 %v9659_v63, %v9653_v2  ;;  %9660 = vpow2.f32 %v6911_v9  ;;  %v13165_v21 = vadd.f32 %v13113_v46, %v6809_v17 }
 0xe5d   : > { %v6614_v30 = vpop.f32.mrf.mxu3  ;;  %v6683_v26 = vpop.f32.mrf.mxu1  ;;  %9662 = vrcp.f32 %v6955_v35 }
 0xe5e   : > { %v7050_v12 = vsel %vm7002_vm7, %v9659_v63, %v7026_v22  ;;  %v6861_v42 = vand.u32 2147483647, %v13165_v21  ;;  %v6684_v7 = vadd.f32 %v6683_v26, %v6614_v30  ;;  %vm7005_vm3 = vcmp.ge.f32.partialorder %v13165_v21, 0.0 }
 0xe5f   : > { %v7074_v52 = vmul.f32 %v7050_v12, %v6834_v3 }
 0xe60   : > { %v6885_v10 = vsub.f32 0.0, %v6861_v42  ;;  %v6761_v56 = vadd.f32 %v6737_v33, %v6684_v7  ;;  %v14655_v7 = vld [vmem:[#allocation84_spill] sm:$0xff] }
 0xe61   : > { %v7113_v43 = vpack.c.bf16 %v7074_v52, %v7073_v57  ;;  %v6739_v33 = vmul.f32 %v13099_v48, %v14655_v7 }
 0xe62   : > { %v9661_v24 = vpop.eup %9660  ;;  %v6913_v2 = vmul.f32 1.442695, %v6885_v10  ;;  %v6810_v41 = vadd.f32 %v6786_v15, %v6761_v56  ;;  %8710 = vmatmul.msk.bf16.gmra.mxu3 %vm1404_vm8, %v14651_v39  ;;  %v14656_v15 = vld [vmem:[#allocation71_spill] sm:$0xff] }
 0xe63   : > { %7185 = vmatmul.bf16.vlgmr.msrb.gmra.mxu2 %v7113_v43  ;;  %v6956_v31 = vadd.f32 1.0, %v9661_v24  ;;  %v9663_v20 = vpop.eup %9662  ;;  %v6788_v10 = vmul.f32 %v13101_v55, %v14656_v15 }
 0xe64   : > { %9664 = vpow2.f32 %v6913_v2  ;;  %v13176_v45 = vadd.f32 %v13113_v46, %v6810_v41  ;;  %v7027_v49 = vmul.f32 %v9663_v20, %v9657_v38 }
 0xe65   : > { %v6617_v3 = vpop.f32.mrf.mxu3  ;;  %v6686_v40 = vpop.f32.mrf.mxu1  ;;  %9666 = vrcp.f32 %v6956_v31 }
 0xe66   : > { %v6862_v54 = vand.u32 2147483647, %v13176_v45  ;;  %v6687_v53 = vadd.f32 %v6686_v40, %v6617_v3  ;;  %v7051_v30 = vsel %vm7003_vm5, %v9663_v20, %v7027_v49  ;;  %vm7006_vm6 = vcmp.ge.f32.partialorder %v13176_v45, 0.0 }
 0xe67   : > { %v7075_v52 = vmul.f32 %v7051_v30, %v13144_v23 }
 0xe68   : > { %v6886_v4 = vsub.f32 0.0, %v6862_v54  ;;  %v6762_v51 = vadd.f32 %v6738_v61, %v6687_v53  ;;  %8722 = vmatmul.msk.bf16.gmra.mxu1 %vm1404_vm8, %v14654_v16  ;;  %v14657_v53 = vld [vmem:[#allocation86_spill] sm:$0xff] }
 0xe69   : > { %v6740_v61 = vmul.f32 %v13099_v48, %v14657_v53 }
 0xe6a   : > { %v9665_v60 = vpop.eup %9664  ;;  %v6915_v9 = vmul.f32 1.442695, %v6886_v4  ;;  %v6811_v17 = vadd.f32 %v6787_v1, %v6762_v51  ;;  %v6789_v1 = vmul.f32 %v13101_v55, %v14658_v11 }
 0xe6b   : > { %v9667_v63 = vpop.eup %9666  ;;  %v6957_v35 = vadd.f32 1.0, %v9665_v60 }
 0xe6c   : > { %9668 = vpow2.f32 %v6915_v9  ;;  %v13187_v25 = vadd.f32 %v13113_v46, %v6811_v17  ;;  %v7028_v22 = vmul.f32 %v9667_v63, %v9661_v24 }
 0xe6d   : > { %v6619_v26 = vpop.f32.mrf.mxu3  ;;  %v6688_v12 = vpop.f32.mrf.mxu1  ;;  %9670 = vrcp.f32 %v6957_v35 }
 0xe6e   : > { %v6863_v42 = vand.u32 2147483647, %v13187_v25  ;;  %v6689_v38 = vadd.f32 %v6688_v12, %v6619_v26  ;;  %v7052_v57 = vsel %vm7004_vm11, %v9667_v63, %v7028_v22  ;;  %vm7007_vm1 = vcmp.ge.f32.partialorder %v13187_v25, 0.0 }
 0xe6f   : > { %v7076_v36 = vmul.f32 %v7052_v57, %v13154_v28 }
 0xe70   : > { %v6887_v56 = vsub.f32 0.0, %v6863_v42  ;;  %v6763_v43 = vadd.f32 %v6739_v33, %v6689_v38  ;;  %v14659_v33 = vld [vmem:[#allocation85_spill] sm:$0xff] }
 0xe71   : > { %v7114_v24 = vpack.c.bf16 %v7076_v36, %v7075_v52  ;;  %v6741_v57 = vmul.f32 %v13099_v48, %v14659_v33 }
 0xe72   : > { %v9669_v2 = vpop.eup %9668  ;;  %v6917_v41 = vmul.f32 1.442695, %v6887_v56  ;;  %v6812_v39 = vadd.f32 %v6788_v10, %v6763_v43  ;;  %v14660_v10 = vld [vmem:[#allocation62_spill] sm:$0xff] }
 0xe73   : > { %7190 = vmatmul.bf16.gmra.mxu2 %v7114_v24  ;;  %v6958_v31 = vadd.f32 1.0, %v9669_v2  ;;  %v9671_v3 = vpop.eup %9670  ;;  %v6790_v56 = vmul.f32 %v13101_v55, %v14660_v10 }
 0xe74   : > { %9672 = vpow2.f32 %v6917_v41  ;;  %v13198_v20 = vadd.f32 %v13113_v46, %v6812_v39  ;;  %v7029_v16 = vmul.f32 %v9671_v3, %v9665_v60 }
 0xe75   : > { %v6622_v23 = vpop.f32.mrf.mxu3  ;;  %v6691_v40 = vpop.f32.mrf.mxu1  ;;  %9674 = vrcp.f32 %v6958_v31 }
 0xe76   : > { %v6864_v28 = vand.u32 2147483647, %v13198_v20  ;;  %v6692_v54 = vadd.f32 %v6691_v40, %v6622_v23  ;;  %v7053_v26 = vsel %vm7005_vm3, %v9671_v3, %v7029_v16  ;;  %vm7008_vm4 = vcmp.ge.f32.partialorder %v13198_v20, 0.0 }
 0xe77   : > { %v7077_v36 = vmul.f32 %v7053_v26, %v13165_v21 }
 0xe78   : > { %v6888_v4 = vsub.f32 0.0, %v6864_v28  ;;  %v6764_v51 = vadd.f32 %v6740_v61, %v6692_v54  ;;  %v14661_v61 = vld [vmem:[#allocation89_spill] sm:$0xff] }
 0xe79   : > { %v6742_v11 = vmul.f32 %v13099_v48, %v14661_v61 }
 0xe7a   : > { %v9673_v49 = vpop.eup %9672  ;;  %v6919_v9 = vmul.f32 1.442695, %v6888_v4  ;;  %v6813_v17 = vadd.f32 %v6789_v1, %v6764_v51  ;;  %v14662_v1 = vld [vmem:[#allocation77_spill] sm:$0xff] }
 0xe7b   : > { %v9675_v63 = vpop.eup %9674  ;;  %v6959_v35 = vadd.f32 1.0, %v9673_v49  ;;  %v6791_v4 = vmul.f32 %v13101_v55, %v14662_v1 }
 0xe7c   : > { %9676 = vpow2.f32 %v6919_v9  ;;  %v13207_v22 = vadd.f32 %v13113_v46, %v6813_v17  ;;  %v7030_v30 = vmul.f32 %v9675_v63, %v9669_v2 }
 0xe7d   : > { %v6624_v12 = vpop.f32.mrf.mxu3  ;;  %v6693_v42 = vpop.f32.mrf.mxu1  ;;  %9678 = vrcp.f32 %v6959_v35 }
 0xe7e   : > { %v6865_v38 = vand.u32 2147483647, %v13207_v22  ;;  %v6694_v60 = vadd.f32 %v6693_v42, %v6624_v12  ;;  %v7054_v52 = vsel %vm7006_vm6, %v9675_v63, %v7030_v30  ;;  %vm7009_vm0 = vcmp.ge.f32.partialorder %v13207_v22, 0.0 }
 0xe7f   : > { %v7078_v15 = vmul.f32 %v7054_v52, %v13176_v45 }
 0xe80   : > { %v6889_v43 = vsub.f32 0.0, %v6865_v38  ;;  %v6765_v24 = vadd.f32 %v6741_v57, %v6694_v60 }
 0xe81   : > { %v7115_v2 = vpack.c.bf16 %v7078_v15, %v7077_v36  ;;  %v14663_v36 = vld [vmem:[#allocation87_spill] sm:$0xff] }
 0xe82   : > { %v9677_v41 = vpop.eup %9676  ;;  %v6921_v39 = vmul.f32 1.442695, %v6889_v43  ;;  %v6814_v31 = vadd.f32 %v6790_v56, %v6765_v24  ;;  %v6743_v15 = vmul.f32 %v13099_v48, %v14663_v36  ;;  %v14664_v24 = vld [vmem:[#allocation73_spill] sm:$0xff] }
 0xe83   : > { %7195 = vmatmul.bf16.gmra.mxu2 %v7115_v2  ;;  %v6960_v3 = vadd.f32 1.0, %v9677_v41  ;;  %v9679_v40 = vpop.eup %9678  ;;  %v6792_v2 = vmul.f32 %v13101_v55, %v14664_v24  ;;  %v14667_v24 = vld [vmem:[#allocation91_spill] sm:$0xff] }
 0xe84   : > { %9680 = vpow2.f32 %v6921_v39  ;;  %v13218_v23 = vadd.f32 %v13113_v46, %v6814_v31  ;;  %v7031_v9 = vmul.f32 %v9679_v40, %v9673_v49 }
 0xe85   : > { %v6627_v21 = vpop.f32.mrf.mxu3  ;;  %v6696_v28 = vpop.f32.mrf.mxu1  ;;  %9682 = vrcp.f32 %v6960_v3 }
 0xe86   : > { %v6866_v45 = vand.u32 2147483647, %v13218_v23  ;;  %v6697_v54 = vadd.f32 %v6696_v28, %v6627_v21  ;;  %v7055_v38 = vsel %vm7007_vm1, %v9679_v40, %v7031_v9  ;;  %vm7010_vm13 = vcmp.ge.f32.partialorder %v13218_v23, 0.0 }
 0xe87   : > { %v7079_v56 = vmul.f32 %v7055_v38, %v13187_v25 }
 0xe88   : > { %v6890_v51 = vsub.f32 0.0, %v6866_v45  ;;  %v6766_v16 = vadd.f32 %v6742_v11, %v6697_v54 }
 0xe8a   : > { %v9681_v17 = vpop.eup %9680  ;;  %v6923_v63 = vmul.f32 1.442695, %v6890_v51  ;;  %v6815_v35 = vadd.f32 %v6791_v4, %v6766_v16  ;;  %v14665_v4 = vld [vmem:[#allocation90_spill] sm:$0xff]  ;;  %v14666_v16 = vld [vmem:[#allocation81_spill] sm:$0xff] }
 0xe8b   : > { %v9683_v30 = vpop.eup %9682  ;;  %v6961_v26 = vadd.f32 1.0, %v9681_v17  ;;  %v6744_v51 = vmul.f32 %v13099_v48, %v14665_v4  ;;  %v6793_v9 = vmul.f32 %v13101_v55, %v14666_v16 }
 0xe8c   : > { %9684 = vpow2.f32 %v6923_v63  ;;  %v13227_v12 = vadd.f32 %v13113_v46, %v6815_v35  ;;  %v7032_v42 = vmul.f32 %v9683_v30, %v9677_v41 }
 0xe8d   : > { %v6629_v60 = vpop.f32.mrf.mxu3  ;;  %v6698_v57 = vpop.f32.mrf.mxu1  ;;  %9686 = vrcp.f32 %v6961_v26 }
 0xe8e   : > { %v6867_v52 = vand.u32 2147483647, %v13227_v12  ;;  %v6699_v49 = vadd.f32 %v6698_v57, %v6629_v60  ;;  %v7056_v10 = vsel %vm7008_vm4, %v9683_v30, %v7032_v42  ;;  %vm7011_vm14 = vcmp.ge.f32.partialorder %v13227_v12, 0.0 }
 0xe8f   : > { %v7080_v43 = vmul.f32 %v7056_v10, %v13198_v20 }
 0xe90   : > { %v6891_v41 = vsub.f32 0.0, %v6867_v52  ;;  %v6767_v39 = vadd.f32 %v6743_v15, %v6699_v49 }
 0xe91   : > { %v7116_v31 = vpack.c.bf16 %v7080_v43, %v7079_v56 }
 0xe92   : > { %v9685_v3 = vpop.eup %9684  ;;  %v6925_v40 = vmul.f32 1.442695, %v6891_v41  ;;  %v6816_v21 = vadd.f32 %v6792_v2, %v6767_v39  ;;  %v6745_v2 = vmul.f32 %v13099_v48, %v14667_v24 }
 0xe93   : > { %7200 = vmatmul.bf16.gmra.mxu2 %v7116_v31  ;;  %v6962_v28 = vadd.f32 1.0, %v9685_v3  ;;  %v9687_v54 = vpop.eup %9686 }
 0xe94   : > { %9688 = vpow2.f32 %v6925_v40  ;;  %v13238_v45 = vadd.f32 %v13113_v46, %v6816_v21  ;;  %v7033_v30 = vmul.f32 %v9687_v54, %v9681_v17  ;;  %v14668_v40 = vld [vmem:[#allocation97_spill] sm:$0xff] }
 0xe95   : > { %v6632_v25 = vpop.f32.mrf.mxu3  ;;  %v6701_v11 = vpop.f32.mrf.mxu1  ;;  %9690 = vrcp.f32 %v6962_v28 }
 0xe96   : > { %v6868_v20 = vand.u32 2147483647, %v13238_v45  ;;  %v6702_v1 = vadd.f32 %v6701_v11, %v6632_v25  ;;  %v7057_v15 = vsel %vm7009_vm0, %v9687_v54, %v7033_v30  ;;  %vm7012_vm9 = vcmp.ge.f32.partialorder %v13238_v45, 0.0 }
 0xe97   : > { %v7081_v39 = vmul.f32 %v7057_v15, %v13207_v22 }
 0xe98   : > { %v6892_v63 = vsub.f32 0.0, %v6868_v20  ;;  %v6768_v35 = vadd.f32 %v6744_v51, %v6702_v1 }
 0xe9a   : > { %v9689_v26 = vpop.eup %9688  ;;  %v6927_v42 = vmul.f32 1.442695, %v6892_v63  ;;  %v6817_v38 = vadd.f32 %v6793_v9, %v6768_v35  ;;  %v14669_v35 = vld [vmem:[#allocation94_spill] sm:$0xff] }
 0xe9b   : > { %v9691_v60 = vpop.eup %9690  ;;  %v6963_v57 = vadd.f32 1.0, %v9689_v26  ;;  %v6746_v30 = vmul.f32 %v13099_v48, %v14669_v35 }
 0xe9c   : > { %9692 = vpow2.f32 %v6927_v42  ;;  %v13247_v52 = vadd.f32 %v13113_v46, %v6817_v38  ;;  %v7034_v49 = vmul.f32 %v9691_v60, %v9685_v3  ;;  %v6794_v3 = vmul.f32 %v13101_v55, %v14668_v40  ;;  %v14670_v42 = vld [vmem:[#allocation99_spill] sm:$0xff] }
 0xe9d   : > { %v6634_v10 = vpop.f32.mrf.mxu3  ;;  %v6703_v56 = vpop.f32.mrf.mxu1  ;;  %9694 = vrcp.f32 %v6963_v57  ;;  %v6795_v38 = vmul.f32 %v13101_v55, %v14670_v42 }
 0xe9e   : > { %v6869_v43 = vand.u32 2147483647, %v13247_v52  ;;  %v6704_v17 = vadd.f32 %v6703_v56, %v6634_v10  ;;  %v7058_v41 = vsel %vm7010_vm13, %v9691_v60, %v7034_v49  ;;  %vm7013_vm12 = vcmp.ge.f32.partialorder %v13247_v52, 0.0 }
 0xe9f   : > { %v7082_v31 = vmul.f32 %v7058_v41, %v13218_v23 }
 0xea0   : > { %v6893_v21 = vsub.f32 0.0, %v6869_v43  ;;  %v6769_v28 = vadd.f32 %v6745_v2, %v6704_v17 }
 0xea1   : > { %v7117_v54 = vpack.c.bf16 %v7082_v31, %v7081_v39 }
 0xea2   : > { %v9693_v25 = vpop.eup %9692  ;;  %v6929_v11 = vmul.f32 1.442695, %v6893_v21  ;;  %v6818_v20 = vadd.f32 %v6794_v3, %v6769_v28  ;;  %v14671_v21 = vld [vmem:[#allocation93_spill] sm:$0xff] }
 0xea3   : > { %7205 = vmatmul.bf16.gmra.mxu2 %v7117_v54  ;;  %v6964_v1 = vadd.f32 1.0, %v9693_v25  ;;  %v9695_v16 = vpop.eup %9694  ;;  %v6747_v28 = vmul.f32 %v13099_v48, %v14671_v21 }
 0xea4   : > { %9696 = vpow2.f32 %v6929_v11  ;;  %v13258_v51 = vadd.f32 %v13113_v46, %v6818_v20  ;;  %v7035_v49 = vmul.f32 %v9695_v16, %v9689_v26 }
 0xea5   : > { %v6637_v22 = vpop.f32.mrf.mxu3  ;;  %v6706_v9 = vpop.f32.mrf.mxu1  ;;  %9698 = vrcp.f32 %v6964_v1  ;;  %v14672_v1 = vld [vmem:[#allocation101_spill] sm:$0xff] }
 0xea6   : > { %v6870_v23 = vand.u32 2147483647, %v13258_v51  ;;  %v6707_v63 = vadd.f32 %v6706_v9, %v6637_v22  ;;  %v7059_v39 = vsel %vm7011_vm14, %v9695_v16, %v7035_v49  ;;  %vm7014_vm2 = vcmp.ge.f32.partialorder %v13258_v51, 0.0 }
 0xea7   : > { %v7083_v11 = vmul.f32 %v7059_v39, %v13227_v12 }
 0xea8   : > { %v6894_v60 = vsub.f32 0.0, %v6870_v23  ;;  %v6770_v57 = vadd.f32 %v6746_v30, %v6707_v63 }
 0xeaa   : > { %v9697_v15 = vpop.eup %9696  ;;  %v6931_v10 = vmul.f32 1.442695, %v6894_v60  ;;  %v6819_v56 = vadd.f32 %v6795_v38, %v6770_v57 }
 0xeab   : > { %v9699_v43 = vpop.eup %9698  ;;  %v6965_v17 = vadd.f32 1.0, %v9697_v15 }
 0xeac   : > { %9700 = vpow2.f32 %v6931_v10  ;;  %v13267_v2 = vadd.f32 %v13113_v46, %v6819_v56  ;;  %v7036_v41 = vmul.f32 %v9699_v43, %v9693_v25  ;;  %v6796_v25 = vmul.f32 %v13101_v55, %v14672_v1  ;;  %v14673_v10 = vld [vmem:[#allocation98_spill] sm:$0xff] }
 0xead   : > { %v6639_v31 = vpop.f32.mrf.mxu3  ;;  %v6708_v40 = vpop.f32.mrf.mxu1  ;;  %9702 = vrcp.f32 %v6965_v17  ;;  %v6748_v56 = vmul.f32 %v13099_v48, %v14673_v10 }
 0xeae   : > { %v6871_v3 = vand.u32 2147483647, %v13267_v2  ;;  %v6709_v26 = vadd.f32 %v6708_v40, %v6639_v31  ;;  %v7060_v54 = vsel %vm7012_vm9, %v9699_v43, %v7036_v41  ;;  %v14674_v43 = vld [vmem:[#allocation100_spill] sm:$0xff]  ;;  %vm7015_vm10 = vcmp.ge.f32.partialorder %v13267_v2, 0.0 }
 0xeaf   : > { %v7084_v20 = vmul.f32 %v7060_v54, %v13238_v45  ;;  %v6797_v17 = vmul.f32 %v13101_v55, %v14674_v43 }
 0xeb0   : > { %v6895_v16 = vsub.f32 0.0, %v6871_v3  ;;  %v6771_v22 = vadd.f32 %v6747_v28, %v6709_v26 }
 0xeb1   : > { %v7118_v9 = vpack.c.bf16 %v7084_v20, %v7083_v11 }
 0xeb2   : > { %v9701_v23 = vpop.eup %9700  ;;  %v6933_v63 = vmul.f32 1.442695, %v6895_v16  ;;  %v6820_v30 = vadd.f32 %v6796_v25, %v6771_v22 }
 0xeb3   : > { %7210 = vmatmul.bf16.gmra.mxu2 %v7118_v9  ;;  %v6966_v42 = vadd.f32 1.0, %v9701_v23  ;;  %v9703_v60 = vpop.eup %9702  ;;  %v14675_v9 = vld [vmem:[#allocation95_spill] sm:$0xff] }
 0xeb4   : > { %9704 = vpow2.f32 %v6933_v63  ;;  %v13278_v38 = vadd.f32 %v13113_v46, %v6820_v30  ;;  %v7037_v31 = vmul.f32 %v9703_v60, %v9697_v15  ;;  %v6749_v63 = vmul.f32 %v13099_v48, %v14675_v9 }
 0xeb5   : > { %v6642_v12 = vpop.f32.mrf.mxu3  ;;  %v6711_v57 = vpop.f32.mrf.mxu1  ;;  %9706 = vrcp.f32 %v6966_v42 }
 0xeb6   : > { %v6872_v45 = vand.u32 2147483647, %v13278_v38  ;;  %v6712_v49 = vadd.f32 %v6711_v57, %v6642_v12  ;;  %v7061_v1 = vsel %vm7013_vm12, %v9703_v60, %v7037_v31  ;;  %v14676_v57 = vld [vmem:[#allocation102_spill] sm:$0xff]  ;;  %vm7016_vm7 = vcmp.ge.f32.partialorder %v13278_v38, 0.0 }
 0xeb7   : > { %v7085_v42 = vmul.f32 %v7061_v1, %v13247_v52 }
 0xeb8   : > { %v6896_v41 = vsub.f32 0.0, %v6872_v45  ;;  %v6772_v39 = vadd.f32 %v6748_v56, %v6712_v49 }
 0xeba   : > { %v9705_v40 = vpop.eup %9704  ;;  %v6935_v3 = vmul.f32 1.442695, %v6896_v41  ;;  %v6821_v26 = vadd.f32 %v6797_v17, %v6772_v39 }
 0xebb   : > { %v9707_v28 = vpop.eup %9706  ;;  %v6967_v54 = vadd.f32 1.0, %v9705_v40 }
 0xebc   : > { %9708 = vpow2.f32 %v6935_v3  ;;  %v13287_v11 = vadd.f32 %v13113_v46, %v6821_v26  ;;  %v7038_v20 = vmul.f32 %v9707_v28, %v9701_v23  ;;  %v6798_v23 = vmul.f32 %v13101_v55, %v14676_v57 }
 0xebd   : > { %v6644_v25 = vpop.f32.mrf.mxu3  ;;  %v6713_v16 = vpop.f32.mrf.mxu1  ;;  %9710 = vrcp.f32 %v6967_v54 }
 0xebe   : > { %v6873_v22 = vand.u32 2147483647, %v13287_v11  ;;  %v6714_v15 = vadd.f32 %v6713_v16, %v6644_v25  ;;  %v7062_v30 = vsel %vm7014_vm2, %v9707_v28, %v7038_v20  ;;  %v14677_v28 = vld [vmem:[#allocation104_spill] sm:$0xff]  ;;  %v14678_v20 = vld [vmem:[#allocation103_spill] sm:$0xff]  ;;  %vm7017_vm5 = vcmp.ge.f32.partialorder %v13287_v11, 0.0 }
 0xebf   : > { %v7086_v12 = vmul.f32 %v7062_v30, %v13258_v51  ;;  %v6750_v54 = vmul.f32 %v13099_v48, %v14677_v28  ;;  %v6799_v1 = vmul.f32 %v13101_v55, %v14678_v20 }
 0xec0   : > { %v6897_v60 = vsub.f32 0.0, %v6873_v22  ;;  %v6773_v45 = vadd.f32 %v6749_v63, %v6714_v15 }
 0xec1   : > { %v7119_v49 = vpack.c.bf16 %v7086_v12, %v7085_v42 }
 0xec2   : > { %v9709_v56 = vpop.eup %9708  ;;  %v6937_v43 = vmul.f32 1.442695, %v6897_v60  ;;  %v6822_v17 = vadd.f32 %v6798_v23, %v6773_v45 }
 0xec3   : > { %7215 = vmatmul.bf16.gmra.mxu2 %v7119_v49  ;;  %v6968_v41 = vadd.f32 1.0, %v9709_v56  ;;  %v9711_v31 = vpop.eup %9710 }
 0xec4   : > { %9712 = vpow2.f32 %v6937_v43  ;;  %v13298_v39 = vadd.f32 %v13113_v46, %v6822_v17  ;;  %v7039_v22 = vmul.f32 %v9711_v31, %v9705_v40  ;;  %v14679_v17 = vld [vmem:[#allocation106_spill] sm:$0xff] }
 0xec5   : > { %v6647_v52 = vpop.f32.mrf.mxu3  ;;  %v6716_v3 = vpop.f32.mrf.mxu1  ;;  %9714 = vrcp.f32 %v6968_v41  ;;  %v6751_v41 = vmul.f32 %v13099_v48, %v14679_v17 }
 0xec6   : > { %v6874_v51 = vand.u32 2147483647, %v13298_v39  ;;  %v6717_v26 = vadd.f32 %v6716_v3, %v6647_v52  ;;  %v7063_v60 = vsel %vm7015_vm10, %v9711_v31, %v7039_v22  ;;  %vm7018_vm11 = vcmp.ge.f32.partialorder %v13298_v39, 0.0 }
 0xec7   : > { %v7087_v3 = vmul.f32 %v7063_v60, %v13267_v2 }
 0xec8   : > { %v6898_v25 = vsub.f32 0.0, %v6874_v51  ;;  %v6774_v16 = vadd.f32 %v6750_v54, %v6717_v26  ;;  %v14680_v26 = vld [vmem:[#allocation105_spill] sm:$0xff] }
 0xeca   : > { %v9713_v15 = vpop.eup %9712  ;;  %v6939_v63 = vmul.f32 1.442695, %v6898_v25  ;;  %v6823_v30 = vadd.f32 %v6799_v1, %v6774_v16 }
 0xecb   : > { %v9715_v42 = vpop.eup %9714  ;;  %v6969_v12 = vadd.f32 1.0, %v9713_v15 }
 0xecc   : > { %9716 = vpow2.f32 %v6939_v63  ;;  %v13307_v57 = vadd.f32 %v13113_v46, %v6823_v30  ;;  %v7040_v23 = vmul.f32 %v9715_v42, %v9709_v56  ;;  %v6800_v56 = vmul.f32 %v13101_v55, %v14680_v26 }
 0xecd   : > { %v6649_v45 = vpop.f32.mrf.mxu3  ;;  %v6718_v49 = vpop.f32.mrf.mxu1  ;;  %9718 = vrcp.f32 %v6969_v12 }
 0xece   : > { %v6875_v43 = vand.u32 2147483647, %v13307_v57  ;;  %v6719_v40 = vadd.f32 %v6718_v49, %v6649_v45  ;;  %v7064_v52 = vsel %vm7016_vm7, %v9715_v42, %v7040_v23  ;;  %v14681_v23 = vld [vmem:[#allocation108_spill] sm:$0xff]  ;;  %v14682_v45 = vld [vmem:[#allocation110_spill] sm:$0xff]  ;;  %vm7019_vm3 = vcmp.ge.f32.partialorder %v13307_v57, 0.0 }
 0xecf   : > { %v7088_v51 = vmul.f32 %v7064_v52, %v13278_v38  ;;  %v6752_v60 = vmul.f32 %v13099_v48, %v14681_v23  ;;  %v6801_v49 = vmul.f32 %v13101_v55, %v14682_v45  ;;  %v14684_v45 = vld [vmem:[#allocation111_spill] sm:$0xff] }
 0xed0   : > { %v6899_v31 = vsub.f32 0.0, %v6875_v43  ;;  %v6775_v54 = vadd.f32 %v6751_v41, %v6719_v40 }
 0xed1   : > { %v7120_v20 = vpack.c.bf16 %v7088_v51, %v7087_v3 }
 0xed2   : > { %v9717_v1 = vpop.eup %9716  ;;  %v6941_v25 = vmul.f32 1.442695, %v6899_v31  ;;  %v6824_v16 = vadd.f32 %v6800_v56, %v6775_v54 }
 0xed3   : > { %7220 = vmatmul.bf16.gmra.mxu2 %v7120_v20  ;;  %v6970_v22 = vadd.f32 1.0, %v9717_v1  ;;  %v9719_v30 = vpop.eup %9718 }
 0xed4   : > { %9720 = vpow2.f32 %v6941_v25  ;;  %v13318_v63 = vadd.f32 %v13113_v46, %v6824_v16  ;;  %v7041_v41 = vmul.f32 %v9719_v30, %v9713_v15 }
 0xed5   : > { %v6652_v2 = vpop.f32.mrf.mxu3  ;;  %v6721_v42 = vpop.f32.mrf.mxu1  ;;  %9722 = vrcp.f32 %v6970_v22 }
 0xed6   : > { %v6876_v38 = vand.u32 2147483647, %v13318_v63  ;;  %v6722_v12 = vadd.f32 %v6721_v42, %v6652_v2  ;;  %v7065_v20 = vsel %vm7017_vm5, %v9719_v30, %v7041_v41  ;;  %v14683_v2 = vld [vmem:[#allocation112_spill] sm:$0xff]  ;;  %vm7020_vm6 = vcmp.ge.f32.partialorder %v13318_v63, 0.0 }
 0xed7   : > { %v6753_v42 = vmul.f32 %v13099_v48, %v14683_v2 }
 0xed8   : > { %v6900_v43 = vsub.f32 0.0, %v6876_v38  ;;  %v6776_v40 = vadd.f32 %v6752_v60, %v6722_v12  ;;  %v7089_v12 = vmul.f32 %v7065_v20, %v13287_v11 }
 0xeda   : > { %v9721_v52 = vpop.eup %9720  ;;  %v6943_v3 = vmul.f32 1.442695, %v6900_v43  ;;  %v6825_v51 = vadd.f32 %v6801_v49, %v6776_v40 }
 0xedb   : > { %v9723_v26 = vpop.eup %9722  ;;  %v6971_v56 = vadd.f32 1.0, %v9721_v52 }
 0xedc   : > { %9724 = vpow2.f32 %v6943_v3  ;;  %v13327_v31 = vadd.f32 %v13113_v46, %v6825_v51  ;;  %v7042_v54 = vmul.f32 %v9723_v26, %v9717_v1  ;;  %v6802_v1 = vmul.f32 %v13101_v55, %v14684_v45  ;;  %v13340_v51 = vld [vmem:[%s14685_s7] ss:$0 sm:$0xff] }
 0xedd   : > { %v6654_v25 = vpop.f32.mrf.mxu3  ;;  %v6723_v16 = vpop.f32.mrf.mxu1  ;;  %9726 = vrcp.f32 %v6971_v56 }
 0xede   : > { %v6877_v22 = vand.u32 2147483647, %v13327_v31  ;;  %v6724_v15 = vadd.f32 %v6723_v16, %v6654_v25  ;;  %v7066_v38 = vsel %vm7018_vm11, %v9723_v26, %v7042_v54  ;;  %v14686_v16 = vld [vmem:[#allocation114_spill] sm:$0xff]  ;;  %vm7021_vm1 = vcmp.ge.f32.partialorder %v13327_v31, 0.0 }
 0xedf   : > { %v7090_v60 = vmul.f32 %v7066_v38, %v13298_v39  ;;  %v14687_v38 = vld [vmem:[#allocation113_spill] sm:$0xff] }
 0xee0   : > { %v6901_v30 = vsub.f32 0.0, %v6877_v22  ;;  %v6777_v49 = vadd.f32 %v6753_v42, %v6724_v15  ;;  %v6754_v22 = vmul.f32 %v13099_v48, %v14686_v16 }
 0xee1   : > { %v7121_v43 = vpack.c.bf16 %v7090_v60, %v7089_v12  ;;  %v6803_v12 = vmul.f32 %v13101_v55, %v14687_v38 }
 0xee2   : > { %v9725_v40 = vpop.eup %9724  ;;  %v6945_v41 = vmul.f32 1.442695, %v6901_v30  ;;  %v6826_v3 = vadd.f32 %v6802_v1, %v6777_v49 }
 0xee3   : > { %7225 = vmatmul.bf16.gmra.mxu2 %v7121_v43  ;;  %v6972_v26 = vadd.f32 1.0, %v9725_v40  ;;  %v9727_v39 = vpop.eup %9726 }
 0xee4   : > { %9728 = vpow2.f32 %v6945_v41  ;;  %v13343_v11 = vadd.f32 %v13113_v46, %v6826_v3  ;;  %v7043_v1 = vmul.f32 %v9727_v39, %v9721_v52  ;;  %v14688_v52 = vld [vmem:[#allocation116_spill] sm:$0xff] }
 0xee5   : > { %v6657_v56 = vpop.f32.mrf.mxu3  ;;  %v6726_v54 = vpop.f32.mrf.mxu1  ;;  %9730 = vrcp.f32 %v6972_v26 }
 0xee6   : > { %v6878_v20 = vand.u32 2147483647, %v13343_v11  ;;  %v6727_v25 = vadd.f32 %v6726_v54, %v6657_v56  ;;  %v7186_v15 = vpop.f32.mrf.mxu2  ;;  %v7067_v44 = vsel %vm7019_vm3, %v9727_v39, %v7043_v1  ;;  %v14689_v1 = vld [vmem:[#allocation115_spill] sm:$0xff]  ;;  %vm7022_vm4 = vcmp.ge.f32.partialorder %v13343_v11, 0.0 }
 0xee7   : > { %v13349_v42 = vadd.f32 %v13340_v51, %v7186_v15 }
 0xee8   : > { %v6902_v60 = vsub.f32 0.0, %v6878_v20  ;;  %v6778_v45 = vadd.f32 %v6754_v22, %v6727_v25  ;;  %v6755_v22 = vmul.f32 %v13099_v48, %v14688_v52 }
 0xee9   : > { %v7246_v30 = vand.u32 2147483647, %v13349_v42  ;;  %vm7390_vm0 = vcmp.ge.f32.partialorder %v13349_v42, 0.0 }
 0xeea   : > { %v9729_v49 = vpop.eup %9728  ;;  %v6947_v43 = vmul.f32 1.442695, %v6902_v60  ;;  %v6827_v41 = vadd.f32 %v6803_v12, %v6778_v45 }
 0xeeb   : > { %v9731_v3 = vpop.eup %9730  ;;  %v7270_v26 = vsub.f32 0.0, %v7246_v30  ;;  %v6973_v56 = vadd.f32 1.0, %v9729_v49 }
 0xeec   : > { %9732 = vpow2.f32 %v6947_v43  ;;  %v13356_v54 = vadd.f32 %v13113_v46, %v6827_v41  ;;  %v7044_v15 = vmul.f32 %v9731_v3, %v9725_v40  ;;  %v7091_v40 = vmul.f32 %v7067_v44, %v13307_v57 }
 0xeed   : > { %v7294_v38 = vmul.f32 1.442695, %v7270_v26  ;;  %v6659_v20 = vpop.f32.mrf.mxu3  ;;  %v6728_v25 = vpop.f32.mrf.mxu1  ;;  %9734 = vrcp.f32 %v6973_v56  ;;  %v6804_v41 = vmul.f32 %v13101_v55, %v14689_v1 }
 0xeee   : > { %v6879_v12 = vand.u32 2147483647, %v13356_v54  ;;  %v6729_v60 = vadd.f32 %v6728_v25, %v6659_v20  ;;  %v7188_v45 = vpop.f32.mrf.mxu2  ;;  %v7068_v30 = vsel %vm7020_vm6, %v9731_v3, %v7044_v15  ;;  %vm7023_vm14 = vcmp.ge.f32.partialorder %v13356_v54, 0.0 }
 0xeef   : > { %9736 = vpow2.f32 %v7294_v38  ;;  %v13363_v43 = vadd.f32 %v13340_v51, %v7188_v45  ;;  %v7092_v39 = vmul.f32 %v7068_v30, %v13318_v63 }
 0xef0   : > { %v6903_v48 = vsub.f32 0.0, %v6879_v12  ;;  %v6779_v26 = vadd.f32 %v6755_v22, %v6729_v60 }
 0xef1   : > { %v7247_v59 = vand.u32 2147483647, %v13363_v43  ;;  %v7122_v8 = vpack.c.bf16 %v7092_v39, %v7091_v40  ;;  %vm7391_vm13 = vcmp.ge.f32.partialorder %v13363_v43, 0.0 }
 0xef2   : > { %v9733_v20 = vpop.eup %9732  ;;  %v6949_v25 = vmul.f32 1.442695, %v6903_v48  ;;  %v6828_v3 = vadd.f32 %v6804_v41, %v6779_v26 }
 0xef3   : > { %v7271_v56 = vsub.f32 0.0, %v7247_v59  ;;  %7230 = vmatmul.bf16.gmra.mxu2 %v7122_v8  ;;  %v6974_v15 = vadd.f32 1.0, %v9733_v20  ;;  %v9735_v38 = vpop.eup %9734 }
 0xef4   : > { %9738 = vpow2.f32 %v6949_v25  ;;  %v13371_v44 = vadd.f32 %v13113_v46, %v6828_v3  ;;  %v7045_v45 = vmul.f32 %v9735_v38, %v9729_v49 }
 0xef5   : > { %v9737_v57 = vpop.eup %9736  ;;  %v7296_v63 = vmul.f32 1.442695, %v7271_v56  ;;  %9740 = vrcp.f32 %v6974_v15 }
 0xef6   : > { %v7342_v55 = vadd.f32 1.0, %v9737_v57  ;;  %v6880_v22 = vand.u32 2147483647, %v13371_v44  ;;  %v7191_v12 = vpop.f32.mrf.mxu2  ;;  %v7069_v1 = vsel %vm7021_vm1, %v9735_v38, %v7045_v45  ;;  %vm7024_vm9 = vcmp.ge.f32.partialorder %v13371_v44, 0.0 }
 0xef7   : > { %9742 = vpow2.f32 %v7296_v63  ;;  %v13375_v60 = vadd.f32 %v13340_v51, %v7191_v12  ;;  %v7093_v63 = vmul.f32 %v7069_v1, %v13327_v31 }
 0xef8   : > { %9744 = vrcp.f32 %v7342_v55  ;;  %v6904_v8 = vsub.f32 0.0, %v6880_v22 }
 0xef9   : > { %v7248_v59 = vand.u32 2147483647, %v13375_v60  ;;  %vm7392_vm12 = vcmp.ge.f32.partialorder %v13375_v60, 0.0 }
 0xefa   : > { %v9739_v30 = vpop.eup %9738  ;;  %v6951_v40 = vmul.f32 1.442695, %v6904_v8 }
 0xefb   : > { %v9741_v46 = vpop.eup %9740  ;;  %v7272_v39 = vsub.f32 0.0, %v7248_v59  ;;  %v6975_v41 = vadd.f32 1.0, %v9739_v30 }
 0xefc   : > { %9746 = vpow2.f32 %v6951_v40  ;;  %v7046_v48 = vmul.f32 %v9741_v46, %v9733_v20  ;;  %v13389_v20 = vld [vmem:[%s14690_s29] ss:$0 sm:$0xff] }
 0xefd   : > { %v9743_v26 = vpop.eup %9742  ;;  %v7298_v25 = vmul.f32 1.442695, %v7272_v39  ;;  %9748 = vrcp.f32 %v6975_v41 }
 0xefe   : > { %v9745_v3 = vpop.eup %9744  ;;  %v7343_v49 = vadd.f32 1.0, %v9743_v26  ;;  %v7193_v56 = vpop.f32.mrf.mxu2  ;;  %v7070_v15 = vsel %vm7022_vm4, %v9741_v46, %v7046_v48 }
 0xeff   : > { %v7414_v55 = vmul.f32 %v9745_v3, %v9737_v57  ;;  %9750 = vpow2.f32 %v7298_v25  ;;  %v13382_v22 = vadd.f32 %v13340_v51, %v7193_v56  ;;  %v7094_v38 = vmul.f32 %v7070_v15, %v13343_v11 }
 0xf00   : > { %9752 = vrcp.f32 %v7343_v49 }
 0xf01   : > { %v7438_v12 = vsel %vm7390_vm0, %v9745_v3, %v7414_v55  ;;  %v7249_v45 = vand.u32 2147483647, %v13382_v22  ;;  %v7123_v31 = vpack.c.bf16 %v7094_v38, %v7093_v63  ;;  %vm7393_vm2 = vcmp.ge.f32.partialorder %v13382_v22, 0.0 }
 0xf02   : > { %v9747_v8 = vpop.eup %9746  ;;  %v7462_v57 = vmul.f32 %v7438_v12, %v13349_v42 }
 0xf03   : > { %v7273_v59 = vsub.f32 0.0, %v7249_v45  ;;  %7235 = vmatmul.bf16.gmra.mxu2 %v7123_v31  ;;  %v6976_v40 = vadd.f32 1.0, %v9747_v8  ;;  %v9749_v46 = vpop.eup %9748 }
 0xf04   : > { %v7490_v11 = vmul.f32 %v13389_v20, %v7462_v57  ;;  %v7047_v56 = vmul.f32 %v9749_v46, %v9739_v30 }
 0xf05   : > { %v9751_v39 = vpop.eup %9750  ;;  %v7300_v1 = vmul.f32 1.442695, %v7273_v59  ;;  %9754 = vrcp.f32 %v6976_v40 }
 0xf06   : > { %v9753_v41 = vpop.eup %9752  ;;  %v7344_v48 = vadd.f32 1.0, %v9751_v39  ;;  %v7196_v25 = vpop.f32.mrf.mxu2  ;;  %7514 = vadd.xlane.f32.xlu2 %v7490_v11  ;;  %v7071_v12 = vsel %vm7023_vm14, %v9749_v46, %v7047_v56 }
 0xf07   : > { %v7415_v3 = vmul.f32 %v9753_v41, %v9743_v26  ;;  %9756 = vpow2.f32 %v7300_v1  ;;  %v13395_v49 = vadd.f32 %v13340_v51, %v7196_v25  ;;  %v7095_v1 = vmul.f32 %v7071_v12, %v13356_v54 }
 0xf08   : > { %9758 = vrcp.f32 %v7344_v48 }
 0xf09   : > { %v7439_v42 = vsel %vm7391_vm13, %v9753_v41, %v7415_v3  ;;  %v7250_v15 = vand.u32 2147483647, %v13395_v49  ;;  %vm7394_vm10 = vcmp.ge.f32.partialorder %v13395_v49, 0.0 }
 0xf0a   : > { %v7463_v63 = vmul.f32 %v7439_v42, %v13363_v43 }
 0xf0b   : > { %v9755_v55 = vpop.eup %9754  ;;  %v7274_v38 = vsub.f32 0.0, %v7250_v15 }
 0xf0c   : > { %v7491_v26 = vmul.f32 %v13389_v20, %v7463_v63  ;;  %v7048_v45 = vmul.f32 %v9755_v55, %v9747_v8 }
 0xf0d   : > { %v9757_v31 = vpop.eup %9756  ;;  %v7302_v57 = vmul.f32 1.442695, %v7274_v38 }
 0xf0e   : > { %v9759_v30 = vpop.eup %9758  ;;  %v7345_v59 = vadd.f32 1.0, %v9757_v31  ;;  %v7198_v40 = vpop.f32.mrf.mxu2  ;;  %7516 = vadd.xlane.f32.xlu0 %v7491_v26  ;;  %v7072_v11 = vsel %vm7024_vm9, %v9755_v55, %v7048_v45 }
 0xf0f   : > { %v7416_v43 = vmul.f32 %v9759_v30, %v9751_v39  ;;  %9760 = vpow2.f32 %v7302_v57  ;;  %v7199_v41 = vadd.f32 %v13340_v51, %v7198_v40  ;;  %v7096_v46 = vmul.f32 %v7072_v11, %v13371_v44 }
 0xf10   : > { %9762 = vrcp.f32 %v7345_v59 }
 0xf11   : > { %v7440_v8 = vsel %vm7392_vm12, %v9759_v30, %v7416_v43  ;;  %v7251_v48 = vand.u32 2147483647, %v7199_v41  ;;  %v7124_v25 = vpack.c.bf16 %v7096_v46, %v7095_v1  ;;  %vm7395_vm7 = vcmp.ge.f32.partialorder %v7199_v41, 0.0 }
 0xf12   : > { %v7464_v3 = vmul.f32 %v7440_v8, %v13375_v60 }
 0xf13   : > { %v7275_v56 = vsub.f32 0.0, %v7251_v48  ;;  %7240 = vmatmul.bf16.gmra.mxu2 %v7124_v25 }
 0xf14   : > { %v7492_v42 = vmul.f32 %v13389_v20, %v7464_v3 }
 0xf15   : > { %v9761_v15 = vpop.eup %9760  ;;  %v7304_v54 = vmul.f32 1.442695, %v7275_v56 }
 0xf16   : > { %v9763_v39 = vpop.eup %9762  ;;  %v7346_v63 = vadd.f32 1.0, %v9761_v15  ;;  %v7201_v55 = vpop.f32.mrf.mxu2  ;;  %7518 = vadd.xlane.f32.xlu0 %v7492_v42 }
 0xf17   : > { %v7417_v38 = vmul.f32 %v9763_v39, %v9757_v31  ;;  %9764 = vpow2.f32 %v7304_v54  ;;  %v7202_v44 = vadd.f32 %v13340_v51, %v7201_v55 }
 0xf18   : > { %9766 = vrcp.f32 %v7346_v63 }
 0xf19   : > { %v7441_v12 = vsel %vm7393_vm2, %v9763_v39, %v7417_v38  ;;  %v7252_v26 = vand.u32 2147483647, %v7202_v44  ;;  %vm7396_vm5 = vcmp.ge.f32.partialorder %v7202_v44, 0.0 }
 0xf1a   : > { %v7465_v60 = vmul.f32 %v7441_v12, %v13382_v22 }
 0xf1b   : > { %v7276_v45 = vsub.f32 0.0, %v7252_v26 }
 0xf1c   : > { %v7493_v57 = vmul.f32 %v13389_v20, %v7465_v60 }
 0xf1d   : > { %v9765_v30 = vpop.eup %9764  ;;  %v7306_v59 = vmul.f32 1.442695, %v7276_v45 }
 0xf1e   : > { %v9767_v40 = vpop.eup %9766  ;;  %v7347_v11 = vadd.f32 1.0, %v9765_v30  ;;  %v7203_v1 = vpop.f32.mrf.mxu2  ;;  %7520 = vadd.xlane.f32.xlu1 %v7493_v57 }
 0xf1f   : > { %v7418_v31 = vmul.f32 %v9767_v40, %v9761_v15  ;;  %9768 = vpow2.f32 %v7306_v59  ;;  %v7204_v43 = vadd.f32 %v13340_v51, %v7203_v1 }
 0xf20   : > { %9770 = vrcp.f32 %v7347_v11 }
 0xf21   : > { %v7442_v46 = vsel %vm7394_vm10, %v9767_v40, %v7418_v31  ;;  %v7253_v8 = vand.u32 2147483647, %v7204_v43  ;;  %vm7397_vm11 = vcmp.ge.f32.partialorder %v7204_v43, 0.0 }
 0xf22   : > { %v7466_v22 = vmul.f32 %v7442_v46, %v13395_v49 }
 0xf23   : > { %v7277_v48 = vsub.f32 0.0, %v7253_v8 }
 0xf24   : > { %v7494_v25 = vmul.f32 %v13389_v20, %v7466_v22 }
 0xf25   : > { %v9769_v3 = vpop.eup %9768  ;;  %v7308_v56 = vmul.f32 1.442695, %v7277_v48 }
 0xf26   : > { %v9771_v42 = vpop.eup %9770  ;;  %v7348_v54 = vadd.f32 1.0, %v9769_v3  ;;  %v7206_v39 = vpop.f32.mrf.mxu2  ;;  %7522 = vadd.xlane.f32.xlu1 %v7494_v25 }
 0xf27   : > { %v7419_v15 = vmul.f32 %v9771_v42, %v9765_v30  ;;  %9772 = vpow2.f32 %v7308_v56  ;;  %v7207_v63 = vadd.f32 %v13340_v51, %v7206_v39 }
 0xf28   : > { %9774 = vrcp.f32 %v7348_v54 }
 0xf29   : > { %v7443_v55 = vsel %vm7395_vm7, %v9771_v42, %v7419_v15  ;;  %v7254_v38 = vand.u32 2147483647, %v7207_v63  ;;  %vm7398_vm3 = vcmp.ge.f32.partialorder %v7207_v63, 0.0 }
 0xf2a   : > { %v7467_v12 = vmul.f32 %v7443_v55, %v7199_v41 }
 0xf2b   : > { %v7278_v26 = vsub.f32 0.0, %v7254_v38 }
 0xf2c   : > { %v7495_v49 = vmul.f32 %v13389_v20, %v7467_v12 }
 0xf2d   : > { %v9773_v60 = vpop.eup %9772  ;;  %v7310_v45 = vmul.f32 1.442695, %v7278_v26 }
 0xf2e   : > { %v9775_v57 = vpop.eup %9774  ;;  %v7349_v59 = vadd.f32 1.0, %v9773_v60  ;;  %v7208_v40 = vpop.f32.mrf.mxu2  ;;  %7524 = vadd.xlane.f32.xlu2 %v7495_v49 }
 0xf2f   : > { %v7420_v11 = vmul.f32 %v9775_v57, %v9769_v3  ;;  %9776 = vpow2.f32 %v7310_v45  ;;  %v7209_v30 = vadd.f32 %v13340_v51, %v7208_v40 }
 0xf30   : > { %9778 = vrcp.f32 %v7349_v59 }
 0xf31   : > { %v7444_v1 = vsel %vm7396_vm5, %v9775_v57, %v7420_v11  ;;  %v7255_v31 = vand.u32 2147483647, %v7209_v30  ;;  %vm7399_vm6 = vcmp.ge.f32.partialorder %v7209_v30, 0.0 }
 0xf32   : > { %v7468_v46 = vmul.f32 %v7444_v1, %v7202_v44 }
 0xf33   : > { %v7279_v8 = vsub.f32 0.0, %v7255_v31 }
 0xf34   : > { %v7496_v41 = vmul.f32 %v13389_v20, %v7468_v46 }
 0xf35   : > { %v9777_v22 = vpop.eup %9776  ;;  %v7312_v48 = vmul.f32 1.442695, %v7279_v8 }
 0xf36   : > { %v9779_v25 = vpop.eup %9778  ;;  %v7350_v56 = vadd.f32 1.0, %v9777_v22  ;;  %v7211_v42 = vpop.f32.mrf.mxu2  ;;  %7526 = vadd.xlane.f32.xlu0 %v7496_v41 }
 0xf37   : > { %v7421_v54 = vmul.f32 %v9779_v25, %v9773_v60  ;;  %9780 = vpow2.f32 %v7312_v48  ;;  %v7212_v3 = vadd.f32 %v13340_v51, %v7211_v42 }
 0xf38   : > { %9782 = vrcp.f32 %v7350_v56 }
 0xf39   : > { %v7445_v39 = vsel %vm7397_vm11, %v9779_v25, %v7421_v54  ;;  %v7256_v15 = vand.u32 2147483647, %v7212_v3  ;;  %vm7400_vm1 = vcmp.ge.f32.partialorder %v7212_v3, 0.0 }
 0xf3a   : > { %v7469_v55 = vmul.f32 %v7445_v39, %v7204_v43 }
 0xf3b   : > { %v7280_v38 = vsub.f32 0.0, %v7256_v15 }
 0xf3c   : > { %v7497_v44 = vmul.f32 %v13389_v20, %v7469_v55 }
 0xf3d   : > { %v9781_v12 = vpop.eup %9780  ;;  %v7314_v26 = vmul.f32 1.442695, %v7280_v38 }
 0xf3e   : > { %v9783_v49 = vpop.eup %9782  ;;  %v7351_v45 = vadd.f32 1.0, %v9781_v12  ;;  %v7213_v57 = vpop.f32.mrf.mxu2  ;;  %7528 = vadd.xlane.f32.xlu0 %v7497_v44 }
 0xf3f   : > { %v7422_v59 = vmul.f32 %v9783_v49, %v9777_v22  ;;  %9784 = vpow2.f32 %v7314_v26  ;;  %v7214_v60 = vadd.f32 %v13340_v51, %v7213_v57 }
 0xf40   : > { %9786 = vrcp.f32 %v7351_v45 }
 0xf41   : > { %v7446_v40 = vsel %vm7398_vm3, %v9783_v49, %v7422_v59  ;;  %v7257_v11 = vand.u32 2147483647, %v7214_v60  ;;  %vm7401_vm4 = vcmp.ge.f32.partialorder %v7214_v60, 0.0 }
 0xf42   : > { %v7470_v1 = vmul.f32 %v7446_v40, %v7207_v63 }
 0xf43   : > { %v7281_v31 = vsub.f32 0.0, %v7257_v11 }
 0xf44   : > { %v7498_v43 = vmul.f32 %v13389_v20, %v7470_v1 }
 0xf45   : > { %v9785_v46 = vpop.eup %9784  ;;  %v7316_v8 = vmul.f32 1.442695, %v7281_v31 }
 0xf46   : > { %v9787_v41 = vpop.eup %9786  ;;  %v7352_v48 = vadd.f32 1.0, %v9785_v46  ;;  %v7216_v25 = vpop.f32.mrf.mxu2  ;;  %7530 = vadd.xlane.f32.xlu1 %v7498_v43 }
 0xf47   : > { %v7423_v56 = vmul.f32 %v9787_v41, %v9781_v12  ;;  %9788 = vpow2.f32 %v7316_v8  ;;  %v7217_v22 = vadd.f32 %v13340_v51, %v7216_v25 }
 0xf48   : > { %9790 = vrcp.f32 %v7352_v48 }
 0xf49   : > { %v7447_v42 = vsel %vm7399_vm6, %v9787_v41, %v7423_v56  ;;  %v7258_v54 = vand.u32 2147483647, %v7217_v22  ;;  %vm7402_vm0 = vcmp.ge.f32.partialorder %v7217_v22, 0.0 }
 0xf4a   : > { %v7471_v39 = vmul.f32 %v7447_v42, %v7209_v30 }
 0xf4b   : > { %v7282_v15 = vsub.f32 0.0, %v7258_v54 }
 0xf4c   : > { %v7499_v63 = vmul.f32 %v13389_v20, %v7471_v39 }
 0xf4d   : > { %v9789_v55 = vpop.eup %9788  ;;  %v7318_v38 = vmul.f32 1.442695, %v7282_v15 }
 0xf4e   : > { %v9791_v44 = vpop.eup %9790  ;;  %v7353_v26 = vadd.f32 1.0, %v9789_v55  ;;  %v7218_v49 = vpop.f32.mrf.mxu2  ;;  %7532 = vadd.xlane.f32.xlu0 %v7499_v63 }
 0xf4f   : > { %v7424_v45 = vmul.f32 %v9791_v44, %v9785_v46  ;;  %9792 = vpow2.f32 %v7318_v38  ;;  %v7219_v12 = vadd.f32 %v13340_v51, %v7218_v49 }
 0xf50   : > { %9794 = vrcp.f32 %v7353_v26 }
 0xf51   : > { %v7448_v57 = vsel %vm7400_vm1, %v9791_v44, %v7424_v45  ;;  %v7259_v59 = vand.u32 2147483647, %v7219_v12  ;;  %vm7403_vm13 = vcmp.ge.f32.partialorder %v7219_v12, 0.0 }
 0xf52   : > { %v7472_v40 = vmul.f32 %v7448_v57, %v7212_v3 }
 0xf53   : > { %v7283_v11 = vsub.f32 0.0, %v7259_v59 }
 0xf54   : > { %v7500_v30 = vmul.f32 %v13389_v20, %v7472_v40 }
 0xf55   : > { %v9793_v1 = vpop.eup %9792  ;;  %v7320_v31 = vmul.f32 1.442695, %v7283_v11 }
 0xf56   : > { %v9795_v43 = vpop.eup %9794  ;;  %v7354_v8 = vadd.f32 1.0, %v9793_v1  ;;  %v7221_v41 = vpop.f32.mrf.mxu2  ;;  %7534 = vadd.xlane.f32.xlu0 %v7500_v30 }
 0xf57   : > { %v7425_v48 = vmul.f32 %v9795_v43, %v9789_v55  ;;  %9796 = vpow2.f32 %v7320_v31  ;;  %v7222_v46 = vadd.f32 %v13340_v51, %v7221_v41 }
 0xf58   : > { %9798 = vrcp.f32 %v7354_v8 }
 0xf59   : > { %v7449_v25 = vsel %vm7401_vm4, %v9795_v43, %v7425_v48  ;;  %v7260_v56 = vand.u32 2147483647, %v7222_v46  ;;  %vm7404_vm14 = vcmp.ge.f32.partialorder %v7222_v46, 0.0 }
 0xf5a   : > { %v7473_v42 = vmul.f32 %v7449_v25, %v7214_v60 }
 0xf5b   : > { %v7284_v54 = vsub.f32 0.0, %v7260_v56 }
 0xf5c   : > { %v7501_v3 = vmul.f32 %v13389_v20, %v7473_v42 }
 0xf5d   : > { %v9797_v39 = vpop.eup %9796  ;;  %v7322_v15 = vmul.f32 1.442695, %v7284_v54 }
 0xf5e   : > { %v9799_v63 = vpop.eup %9798  ;;  %v7355_v38 = vadd.f32 1.0, %v9797_v39  ;;  %v7223_v44 = vpop.f32.mrf.mxu2  ;;  %7536 = vadd.xlane.f32.xlu2 %v7501_v3 }
 0xf5f   : > { %v7426_v26 = vmul.f32 %v9799_v63, %v9793_v1  ;;  %9800 = vpow2.f32 %v7322_v15  ;;  %v7224_v55 = vadd.f32 %v13340_v51, %v7223_v44  ;;  %v13438_v44 = vpop.permute.xlu0 %7696 }
 0xf60   : > { %9802 = vrcp.f32 %v7355_v38 }
 0xf61   : > { %v7450_v49 = vsel %vm7402_vm0, %v9799_v63, %v7426_v26  ;;  %v7261_v45 = vand.u32 2147483647, %v7224_v55  ;;  %vm7405_vm9 = vcmp.ge.f32.partialorder %v7224_v55, 0.0 }
 0xf62   : > { %v7474_v57 = vmul.f32 %v7450_v49, %v7217_v22 }
 0xf63   : > { %v7285_v59 = vsub.f32 0.0, %v7261_v45  ;;  %v13441_v45 = vpop.permute.xlu1 %7711 }
 0xf64   : > { %v7502_v60 = vmul.f32 %v13389_v20, %v7474_v57 }
 0xf65   : > { %v9801_v40 = vpop.eup %9800  ;;  %v7324_v11 = vmul.f32 1.442695, %v7285_v59 }
 0xf66   : > { %v9803_v30 = vpop.eup %9802  ;;  %v7356_v31 = vadd.f32 1.0, %v9801_v40  ;;  %v7226_v43 = vpop.f32.mrf.mxu2  ;;  %7538 = vadd.xlane.f32.xlu2 %v7502_v60 }
 0xf67   : > { %v7427_v8 = vmul.f32 %v9803_v30, %v9797_v39  ;;  %9804 = vpow2.f32 %v7324_v11  ;;  %v13435_v63 = vadd.f32 %v13340_v51, %v7226_v43 }
 0xf68   : > { %9806 = vrcp.f32 %v7356_v31 }
 0xf69   : > { %v7451_v1 = vsel %vm7403_vm13, %v9803_v30, %v7427_v8  ;;  %v7262_v49 = vand.u32 2147483647, %v13435_v63  ;;  %v10023_v30 = vld [vmem:[%s11654_s30 + $0xa0] sm:$0xff]  ;;  %v13449_v8 = vpop.permute.xlu0 %7686  ;;  %vm7406_vm12 = vcmp.ge.f32.partialorder %v13435_v63, 0.0 }
 0xf6a   : > { %v7475_v41 = vmul.f32 %v7451_v1, %v7219_v12 }
 0xf6b   : > { %v7286_v60 = vsub.f32 0.0, %v7262_v49  ;;  %v13451_v1 = vpop.permute.xlu1 %7681  ;;  %v10024_v49 = vld [vmem:[%s11654_s30 + $0x90] sm:$0xff] }
 0xf6c   : > { %v7503_v48 = vmul.f32 %v13389_v20, %v7475_v41 }
 0xf6d   : > { %v9805_v25 = vpop.eup %9804  ;;  %v7326_v43 = vmul.f32 1.442695, %v7286_v60 }
 0xf6e   : > { %v9807_v56 = vpop.eup %9806  ;;  %v7357_v22 = vadd.f32 1.0, %v9805_v25  ;;  %v7228_v42 = vpop.f32.mrf.mxu2  ;;  %7540 = vadd.xlane.f32.xlu1 %v7503_v48 }
 0xf6f   : > { %v7428_v54 = vmul.f32 %v9807_v56, %v9801_v40 }
 0xf70   : > { %9808 = vrcp.f32 %v7357_v22 }
 0xf71   : > { %v7452_v3 = vsel %vm7404_vm14, %v9807_v56, %v7428_v54  ;;  %9810 = vpow2.f32 %v7326_v43  ;;  %v13460_v54 = vpop.permute.xlu0 %7691 }
 0xf72   : > { %v7476_v15 = vmul.f32 %v7452_v3, %v7222_v46  ;;  %v13444_v46 = vadd.f32 %v13340_v51, %v7228_v42 }
 0xf74   : > { %v7504_v39 = vmul.f32 %v13389_v20, %v7476_v15  ;;  %v7263_v31 = vand.u32 2147483647, %v13444_v46  ;;  %vm7407_vm2 = vcmp.ge.f32.partialorder %v13444_v46, 0.0 }
 0xf76   : > { %v9809_v38 = vpop.eup %9808  ;;  %v7231_v12 = vpop.f32.mrf.mxu2  ;;  %7542 = vadd.xlane.f32.xlu1 %v7504_v39  ;;  %v7287_v41 = vsub.f32 0.0, %v7263_v31  ;;  %v10025_v31 = vld [vmem:[%s11654_s30 + $0xa8] sm:$0xff] }
 0xf77   : > { %v7429_v26 = vmul.f32 %v9809_v38, %v9805_v25  ;;  %v9811_v42 = vpop.eup %9810  ;;  %v13465_v39 = vpop.permute.xlu1 %7666 }
 0xf78   : > { %v7328_v25 = vmul.f32 1.442695, %v7287_v41 }
 0xf79   : > { %v7453_v57 = vsel %vm7405_vm9, %v9809_v38, %v7429_v26  ;;  %v7358_v38 = vadd.f32 1.0, %v9811_v42 }
 0xf7a   : > { %v7477_v59 = vmul.f32 %v7453_v57, %v7224_v55  ;;  %v13454_v55 = vadd.f32 %v13340_v51, %v7231_v12  ;;  %9812 = vpow2.f32 %v7328_v25 }
 0xf7b   : > { %9814 = vrcp.f32 %v7358_v38 }
 0xf7c   : > { %v7505_v40 = vmul.f32 %v13389_v20, %v7477_v59  ;;  %v7264_v56 = vand.u32 2147483647, %v13454_v55  ;;  %vm7408_vm10 = vcmp.ge.f32.partialorder %v13454_v55, 0.0 }
 0xf7e   : > { %v7233_v11 = vpop.f32.mrf.mxu2  ;;  %7544 = vadd.xlane.f32.xlu0 %v7505_v40  ;;  %7736 = vperm.xlu2 %8994, %v10023_v30   ;;  %v7288_v3 = vsub.f32 0.0, %v7264_v56  ;;  %v13471_v30 = vadd.f32 1e-08, %v14634_v0 }
 0xf7f   : > { %v13463_v15 = vadd.f32 %v13340_v51, %v7233_v11  ;;  %v13480_v38 = vpop.permute.xlu1 %7656 }
 0xf80   : > { %v7330_v57 = vmul.f32 1.442695, %v7288_v3  ;;  %v9813_v60 = vpop.eup %9812  ;;  %14691 = vst [vmem:[#allocation132_spill] sm:$0xff] %v13480_v38  ;;  %vm1638_vm5 = vcmp.eq.f32.partialorder %v13471_v30, inf  ;;  %vm1640_vm3 = vcmp.eq.f32.partialorder %v13471_v30, 0.0 }
 0xf81   : > { %v7265_v59 = vand.u32 2147483647, %v13463_v15  ;;  %v7359_v11 = vadd.f32 1.0, %v9813_v60  ;;  %v9815_v3 = vpop.eup %9814  ;;  %vm7409_vm11 = vcmp.ge.f32.partialorder %v13463_v15, 0.0 }
 0xf82   : > { %9816 = vpow2.f32 %v7330_v57  ;;  %v13484_v57 = vadd.f32 1e-08, %v14637_v32 }
 0xf83   : > { %v7289_v43 = vsub.f32 0.0, %v7265_v59  ;;  %9818 = vrsqrt.f32 %v13471_v30  ;;  %v13487_v59 = vadd.f32 1e-08, %v14640_v29 }
 0xf84   : > { %9820 = vrcp.f32 %v7359_v11  ;;  %vm1650_vm1 = vcmp.eq.f32.partialorder %v13484_v57, inf  ;;  %vm1652_vm13 = vcmp.eq.f32.partialorder %v13484_v57, 0.0 }
 0xf85   : > { %v7332_v0 = vmul.f32 1.442695, %v7289_v43  ;;  %vm1662_vm0 = vcmp.eq.f32.partialorder %v13487_v59, inf  ;;  %vm1664_vm14 = vcmp.eq.f32.partialorder %v13487_v59, 0.0 }
 0xf86   : > { %v7236_v48 = vpop.f32.mrf.mxu2 }
 0xf87   : > { %v13458_v22 = vadd.f32 %v13340_v51, %v7236_v48  ;;  %v13477_v48 = vpop.permute.xlu0 %7671  ;;  %v13505_v47 = vpop.permute.xlu1 %7661 }
 0xf89   : > { %v7266_v12 = vand.u32 2147483647, %v13458_v22  ;;  %vm7410_vm7 = vcmp.ge.f32.partialorder %v13458_v22, 0.0 }
 0xf8b   : > { %v7290_v40 = vsub.f32 0.0, %v7266_v12 }
 0xf8d   : > { %v7334_v25 = vmul.f32 1.442695, %v7290_v40 }
 0xf8e   : > { %v7238_v26 = vpop.f32.mrf.mxu2 }
 0xf8f   : > { %7726 = vperm.xlu1 %8993, %v10024_v49   ;;  %v13475_v41 = vadd.f32 %v13340_v51, %v7238_v26  ;;  %9822 = vpow2.f32 %v7334_v25  ;;  %v9817_v49 = vpop.eup %9816  ;;  %v7430_v26 = vmul.f32 %v9815_v3, %v9811_v42  ;;  %v13497_v29 = vpop.permute.xlu0 %7651 }
 0xf90   : > { %v13489_v40 = vpop.eup %9818  ;;  %9824 = vpow2.f32 %v7332_v0  ;;  %v7360_v11 = vadd.f32 1.0, %v9817_v49  ;;  %14692 = vst [vmem:[#allocation133_spill] sm:$0xff] %v13497_v29 }
 0xf91   : > { %v7267_v12 = vand.u32 2147483647, %v13475_v41  ;;  %v9821_v43 = vpop.eup %9820  ;;  %9826 = vrsqrt.f32 %v13484_v57  ;;  %v7454_v25 = vsel %vm7406_vm12, %v9815_v3, %v7430_v26  ;;  %v1632_v42 = vmul.f32 %v13489_v40, %v13471_v30 }
 0xf92   : > { %7741 = vperm.xlu0 %8992, %v10025_v31   ;;  %9828 = vrsqrt.f32 %v13487_v59  ;;  %v7478_v18 = vmul.f32 %v7454_v25, %v13435_v63  ;;  %v7431_v5 = vmul.f32 %v9821_v43, %v9813_v60  ;;  %vm7411_vm4 = vcmp.ge.f32.partialorder %v13475_v41, 0.0 }
 0xf93   : > { %v7291_v31 = vsub.f32 0.0, %v7267_v12  ;;  %9830 = vrcp.f32 %v7360_v11  ;;  %v1633_v6 = vmul.f32 %v13489_v40, %v1632_v42  ;;  %v13517_v11 = vadd.f32 1e-08, %v14646_v50 }
 0xf94   : > { %v7506_v63 = vmul.f32 %v13389_v20, %v7478_v18  ;;  %v7455_v60 = vsel %vm7407_vm2, %v9821_v43, %v7431_v5  ;;  %v13520_v42 = vadd.f32 1e-08, %v14649_v19 }
 0xf95   : > { %v9823_v27 = vpop.eup %9822  ;;  %v7479_v50 = vmul.f32 %v7455_v60, %v13444_v46  ;;  %vm1686_vm12 = vcmp.eq.f32.partialorder %v13517_v11, inf  ;;  %vm1688_vm2 = vcmp.eq.f32.partialorder %v13517_v11, 0.0 }
 0xf96   : > { %v7241_v56 = vpop.f32.mrf.mxu2  ;;  %v9825_v26 = vpop.eup %9824  ;;  %v7362_v58 = vadd.f32 1.0, %v9823_v27  ;;  %v1701_v29 = vand.u32 2147483648, %v13520_v42 }
 0xf97   : > { %v13492_v14 = vadd.f32 %v13340_v51, %v7241_v56  ;;  %v7336_v56 = vmul.f32 1.442695, %v7291_v31  ;;  %v13510_v37 = vpop.eup %9826  ;;  %v13526_v18 = vpop.permute.xlu0 %7641 }
 0xf98   : > { %v13512_v31 = vpop.eup %9828  ;;  %14693 = vst [vmem:[#allocation131_spill] sm:$0xff] %v13526_v18 }
 0xf99   : > { %v7268_v12 = vand.u32 2147483647, %v13492_v14  ;;  %9832 = vpow2.f32 %v7336_v56  ;;  %v9831_v25 = vpop.eup %9830  ;;  %v1644_v56 = vmul.f32 %v13510_v37, %v13484_v57  ;;  %vm7412_vm9 = vcmp.ge.f32.partialorder %v13492_v14, 0.0 }
 0xf9a   : > { %9834 = vrcp.f32 %v7362_v58  ;;  %v7432_v5 = vmul.f32 %v9831_v25, %v9817_v49 }
 0xf9c   : > { %v7456_v60 = vsel %vm7408_vm10, %v9831_v25, %v7432_v5  ;;  %vm1698_vm10 = vcmp.eq.f32.partialorder %v13520_v42, inf }
 0xf9e   : > { %v7243_v32 = vpop.f32.mrf.mxu2 }
 0xf9f   : > { %v13502_v0 = vadd.f32 %v13340_v51, %v7243_v32  ;;  %v7292_v51 = vsub.f32 0.0, %v7268_v12  ;;  %v7361_v32 = vadd.f32 1.0, %v9825_v26  ;;  %v13529_v58 = vpop.eup %9832 }
 0xfa0   : > { %v9835_v43 = vpop.eup %9834  ;;  %v7363_v46 = vadd.f32 1.0, %v13529_v58 }
 0xfa1   : > { %v7269_v3 = vand.u32 2147483647, %v13502_v0  ;;  %v7338_v12 = vmul.f32 1.442695, %v7292_v51  ;;  %vm7413_vm6 = vcmp.ge.f32.partialorder %v13502_v0, 0.0 }
 0xfa3   : > { %v7293_v34 = vsub.f32 0.0, %v7269_v3  ;;  %v1634_v3 = vmul.f32 0.5, %v1633_v6  ;;  %v13533_v6 = vpop.permute.xlu1 %7646 }
 0xfa4   : > { %14694 = vst [vmem:[#allocation16_spill] sm:$0xff] %v13533_v6  ;;  %v7480_v6 = vmul.f32 %v7456_v60, %v13454_v55  ;;  %v13561_v55 = vadd.f32 1e-08, %v14655_v7  ;;  %v13575_v60 = vpop.permute.xlu2 %7706 }
 0xfa5   : > { %v7340_v10 = vmul.f32 1.442695, %v7293_v34  ;;  %v1656_v34 = vmul.f32 %v13512_v31, %v13487_v59  ;;  %v1635_v19 = vsub.f32 1.5, %v1634_v3  ;;  %v7434_v3 = vmul.f32 %v9835_v43, %v9823_v27  ;;  %v13555_v27 = vpop.permute.xlu0 %7751 }
 0xfa6   : > { %14695 = vst [vmem:[#allocation17_spill] sm:$0xff] %v13555_v27 }
 0xfa7   : > { %9836 = vpow2.f32 %v7340_v10  ;;  %7546 = vadd.xlane.f32.xlu2 %v7506_v63  ;;  %v1645_v10 = vmul.f32 %v13510_v37, %v1644_v56  ;;  %v1657_v51 = vmul.f32 %v13512_v31, %v1656_v34  ;;  %v1636_v18 = vmul.f32 %v13489_v40, %v1635_v19 }
 0xfa8   : > { %9838 = vrcp.f32 %v7361_v32  ;;  %v7507_v32 = vmul.f32 %v13389_v20, %v7479_v50  ;;  %v13544_v34 = vadd.f32 1e-08, %v14652_v13  ;;  %v13552_v50 = vadd.f32 1e-08, %v14643_v62 }
 0xfa9   : > { %9840 = vrsqrt.f32 %v13517_v11  ;;  %v1646_v28 = vmul.f32 0.5, %v1645_v10  ;;  %v1637_v13 = vmul.f32 %v1636_v18, %v13471_v30  ;;  %v7458_v19 = vsel %vm7410_vm7, %v9835_v43, %v7434_v3 }
 0xfaa   : > { %9842 = vrsqrt.f32 %v13520_v42  ;;  %v1641_v3 = vand.u32 2147483648, %v13471_v30  ;;  %vm1700_vm7 = vcmp.eq.f32.partialorder %v13520_v42, 0.0 }
 0xfab   : > { %9844 = vpow2.f32 %v7338_v12  ;;  %v1658_v12 = vmul.f32 0.5, %v1657_v51  ;;  %v1647_v5 = vsub.f32 1.5, %v1646_v28  ;;  %v7508_v28 = vmul.f32 %v13389_v20, %v7480_v6 }
 0xfad   : > { %v9837_v63 = vpop.eup %9836  ;;  %v1659_v10 = vsub.f32 1.5, %v1658_v12  ;;  %v1648_v12 = vmul.f32 %v13510_v37, %v1647_v5  ;;  %v13591_v37 = vadd.f32 1e-08, %v14657_v53 }
 0xfae   : > { %v7365_v49 = vadd.f32 1.0, %v9837_v63  ;;  %v9839_v17 = vpop.eup %9838 }
 0xfaf   : > { %7548 = vadd.xlane.f32.xlu2 %v7507_v32  ;;  %v13541_v56 = vpop.eup %9840  ;;  %v7433_v40 = vmul.f32 %v9839_v17, %v9825_v26  ;;  %v13565_v26 = vpop.permute.xlu1 %7636  ;;  %v1660_v27 = vmul.f32 %v13512_v31, %v1659_v10  ;;  %v13597_v10 = vadd.f32 1e-08, %v14665_v4 }
 0xfb0   : > { %9846 = vrcp.f32 %v7365_v49  ;;  %v13546_v9 = vpop.eup %9842  ;;  %v1680_v62 = vmul.f32 %v13541_v56, %v13517_v11  ;;  %14696 = vst [vmem:[#allocation121_spill] sm:$0xff] %v13565_v26  ;;  %v1639_v49 = vsel %vm1638_vm5, %v13471_v30, %v1637_v13  ;;  %vm1710_vm5 = vcmp.eq.f32.partialorder %v13544_v34, inf }
 0xfb1   : > { %9848 = vrcp.f32 %v7363_v46  ;;  %v13549_v25 = vpop.eup %9844  ;;  %v1692_v18 = vmul.f32 %v13546_v9, %v13520_v42  ;;  %v7457_v7 = vsel %vm7409_vm11, %v9839_v17, %v7433_v40  ;;  %v7482_v46 = vmul.f32 %v7458_v19, %v13458_v22 }
 0xfb2   : > { %9850 = vrsqrt.f32 %v13544_v34  ;;  %v7364_v51 = vadd.f32 1.0, %v13549_v25  ;;  %v1681_v17 = vmul.f32 %v13541_v56, %v1680_v62  ;;  %v7481_v22 = vmul.f32 %v7457_v7, %v13463_v15 }
 0xfb3   : > { %9852 = vrsqrt.f32 %v13552_v50  ;;  %v1693_v13 = vmul.f32 %v13546_v9, %v1692_v18  ;;  %v7510_v31 = vmul.f32 %v13389_v20, %v7482_v46  ;;  %v1642_v15 = vsel %vm1640_vm3, %v1641_v3, %v1639_v49 }
 0xfb4   : > { %9854 = vrsqrt.f32 %v13561_v55  ;;  %v1653_v62 = vand.u32 2147483648, %v13484_v57  ;;  %v1661_v18 = vmul.f32 %v1660_v27, %v13487_v59  ;;  %v1682_v30 = vmul.f32 0.5, %v1681_v17 }
 0xfb5   : > { %9856 = vrcp.f32 %v7364_v51  ;;  %v13603_v51 = vpop.xlane.xlu0 %7516  ;;  %v1665_v17 = vand.u32 2147483648, %v13487_v59  ;;  %vm1712_vm11 = vcmp.eq.f32.partialorder %v13544_v34, 0.0  ;;  %vm1674_vm3 = vcmp.eq.f32.partialorder %v13552_v50, inf }
 0xfb6   : > { %v9847_v43 = vpop.eup %9846  ;;  %9858 = vrsqrt.f32 %v13591_v37 }
 0xfb7   : > { %v9849_v32 = vpop.eup %9848  ;;  %v7437_v6 = vmul.f32 %v9847_v43, %v9837_v63  ;;  %7550 = vadd.xlane.f32.xlu2 %v7508_v28  ;;  %v1694_v28 = vmul.f32 0.5, %v1693_v13  ;;  %9860 = vrsqrt.f32 %v13597_v10  ;;  %v13624_v3 = vpop.permute.xlu1 %7746 }
 0xfb8   : > { %v13588_v19 = vpop.eup %9850  ;;  %v7435_v63 = vmul.f32 %v9849_v32, %v13529_v58  ;;  %v13608_v58 = vadd.f32 1e-08, %v14667_v24  ;;  %v13619_v24 = vadd.f32 1e-08, %v14669_v35  ;;  %14697 = vst [vmem:[#allocation122_spill] sm:$0xff] %v13624_v3 }
 0xfb9   : > { %v7461_v40 = vsel %vm7413_vm6, %v9847_v43, %v7437_v6  ;;  %v13605_v53 = vpop.eup %9852  ;;  %v7509_v43 = vmul.f32 %v13389_v20, %v7481_v22  ;;  %v1704_v27 = vmul.f32 %v13588_v19, %v13544_v34  ;;  %v13631_v35 = vadd.f32 1e-08, %v14671_v21  ;;  %v13637_v22 = vpop.permute.xlu2 %7701 }
 0xfba   : > { %v7485_v5 = vmul.f32 %v7461_v40, %v13502_v0  ;;  %v1649_v0 = vmul.f32 %v1648_v12, %v13484_v57  ;;  %v13615_v7 = vpop.eup %9854  ;;  %v7459_v46 = vsel %vm7411_vm4, %v9849_v32, %v7435_v63  ;;  %v1919_v12 = vadd.f32 1.0, %v1642_v15 }
 0xfbb   : > { %v9857_v49 = vpop.eup %9856  ;;  %v1668_v6 = vmul.f32 %v13605_v53, %v13552_v50  ;;  %9862 = vrsqrt.f32 %v13608_v58  ;;  %v1663_v40 = vsel %vm1662_vm0, %v13487_v59, %v1661_v18  ;;  %v7483_v13 = vmul.f32 %v7459_v46, %v13475_v41 }
 0xfbc   : > { %7554 = vadd.xlane.f32.xlu0 %v7510_v31  ;;  %v7513_v4 = vmul.f32 %v13389_v20, %v7485_v5  ;;  %v1651_v32 = vsel %vm1650_vm1, %v13484_v57, %v1649_v0  ;;  %v1683_v63 = vsub.f32 1.5, %v1682_v30  ;;  %v1695_v5 = vsub.f32 1.5, %v1694_v28  ;;  %v13649_v18 = vpop.eup %9858 }
 0xfbd   : > { %9864 = vrsqrt.f32 %v13619_v24  ;;  %v7436_v31 = vmul.f32 %v9857_v49, %v13549_v25  ;;  %v1705_v21 = vmul.f32 %v13588_v19, %v1704_v27  ;;  %v1716_v15 = vmul.f32 %v13615_v7, %v13561_v55  ;;  %v13655_v30 = vpop.eup %9860  ;;  %v13657_v28 = vpop.xlane.xlu0 %7518 }
 0xfbe   : > { %7560 = vadd.xlane.f32.xlu1 %v7513_v4  ;;  %9866 = vrcp.f32 %v1919_v12  ;;  %v1669_v0 = vmul.f32 %v13605_v53, %v1668_v6  ;;  %v13652_v41 = vadd.f32 1e-08, %v14663_v36  ;;  %v1654_v25 = vsel %vm1652_vm13, %v1653_v62, %v1651_v32 }
 0xfbf   : > { %7552 = vadd.xlane.f32.xlu2 %v7509_v43  ;;  %9868 = vrsqrt.f32 %v13631_v35  ;;  %v1666_v4 = vsel %vm1664_vm14, %v1665_v17, %v1663_v40  ;;  %v1684_v57 = vmul.f32 %v13541_v56, %v1683_v63  ;;  %v1696_v59 = vmul.f32 %v13546_v9, %v1695_v5  ;;  %v13672_v40 = vpop.xlane.xlu1 %7520 }
 0xfc0   : > { %v7511_v43 = vmul.f32 %v13389_v20, %v7483_v13  ;;  %v13666_v36 = vadd.f32 1e-08, %v14661_v61  ;;  %v7460_v27 = vsel %vm7412_vm9, %v9857_v49, %v7436_v31  ;;  %v1706_v62 = vmul.f32 0.5, %v1705_v21 }
 0xfc1   : > { %v13663_v46 = vpop.eup %9862  ;;  %v1717_v12 = vmul.f32 %v13615_v7, %v1716_v15  ;;  %v13670_v6 = vadd.f32 1e-08, %v14659_v33  ;;  %v1920_v32 = vadd.f32 1.0, %v1654_v25  ;;  %v1670_v17 = vmul.f32 0.5, %v1669_v0  ;;  %v13694_v0 = vpop.permute.xlu2 %7676 }
 0xfc2   : > { %v1728_v9 = vmul.f32 %v13649_v18, %v13591_v37  ;;  %9870 = vrsqrt.f32 %v13652_v41  ;;  %v1776_v33 = vmul.f32 %v13655_v30, %v13597_v10  ;;  %v1921_v56 = vadd.f32 1.0, %v1666_v4 }
 0xfc3   : > { %v13676_v20 = vpop.eup %9864  ;;  %v7484_v49 = vmul.f32 %v7460_v27, %v13492_v14  ;;  %v1685_v13 = vmul.f32 %v1684_v57, %v13517_v11  ;;  %v1788_v63 = vmul.f32 %v13663_v46, %v13608_v58  ;;  %9872 = vrsqrt.f32 %v13666_v36  ;;  %v10026_v27 = vld [vmem:[%s14690_s29] ss:$0 sm:$0xff] }
 0xfc4   : > { %v13683_v61 = vpop.eup %9866  ;;  %v1697_v31 = vmul.f32 %v1696_v59, %v13520_v42  ;;  %v1707_v21 = vsub.f32 1.5, %v1706_v62  ;;  %v1718_v15 = vmul.f32 0.5, %v1717_v12  ;;  %9874 = vrsqrt.f32 %v13670_v6 }
 0xfc5   : > { %14698 = vst [vmem:[#allocation125_spill] sm:$0xff] %v13683_v61  ;;  %v13689_v5 = vpop.eup %9868  ;;  %v1671_v25 = vsub.f32 1.5, %v1670_v17  ;;  %v1729_v14 = vmul.f32 %v13649_v18, %v1728_v9  ;;  %v1800_v4 = vmul.f32 %v13676_v20, %v13619_v24  ;;  %9876 = vrcp.f32 %v1920_v32  ;;  %v13702_v59 = vpop.xlane.xlu0 %7526 }
 0xfc6   : > { %v1689_v57 = vand.u32 2147483648, %v13517_v11  ;;  %9878 = vrcp.f32 %v1921_v56  ;;  %v7512_v62 = vmul.f32 %v10026_v27, %v7484_v49  ;;  %v1789_v12 = vmul.f32 %v13663_v46, %v1788_v63 }
 0xfc7   : > { %7556 = vadd.xlane.f32.xlu2 %v7511_v43  ;;  %v1777_v43 = vmul.f32 %v13655_v30, %v1776_v33  ;;  %v1812_v32 = vmul.f32 %v13689_v5, %v13631_v35  ;;  %v1687_v9 = vsel %vm1686_vm12, %v13517_v11, %v1685_v13  ;;  %v1708_v33 = vmul.f32 %v13588_v19, %v1707_v21  ;;  %v10027_v13 = vld [vmem:[%s11654_s30 + $0x80] sm:$0xff] }
 0xfc8   : > { %v13710_v17 = vpop.eup %9870  ;;  %v1719_v56 = vsub.f32 1.5, %v1718_v15  ;;  %v1672_v3 = vmul.f32 %v13605_v53, %v1671_v25  ;;  %v1699_v49 = vsel %vm1698_vm10, %v13520_v42, %v1697_v31  ;;  %v1730_v63 = vmul.f32 0.5, %v1729_v14  ;;  %v13730_v31 = vpop.xlane.xlu1 %7522 }
 0xfc9   : > { %v1801_v27 = vmul.f32 %v13676_v20, %v1800_v4  ;;  %v13720_v26 = vpop.eup %9872  ;;  %v1778_v19 = vmul.f32 0.5, %v1777_v43  ;;  %v1690_v53 = vsel %vm1688_vm2, %v1689_v57, %v1687_v9  ;;  %v1764_v15 = vmul.f32 %v13710_v17, %v13652_v41  ;;  %v13744_v9 = vpop.xlane.xlu2 %7514 }
 0xfca   : > { %v13726_v21 = vpop.eup %9874  ;;  %v1790_v25 = vmul.f32 0.5, %v1789_v12  ;;  %v1813_v14 = vmul.f32 %v13689_v5, %v1812_v32  ;;  %v1709_v43 = vmul.f32 %v1708_v33, %v13544_v34  ;;  %v1720_v11 = vmul.f32 %v13615_v7, %v1719_v56 }
 0xfcb   : > { %v13735_v4 = vpop.eup %9876  ;;  %v1673_v61 = vmul.f32 %v1672_v3, %v13552_v50  ;;  %v1731_v12 = vsub.f32 1.5, %v1730_v63  ;;  %v1752_v32 = vmul.f32 %v13720_v26, %v13666_v36  ;;  %v1802_v23 = vmul.f32 0.5, %v1801_v27 }
 0xfcc   : > { %14699 = vst [vmem:[#allocation126_spill] sm:$0xff] %v13735_v4  ;;  %v13742_v57 = vpop.eup %9878  ;;  %v1740_v42 = vmul.f32 %v13726_v21, %v13670_v6  ;;  %v1779_v33 = vsub.f32 1.5, %v1778_v19  ;;  %vm1676_vm6 = vcmp.eq.f32.partialorder %v13552_v50, 0.0  ;;  %v1765_v7 = vmul.f32 %v13710_v17, %v1764_v15  ;;  %v10028_v15 = vld [vmem:[%s11654_s30 + $0x88] sm:$0xff] }
 0xfcd   : > { %v1791_v56 = vsub.f32 1.5, %v1790_v25  ;;  %v1677_v3 = vand.u32 2147483648, %v13552_v50  ;;  %v1711_v27 = vsel %vm1710_vm5, %v13544_v34, %v1709_v43  ;;  %v1721_v38 = vmul.f32 %v1720_v11, %v13561_v55  ;;  %v13760_v16 = vpop.xlane.xlu0 %7528 }
 0xfce   : > { %v1732_v19 = vmul.f32 %v13649_v18, %v1731_v12  ;;  %v1753_v4 = vmul.f32 %v13720_v26, %v1752_v32  ;;  %v1803_v25 = vsub.f32 1.5, %v1802_v23  ;;  %vm1722_vm1 = vcmp.eq.f32.partialorder %v13561_v55, inf }
 0xfcf   : > { %7558 = vadd.xlane.f32.xlu2 %v7512_v62  ;;  %v1702_v62 = vsel %vm1700_vm7, %v1701_v29, %v1699_v49  ;;  %v1923_v29 = vadd.f32 1.0, %v1690_v53  ;;  %v1814_v49 = vmul.f32 0.5, %v1813_v14  ;;  %v1675_v53 = vsel %vm1674_vm3, %v13552_v50, %v1673_v61 }
 0xfd0   : > { %7716 = vperm.xlu0 %8992, %v10027_v13   ;;  %v1713_v13 = vand.u32 2147483648, %v13544_v34  ;;  %v1924_v63 = vadd.f32 1.0, %v1702_v62  ;;  %v1741_v14 = vmul.f32 %v13726_v21, %v1740_v42  ;;  %v1780_v62 = vmul.f32 %v13655_v30, %v1779_v33  ;;  %v13770_v61 = vpop.xlane.xlu1 %7530 }
 0xfd1   : > { %9880 = vrcp.f32 %v1923_v29  ;;  %v1766_v11 = vmul.f32 0.5, %v1765_v7  ;;  %v1792_v18 = vmul.f32 %v13663_v46, %v1791_v56  ;;  %v1815_v12 = vsub.f32 1.5, %v1814_v49  ;;  %v13776_v29 = vpop.xlane.xlu2 %7524 }
 0xfd2   : > { %v1714_v43 = vsel %vm1712_vm11, %v1713_v13, %v1711_v27  ;;  %v1678_v32 = vsel %vm1676_vm6, %v1677_v3, %v1675_v53  ;;  %9882 = vrcp.f32 %v1924_v63  ;;  %v1723_v23 = vsel %vm1722_vm1, %v13561_v55, %v1721_v38 }
 0xfd3   : > { %v1725_v42 = vand.u32 2147483648, %v13561_v55  ;;  %v1733_v30 = vmul.f32 %v1732_v19, %v13591_v37  ;;  %v1754_v34 = vmul.f32 0.5, %v1753_v4  ;;  %v1804_v13 = vmul.f32 %v13676_v20, %v1803_v25 }
 0xfd4   : > { %v1925_v33 = vadd.f32 1.0, %v1714_v43  ;;  %vm1724_vm4 = vcmp.eq.f32.partialorder %v13561_v55, 0.0  ;;  %v1742_v46 = vmul.f32 0.5, %v1741_v14  ;;  %v1781_v7 = vmul.f32 %v1780_v62, %v13597_v10 }
 0xfd5   : > { %v1726_v50 = vsel %vm1724_vm4, %v1725_v42, %v1723_v23  ;;  %v1767_v56 = vsub.f32 1.5, %v1766_v11  ;;  %v1793_v49 = vmul.f32 %v1792_v18, %v13608_v58  ;;  %v1816_v38 = vmul.f32 %v13689_v5, %v1815_v12  ;;  %v13791_v4 = vpop.xlane.xlu0 %7532 }
 0xfd6   : > { %v1922_v63 = vadd.f32 1.0, %v1678_v32  ;;  %vm1734_vm0 = vcmp.eq.f32.partialorder %v13591_v37, inf  ;;  %vm1736_vm13 = vcmp.eq.f32.partialorder %v13591_v37, 0.0  ;;  %v1737_v20 = vand.u32 2147483648, %v13591_v37 }
 0xfd7   : > { %7721 = vperm.xlu1 %8993, %v10028_v15   ;;  %v13785_v3 = vpop.eup %9880  ;;  %v1735_v55 = vsel %vm1734_vm0, %v13591_v37, %v1733_v30  ;;  %v1755_v27 = vsub.f32 1.5, %v1754_v34  ;;  %vm1782_vm14 = vcmp.eq.f32.partialorder %v13597_v10, inf  ;;  %v1805_v53 = vmul.f32 %v1804_v13, %v13619_v24 }
 0xfd8   : > { %v13795_v19 = vpop.eup %9882  ;;  %v1926_v5 = vadd.f32 1.0, %v1726_v50  ;;  %v1743_v15 = vsub.f32 1.5, %v1742_v46  ;;  %v1783_v25 = vsel %vm1782_vm14, %v13597_v10, %v1781_v7  ;;  %vm1794_vm9 = vcmp.eq.f32.partialorder %v13608_v58, inf }
 0xfd9   : > { %v1768_v14 = vmul.f32 %v13710_v17, %v1767_v56  ;;  %v1785_v62 = vand.u32 2147483648, %v13597_v10  ;;  %v1795_v43 = vsel %vm1794_vm9, %v13608_v58, %v1793_v49  ;;  %v1817_v18 = vmul.f32 %v1816_v38, %v13631_v35  ;;  %v7537_v42 = vpop.xlane.xlu2 %7536  ;;  %v10029_v49 = vld [vmem:[%s11654_s30 + $0x98] sm:$0xff]  ;;  %s14739_s30 = sld [smem:[#allocation8_spill]] }
 0xfda   : > { %v1738_v12 = vsel %vm1736_vm13, %v1737_v20, %v1735_v55  ;;  %vm1784_vm12 = vcmp.eq.f32.partialorder %v13597_v10, 0.0  ;;  %v1797_v32 = vand.u32 2147483648, %v13608_v58  ;;  %vm1806_vm2 = vcmp.eq.f32.partialorder %v13619_v24, inf }
 0xfdb   : > { %v1756_v23 = vmul.f32 %v13720_v26, %v1755_v27  ;;  %v1786_v17 = vsel %vm1784_vm12, %v1785_v62, %v1783_v25  ;;  %vm1796_vm10 = vcmp.eq.f32.partialorder %v13608_v58, 0.0  ;;  %v1807_v30 = vsel %vm1806_vm2, %v13619_v24, %v1805_v53 }
 0xfdc   : > { %v1744_v34 = vmul.f32 %v13726_v21, %v1743_v15  ;;  %v1798_v13 = vsel %vm1796_vm10, %v1797_v32, %v1795_v43  ;;  %v1809_v37 = vand.u32 2147483648, %v13619_v24  ;;  %vm1818_vm7 = vcmp.eq.f32.partialorder %v13631_v35, inf }
 0xfdd   : > { %v1927_v10 = vadd.f32 1.0, %v1738_v12  ;;  %v1769_v46 = vmul.f32 %v1768_v14, %v13652_v41  ;;  %vm1808_vm5 = vcmp.eq.f32.partialorder %v13619_v24, 0.0  ;;  %v1819_v26 = vsel %vm1818_vm7, %v13631_v35, %v1817_v18 }
 0xfde   : > { %9884 = vrcp.f32 %v1925_v33  ;;  %v1931_v7 = vadd.f32 1.0, %v1786_v17  ;;  %v1810_v58 = vsel %vm1808_vm5, %v1809_v37, %v1807_v30  ;;  %v1821_v50 = vand.u32 2147483648, %v13631_v35  ;;  %v7535_v33 = vpop.xlane.xlu0 %7534 }
 0xfdf   : > { %9886 = vrcp.f32 %v1922_v63  ;;  %v1757_v21 = vmul.f32 %v1756_v23, %v13666_v36  ;;  %v1932_v56 = vadd.f32 1.0, %v1798_v13  ;;  %vm1820_vm11 = vcmp.eq.f32.partialorder %v13631_v35, 0.0  ;;  %s8888_s12 = sshll.u32 %s14739_s30, 6 }
 0xfe0   : > { %9888 = vrcp.f32 %v1926_v5  ;;  %vm1770_vm3 = vcmp.eq.f32.partialorder %v13652_v41, inf  ;;  %v1822_v38 = vsel %vm1820_vm11, %v1821_v50, %v1819_v26  ;;  %v1745_v24 = vmul.f32 %v1744_v34, %v13670_v6  ;;  %s7897_s25 = scalar_lea.hbm %s14745_s27, %s8888_s12 }
 0xfe1   : > { %v7541_v11 = vpop.xlane.xlu1 %7540  ;;  %9890 = vrcp.f32 %v1927_v10  ;;  %v1771_v20 = vsel %vm1770_vm3, %v13652_v41, %v1769_v46  ;;  %v1933_v55 = vadd.f32 1.0, %v1810_v58  ;;  %vm1758_vm6 = vcmp.eq.f32.partialorder %v13666_v36, inf  ;;  %v7539_v43 = vpop.xlane.xlu2 %7538  ;;  %s7900_s1 = sshll.u32 %s7897_s25, 4  ;;  %s7901_s1 = int_to_ptr.hbm [resolvable:$true] %s7900_s1 }
 0xfe2   : > { %v1773_v63 = vand.u32 2147483648, %v13652_v41  ;;  %9892 = vrcp.f32 %v1931_v7  ;;  %v1759_v53 = vsel %vm1758_vm6, %v13666_v36, %v1757_v21  ;;  %vm1772_vm1 = vcmp.eq.f32.partialorder %v13652_v41, 0.0  ;;  %v14700_v21 = vld [vmem:[#allocation63_spill] sm:$0xff]  ;;  %s10052_s2 = sshra.s32 %s7901_s1, 4  ;;  %s10053_s2 = int_to_ptr.hbm [resolvable:$true] %s10052_s2 }
 0xfe3   : > { %9894 = vrcp.f32 %v1932_v56  ;;  %v1934_v35 = vadd.f32 1.0, %v1822_v38  ;;  %vm1746_vm4 = vcmp.eq.f32.partialorder %v13670_v6, inf  ;;  %v1761_v15 = vand.u32 2147483648, %v13666_v36  ;;  %s10054_s3 = scalar_lea.hbm %s10053_s2, 64  ;;  %p10059_p0 = scmp.lt.s32.totalorder %s10053_s2, %s14745_s27 }
 0xfe4   : > { %v13828_v5 = vpop.eup %9884  ;;  %v1774_v25 = vsel %vm1772_vm1, %v1773_v63, %v1771_v20  ;;  %v1747_v62 = vsel %vm1746_vm4, %v13670_v6, %v1745_v24  ;;  %vm1760_vm0 = vcmp.eq.f32.partialorder %v13666_v36, 0.0  ;;  %v1749_v41 = vand.u32 2147483648, %v13670_v6  ;;  %p10055_p11 = scmp.ne.s32.totalorder %s10053_s2, %s10054_s3  ;;  %p10060_p1 = scmp.lt.s32.totalorder %s10058_s26, %s10054_s3 }
 0xfe5   : > { %v13832_v14 = vpop.eup %9886  ;;  %v1762_v12 = vsel %vm1760_vm0, %v1761_v15, %v1759_v53  ;;  %vm1748_vm13 = vcmp.eq.f32.partialorder %v13670_v6, 0.0  ;;  %v1930_v23 = vadd.f32 1.0, %v1774_v25  ;;  %v14703_v15 = vld [vmem:[#allocation57_spill] sm:$0xff] }
 0xfe6   : > { %v13836_v18 = vpop.eup %9888  ;;  %v1750_v30 = vsel %vm1748_vm13, %v1749_v41, %v1747_v62  ;;  %v1929_v13 = vadd.f32 1.0, %v1762_v12  ;;  %p10056_p12 = pnand %p10055_p11, %p10291_p5  ;;  %p10061_p2 = por %p10060_p1, %p10059_p0 }
 0xfe7   : > { %7731 = vperm.xlu2 %8994, %v10029_v49   ;;  %v13839_v32 = vpop.eup %9890  ;;  %v1928_v46 = vadd.f32 1.0, %v1750_v30  ;;  %v14701_v49 = vld [vmem:[#allocation60_spill] sm:$0xff] }
 0xfe8   : > { %v9893_v17 = vpop.eup %9892  ;;  %p10057_p13 = pneg %p10056_p12 }
 0xfe9   : > { %v7543_v27 = vpop.xlane.xlu1 %7542  ;;  %v9895_v34 = vpop.eup %9894  ;;  %v1979_v25 = vmul.f32 %v9893_v17, %v14703_v15 }
 0xfea   : > { %9896 = vtanh.f32 %v7543_v27  ;;  %v1980_v38 = vmul.f32 %v9895_v34, %v14701_v49  ;;  %p10062_p3 = pnand %p10061_p2, %p10057_p13 }
 0xfeb   : > { %9898 = vrcp.f32 %v1933_v55 }
 0xfec   : > { %9900 = vtanh.f32 %v7541_v11 }
 0xfed   : > { %9902 = vrcp.f32 %v1934_v35 }
 0xfee   : > { %9904 = vtanh.f32 %v7539_v43 }
 0xfef   : > { %9906 = vtanh.f32 %v7537_v42 }
 0xff0   : > { %v9897_v37 = vpop.eup %9896 }
 0xff1   : > { %v7545_v36 = vpop.xlane.xlu0 %7544  ;;  %v9899_v10 = vpop.eup %9898  ;;  %v7600_v7 = vmul.f32 3.0, %v9897_v37 }
 0xff2   : > { %9908 = vtanh.f32 %v7545_v36  ;;  %v9901_v26 = vpop.eup %9900  ;;  %v1981_v56 = vmul.f32 %v9899_v10, %v14700_v21 }
 0xff3   : > { %9910 = vrcp.f32 %v1930_v23  ;;  %v9903_v11 = vpop.eup %9902  ;;  %v7599_v50 = vmul.f32 3.0, %v9901_v26 }
 0xff4   : > { %9912 = vtanh.f32 %v7535_v33  ;;  %v9905_v6 = vpop.eup %9904  ;;  %v7624_v55 = vmul.f32 %v7600_v7, %v1981_v56  ;;  %v14702_v33 = vld [vmem:[#allocation67_spill] sm:$0xff] }
 0xff5   : > { %9914 = vrcp.f32 %v1929_v13  ;;  %v9907_v58 = vpop.eup %9906  ;;  %v7598_v20 = vmul.f32 3.0, %v9905_v6  ;;  %v1982_v27 = vmul.f32 %v9903_v11, %v14702_v33  ;;  %v7623_v62 = vmul.f32 %v7599_v50, %v1980_v38  ;;  %v14706_v6 = vld [vmem:[#allocation52_spill] sm:$0xff] }
 0xff6   : > { %9916 = vtanh.f32 %v13791_v4  ;;  %v7597_v35 = vmul.f32 3.0, %v9907_v58  ;;  %v7768_v13 = vmul.f32 %v13575_v60, %v7624_v55 }
 0xff7   : > { %9918 = vrcp.f32 %v1928_v46  ;;  %v7622_v34 = vmul.f32 %v7598_v20, %v1979_v25  ;;  %v7767_v11 = vmul.f32 %v13637_v22, %v7623_v62  ;;  %v14711_v25 = vld [vmem:[#allocation47_spill] sm:$0xff] }
 0xff8   : > { %v9909_v42 = vpop.eup %9908  ;;  %9920 = vtanh.f32 %v13770_v61  ;;  %v14704_v61 = vld [vmem:[#allocation55_spill] sm:$0xff] }
 0xff9   : > { %v9911_v24 = vpop.eup %9910  ;;  %v7601_v63 = vmul.f32 3.0, %v9909_v42  ;;  %9922 = vtanh.f32 %v13760_v16  ;;  %v14705_v16 = vld [vmem:[#allocation53_spill] sm:$0xff] }
 0xffa   : > { %v9913_v53 = vpop.eup %9912  ;;  %9924 = vtanh.f32 %v13702_v59  ;;  %v1978_v12 = vmul.f32 %v9911_v24, %v14704_v61  ;;  %v14708_v24 = vld [vmem:[#allocation50_spill] sm:$0xff] }
 0xffb   : > { %v9915_v4 = vpop.eup %9914  ;;  %v7625_v43 = vmul.f32 %v7601_v63, %v1982_v27  ;;  %v7596_v30 = vmul.f32 3.0, %v9913_v53  ;;  %9926 = vtanh.f32 %v13776_v29  ;;  %v14707_v29 = vld [vmem:[#allocation51_spill] sm:$0xff]  ;;  %v1974_v20 = vmul.f32 %v13836_v18, %v14708_v24  ;;  %v14710_v18 = vld [vmem:[#allocation48_spill] sm:$0xff] }
 0xffc   : > { %v9917_v41 = vpop.eup %9916  ;;  %v1977_v10 = vmul.f32 %v9915_v4, %v14705_v16  ;;  %v7621_v46 = vmul.f32 %v7597_v35, %v1978_v12  ;;  %9928 = vtanh.f32 %v13730_v31  ;;  %v1975_v21 = vmul.f32 %v13839_v32, %v14707_v29  ;;  %v14709_v32 = vld [vmem:[#allocation49_spill] sm:$0xff]  ;;  %v14724_v24 = vld [vmem:[#allocation104_spill] sm:$0xff] }
 0xffd   : > { %v9919_v23 = vpop.eup %9918  ;;  %v7769_v36 = vmul.f32 %v13441_v45, %v7625_v43  ;;  %v7595_v17 = vmul.f32 3.0, %v9917_v41  ;;  %v7766_v45 = vmul.f32 %v13438_v44, %v7622_v34  ;;  %9930 = vtanh.f32 %v13672_v40  ;;  %v14721_v29 = vld [vmem:[#allocation133_spill] sm:$0xff] }
 0xffe   : > { %v9921_v37 = vpop.eup %9920  ;;  %v1976_v58 = vmul.f32 %v9919_v23, %v14706_v6  ;;  %v7620_v50 = vmul.f32 %v7596_v30, %v1977_v10  ;;  %v7765_v22 = vmul.f32 %v13460_v54, %v7621_v46  ;;  %9932 = vtanh.f32 %v13657_v28  ;;  %v14712_v23 = vld [vmem:[#allocation46_spill] sm:$0xff]  ;;  %v14714_v10 = vld [vmem:[#allocation44_spill] sm:$0xff]  ;;  %v14719_v6 = vld [vmem:[#allocation43_spill] sm:$0xff] }
 0xfff   : > { %v7785_v26 = vpack.c.bf16 %v7769_v36, %v7768_v13  ;;  %v9923_v59 = vpop.eup %9922  ;;  %v7594_v7 = vmul.f32 3.0, %v9921_v37  ;;  %v7784_v49 = vpack.c.bf16 %v7767_v11, %v7766_v45  ;;  %9934 = vtanh.f32 %v13603_v51  ;;  %v14713_v13 = vld [vmem:[#allocation45_spill] sm:$0xff]  ;;  %v14716_v46 = vld [vmem:[#allocation114_spill] sm:$0xff] }
0x1000   : > { %v9925_v60 = vpop.eup %9924  ;;  %v7593_v56 = vmul.f32 3.0, %v9923_v59  ;;  %v7619_v42 = vmul.f32 %v7595_v17, %v1976_v58  ;;  %v7764_v44 = vmul.f32 %v13449_v8, %v7620_v50  ;;  %v1973_v33 = vmul.f32 %v13828_v5, %v14709_v32  ;;  %v14720_v58 = vld [vmem:[#allocation125_spill] sm:$0xff]  ;;  %v14726_v32 = vld [vmem:[#allocation106_spill] sm:$0xff] }
0x1001   : > { %7790 = vmatpush.bf16.msra.mxu0 %v7785_v26  ;;  %v9927_v38 = vpop.eup %9926  ;;  %v7592_v31 = vmul.f32 3.0, %v9925_v60  ;;  %v7618_v55 = vmul.f32 %v7594_v7, %v1975_v21  ;;  %9936 = vtanh.f32 %v13744_v9  ;;  %v1972_v35 = vmul.f32 %v13795_v19, %v14710_v18  ;;  %v14718_v7 = vld [vmem:[#allocation108_spill] sm:$0xff] }
0x1002   : > { %v9929_v40 = vpop.eup %9928  ;;  %v7591_v27 = vmul.f32 3.0, %v9927_v38  ;;  %v7617_v63 = vmul.f32 %v7593_v56, %v1974_v20  ;;  %v7783_v54 = vpack.c.bf16 %v7765_v22, %v7764_v44  ;;  %v7763_v53 = vmul.f32 %v13451_v1, %v7619_v42  ;;  %v14722_v42 = vld [vmem:[#allocation16_spill] sm:$0xff]  ;;  %v14723_v38 = vld [vmem:[#allocation95_spill] sm:$0xff] }
0x1003   : > { %v9931_v28 = vpop.eup %9930  ;;  %v7590_v4 = vmul.f32 3.0, %v9929_v40  ;;  %v7616_v15 = vmul.f32 %v7592_v31, %v1973_v33  ;;  %v7762_v8 = vmul.f32 %v13694_v0, %v7618_v55  ;;  %v1971_v5 = vmul.f32 %v13785_v3, %v14711_v25  ;;  %v14725_v44 = vld [vmem:[#allocation131_spill] sm:$0xff] }
0x1004   : > { %v9933_v51 = vpop.eup %9932  ;;  %v7589_v62 = vmul.f32 3.0, %v9931_v28  ;;  %v7615_v43 = vmul.f32 %v7591_v27, %v1972_v35  ;;  %v7761_v1 = vmul.f32 %v13477_v48, %v7617_v63  ;;  %v13879_v9 = vadd.f32 1e-08, %v14683_v2  ;;  %v14727_v63 = vld [vmem:[#allocation121_spill] sm:$0xff] }
0x1005   : > { %7791 = vmatpush.bf16.msra.mxu0 %v7784_v49  ;;  %v7782_v41 = vpack.c.bf16 %v7763_v53, %v7762_v8  ;;  %v9935_v61 = vpop.eup %9934  ;;  %v7588_v12 = vmul.f32 3.0, %v9933_v51  ;;  %v1970_v19 = vmul.f32 %v13832_v14, %v14712_v23  ;;  %v7614_v30 = vmul.f32 %v7590_v4, %v1971_v5  ;;  %v14715_v14 = vld [vmem:[#allocation126_spill] sm:$0xff] }
0x1006   : > { %v7760_v0 = vmul.f32 %v13465_v39, %v7616_v15  ;;  %v13885_v3 = vadd.f32 1e-08, %v14688_v52  ;;  %v1969_v36 = vmul.f32 %v13742_v57, %v14713_v13  ;;  %v7587_v48 = vmul.f32 3.0, %v9935_v61  ;;  %v14717_v52 = vld [vmem:[#allocation132_spill] sm:$0xff]  ;;  %v14728_v53 = vld [vmem:[#allocation98_spill] sm:$0xff] }
0x1007   : > { %v9937_v34 = vpop.eup %9936  ;;  %v7613_v37 = vmul.f32 %v7589_v62, %v1970_v19  ;;  %v7759_v2 = vmul.f32 %v13505_v47, %v7615_v43  ;;  %9938 = vrsqrt.f32 %v13879_v9  ;;  %v1968_v17 = vmul.f32 %v14715_v14, %v14714_v10  ;;  %v13902_v47 = vpop.permute.xlu2 %7736 }
0x1008   : > { %v7781_v16 = vpack.c.bf16 %v7761_v1, %v7760_v0  ;;  %v13894_v26 = vadd.f32 1e-08, %v14716_v46  ;;  %v7586_v39 = vmul.f32 3.0, %v9937_v34  ;;  %v7612_v11 = vmul.f32 %v7588_v12, %v1969_v36 }
0x1009   : > { %7792 = vmatpush.bf16.msra.mxu0 %v7783_v54  ;;  %v7758_v59 = vmul.f32 %v14717_v52, %v7614_v30  ;;  %v13898_v57 = vadd.f32 1e-08, %v14718_v7  ;;  %v1967_v50 = vmul.f32 %v14720_v58, %v14719_v6  ;;  %9940 = vrsqrt.f32 %v13885_v3 }
0x100a   : > { %v7611_v45 = vmul.f32 %v7587_v48, %v1968_v17  ;;  %v7757_v21 = vmul.f32 %v14721_v29, %v7613_v37  ;;  %9942 = vrsqrt.f32 %v13894_v26  ;;  %v7756_v49 = vmul.f32 %v14722_v42, %v7612_v11 }
0x100b   : > { %v7780_v60 = vpack.c.bf16 %v7759_v2, %v7758_v59  ;;  %v7610_v56 = vmul.f32 %v7586_v39, %v1967_v50  ;;  %v13909_v31 = vadd.f32 1e-08, %v14723_v38  ;;  %v13912_v20 = vadd.f32 1e-08, %v14724_v24 }
0x100c   : > { %9944 = vrsqrt.f32 %v13898_v57  ;;  %v7779_v55 = vpack.c.bf16 %v7757_v21, %v7756_v49  ;;  %v7755_v40 = vmul.f32 %v14725_v44, %v7611_v45  ;;  %v13917_v33 = vadd.f32 1e-08, %v14726_v32 }
0x100d   : > { %7793 = vmatpush.bf16.msra.mxu0 %v7782_v41  ;;  %v9939_v22 = vpop.eup %9938  ;;  %v7754_v54 = vmul.f32 %v14727_v63, %v7610_v56  ;;  %v13921_v28 = vadd.f32 1e-08, %v14728_v53  ;;  %9946 = vrsqrt.f32 %v13909_v31  ;;  %vm1890_vm14 = vcmp.eq.f32.partialorder %v13879_v9, inf }
0x100e   : > { %v1884_v18 = vmul.f32 %v9939_v22, %v13879_v9  ;;  %9948 = vrsqrt.f32 %v13912_v20  ;;  %vm1914_vm9 = vcmp.eq.f32.partialorder %v13885_v3, inf  ;;  %vm1892_vm12 = vcmp.eq.f32.partialorder %v13879_v9, 0.0 }
0x100f   : > { %v9941_v27 = vpop.eup %9940  ;;  %v7778_v15 = vpack.c.bf16 %v7755_v40, %v7754_v54  ;;  %9950 = vrsqrt.f32 %v13917_v33  ;;  %vm1902_vm2 = vcmp.eq.f32.partialorder %v13894_v26, inf  ;;  %vm1916_vm10 = vcmp.eq.f32.partialorder %v13885_v3, 0.0 }
0x1010   : > { %v9943_v35 = vpop.eup %9942  ;;  %v1908_v8 = vmul.f32 %v9941_v27, %v13885_v3  ;;  %9952 = vrsqrt.f32 %v13921_v28  ;;  %v1885_v25 = vmul.f32 %v9939_v22, %v1884_v18  ;;  %vm1878_vm7 = vcmp.eq.f32.partialorder %v13898_v57, inf }
0x1011   : > { %7794 = vmatpush.bf16.msra.mxu0 %v7781_v16  ;;  %v1896_v5 = vmul.f32 %v9943_v35, %v13894_v26  ;;  %vm1904_vm5 = vcmp.eq.f32.partialorder %v13894_v26, 0.0  ;;  %vm1880_vm11 = vcmp.eq.f32.partialorder %v13898_v57, 0.0  ;;  %vm1854_vm3 = vcmp.eq.f32.partialorder %v13912_v20, inf }
0x1012   : > { %v9945_v51 = vpop.eup %9944  ;;  %v1909_v41 = vmul.f32 %v9941_v27, %v1908_v8  ;;  %v1886_v23 = vmul.f32 0.5, %v1885_v25  ;;  %v13957_v25 = vpop.permute.xlu0 %7741  ;;  %vm1842_vm6 = vcmp.eq.f32.partialorder %v13909_v31, inf  ;;  %vm1866_vm1 = vcmp.eq.f32.partialorder %v13917_v33, inf }
0x1013   : > { %v9947_v62 = vpop.eup %9946  ;;  %v1872_v43 = vmul.f32 %v9945_v51, %v13898_v57  ;;  %v1897_v19 = vmul.f32 %v9943_v35, %v1896_v5  ;;  %vm1856_vm4 = vcmp.eq.f32.partialorder %v13912_v20, 0.0  ;;  %vm1868_vm0 = vcmp.eq.f32.partialorder %v13917_v33, 0.0 }
0x1014   : > { %v9949_v1 = vpop.eup %9948  ;;  %v1836_v30 = vmul.f32 %v9947_v62, %v13909_v31  ;;  %v1910_v36 = vmul.f32 0.5, %v1909_v41  ;;  %v1887_v37 = vsub.f32 1.5, %v1886_v23  ;;  %v1905_v41 = vand.u32 2147483648, %v13894_v26 }
0x1015   : > { %7795 = vmatpush.bf16.msra.mxu0 %v7780_v60  ;;  %v9951_v61 = vpop.eup %9950  ;;  %v1848_v34 = vmul.f32 %v9949_v1, %v13912_v20  ;;  %v1873_v13 = vmul.f32 %v9945_v51, %v1872_v43  ;;  %v1898_v16 = vmul.f32 0.5, %v1897_v19  ;;  %vm1844_vm13 = vcmp.eq.f32.partialorder %v13909_v31, 0.0 }
0x1016   : > { %v9953_v0 = vpop.eup %9952  ;;  %v1860_v48 = vmul.f32 %v9951_v61, %v13917_v33  ;;  %v1837_v10 = vmul.f32 %v9947_v62, %v1836_v30  ;;  %v1911_v46 = vsub.f32 1.5, %v1910_v36  ;;  %v1888_v52 = vmul.f32 %v9939_v22, %v1887_v37 }
0x1017   : > { %v1824_v2 = vmul.f32 %v9953_v0, %v13921_v28  ;;  %v1849_v14 = vmul.f32 %v9949_v1, %v1848_v34  ;;  %v1874_v17 = vmul.f32 0.5, %v1873_v13  ;;  %v1899_v59 = vsub.f32 1.5, %v1898_v16 }
0x1018   : > { %v1861_v39 = vmul.f32 %v9951_v61, %v1860_v48  ;;  %v1838_v6 = vmul.f32 0.5, %v1837_v10  ;;  %v1912_v45 = vmul.f32 %v9941_v27, %v1911_v46  ;;  %v1889_v29 = vmul.f32 %v1888_v52, %v13879_v9 }
0x1019   : > { %7796 = vmatpush.bf16.msra.mxu0 %v7779_v55  ;;  %v1825_v7 = vmul.f32 %v9953_v0, %v1824_v2  ;;  %v1850_v58 = vmul.f32 0.5, %v1849_v14  ;;  %v1875_v50 = vsub.f32 1.5, %v1874_v17  ;;  %v1900_v21 = vmul.f32 %v9943_v35, %v1899_v59  ;;  %v13944_v55 = vpop.permute.xlu1 %7726 }
0x101a   : > { %v13924_v4 = vpop.xlane.xlu2 %7546  ;;  %v1862_v60 = vmul.f32 0.5, %v1861_v39  ;;  %v1839_v42 = vsub.f32 1.5, %v1838_v6  ;;  %v1913_v24 = vmul.f32 %v1912_v45, %v13885_v3  ;;  %v1891_v40 = vsel %vm1890_vm14, %v13879_v9, %v1889_v29 }
0x101b   : > { %v1826_v56 = vmul.f32 0.5, %v1825_v7  ;;  %v1851_v49 = vsub.f32 1.5, %v1850_v58  ;;  %v1876_v38 = vmul.f32 %v9945_v51, %v1875_v50  ;;  %v1901_v32 = vmul.f32 %v1900_v21, %v13894_v26 }
0x101c   : > { %v1863_v22 = vsub.f32 1.5, %v1862_v60  ;;  %v1893_v27 = vand.u32 2147483648, %v13879_v9  ;;  %v1840_v54 = vmul.f32 %v9947_v62, %v1839_v42  ;;  %v1915_v35 = vsel %vm1914_vm9, %v13885_v3, %v1913_v24  ;;  %v14729_v24 = vld [vmem:[#allocation96_spill] sm:$0xff] }
0x101d   : > { %7797 = vmatpush.bf16.msra.mxu0 %v7778_v15  ;;  %v1827_v63 = vsub.f32 1.5, %v1826_v56  ;;  %v1852_v53 = vmul.f32 %v9949_v1, %v1851_v49  ;;  %v1877_v18 = vmul.f32 %v1876_v38, %v13898_v57  ;;  %v1917_v15 = vand.u32 2147483648, %v13885_v3 }
0x101e   : > { %v1894_v8 = vsel %vm1892_vm12, %v1893_v27, %v1891_v40  ;;  %v1864_v51 = vmul.f32 %v9951_v61, %v1863_v22  ;;  %v1903_v5 = vsel %vm1902_vm2, %v13894_v26, %v1901_v32  ;;  %v1881_v61 = vand.u32 2147483648, %v13898_v57  ;;  %v14730_v32 = vld [vmem:[#allocation88_spill] sm:$0xff] }
0x101f   : > { %v1918_v62 = vsel %vm1916_vm10, %v1917_v15, %v1915_v35  ;;  %v1828_v43 = vmul.f32 %v9953_v0, %v1827_v63  ;;  %v1853_v9 = vmul.f32 %v1852_v53, %v13912_v20  ;;  %v1879_v1 = vsel %vm1878_vm7, %v13898_v57, %v1877_v18  ;;  %v14731_v53 = vld [vmem:[#allocation92_spill] sm:$0xff] }
0x1020   : > { %8923 = vmatmul.lmr.bf16.vlgmr.msra.gmra.8.mxu0  ;;  %v1940_v23 = vadd.f32 1.0, %v1894_v8  ;;  %v1906_v19 = vsel %vm1904_vm5, %v1905_v41, %v1903_v5  ;;  %v1841_v3 = vmul.f32 %v1840_v54, %v13909_v31  ;;  %v1865_v30 = vmul.f32 %v1864_v51, %v13917_v33  ;;  %v14732_v51 = vld [vmem:[#allocation83_spill] sm:$0xff] }
0x1021   : > { %v1942_v0 = vadd.f32 1.0, %v1918_v62  ;;  %v1882_v36 = vsel %vm1880_vm11, %v1881_v61, %v1879_v1  ;;  %v1829_v48 = vmul.f32 %v1828_v43, %v13921_v28  ;;  %v1855_v26 = vsel %vm1854_vm3, %v13912_v20, %v1853_v9  ;;  %v14733_v61 = vld [vmem:[#allocation122_spill] sm:$0xff] }
0x1022   : > { %v13933_v12 = vpop.xlane.xlu2 %7548  ;;  %9954 = vrcp.f32 %v1940_v23  ;;  %v1941_v37 = vadd.f32 1.0, %v1906_v19  ;;  %v1857_v16 = vand.u32 2147483648, %v13912_v20  ;;  %v1843_v57 = vsel %vm1842_vm6, %v13909_v31, %v1841_v3  ;;  %v14734_v3 = vld [vmem:[#allocation17_spill] sm:$0xff] }
0x1023   : > { %v1867_v2 = vsel %vm1866_vm1, %v13917_v33, %v1865_v30  ;;  %v1939_v10 = vadd.f32 1.0, %v1882_v36  ;;  %v1869_v17 = vand.u32 2147483648, %v13917_v33  ;;  %v1845_v39 = vand.u32 2147483648, %v13909_v31  ;;  %v14736_v36 = vld [vmem:[#allocation80_spill] sm:$0xff] }
0x1024   : > { %v1858_v46 = vsel %vm1856_vm4, %v1857_v16, %v1855_v26  ;;  %vm1830_vm14 = vcmp.eq.f32.partialorder %v13921_v28, inf  ;;  %v1833_v33 = vand.u32 2147483648, %v13921_v28  ;;  %vm1832_vm9 = vcmp.eq.f32.partialorder %v13921_v28, 0.0 }
0x1025   : > { %v1870_v52 = vsel %vm1868_vm0, %v1869_v17, %v1867_v2  ;;  %v1846_v59 = vsel %vm1844_vm13, %v1845_v39, %v1843_v57  ;;  %v1937_v20 = vadd.f32 1.0, %v1858_v46  ;;  %v1831_v50 = vsel %vm1830_vm14, %v13921_v28, %v1829_v48  ;;  %v14737_v39 = vld [vmem:[#allocation72_spill] sm:$0xff] }
0x1026   : > { %v1938_v45 = vadd.f32 1.0, %v1870_v52  ;;  %v1936_v31 = vadd.f32 1.0, %v1846_v59  ;;  %v1834_v42 = vsel %vm1832_vm9, %v1833_v33, %v1831_v50 }
0x1028   : > { %8924 = vmatmul.lmr.bf16.gmra.8.mxu0  ;;  %v9955_v7 = vpop.eup %9954 }
0x1029   : > { %v1988_v27 = vmul.f32 %v9955_v7, %v14730_v32 }
0x102a   : > { %v13939_v11 = vpop.xlane.xlu2 %7550 }
0x102f   : > { %v7555_v14 = vpop.xlane.xlu0 %7554 }
0x1030   : > { %8925 = vmatmul.lmr.bf16.gmra.8.mxu0 }
0x1031   : > { %v7561_v34 = vpop.xlane.xlu1 %7560 }
0x1032   : > { %v13946_v44 = vpop.xlane.xlu2 %7552  ;;  %9956 = vtanh.f32 %v7561_v34  ;;  %v14735_v34 = vld [vmem:[#allocation78_spill] sm:$0xff] }
0x1033   : > { %9958 = vrcp.f32 %v1942_v0 }
0x1038   : > { %8926 = vmatmul.lmr.bf16.gmra.8.mxu0  ;;  %v9957_v58 = vpop.eup %9956 }
0x1039   : > { %v9959_v60 = vpop.eup %9958  ;;  %v7609_v56 = vmul.f32 3.0, %v9957_v58 }
0x103a   : > { %v7557_v13 = vpop.xlane.xlu2 %7556  ;;  %v1990_v22 = vmul.f32 %v9959_v60, %v14729_v24 }
0x103b   : > { %9960 = vtanh.f32 %v7557_v13 }
0x103c   : > { %9962 = vrcp.f32 %v1941_v37  ;;  %v7633_v54 = vmul.f32 %v7609_v56, %v1990_v22  ;;  %v14741_v56 = vld [vmem:[#allocation107_spill] sm:$0xff] }
0x103d   : > { %9964 = vtanh.f32 %v7555_v14 }
0x103e   : > { %9966 = vrcp.f32 %v1939_v10  ;;  %v7777_v30 = vmul.f32 %v14734_v3, %v7633_v54 }
0x1040   : > { %8927 = vmatmul.lmr.bf16.gmra.8.mxu0 }
0x1041   : > { %v9961_v29 = vpop.eup %9960 }
0x1042   : > { %v7559_v6 = vpop.xlane.xlu2 %7558  ;;  %v9963_v21 = vpop.eup %9962  ;;  %v7607_v40 = vmul.f32 3.0, %v9961_v29 }
0x1043   : > { %9968 = vtanh.f32 %v7559_v6  ;;  %v9965_v49 = vpop.eup %9964  ;;  %v1989_v18 = vmul.f32 %v9963_v21, %v14731_v53  ;;  %v14738_v6 = vld [vmem:[#allocation70_spill] sm:$0xff]  ;;  %v14740_v21 = vld [vmem:[#allocation109_spill] sm:$0xff] }
0x1044   : > { %9970 = vtanh.f32 %v13939_v11  ;;  %v9967_v38 = vpop.eup %9966  ;;  %v7606_v28 = vmul.f32 3.0, %v9965_v49  ;;  %v7631_v62 = vmul.f32 %v7607_v40, %v1988_v27 }
0x1045   : > { %9972 = vtanh.f32 %v13946_v44  ;;  %v1935_v44 = vadd.f32 1.0, %v1834_v42  ;;  %v1987_v5 = vmul.f32 %v9967_v38, %v14732_v51  ;;  %v14744_v42 = vld [vmem:[#allocation118_spill] sm:$0xff] }
0x1046   : > { %9974 = vrcp.f32 %v1937_v20  ;;  %v7775_v26 = vmul.f32 %v13957_v25, %v7631_v62 }
0x1047   : > { %9976 = vrcp.f32 %v1938_v45  ;;  %v7630_v1 = vmul.f32 %v7606_v28, %v1987_v5  ;;  %v7717_v45 = vpop.permute.xlu0 %7716 }
0x1048   : > { %9978 = vrcp.f32 %v1936_v31  ;;  %8928 = vmatmul.lmr.bf16.gmra.8.mxu0 }
0x1049   : > { %v9969_v11 = vpop.eup %9968  ;;  %9980 = vtanh.f32 %v13933_v12  ;;  %v7774_v14 = vmul.f32 %v13902_v47, %v7630_v1  ;;  %v7722_v20 = vpop.permute.xlu1 %7721 }
0x104a   : > { %v9971_v63 = vpop.eup %9970  ;;  %v7608_v35 = vmul.f32 3.0, %v9969_v11  ;;  %9982 = vtanh.f32 %v13924_v4  ;;  %v7732_v16 = vpop.permute.xlu2 %7731 }
0x104b   : > { %v9973_v15 = vpop.eup %9972  ;;  %v7604_v9 = vmul.f32 3.0, %v9971_v63  ;;  %9984 = vrcp.f32 %v1935_v44  ;;  %v7788_v7 = vpack.c.bf16 %v7775_v26, %v7774_v14 }
0x104c   : > { %v9975_v8 = vpop.eup %9974  ;;  %v7632_v43 = vmul.f32 %v7608_v35, %v1989_v18  ;;  %v7605_v23 = vmul.f32 3.0, %v9973_v15 }
0x104d   : > { %v9977_v41 = vpop.eup %9976  ;;  %v1985_v13 = vmul.f32 %v9975_v8, %v14735_v34 }
0x104e   : > { %v9979_v12 = vpop.eup %9978  ;;  %v7776_v19 = vmul.f32 %v14733_v61, %v7632_v43  ;;  %v1986_v4 = vmul.f32 %v9977_v41, %v14736_v36 }
0x104f   : > { %v9981_v0 = vpop.eup %9980  ;;  %v7628_v2 = vmul.f32 %v7604_v9, %v1985_v13  ;;  %v1984_v52 = vmul.f32 %v9979_v12, %v14737_v39 }
0x1050   : > { %8929 = vmatmul.lmr.bf16.gmra.8.mxu0  ;;  %v7789_v48 = vpack.c.bf16 %v7777_v30, %v7776_v19  ;;  %v9983_v37 = vpop.eup %9982  ;;  %v7603_v57 = vmul.f32 3.0, %v9981_v0  ;;  %v7629_v10 = vmul.f32 %v7605_v23, %v1986_v4 }
0x1051   : > { %v9985_v17 = vpop.eup %9984  ;;  %v7602_v46 = vmul.f32 3.0, %v9983_v37  ;;  %v7772_v25 = vmul.f32 %v13944_v55, %v7628_v2  ;;  %v14743_v55 = vld [vmem:[#allocation117_spill] sm:$0xff] }
0x1052   : > { %7823 = vmatpush.bf16.msra.mxu0 %v7789_v48  ;;  %v7773_v59 = vmul.f32 %v7732_v16, %v7629_v10  ;;  %v1983_v58 = vmul.f32 %v9985_v17, %v14738_v6  ;;  %v7627_v50 = vmul.f32 %v7603_v57, %v1984_v52 }
0x1054   : > { %v7626_v60 = vmul.f32 %v7602_v46, %v1983_v58  ;;  %v7771_v33 = vmul.f32 %v7722_v20, %v7627_v50  ;;  %v7787_v31 = vpack.c.bf16 %v7773_v59, %v7772_v25 }
0x1056   : > { %7824 = vmatpush.bf16.msra.mxu0 %v7788_v7  ;;  %v7770_v47 = vmul.f32 %v7717_v45, %v7626_v60 }
0x1058   : > { %8930 = vmatmul.lmr.bf16.gmra.8.mxu0  ;;  %v7786_v29 = vpack.c.bf16 %v7771_v33, %v7770_v47 }
0x105a   : > { %7825 = vmatpush.bf16.msra.mxu0 %v7787_v31 }
0x105e   : > { %7826 = vmatpush.bf16.msra.mxu0 %v7786_v29 }
0x1061   : > { %8755 = vmatmul.msk.bf16.vlgmr.msra.gmra.mxu0 %vm1404_vm8, %v14740_v21 }
0x1071   : > { %8756 = vmatmul.msk.bf16.gmra.mxu0 %vm1404_vm8, %v14741_v56 }
0x1081   : > { %8757 = vmatmul.msk.bf16.gmra.mxu0 %vm1404_vm8, %v14743_v55 }
0x1091   : > { %8758 = vmatmul.msk.bf16.gmra.mxu0 %vm1404_vm8, %v14744_v42 }
0x109d   : > { %v7799_v49 = vpop.f32.mrf.mxu0 }
0x109e   : > { %10065 = shalt.err (!%p10062_p3)
}
0x109f   : > { %s10105_s8 = smov 128   ;;  %s14746_s12 = sld [smem:[#allocation18_spill]]  ;;  %v14749_v53 = vld [vmem:[#allocation15_spill] sm:$0xff]  ;;  %v14750_v5 = vld [vmem:[#allocation14_spill] sm:$0xff] }
0x10a0   : > { %s14747_s7 = sld [smem:[#allocation13_spill]]  ;;  %s10106_s6 = smov 8   ;;  %v14751_v1 = vld [vmem:[#allocation120_spill] sm:$0xff]  ;;  %v14752_v0 = vld [vmem:[#allocation119_spill] sm:$0xff] }
0x10a1   : > { %8948 = dma.vmem_to_hbm [thread:$0]  (%p10291_p5), %s7899_s28, 1024, %s7901_s1, %s7881_s0, %s10105_s8, %s10105_s8, %s10106_s6   ;;  %v14753_v26 = vld [vmem:[#allocation124_spill] sm:$0xff]  ;;  %v14754_v14 = vld [vmem:[#allocation123_spill] sm:$0xff] }
0x10a2   : > { %s14748_s3 = sld [smem:[#allocation150_spill]]  ;;  %v14755_v7 = vld [vmem:[#allocation128_spill] sm:$0xff]  ;;  %v14756_v45 = vld [vmem:[#allocation127_spill] sm:$0xff] }
0x10a5   : > { %v7801_v38 = vpop.f32.mrf.mxu0  ;;  %v10030_v28 = vld [vmem:[%s14746_s12] sm:$0xff]  ;;  %v10031_v8 = vld [vmem:[%s14746_s12 + $0x8] sm:$0xff]  ;;  %v10032_v9 = vld [vmem:[%s14746_s12 + $0x10] sm:$0xff] }
0x10a6   : > { %v10033_v3 = vld [vmem:[%s14746_s12 + $0x18] sm:$0xff]  ;;  %v10034_v4 = vld [vmem:[%s14746_s12 + $0x20] sm:$0xff]  ;;  %v10035_v2 = vld [vmem:[%s14746_s12 + $0x28] sm:$0xff] }
0x10a7   : > { %v10036_v52 = vld [vmem:[%s14746_s12 + $0x30] sm:$0xff]  ;;  %v10037_v50 = vld [vmem:[%s14746_s12 + $0x38] sm:$0xff] }
0x10a8   : > { %s14034_s2 = scalar_lea.vmem %s14748_s3, %s14747_s7 }
0x10ad   : > { %v7804_v24 = vpop.f32.mrf.mxu0 }
0x10b5   : > { %v7806_v22 = vpop.f32.mrf.mxu0 }
0x10bd   : > { %v7809_v40 = vpop.f32.mrf.mxu0 }
0x10c5   : > { %v7811_v11 = vpop.f32.mrf.mxu0 }
0x10cd   : > { %v7814_v32 = vpop.f32.mrf.mxu0 }
0x10d5   : > { %v7816_v27 = vpop.f32.mrf.mxu0 }
0x10de   : > { %v7828_v44 = vpop.f32.mrf.mxu0 }
0x10df   : > { %v7829_v63 = vadd.f32 %v7828_v44, %v7799_v49 }
0x10e1   : > { %v7848_v54 = vadd.f32 %v10030_v28, %v7829_v63 }
0x10e3   : > { %v7856_v18 = vmul.f32 %v7848_v54, %v14749_v53 }
0x10e5   : > { %7872 = vst.msk [vmem:[%s14034_s2] sm:$0xff] %vm1534_vm15, %v7856_v18 }
0x10e6   : > { %v7830_v35 = vpop.f32.mrf.mxu0 }
0x10e7   : > { %v7831_v15 = vadd.f32 %v7830_v35, %v7801_v38 }
0x10e9   : > { %v7849_v51 = vadd.f32 %v10031_v8, %v7831_v15 }
0x10eb   : > { %v7857_v62 = vmul.f32 %v7849_v51, %v14750_v5 }
0x10ed   : > { %7873 = vst.msk [vmem:[%s14034_s2 + $0x8] sm:$0xff] %vm1534_vm15, %v7857_v62 }
0x10ee   : > { %v7833_v43 = vpop.f32.mrf.mxu0 }
0x10ef   : > { %v7834_v41 = vadd.f32 %v7833_v43, %v7804_v24 }
0x10f1   : > { %v7850_v12 = vadd.f32 %v10032_v9, %v7834_v41 }
0x10f3   : > { %v7858_v23 = vmul.f32 %v7850_v12, %v14751_v1 }
0x10f5   : > { %7874 = vst.msk [vmem:[%s14034_s2 + $0x10] sm:$0xff] %vm1534_vm15, %v7858_v23 }
0x10f6   : > { %v7835_v61 = vpop.f32.mrf.mxu0 }
0x10f7   : > { %v7836_v19 = vadd.f32 %v7835_v61, %v7806_v22 }
0x10f9   : > { %v7851_v30 = vadd.f32 %v10033_v3, %v7836_v19 }
0x10fb   : > { %v7859_v34 = vmul.f32 %v7851_v30, %v14752_v0 }
0x10fd   : > { %7875 = vst.msk [vmem:[%s14034_s2 + $0x18] sm:$0xff] %vm1534_vm15, %v7859_v34 }
0x10fe   : > { %v7838_v13 = vpop.f32.mrf.mxu0 }
0x10ff   : > { %v7839_v36 = vadd.f32 %v7838_v13, %v7809_v40 }
0x1101   : > { %v7852_v48 = vadd.f32 %v10034_v4, %v7839_v36 }
0x1103   : > { %v7860_v37 = vmul.f32 %v7852_v48, %v14753_v26 }
0x1105   : > { %7876 = vst.msk [vmem:[%s14034_s2 + $0x20] sm:$0xff] %vm1534_vm15, %v7860_v37 }
0x1106   : > { %v7840_v16 = vpop.f32.mrf.mxu0 }
0x1107   : > { %v7841_v57 = vadd.f32 %v7840_v16, %v7811_v11 }
0x1109   : > { %v7853_v10 = vadd.f32 %v10035_v2, %v7841_v57 }
0x110b   : > { %v7861_v17 = vmul.f32 %v7853_v10, %v14754_v14 }
0x110d   : > { %7877 = vst.msk [vmem:[%s14034_s2 + $0x28] sm:$0xff] %vm1534_vm15, %v7861_v17 }
0x110e   : > { %v7843_v46 = vpop.f32.mrf.mxu0 }
0x110f   : > { %v7844_v39 = vadd.f32 %v7843_v46, %v7814_v32 }
0x1111   : > { %v7854_v59 = vadd.f32 %v10036_v52, %v7844_v39 }
0x1113   : > { %v7862_v20 = vmul.f32 %v7854_v59, %v14755_v7 }
0x1115   : > { %7878 = vst.msk [vmem:[%s14034_s2 + $0x30] sm:$0xff] %vm1534_vm15, %v7862_v20 }
0x1116   : > { %v7845_v6 = vpop.f32.mrf.mxu0 }
0x1117   : > { %v7846_v58 = vadd.f32 %v7845_v6, %v7816_v27 }
0x1119   : > { %v7855_v25 = vadd.f32 %v10037_v50, %v7846_v58 }
0x111b   : > { %v7863_v60 = vmul.f32 %v7855_v25, %v14756_v45 }
0x111d   : > { %7879 = vst.msk [vmem:[%s14034_s2 + $0x38] sm:$0xff] %vm1534_vm15, %v7863_v60 }
0x111e PF: > { %s14757_s10 = sld [smem:[#allocation7_spill]] }
0x111f   : > { %s14758_s0 = sld [smem:[#allocation5_spill]] }
0x1124   : > { %p8954_p4 = scmp.ge.s32.totalorder %s14757_s10, 2 }
0x1125   : > { %s7918_s28 = sand.u32 1, %s14758_s0  }
0x1126   : > { %p8951_p5 = pnand %p8954_p4, %p10295_p6  ;;  %s7919_s25 = scalar_lea.sflag [#allocation3], %s7918_s28 }
0x1128   : > { %p8952_p7 = pneg %p8951_p5 }
0x112a   : > { %10083 = dma.done.wait (%p8952_p7), %s7919_s25, 1024  }
0x112b   : > { %10085 = vsyncadd (%p8952_p7), %s7919_s25, 4294966272  ;;  %s14760_s30 = sld [smem:[#allocation9_spill]]  ;;  %s14763_s8 = smov %s10092_s5 }
0x112c   : > { %s14761_s1 = sld [smem:[#allocation6_spill]] }
0x112d   : > { %s14762_s9 = sld [smem:[#allocation10_spill]] }
0x1131   : > { %p39_p8 = scmp.ge.s32.totalorder %s14760_s30, 4  }
0x1132   : > { %s14764_s5 = smov %s14761_s1 }
0x1133   :  { %41 = sbr.rel (!%p39_p8) target bundleno = 21 (0x15), region = 206 }
0x1138   :  { %7933 = vsyncpa [#allocation3], 1 }
0x1139   :  { %7935 = vsyncpa [#allocation3 + $0x1], 1 }

</bundles_post_ra>
